<compile_context>
chip_gen: v7x
topology: tpu7x:2x2x1
jax: 0.10.0
libtpu: 0.0.40
codegen_flags: <defaults>
</compile_context>

<pallas_src>
import jax
import jax.numpy as jnp
from jax import lax
from jax.experimental import pallas as pl
from jax.experimental.pallas import tpu as pltpu

BN_EPS = 1e-5
PAD = 18                     # max dilation: one shared padded image serves d = 6, 12, 18 and 1x1
DILATIONS = (6, 12, 18)

_VMEM_LIMIT = None


def _vmem_limit_bytes():
    """Per-generation scoped-VMEM budget (raises the 16/32 MiB defaults, safe on v7x)."""
    global _VMEM_LIMIT
    if _VMEM_LIMIT is None:
        try:
            phys = int(pltpu.get_tpu_info().vmem_capacity_bytes)
        except Exception:
            phys = 64 * 1024 * 1024            # conservative: v7x physical VMEM
        _VMEM_LIMIT = max(32 * 1024 * 1024, min(96 * 1024 * 1024, (phys * 3) // 4))
    return _VMEM_LIMIT


def _pick_rows(H, W, target_rows=1024, whole_image_rows=4096):
    """Row-tile height TH for the dilated-conv kernel (whole image when it is small)."""
    if H * W <= whole_image_rows:
        return H
    best = 1
    for th in range(1, H + 1):
        if H % th == 0 and th * W <= target_rows:
            best = th
    # TODO(synk): an H with no good divisor degrades to small tiles; a pl.cdiv grid with a
    #             masked tail tile would keep tiles in the 512-2048 row sweet spot.
    return best


def _chunk(M, target=2048):
    """Largest multiple-of-8 divisor of M that is <= target (M itself when small)."""
    if M <= 2 * target:
        return M
    best = 0
    for d in range(8, target + 1, 8):
        if M % d == 0:
            best = d
    # TODO(synk): pathological (e.g. prime) M falls back to one whole-M tile.
    return best if best else M


# --------------------------------------------------------------------------- stage 1
# One kernel for branches 1-4: 28 tap matmuls over windows of the resident padded image.
# Emits bf16 y for the dilated branches and per-tile f32 sum / sum-of-squares for all four.
def _make_stage1_kernel(TH, W, C):
    TMR = TH * W

    def kernel(xp_ref, w_ref, y2_ref, y3_ref, y4_ref, psum_ref, pssq_ref):
        row0 = pl.program_id(1) * TH

        def window(r_off, c_off):
            # (TH, W, C) bf16 window from the VMEM-resident padded image.  The f32
            # round-trip keeps the (TH, W, C) -> (TH*W, C) merge a pure sublane
            # relabel (W % 8 == 0); cast back to bf16 for the MXU.
            win = xp_ref[0, pl.ds(row0 + r_off, TH), c_off:c_off + W, :]
            return win.astype(jnp.float32).reshape(TMR, C).astype(jnp.bfloat16)

        def put_stats(b, acc):
            psum_ref[0, 0, b:b + 1, :] = jnp.sum(acc, axis=0, keepdims=True)
            pssq_ref[0, 0, b:b + 1, :] = jnp.sum(acc * acc, axis=0, keepdims=True)

        center = window(PAD, PAD)

        # Branch 1 (1x1 conv): stats only — its y is recomputed from x in stage 2.
        y1 = jnp.dot(center, w_ref[0], preferred_element_type=jnp.float32)
        put_stats(0, y1)

        y_refs = (y2_ref, y3_ref, y4_ref)
        for bi, d in enumerate(DILATIONS):
            acc = None                                    # accumulate in a local f32 value
            for ky in range(3):
                for kx in range(3):
                    xs = center if (ky == 1 and kx == 1) else window(
                        PAD + (ky - 1) * d, PAD + (kx - 1) * d)
                    part = jnp.dot(xs, w_ref[1 + bi * 9 + ky * 3 + kx],
                                   preferred_element_type=jnp.float32)
                    acc = part if acc is None else acc + part
            y_refs[bi][0, 0] = acc.astype(jnp.bfloat16)   # single bf16 store of y
            put_stats(1 + bi, acc)

    return kernel


def _stage1(xpad, w_stack, N, H, W, C, Co, TH):
    n_tiles = H // TH
    TMR = TH * W
    Hp, Wp = xpad.shape[1], xpad.shape[2]
    kernel = _make_stage1_kernel(TH, W, C)

    y_shape = jax.ShapeDtypeStruct((N, n_tiles, TMR, Co), jnp.bfloat16)
    st_shape = jax.ShapeDtypeStruct((N, n_tiles, 4, Co), jnp.float32)
    y_spec = pl.BlockSpec((1, 1, TMR, Co), lambda n, j: (n, j, 0, 0))
    st_spec = pl.BlockSpec((1, 1, 4, Co), lambda n, j: (n, j, 0, 0))

    y2, y3, y4, psum, pssq = pl.pallas_call(
        kernel,
        grid=(N, n_tiles),
        in_specs=[
            # Whole padded image resident per batch element (block index only changes with n).
            pl.BlockSpec((1, Hp, Wp, C), lambda n, j: (n, 0, 0, 0)),
            pl.BlockSpec((28, C, Co), lambda n, j: (0, 0, 0)),       # resident tap weights
        ],
        out_specs=(y_spec, y_spec, y_spec, st_spec, st_spec),
        out_shape=(y_shape, y_shape, y_shape, st_shape, st_shape),
        compiler_params=pltpu.CompilerParams(
            dimension_semantics=("parallel", "parallel"),            # per-tile partial stats
            vmem_limit_bytes=_vmem_limit_bytes()),
    )(xpad, w_stack)

    ys = [a.reshape(N, H * W, Co) for a in (y2, y3, y4)]
    return ys, psum, pssq


# --------------------------------------------------------------------------- stage 2
# Fused per-branch BN+ReLU + final 1x1 conv accumulation (+ final-BN per-tile partial stats).
def _make_stage2_kernel(TM2, Co):
    def kernel(x_ref, y2_ref, y3_ref, y4_ref, w1_ref, scl_ref, sft_ref, wf_ref,
               z5_ref, f_ref, fs_ref, fq_ref):
        # Pooled-branch contribution (bilinear upsample of a 1x1 map == per-image constant).
        acc = jnp.zeros((TM2, Co), jnp.float32) + z5_ref[0]
        # Branch 1 recomputed from x (trades one cheap matmul for the y1 slab's HBM round trip).
        y1 = jnp.dot(x_ref[0], w1_ref[...], preferred_element_type=jnp.float32)
        y_bf = (y2_ref, y3_ref, y4_ref)
        for b in range(4):
            yb = y1 if b == 0 else y_bf[b - 1][0].astype(jnp.float32)
            ob = jnp.maximum(yb * scl_ref[b:b + 1, :] + sft_ref[b:b + 1, :], 0.0)
            acc = acc + jnp.dot(ob.astype(jnp.bfloat16), wf_ref[b],
                                preferred_element_type=jnp.float32)
        f_ref[0] = acc
        fs_ref[0, 0] = jnp.sum(acc, axis=0, keepdims=True)
        fq_ref[0, 0] = jnp.sum(acc * acc, axis=0, keepdims=True)

    return kernel


def _stage2(x_flat, ys, scales, shifts, w1_bf, wf_bf, z5):
    N, HW, C = x_flat.shape
    Co = wf_bf.shape[-1]
    TM2 = _chunk(HW, 2048)
    nt = HW // TM2
    kernel = _make_stage2_kernel(TM2, Co)

    y_spec = pl.BlockSpec((1, TM2, Co), lambda n, i: (n, i, 0))
    st_spec = pl.BlockSpec((1, 1, 1, Co), lambda n, i: (n, i, 0, 0))
    return pl.pallas_call(
        kernel,
        grid=(N, nt),
        in_specs=[
            pl.BlockSpec((1, TM2, C), lambda n, i: (n, i, 0)),
            y_spec, y_spec, y_spec,
            pl.BlockSpec((C, Co), lambda n, i: (0, 0)),              # resident w1
            pl.BlockSpec((4, Co), lambda n, i: (0, 0)),              # resident scales
            pl.BlockSpec((4, Co), lambda n, i: (0, 0)),              # resident shifts
            pl.BlockSpec((4, Co, Co), lambda n, i: (0, 0, 0)),       # resident final-conv blocks
            pl.BlockSpec((1, 1, Co), lambda n, i: (n, 0, 0)),        # pooled-branch constant
        ],
        out_specs=(
            pl.BlockSpec((1, TM2, Co), lambda n, i: (n, i, 0)),
            st_spec, st_spec,
        ),
        out_shape=(
            jax.ShapeDtypeStruct((N, HW, Co), jnp.float32),
            jax.ShapeDtypeStruct((N, nt, 1, Co), jnp.float32),
            jax.ShapeDtypeStruct((N, nt, 1, Co), jnp.float32),
        ),
        compiler_params=pltpu.CompilerParams(
            dimension_semantics=("parallel", "parallel"),
            vmem_limit_bytes=_vmem_limit_bytes()),
    )(x_flat, *ys, w1_bf, scales, shifts, wf_bf, z5)


# --------------------------------------------------------------------------- stage 3
def _bn_relu_kernel(f_ref, scl_ref, sft_ref, o_ref):
    o_ref[...] = jnp.maximum(f_ref[...] * scl_ref[...] + sft_ref[...], 0.0)


def _stage3(F2, scale, shift):
    M, Co = F2.shape
    TM3 = _chunk(M, 4096)
    return pl.pallas_call(
        _bn_relu_kernel,
        grid=(M // TM3,),
        in_specs=[
            pl.BlockSpec((TM3, Co), lambda i: (i, 0)),
            pl.BlockSpec((1, Co), lambda i: (0, 0)),
            pl.BlockSpec((1, Co), lambda i: (0, 0)),
        ],
        out_specs=pl.BlockSpec((TM3, Co), lambda i: (i, 0)),
        out_shape=jax.ShapeDtypeStruct((M, Co), jnp.float32),
        compiler_params=pltpu.CompilerParams(
            dimension_semantics=("parallel",),
            vmem_limit_bytes=_vmem_limit_bytes()),
    )(F2, scale.reshape(1, Co), shift.reshape(1, Co))


# --------------------------------------------------------------------------- BN fold
def _fold_bn(s, ss, count, gamma, beta):
    # track_running_stats=False => PyTorch BN normalizes with batch statistics (biased
    # variance) in BOTH train and eval, so the two-pass batch-stat formulation matches
    # the module.  Stats are accumulated in f32; E[x^2]-E[x]^2 is clamped at 0.
    mean = s / count
    var = jnp.maximum(ss / count - mean * mean, 0.0)
    scale = gamma * lax.rsqrt(var + BN_EPS)
    shift = beta - mean * scale
    return scale, shift


# --------------------------------------------------------------------------- ASPP forward
def aspp_forward(x_nchw, params):
    N, C, H, W = x_nchw.shape
    Co = params["w1"].shape[0]
    HW, M = H * W, N * H * W
    assert W % 8 == 0, "aspp_forward expects the feature-map width to be a multiple of 8"

    xb = jnp.transpose(x_nchw, (0, 2, 3, 1)).astype(jnp.bfloat16)          # NHWC bf16
    x_flat = xb.reshape(N, HW, C)
    xpad = jnp.pad(xb, ((0, 0), (PAD, PAD), (PAD, PAD), (0, 0)))           # shared max-pad image

    # Weight taps: [w1 (1x1)] + 9 per dilated branch -> (28, C, Co) bf16, VMEM resident.
    w1 = jnp.transpose(params["w1"].reshape(Co, C), (1, 0))                # (C, Co) f32
    taps = [w1]
    for name in ("2", "3", "4"):
        wm = jnp.transpose(params["w" + name], (2, 3, 1, 0))               # (3, 3, C, Co)
        taps += [wm[ky, kx] for ky in range(3) for kx in range(3)]
    w_stack = jnp.stack(taps, axis=0).astype(jnp.bfloat16)

    TH = _pick_rows(H, W)
    ys, psum, pssq = _stage1(xpad, w_stack, N, H, W, C, Co, TH)

    gammas = jnp.stack([params[f"g{b}"] for b in (1, 2, 3, 4)], axis=0)
    betas = jnp.stack([params[f"b{b}"] for b in (1, 2, 3, 4)], axis=0)
    scales, shifts = _fold_bn(jnp.sum(psum, axis=(0, 1)),
                              jnp.sum(pssq, axis=(0, 1)), float(M), gammas, betas)

    # Branch 5: global average pool (only N rows of work -> plain XLA).
    pooled = jnp.mean(x_nchw, axis=(2, 3))                                 # (N, C) f32
    w5 = jnp.transpose(params["w5"].reshape(Co, C), (1, 0))
    y5 = pooled @ w5
    m5 = jnp.mean(y5, axis=0)
    v5 = jnp.maximum(jnp.mean(y5 * y5, axis=0) - m5 * m5, 0.0)
    out5 = jnp.maximum((y5 - m5) * lax.rsqrt(v5 + BN_EPS) * params["g5"] + params["b5"], 0.0)

    # Final 1x1 conv as five (Co, Co) blocks; the pooled-branch block folds to a per-image
    # constant (bilinear upsample of a 1x1 map is spatially constant).
    wf2 = params["wf"].reshape(Co, 5 * Co)
    wf_blocks = jnp.stack(
        [jnp.transpose(wf2[:, b * Co:(b + 1) * Co]) for b in range(5)], axis=0)
    z5 = (out5 @ wf_blocks[4]).reshape(N, 1, Co)

    F, fs, fq = _stage2(x_flat, ys, scales, shifts, w1.astype(jnp.bfloat16),
                        wf_blocks[:4].astype(jnp.bfloat16), z5)

    sc_f, sh_f = _fold_bn(jnp.sum(fs, axis=(0, 1, 2)), jnp.sum(fq, axis=(0, 1, 2)),
                          float(M), params["gf"], params["bf"])
    out = _stage3(F.reshape(M, Co), sc_f, sh_f)                            # (M, Co) f32
    return jnp.transpose(out.reshape(N, H, W, Co), (0, 3, 1, 2))           # NCHW f32


# --------------------------------------------------------------------------- params
def init_params(key, in_channels=160, out_channels=256):
    ks = jax.random.split(key, 12)
    Ci, Co = in_channels, out_channels
    params = {
        "w1": 0.05 * jax.random.normal(ks[0], (Co, Ci, 1, 1), jnp.float32),
        "w2": 0.02 * jax.random.normal(ks[1], (Co, Ci, 3, 3), jnp.float32),
        "w3": 0.02 * jax.random.normal(ks[2], (Co, Ci, 3, 3), jnp.float32),
        "w4": 0.02 * jax.random.normal(ks[3], (Co, Ci, 3, 3), jnp.float32),
        "w5": 0.05 * jax.random.normal(ks[4], (Co, Ci, 1, 1), jnp.float32),
        "wf": 0.02 * jax.random.normal(ks[5], (Co, 5 * Co, 1, 1), jnp.float32),
    }
    for i, name in enumerate(["1", "2", "3", "4", "5", "f"]):
        kg, kb = jax.random.split(ks[6 + i])
        params["g" + name] = 1.0 + 0.1 * jax.random.normal(kg, (Co,), jnp.float32)
        params["b" + name] = 0.05 * jax.random.normal(kb, (Co,), jnp.float32)
    return params


if __name__ == "__main__":
    key = jax.random.PRNGKey(0)
    kx, kp = jax.random.split(key)

    # The module fixes in_channels=160, out_channels=256; small batch/spatial for the demo.
    N, Cin, H, W = 2, 160, 8, 8
    x = jax.random.normal(kx, (N, Cin, H, W), dtype=jnp.float32)
    params = init_params(kp, in_channels=Cin, out_channels=256)

    out = jax.jit(aspp_forward)(x, params)
    out = jax.block_until_ready(out)

    assert out.shape == (N, 256, H, W), out.shape
    assert out.dtype == jnp.float32
    assert bool(jnp.all(jnp.isfinite(out)))
    print("KERNEL_OK")
</pallas_src>

<mosaic_0001>
module attributes {stable_mosaic.version = 11 : i64} {
  func.func @kernel(%arg0: i32, %arg1: i32, %arg2: memref<1x44x44x160xbf16, #tpu.memory_space<vmem>>, %arg3: memref<28x160x256xbf16, #tpu.memory_space<vmem>>, %arg4: memref<1x1x64x256xbf16, #tpu.memory_space<vmem>>, %arg5: memref<1x1x64x256xbf16, #tpu.memory_space<vmem>>, %arg6: memref<1x1x64x256xbf16, #tpu.memory_space<vmem>>, %arg7: memref<1x1x4x256xf32, #tpu.memory_space<vmem>>, %arg8: memref<1x1x4x256xf32, #tpu.memory_space<vmem>>) attributes {dimension_semantics = [#tpu.dimension_semantics<parallel>, #tpu.dimension_semantics<parallel>], iteration_bounds = array<i64: 2, 1>, scalar_prefetch = 0 : i64, scratch_operands = 0 : i64, tpu.core_type = #tpu.core_type<tc>, window_params = [{transform_indices = @transform_0, window_bounds = array<i64: 1, 44, 44, 160>}, {pipeline_mode = #tpu.pipeline_mode<synchronous>, transform_indices = @transform_1, window_bounds = array<i64: 28, 160, 256>}, {transform_indices = @transform_2, window_bounds = array<i64: 1, 1, 64, 256>}, {transform_indices = @transform_3, window_bounds = array<i64: 1, 1, 64, 256>}, {transform_indices = @transform_4, window_bounds = array<i64: 1, 1, 64, 256>}, {transform_indices = @transform_5, window_bounds = array<i64: 1, 1, 4, 256>}, {transform_indices = @transform_6, window_bounds = array<i64: 1, 1, 4, 256>}]} {
    %c8_i32 = arith.constant 8 : i32
    %0 = arith.muli %arg1, %c8_i32 : i32
    %c18_i32 = arith.constant 18 : i32
    %1 = arith.addi %0, %c18_i32 : i32
    %c0 = arith.constant 0 : index
    %2 = arith.index_cast %1 : i32 to index
    %c18 = arith.constant 18 : index
    %c0_0 = arith.constant 0 : index
    %3 = vector.load %arg2[%c0, %2, %c18, %c0_0] : memref<1x44x44x160xbf16, #tpu.memory_space<vmem>>, vector<1x8x8x160xbf16>
    %4 = vector.shape_cast %3 : vector<1x8x8x160xbf16> to vector<8x8x160xbf16>
    %5 = arith.extf %4 : vector<8x8x160xbf16> to vector<8x8x160xf32>
    %6 = vector.shape_cast %5 : vector<8x8x160xf32> to vector<64x160xf32>
    %7 = arith.truncf %6 : vector<64x160xf32> to vector<64x160xbf16>
    %c0_1 = arith.constant 0 : index
    %c0_2 = arith.constant 0 : index
    %c0_3 = arith.constant 0 : index
    %8 = vector.load %arg3[%c0_1, %c0_2, %c0_3] : memref<28x160x256xbf16, #tpu.memory_space<vmem>>, vector<1x160x256xbf16>
    %9 = vector.shape_cast %8 : vector<1x160x256xbf16> to vector<160x256xbf16>
    %cst = arith.constant dense<0.000000e+00> : vector<64x256xf32>
    %10 = tpu.matmul %7, %9, %cst {dimension_numbers = #tpu.dot_dimension_numbers<[1], [0], [0], [1], [0, 0, 1, 1], [], []>} : vector<64x160xbf16>, vector<160x256xbf16>, vector<64x256xf32> -> vector<64x256xf32>
    %cst_4 = arith.constant dense<0.000000e+00> : vector<256xf32>
    %11 = vector.multi_reduction <add>, %10, %cst_4 [0] : vector<64x256xf32> to vector<256xf32>
    %12 = vector.shape_cast %11 : vector<256xf32> to vector<1x256xf32>
    %c0_5 = arith.constant 0 : index
    %c0_6 = arith.constant 0 : index
    %c0_7 = arith.constant 0 : index
    %c0_8 = arith.constant 0 : index
    %13 = vector.load %arg7[%c0_5, %c0_6, %c0_7, %c0_8] : memref<1x1x4x256xf32, #tpu.memory_space<vmem>>, vector<1x1x1x256xf32>
    %14 = vector.shape_cast %13 : vector<1x1x1x256xf32> to vector<1x256xf32>
    %15 = vector.shape_cast %12 : vector<1x256xf32> to vector<1x1x1x256xf32>
    tpu.vector_store %arg7[%c0_5, %c0_6, %c0_7, %c0_8], %15 {strides = array<i32>} : memref<1x1x4x256xf32, #tpu.memory_space<vmem>>, vector<1x1x1x256xf32>,
    %16 = arith.mulf %10, %10 : vector<64x256xf32>
    %cst_9 = arith.constant dense<0.000000e+00> : vector<256xf32>
    %17 = vector.multi_reduction <add>, %16, %cst_9 [0] : vector<64x256xf32> to vector<256xf32>
    %18 = vector.shape_cast %17 : vector<256xf32> to vector<1x256xf32>
    %c0_10 = arith.constant 0 : index
    %c0_11 = arith.constant 0 : index
    %c0_12 = arith.constant 0 : index
    %c0_13 = arith.constant 0 : index
    %19 = vector.load %arg8[%c0_10, %c0_11, %c0_12, %c0_13] : memref<1x1x4x256xf32, #tpu.memory_space<vmem>>, vector<1x1x1x256xf32>
    %20 = vector.shape_cast %19 : vector<1x1x1x256xf32> to vector<1x256xf32>
    %21 = vector.shape_cast %18 : vector<1x256xf32> to vector<1x1x1x256xf32>
    tpu.vector_store %arg8[%c0_10, %c0_11, %c0_12, %c0_13], %21 {strides = array<i32>} : memref<1x1x4x256xf32, #tpu.memory_space<vmem>>, vector<1x1x1x256xf32>,
    %c12_i32 = arith.constant 12 : i32
    %22 = arith.addi %0, %c12_i32 : i32
    %c0_14 = arith.constant 0 : index
    %23 = arith.index_cast %22 : i32 to index
    %c12 = arith.constant 12 : index
    %c0_15 = arith.constant 0 : index
    %24 = vector.load %arg2[%c0_14, %23, %c12, %c0_15] : memref<1x44x44x160xbf16, #tpu.memory_space<vmem>>, vector<1x8x8x160xbf16>
    %25 = vector.shape_cast %24 : vector<1x8x8x160xbf16> to vector<8x8x160xbf16>
    %26 = arith.extf %25 : vector<8x8x160xbf16> to vector<8x8x160xf32>
    %27 = vector.shape_cast %26 : vector<8x8x160xf32> to vector<64x160xf32>
    %28 = arith.truncf %27 : vector<64x160xf32> to vector<64x160xbf16>
    %c1 = arith.constant 1 : index
    %c0_16 = arith.constant 0 : index
    %c0_17 = arith.constant 0 : index
    %29 = vector.load %arg3[%c1, %c0_16, %c0_17] : memref<28x160x256xbf16, #tpu.memory_space<vmem>>, vector<1x160x256xbf16>
    %30 = vector.shape_cast %29 : vector<1x160x256xbf16> to vector<160x256xbf16>
    %cst_18 = arith.constant dense<0.000000e+00> : vector<64x256xf32>
    %31 = tpu.matmul %28, %30, %cst_18 {dimension_numbers = #tpu.dot_dimension_numbers<[1], [0], [0], [1], [0, 0, 1, 1], [], []>} : vector<64x160xbf16>, vector<160x256xbf16>, vector<64x256xf32> -> vector<64x256xf32>
    %c12_i32_19 = arith.constant 12 : i32
    %32 = arith.addi %0, %c12_i32_19 : i32
    %c0_20 = arith.constant 0 : index
    %33 = arith.index_cast %32 : i32 to index
    %c18_21 = arith.constant 18 : index
    %c0_22 = arith.constant 0 : index
    %34 = vector.load %arg2[%c0_20, %33, %c18_21, %c0_22] : memref<1x44x44x160xbf16, #tpu.memory_space<vmem>>, vector<1x8x8x160xbf16>
    %35 = vector.shape_cast %34 : vector<1x8x8x160xbf16> to vector<8x8x160xbf16>
    %36 = arith.extf %35 : vector<8x8x160xbf16> to vector<8x8x160xf32>
    %37 = vector.shape_cast %36 : vector<8x8x160xf32> to vector<64x160xf32>
    %38 = arith.truncf %37 : vector<64x160xf32> to vector<64x160xbf16>
    %c2 = arith.constant 2 : index
    %c0_23 = arith.constant 0 : index
    %c0_24 = arith.constant 0 : index
    %39 = vector.load %arg3[%c2, %c0_23, %c0_24] : memref<28x160x256xbf16, #tpu.memory_space<vmem>>, vector<1x160x256xbf16>
    %40 = vector.shape_cast %39 : vector<1x160x256xbf16> to vector<160x256xbf16>
    %cst_25 = arith.constant dense<0.000000e+00> : vector<64x256xf32>
    %41 = tpu.matmul %38, %40, %cst_25 {dimension_numbers = #tpu.dot_dimension_numbers<[1], [0], [0], [1], [0, 0, 1, 1], [], []>} : vector<64x160xbf16>, vector<160x256xbf16>, vector<64x256xf32> -> vector<64x256xf32>
    %42 = arith.addf %31, %41 : vector<64x256xf32>
    %c12_i32_26 = arith.constant 12 : i32
    %43 = arith.addi %0, %c12_i32_26 : i32
    %c0_27 = arith.constant 0 : index
    %44 = arith.index_cast %43 : i32 to index
    %c24 = arith.constant 24 : index
    %c0_28 = arith.constant 0 : index
    %45 = vector.load %arg2[%c0_27, %44, %c24, %c0_28] : memref<1x44x44x160xbf16, #tpu.memory_space<vmem>>, vector<1x8x8x160xbf16>
    %46 = vector.shape_cast %45 : vector<1x8x8x160xbf16> to vector<8x8x160xbf16>
    %47 = arith.extf %46 : vector<8x8x160xbf16> to vector<8x8x160xf32>
    %48 = vector.shape_cast %47 : vector<8x8x160xf32> to vector<64x160xf32>
    %49 = arith.truncf %48 : vector<64x160xf32> to vector<64x160xbf16>
    %c3 = arith.constant 3 : index
    %c0_29 = arith.constant 0 : index
    %c0_30 = arith.constant 0 : index
    %50 = vector.load %arg3[%c3, %c0_29, %c0_30] : memref<28x160x256xbf16, #tpu.memory_space<vmem>>, vector<1x160x256xbf16>
    %51 = vector.shape_cast %50 : vector<1x160x256xbf16> to vector<160x256xbf16>
    %cst_31 = arith.constant dense<0.000000e+00> : vector<64x256xf32>
    %52 = tpu.matmul %49, %51, %cst_31 {dimension_numbers = #tpu.dot_dimension_numbers<[1], [0], [0], [1], [0, 0, 1, 1], [], []>} : vector<64x160xbf16>, vector<160x256xbf16>, vector<64x256xf32> -> vector<64x256xf32>
    %53 = arith.addf %42, %52 : vector<64x256xf32>
    %c18_i32_32 = arith.constant 18 : i32
    %54 = arith.addi %0, %c18_i32_32 : i32
    %c0_33 = arith.constant 0 : index
    %55 = arith.index_cast %54 : i32 to index
    %c12_34 = arith.constant 12 : index
    %c0_35 = arith.constant 0 : index
    %56 = vector.load %arg2[%c0_33, %55, %c12_34, %c0_35] : memref<1x44x44x160xbf16, #tpu.memory_space<vmem>>, vector<1x8x8x160xbf16>
    %57 = vector.shape_cast %56 : vector<1x8x8x160xbf16> to vector<8x8x160xbf16>
    %58 = arith.extf %57 : vector<8x8x160xbf16> to vector<8x8x160xf32>
    %59 = vector.shape_cast %58 : vector<8x8x160xf32> to vector<64x160xf32>
    %60 = arith.truncf %59 : vector<64x160xf32> to vector<64x160xbf16>
    %c4 = arith.constant 4 : index
    %c0_36 = arith.constant 0 : index
    %c0_37 = arith.constant 0 : index
    %61 = vector.load %arg3[%c4, %c0_36, %c0_37] : memref<28x160x256xbf16, #tpu.memory_space<vmem>>, vector<1x160x256xbf16>
    %62 = vector.shape_cast %61 : vector<1x160x256xbf16> to vector<160x256xbf16>
    %cst_38 = arith.constant dense<0.000000e+00> : vector<64x256xf32>
    %63 = tpu.matmul %60, %62, %cst_38 {dimension_numbers = #tpu.dot_dimension_numbers<[1], [0], [0], [1], [0, 0, 1, 1], [], []>} : vector<64x160xbf16>, vector<160x256xbf16>, vector<64x256xf32> -> vector<64x256xf32>
    %64 = arith.addf %53, %63 : vector<64x256xf32>
    %c5 = arith.constant 5 : index
    %c0_39 = arith.constant 0 : index
    %c0_40 = arith.constant 0 : index
    %65 = vector.load %arg3[%c5, %c0_39, %c0_40] : memref<28x160x256xbf16, #tpu.memory_space<vmem>>, vector<1x160x256xbf16>
    %66 = vector.shape_cast %65 : vector<1x160x256xbf16> to vector<160x256xbf16>
    %cst_41 = arith.constant dense<0.000000e+00> : vector<64x256xf32>
    %67 = tpu.matmul %7, %66, %cst_41 {dimension_numbers = #tpu.dot_dimension_numbers<[1], [0], [0], [1], [0, 0, 1, 1], [], []>} : vector<64x160xbf16>, vector<160x256xbf16>, vector<64x256xf32> -> vector<64x256xf32>
    %68 = arith.addf %64, %67 : vector<64x256xf32>
    %c18_i32_42 = arith.constant 18 : i32
    %69 = arith.addi %0, %c18_i32_42 : i32
    %c0_43 = arith.constant 0 : index
    %70 = arith.index_cast %69 : i32 to index
    %c24_44 = arith.constant 24 : index
    %c0_45 = arith.constant 0 : index
    %71 = vector.load %arg2[%c0_43, %70, %c24_44, %c0_45] : memref<1x44x44x160xbf16, #tpu.memory_space<vmem>>, vector<1x8x8x160xbf16>
    %72 = vector.shape_cast %71 : vector<1x8x8x160xbf16> to vector<8x8x160xbf16>
    %73 = arith.extf %72 : vector<8x8x160xbf16> to vector<8x8x160xf32>
    %74 = vector.shape_cast %73 : vector<8x8x160xf32> to vector<64x160xf32>
    %75 = arith.truncf %74 : vector<64x160xf32> to vector<64x160xbf16>
    %c6 = arith.constant 6 : index
    %c0_46 = arith.constant 0 : index
    %c0_47 = arith.constant 0 : index
    %76 = vector.load %arg3[%c6, %c0_46, %c0_47] : memref<28x160x256xbf16, #tpu.memory_space<vmem>>, vector<1x160x256xbf16>
    %77 = vector.shape_cast %76 : vector<1x160x256xbf16> to vector<160x256xbf16>
    %cst_48 = arith.constant dense<0.000000e+00> : vector<64x256xf32>
    %78 = tpu.matmul %75, %77, %cst_48 {dimension_numbers = #tpu.dot_dimension_numbers<[1], [0], [0], [1], [0, 0, 1, 1], [], []>} : vector<64x160xbf16>, vector<160x256xbf16>, vector<64x256xf32> -> vector<64x256xf32>
    %79 = arith.addf %68, %78 : vector<64x256xf32>
    %c24_i32 = arith.constant 24 : i32
    %80 = arith.addi %0, %c24_i32 : i32
    %c0_49 = arith.constant 0 : index
    %81 = arith.index_cast %80 : i32 to index
    %c12_50 = arith.constant 12 : index
    %c0_51 = arith.constant 0 : index
    %82 = vector.load %arg2[%c0_49, %81, %c12_50, %c0_51] : memref<1x44x44x160xbf16, #tpu.memory_space<vmem>>, vector<1x8x8x160xbf16>
    %83 = vector.shape_cast %82 : vector<1x8x8x160xbf16> to vector<8x8x160xbf16>
    %84 = arith.extf %83 : vector<8x8x160xbf16> to vector<8x8x160xf32>
    %85 = vector.shape_cast %84 : vector<8x8x160xf32> to vector<64x160xf32>
    %86 = arith.truncf %85 : vector<64x160xf32> to vector<64x160xbf16>
    %c7 = arith.constant 7 : index
    %c0_52 = arith.constant 0 : index
    %c0_53 = arith.constant 0 : index
    %87 = vector.load %arg3[%c7, %c0_52, %c0_53] : memref<28x160x256xbf16, #tpu.memory_space<vmem>>, vector<1x160x256xbf16>
    %88 = vector.shape_cast %87 : vector<1x160x256xbf16> to vector<160x256xbf16>
    %cst_54 = arith.constant dense<0.000000e+00> : vector<64x256xf32>
    %89 = tpu.matmul %86, %88, %cst_54 {dimension_numbers = #tpu.dot_dimension_numbers<[1], [0], [0], [1], [0, 0, 1, 1], [], []>} : vector<64x160xbf16>, vector<160x256xbf16>, vector<64x256xf32> -> vector<64x256xf32>
    %90 = arith.addf %79, %89 : vector<64x256xf32>
    %c24_i32_55 = arith.constant 24 : i32
    %91 = arith.addi %0, %c24_i32_55 : i32
    %c0_56 = arith.constant 0 : index
    %92 = arith.index_cast %91 : i32 to index
    %c18_57 = arith.constant 18 : index
    %c0_58 = arith.constant 0 : index
    %93 = vector.load %arg2[%c0_56, %92, %c18_57, %c0_58] : memref<1x44x44x160xbf16, #tpu.memory_space<vmem>>, vector<1x8x8x160xbf16>
    %94 = vector.shape_cast %93 : vector<1x8x8x160xbf16> to vector<8x8x160xbf16>
    %95 = arith.extf %94 : vector<8x8x160xbf16> to vector<8x8x160xf32>
    %96 = vector.shape_cast %95 : vector<8x8x160xf32> to vector<64x160xf32>
    %97 = arith.truncf %96 : vector<64x160xf32> to vector<64x160xbf16>
    %c8 = arith.constant 8 : index
    %c0_59 = arith.constant 0 : index
    %c0_60 = arith.constant 0 : index
    %98 = vector.load %arg3[%c8, %c0_59, %c0_60] : memref<28x160x256xbf16, #tpu.memory_space<vmem>>, vector<1x160x256xbf16>
    %99 = vector.shape_cast %98 : vector<1x160x256xbf16> to vector<160x256xbf16>
    %cst_61 = arith.constant dense<0.000000e+00> : vector<64x256xf32>
    %100 = tpu.matmul %97, %99, %cst_61 {dimension_numbers = #tpu.dot_dimension_numbers<[1], [0], [0], [1], [0, 0, 1, 1], [], []>} : vector<64x160xbf16>, vector<160x256xbf16>, vector<64x256xf32> -> vector<64x256xf32>
    %101 = arith.addf %90, %100 : vector<64x256xf32>
    %c24_i32_62 = arith.constant 24 : i32
    %102 = arith.addi %0, %c24_i32_62 : i32
    %c0_63 = arith.constant 0 : index
    %103 = arith.index_cast %102 : i32 to index
    %c24_64 = arith.constant 24 : index
    %c0_65 = arith.constant 0 : index
    %104 = vector.load %arg2[%c0_63, %103, %c24_64, %c0_65] : memref<1x44x44x160xbf16, #tpu.memory_space<vmem>>, vector<1x8x8x160xbf16>
    %105 = vector.shape_cast %104 : vector<1x8x8x160xbf16> to vector<8x8x160xbf16>
    %106 = arith.extf %105 : vector<8x8x160xbf16> to vector<8x8x160xf32>
    %107 = vector.shape_cast %106 : vector<8x8x160xf32> to vector<64x160xf32>
    %108 = arith.truncf %107 : vector<64x160xf32> to vector<64x160xbf16>
    %c9 = arith.constant 9 : index
    %c0_66 = arith.constant 0 : index
    %c0_67 = arith.constant 0 : index
    %109 = vector.load %arg3[%c9, %c0_66, %c0_67] : memref<28x160x256xbf16, #tpu.memory_space<vmem>>, vector<1x160x256xbf16>
    %110 = vector.shape_cast %109 : vector<1x160x256xbf16> to vector<160x256xbf16>
    %cst_68 = arith.constant dense<0.000000e+00> : vector<64x256xf32>
    %111 = tpu.matmul %108, %110, %cst_68 {dimension_numbers = #tpu.dot_dimension_numbers<[1], [0], [0], [1], [0, 0, 1, 1], [], []>} : vector<64x160xbf16>, vector<160x256xbf16>, vector<64x256xf32> -> vector<64x256xf32>
    %112 = arith.addf %101, %111 : vector<64x256xf32>
    %113 = arith.truncf %112 : vector<64x256xf32> to vector<64x256xbf16>
    %c0_69 = arith.constant 0 : index
    %c0_70 = arith.constant 0 : index
    %c0_71 = arith.constant 0 : index
    %c0_72 = arith.constant 0 : index
    %114 = vector.load %arg4[%c0_69, %c0_70, %c0_71, %c0_72] : memref<1x1x64x256xbf16, #tpu.memory_space<vmem>>, vector<1x1x64x256xbf16>
    %115 = vector.shape_cast %114 : vector<1x1x64x256xbf16> to vector<64x256xbf16>
    %116 = vector.shape_cast %113 : vector<64x256xbf16> to vector<1x1x64x256xbf16>
    tpu.vector_store %arg4[%c0_69, %c0_70, %c0_71, %c0_72], %116 {strides = array<i32>} : memref<1x1x64x256xbf16, #tpu.memory_space<vmem>>, vector<1x1x64x256xbf16>,
    %cst_73 = arith.constant dense<0.000000e+00> : vector<256xf32>
    %117 = vector.multi_reduction <add>, %112, %cst_73 [0] : vector<64x256xf32> to vector<256xf32>
    %118 = vector.shape_cast %117 : vector<256xf32> to vector<1x256xf32>
    %c0_74 = arith.constant 0 : index
    %c0_75 = arith.constant 0 : index
    %c1_76 = arith.constant 1 : index
    %c0_77 = arith.constant 0 : index
    %119 = vector.load %arg7[%c0_74, %c0_75, %c1_76, %c0_77] : memref<1x1x4x256xf32, #tpu.memory_space<vmem>>, vector<1x1x1x256xf32>
    %120 = vector.shape_cast %119 : vector<1x1x1x256xf32> to vector<1x256xf32>
    %121 = vector.shape_cast %118 : vector<1x256xf32> to vector<1x1x1x256xf32>
    tpu.vector_store %arg7[%c0_74, %c0_75, %c1_76, %c0_77], %121 {strides = array<i32>} : memref<1x1x4x256xf32, #tpu.memory_space<vmem>>, vector<1x1x1x256xf32>,
    %122 = arith.mulf %112, %112 : vector<64x256xf32>
    %cst_78 = arith.constant dense<0.000000e+00> : vector<256xf32>
    %123 = vector.multi_reduction <add>, %122, %cst_78 [0] : vector<64x256xf32> to vector<256xf32>
    %124 = vector.shape_cast %123 : vector<256xf32> to vector<1x256xf32>
    %c0_79 = arith.constant 0 : index
    %c0_80 = arith.constant 0 : index
    %c1_81 = arith.constant 1 : index
    %c0_82 = arith.constant 0 : index
    %125 = vector.load %arg8[%c0_79, %c0_80, %c1_81, %c0_82] : memref<1x1x4x256xf32, #tpu.memory_space<vmem>>, vector<1x1x1x256xf32>
    %126 = vector.shape_cast %125 : vector<1x1x1x256xf32> to vector<1x256xf32>
    %127 = vector.shape_cast %124 : vector<1x256xf32> to vector<1x1x1x256xf32>
    tpu.vector_store %arg8[%c0_79, %c0_80, %c1_81, %c0_82], %127 {strides = array<i32>} : memref<1x1x4x256xf32, #tpu.memory_space<vmem>>, vector<1x1x1x256xf32>,
    %c6_i32 = arith.constant 6 : i32
    %128 = arith.addi %0, %c6_i32 : i32
    %c0_83 = arith.constant 0 : index
    %129 = arith.index_cast %128 : i32 to index
    %c6_84 = arith.constant 6 : index
    %c0_85 = arith.constant 0 : index
    %130 = vector.load %arg2[%c0_83, %129, %c6_84, %c0_85] : memref<1x44x44x160xbf16, #tpu.memory_space<vmem>>, vector<1x8x8x160xbf16>
    %131 = vector.shape_cast %130 : vector<1x8x8x160xbf16> to vector<8x8x160xbf16>
    %132 = arith.extf %131 : vector<8x8x160xbf16> to vector<8x8x160xf32>
    %133 = vector.shape_cast %132 : vector<8x8x160xf32> to vector<64x160xf32>
    %134 = arith.truncf %133 : vector<64x160xf32> to vector<64x160xbf16>
    %c10 = arith.constant 10 : index
    %c0_86 = arith.constant 0 : index
    %c0_87 = arith.constant 0 : index
    %135 = vector.load %arg3[%c10, %c0_86, %c0_87] : memref<28x160x256xbf16, #tpu.memory_space<vmem>>, vector<1x160x256xbf16>
    %136 = vector.shape_cast %135 : vector<1x160x256xbf16> to vector<160x256xbf16>
    %cst_88 = arith.constant dense<0.000000e+00> : vector<64x256xf32>
    %137 = tpu.matmul %134, %136, %cst_88 {dimension_numbers = #tpu.dot_dimension_numbers<[1], [0], [0], [1], [0, 0, 1, 1], [], []>} : vector<64x160xbf16>, vector<160x256xbf16>, vector<64x256xf32> -> vector<64x256xf32>
    %c6_i32_89 = arith.constant 6 : i32
    %138 = arith.addi %0, %c6_i32_89 : i32
    %c0_90 = arith.constant 0 : index
    %139 = arith.index_cast %138 : i32 to index
    %c18_91 = arith.constant 18 : index
    %c0_92 = arith.constant 0 : index
    %140 = vector.load %arg2[%c0_90, %139, %c18_91, %c0_92] : memref<1x44x44x160xbf16, #tpu.memory_space<vmem>>, vector<1x8x8x160xbf16>
    %141 = vector.shape_cast %140 : vector<1x8x8x160xbf16> to vector<8x8x160xbf16>
    %142 = arith.extf %141 : vector<8x8x160xbf16> to vector<8x8x160xf32>
    %143 = vector.shape_cast %142 : vector<8x8x160xf32> to vector<64x160xf32>
    %144 = arith.truncf %143 : vector<64x160xf32> to vector<64x160xbf16>
    %c11 = arith.constant 11 : index
    %c0_93 = arith.constant 0 : index
    %c0_94 = arith.constant 0 : index
    %145 = vector.load %arg3[%c11, %c0_93, %c0_94] : memref<28x160x256xbf16, #tpu.memory_space<vmem>>, vector<1x160x256xbf16>
    %146 = vector.shape_cast %145 : vector<1x160x256xbf16> to vector<160x256xbf16>
    %cst_95 = arith.constant dense<0.000000e+00> : vector<64x256xf32>
    %147 = tpu.matmul %144, %146, %cst_95 {dimension_numbers = #tpu.dot_dimension_numbers<[1], [0], [0], [1], [0, 0, 1, 1], [], []>} : vector<64x160xbf16>, vector<160x256xbf16>, vector<64x256xf32> -> vector<64x256xf32>
    %148 = arith.addf %137, %147 : vector<64x256xf32>
    %c6_i32_96 = arith.constant 6 : i32
    %149 = arith.addi %0, %c6_i32_96 : i32
    %c0_97 = arith.constant 0 : index
    %150 = arith.index_cast %149 : i32 to index
    %c30 = arith.constant 30 : index
    %c0_98 = arith.constant 0 : index
    %151 = vector.load %arg2[%c0_97, %150, %c30, %c0_98] : memref<1x44x44x160xbf16, #tpu.memory_space<vmem>>, vector<1x8x8x160xbf16>
    %152 = vector.shape_cast %151 : vector<1x8x8x160xbf16> to vector<8x8x160xbf16>
    %153 = arith.extf %152 : vector<8x8x160xbf16> to vector<8x8x160xf32>
    %154 = vector.shape_cast %153 : vector<8x8x160xf32> to vector<64x160xf32>
    %155 = arith.truncf %154 : vector<64x160xf32> to vector<64x160xbf16>
    %c12_99 = arith.constant 12 : index
    %c0_100 = arith.constant 0 : index
    %c0_101 = arith.constant 0 : index
    %156 = vector.load %arg3[%c12_99, %c0_100, %c0_101] : memref<28x160x256xbf16, #tpu.memory_space<vmem>>, vector<1x160x256xbf16>
    %157 = vector.shape_cast %156 : vector<1x160x256xbf16> to vector<160x256xbf16>
    %cst_102 = arith.constant dense<0.000000e+00> : vector<64x256xf32>
    %158 = tpu.matmul %155, %157, %cst_102 {dimension_numbers = #tpu.dot_dimension_numbers<[1], [0], [0], [1], [0, 0, 1, 1], [], []>} : vector<64x160xbf16>, vector<160x256xbf16>, vector<64x256xf32> -> vector<64x256xf32>
    %159 = arith.addf %148, %158 : vector<64x256xf32>
    %c18_i32_103 = arith.constant 18 : i32
    %160 = arith.addi %0, %c18_i32_103 : i32
    %c0_104 = arith.constant 0 : index
    %161 = arith.index_cast %160 : i32 to index
    %c6_105 = arith.constant 6 : index
    %c0_106 = arith.constant 0 : index
    %162 = vector.load %arg2[%c0_104, %161, %c6_105, %c0_106] : memref<1x44x44x160xbf16, #tpu.memory_space<vmem>>, vector<1x8x8x160xbf16>
    %163 = vector.shape_cast %162 : vector<1x8x8x160xbf16> to vector<8x8x160xbf16>
    %164 = arith.extf %163 : vector<8x8x160xbf16> to vector<8x8x160xf32>
    %165 = vector.shape_cast %164 : vector<8x8x160xf32> to vector<64x160xf32>
    %166 = arith.truncf %165 : vector<64x160xf32> to vector<64x160xbf16>
    %c13 = arith.constant 13 : index
    %c0_107 = arith.constant 0 : index
    %c0_108 = arith.constant 0 : index
    %167 = vector.load %arg3[%c13, %c0_107, %c0_108] : memref<28x160x256xbf16, #tpu.memory_space<vmem>>, vector<1x160x256xbf16>
    %168 = vector.shape_cast %167 : vector<1x160x256xbf16> to vector<160x256xbf16>
    %cst_109 = arith.constant dense<0.000000e+00> : vector<64x256xf32>
    %169 = tpu.matmul %166, %168, %cst_109 {dimension_numbers = #tpu.dot_dimension_numbers<[1], [0], [0], [1], [0, 0, 1, 1], [], []>} : vector<64x160xbf16>, vector<160x256xbf16>, vector<64x256xf32> -> vector<64x256xf32>
    %170 = arith.addf %159, %169 : vector<64x256xf32>
    %c14 = arith.constant 14 : index
    %c0_110 = arith.constant 0 : index
    %c0_111 = arith.constant 0 : index
    %171 = vector.load %arg3[%c14, %c0_110, %c0_111] : memref<28x160x256xbf16, #tpu.memory_space<vmem>>, vector<1x160x256xbf16>
    %172 = vector.shape_cast %171 : vector<1x160x256xbf16> to vector<160x256xbf16>
    %cst_112 = arith.constant dense<0.000000e+00> : vector<64x256xf32>
    %173 = tpu.matmul %7, %172, %cst_112 {dimension_numbers = #tpu.dot_dimension_numbers<[1], [0], [0], [1], [0, 0, 1, 1], [], []>} : vector<64x160xbf16>, vector<160x256xbf16>, vector<64x256xf32> -> vector<64x256xf32>
    %174 = arith.addf %170, %173 : vector<64x256xf32>
    %c18_i32_113 = arith.constant 18 : i32
    %175 = arith.addi %0, %c18_i32_113 : i32
    %c0_114 = arith.constant 0 : index
    %176 = arith.index_cast %175 : i32 to index
    %c30_115 = arith.constant 30 : index
    %c0_116 = arith.constant 0 : index
    %177 = vector.load %arg2[%c0_114, %176, %c30_115, %c0_116] : memref<1x44x44x160xbf16, #tpu.memory_space<vmem>>, vector<1x8x8x160xbf16>
    %178 = vector.shape_cast %177 : vector<1x8x8x160xbf16> to vector<8x8x160xbf16>
    %179 = arith.extf %178 : vector<8x8x160xbf16> to vector<8x8x160xf32>
    %180 = vector.shape_cast %179 : vector<8x8x160xf32> to vector<64x160xf32>
    %181 = arith.truncf %180 : vector<64x160xf32> to vector<64x160xbf16>
    %c15 = arith.constant 15 : index
    %c0_117 = arith.constant 0 : index
    %c0_118 = arith.constant 0 : index
    %182 = vector.load %arg3[%c15, %c0_117, %c0_118] : memref<28x160x256xbf16, #tpu.memory_space<vmem>>, vector<1x160x256xbf16>
    %183 = vector.shape_cast %182 : vector<1x160x256xbf16> to vector<160x256xbf16>
    %cst_119 = arith.constant dense<0.000000e+00> : vector<64x256xf32>
    %184 = tpu.matmul %181, %183, %cst_119 {dimension_numbers = #tpu.dot_dimension_numbers<[1], [0], [0], [1], [0, 0, 1, 1], [], []>} : vector<64x160xbf16>, vector<160x256xbf16>, vector<64x256xf32> -> vector<64x256xf32>
    %185 = arith.addf %174, %184 : vector<64x256xf32>
    %c30_i32 = arith.constant 30 : i32
    %186 = arith.addi %0, %c30_i32 : i32
    %c0_120 = arith.constant 0 : index
    %187 = arith.index_cast %186 : i32 to index
    %c6_121 = arith.constant 6 : index
    %c0_122 = arith.constant 0 : index
    %188 = vector.load %arg2[%c0_120, %187, %c6_121, %c0_122] : memref<1x44x44x160xbf16, #tpu.memory_space<vmem>>, vector<1x8x8x160xbf16>
    %189 = vector.shape_cast %188 : vector<1x8x8x160xbf16> to vector<8x8x160xbf16>
    %190 = arith.extf %189 : vector<8x8x160xbf16> to vector<8x8x160xf32>
    %191 = vector.shape_cast %190 : vector<8x8x160xf32> to vector<64x160xf32>
    %192 = arith.truncf %191 : vector<64x160xf32> to vector<64x160xbf16>
    %c16 = arith.constant 16 : index
    %c0_123 = arith.constant 0 : index
    %c0_124 = arith.constant 0 : index
    %193 = vector.load %arg3[%c16, %c0_123, %c0_124] : memref<28x160x256xbf16, #tpu.memory_space<vmem>>, vector<1x160x256xbf16>
    %194 = vector.shape_cast %193 : vector<1x160x256xbf16> to vector<160x256xbf16>
    %cst_125 = arith.constant dense<0.000000e+00> : vector<64x256xf32>
    %195 = tpu.matmul %192, %194, %cst_125 {dimension_numbers = #tpu.dot_dimension_numbers<[1], [0], [0], [1], [0, 0, 1, 1], [], []>} : vector<64x160xbf16>, vector<160x256xbf16>, vector<64x256xf32> -> vector<64x256xf32>
    %196 = arith.addf %185, %195 : vector<64x256xf32>
    %c30_i32_126 = arith.constant 30 : i32
    %197 = arith.addi %0, %c30_i32_126 : i32
    %c0_127 = arith.constant 0 : index
    %198 = arith.index_cast %197 : i32 to index
    %c18_128 = arith.constant 18 : index
    %c0_129 = arith.constant 0 : index
    %199 = vector.load %arg2[%c0_127, %198, %c18_128, %c0_129] : memref<1x44x44x160xbf16, #tpu.memory_space<vmem>>, vector<1x8x8x160xbf16>
    %200 = vector.shape_cast %199 : vector<1x8x8x160xbf16> to vector<8x8x160xbf16>
    %201 = arith.extf %200 : vector<8x8x160xbf16> to vector<8x8x160xf32>
    %202 = vector.shape_cast %201 : vector<8x8x160xf32> to vector<64x160xf32>
    %203 = arith.truncf %202 : vector<64x160xf32> to vector<64x160xbf16>
    %c17 = arith.constant 17 : index
    %c0_130 = arith.constant 0 : index
    %c0_131 = arith.constant 0 : index
    %204 = vector.load %arg3[%c17, %c0_130, %c0_131] : memref<28x160x256xbf16, #tpu.memory_space<vmem>>, vector<1x160x256xbf16>
    %205 = vector.shape_cast %204 : vector<1x160x256xbf16> to vector<160x256xbf16>
    %cst_132 = arith.constant dense<0.000000e+00> : vector<64x256xf32>
    %206 = tpu.matmul %203, %205, %cst_132 {dimension_numbers = #tpu.dot_dimension_numbers<[1], [0], [0], [1], [0, 0, 1, 1], [], []>} : vector<64x160xbf16>, vector<160x256xbf16>, vector<64x256xf32> -> vector<64x256xf32>
    %207 = arith.addf %196, %206 : vector<64x256xf32>
    %c30_i32_133 = arith.constant 30 : i32
    %208 = arith.addi %0, %c30_i32_133 : i32
    %c0_134 = arith.constant 0 : index
    %209 = arith.index_cast %208 : i32 to index
    %c30_135 = arith.constant 30 : index
    %c0_136 = arith.constant 0 : index
    %210 = vector.load %arg2[%c0_134, %209, %c30_135, %c0_136] : memref<1x44x44x160xbf16, #tpu.memory_space<vmem>>, vector<1x8x8x160xbf16>
    %211 = vector.shape_cast %210 : vector<1x8x8x160xbf16> to vector<8x8x160xbf16>
    %212 = arith.extf %211 : vector<8x8x160xbf16> to vector<8x8x160xf32>
    %213 = vector.shape_cast %212 : vector<8x8x160xf32> to vector<64x160xf32>
    %214 = arith.truncf %213 : vector<64x160xf32> to vector<64x160xbf16>
    %c18_137 = arith.constant 18 : index
    %c0_138 = arith.constant 0 : index
    %c0_139 = arith.constant 0 : index
    %215 = vector.load %arg3[%c18_137, %c0_138, %c0_139] : memref<28x160x256xbf16, #tpu.memory_space<vmem>>, vector<1x160x256xbf16>
    %216 = vector.shape_cast %215 : vector<1x160x256xbf16> to vector<160x256xbf16>
    %cst_140 = arith.constant dense<0.000000e+00> : vector<64x256xf32>
    %217 = tpu.matmul %214, %216, %cst_140 {dimension_numbers = #tpu.dot_dimension_numbers<[1], [0], [0], [1], [0, 0, 1, 1], [], []>} : vector<64x160xbf16>, vector<160x256xbf16>, vector<64x256xf32> -> vector<64x256xf32>
    %218 = arith.addf %207, %217 : vector<64x256xf32>
    %219 = arith.truncf %218 : vector<64x256xf32> to vector<64x256xbf16>
    %c0_141 = arith.constant 0 : index
    %c0_142 = arith.constant 0 : index
    %c0_143 = arith.constant 0 : index
    %c0_144 = arith.constant 0 : index
    %220 = vector.load %arg5[%c0_141, %c0_142, %c0_143, %c0_144] : memref<1x1x64x256xbf16, #tpu.memory_space<vmem>>, vector<1x1x64x256xbf16>
    %221 = vector.shape_cast %220 : vector<1x1x64x256xbf16> to vector<64x256xbf16>
    %222 = vector.shape_cast %219 : vector<64x256xbf16> to vector<1x1x64x256xbf16>
    tpu.vector_store %arg5[%c0_141, %c0_142, %c0_143, %c0_144], %222 {strides = array<i32>} : memref<1x1x64x256xbf16, #tpu.memory_space<vmem>>, vector<1x1x64x256xbf16>,
    %cst_145 = arith.constant dense<0.000000e+00> : vector<256xf32>
    %223 = vector.multi_reduction <add>, %218, %cst_145 [0] : vector<64x256xf32> to vector<256xf32>
    %224 = vector.shape_cast %223 : vector<256xf32> to vector<1x256xf32>
    %c0_146 = arith.constant 0 : index
    %c0_147 = arith.constant 0 : index
    %c2_148 = arith.constant 2 : index
    %c0_149 = arith.constant 0 : index
    %225 = vector.load %arg7[%c0_146, %c0_147, %c2_148, %c0_149] : memref<1x1x4x256xf32, #tpu.memory_space<vmem>>, vector<1x1x1x256xf32>
    %226 = vector.shape_cast %225 : vector<1x1x1x256xf32> to vector<1x256xf32>
    %227 = vector.shape_cast %224 : vector<1x256xf32> to vector<1x1x1x256xf32>
    tpu.vector_store %arg7[%c0_146, %c0_147, %c2_148, %c0_149], %227 {strides = array<i32>} : memref<1x1x4x256xf32, #tpu.memory_space<vmem>>, vector<1x1x1x256xf32>,
    %228 = arith.mulf %218, %218 : vector<64x256xf32>
    %cst_150 = arith.constant dense<0.000000e+00> : vector<256xf32>
    %229 = vector.multi_reduction <add>, %228, %cst_150 [0] : vector<64x256xf32> to vector<256xf32>
    %230 = vector.shape_cast %229 : vector<256xf32> to vector<1x256xf32>
    %c0_151 = arith.constant 0 : index
    %c0_152 = arith.constant 0 : index
    %c2_153 = arith.constant 2 : index
    %c0_154 = arith.constant 0 : index
    %231 = vector.load %arg8[%c0_151, %c0_152, %c2_153, %c0_154] : memref<1x1x4x256xf32, #tpu.memory_space<vmem>>, vector<1x1x1x256xf32>
    %232 = vector.shape_cast %231 : vector<1x1x1x256xf32> to vector<1x256xf32>
    %233 = vector.shape_cast %230 : vector<1x256xf32> to vector<1x1x1x256xf32>
    tpu.vector_store %arg8[%c0_151, %c0_152, %c2_153, %c0_154], %233 {strides = array<i32>} : memref<1x1x4x256xf32, #tpu.memory_space<vmem>>, vector<1x1x1x256xf32>,
    %c0_i32 = arith.constant 0 : i32
    %234 = arith.addi %0, %c0_i32 : i32
    %c0_155 = arith.constant 0 : index
    %235 = arith.index_cast %234 : i32 to index
    %c0_156 = arith.constant 0 : index
    %c0_157 = arith.constant 0 : index
    %236 = vector.load %arg2[%c0_155, %235, %c0_156, %c0_157] : memref<1x44x44x160xbf16, #tpu.memory_space<vmem>>, vector<1x8x8x160xbf16>
    %237 = vector.shape_cast %236 : vector<1x8x8x160xbf16> to vector<8x8x160xbf16>
    %238 = arith.extf %237 : vector<8x8x160xbf16> to vector<8x8x160xf32>
    %239 = vector.shape_cast %238 : vector<8x8x160xf32> to vector<64x160xf32>
    %240 = arith.truncf %239 : vector<64x160xf32> to vector<64x160xbf16>
    %c19 = arith.constant 19 : index
    %c0_158 = arith.constant 0 : index
    %c0_159 = arith.constant 0 : index
    %241 = vector.load %arg3[%c19, %c0_158, %c0_159] : memref<28x160x256xbf16, #tpu.memory_space<vmem>>, vector<1x160x256xbf16>
    %242 = vector.shape_cast %241 : vector<1x160x256xbf16> to vector<160x256xbf16>
    %cst_160 = arith.constant dense<0.000000e+00> : vector<64x256xf32>
    %243 = tpu.matmul %240, %242, %cst_160 {dimension_numbers = #tpu.dot_dimension_numbers<[1], [0], [0], [1], [0, 0, 1, 1], [], []>} : vector<64x160xbf16>, vector<160x256xbf16>, vector<64x256xf32> -> vector<64x256xf32>
    %c0_i32_161 = arith.constant 0 : i32
    %244 = arith.addi %0, %c0_i32_161 : i32
    %c0_162 = arith.constant 0 : index
    %245 = arith.index_cast %244 : i32 to index
    %c18_163 = arith.constant 18 : index
    %c0_164 = arith.constant 0 : index
    %246 = vector.load %arg2[%c0_162, %245, %c18_163, %c0_164] : memref<1x44x44x160xbf16, #tpu.memory_space<vmem>>, vector<1x8x8x160xbf16>
    %247 = vector.shape_cast %246 : vector<1x8x8x160xbf16> to vector<8x8x160xbf16>
    %248 = arith.extf %247 : vector<8x8x160xbf16> to vector<8x8x160xf32>
    %249 = vector.shape_cast %248 : vector<8x8x160xf32> to vector<64x160xf32>
    %250 = arith.truncf %249 : vector<64x160xf32> to vector<64x160xbf16>
    %c20 = arith.constant 20 : index
    %c0_165 = arith.constant 0 : index
    %c0_166 = arith.constant 0 : index
    %251 = vector.load %arg3[%c20, %c0_165, %c0_166] : memref<28x160x256xbf16, #tpu.memory_space<vmem>>, vector<1x160x256xbf16>
    %252 = vector.shape_cast %251 : vector<1x160x256xbf16> to vector<160x256xbf16>
    %cst_167 = arith.constant dense<0.000000e+00> : vector<64x256xf32>
    %253 = tpu.matmul %250, %252, %cst_167 {dimension_numbers = #tpu.dot_dimension_numbers<[1], [0], [0], [1], [0, 0, 1, 1], [], []>} : vector<64x160xbf16>, vector<160x256xbf16>, vector<64x256xf32> -> vector<64x256xf32>
    %254 = arith.addf %243, %253 : vector<64x256xf32>
    %c0_i32_168 = arith.constant 0 : i32
    %255 = arith.addi %0, %c0_i32_168 : i32
    %c0_169 = arith.constant 0 : index
    %256 = arith.index_cast %255 : i32 to index
    %c36 = arith.constant 36 : index
    %c0_170 = arith.constant 0 : index
    %257 = vector.load %arg2[%c0_169, %256, %c36, %c0_170] : memref<1x44x44x160xbf16, #tpu.memory_space<vmem>>, vector<1x8x8x160xbf16>
    %258 = vector.shape_cast %257 : vector<1x8x8x160xbf16> to vector<8x8x160xbf16>
    %259 = arith.extf %258 : vector<8x8x160xbf16> to vector<8x8x160xf32>
    %260 = vector.shape_cast %259 : vector<8x8x160xf32> to vector<64x160xf32>
    %261 = arith.truncf %260 : vector<64x160xf32> to vector<64x160xbf16>
    %c21 = arith.constant 21 : index
    %c0_171 = arith.constant 0 : index
    %c0_172 = arith.constant 0 : index
    %262 = vector.load %arg3[%c21, %c0_171, %c0_172] : memref<28x160x256xbf16, #tpu.memory_space<vmem>>, vector<1x160x256xbf16>
    %263 = vector.shape_cast %262 : vector<1x160x256xbf16> to vector<160x256xbf16>
    %cst_173 = arith.constant dense<0.000000e+00> : vector<64x256xf32>
    %264 = tpu.matmul %261, %263, %cst_173 {dimension_numbers = #tpu.dot_dimension_numbers<[1], [0], [0], [1], [0, 0, 1, 1], [], []>} : vector<64x160xbf16>, vector<160x256xbf16>, vector<64x256xf32> -> vector<64x256xf32>
    %265 = arith.addf %254, %264 : vector<64x256xf32>
    %c18_i32_174 = arith.constant 18 : i32
    %266 = arith.addi %0, %c18_i32_174 : i32
    %c0_175 = arith.constant 0 : index
    %267 = arith.index_cast %266 : i32 to index
    %c0_176 = arith.constant 0 : index
    %c0_177 = arith.constant 0 : index
    %268 = vector.load %arg2[%c0_175, %267, %c0_176, %c0_177] : memref<1x44x44x160xbf16, #tpu.memory_space<vmem>>, vector<1x8x8x160xbf16>
    %269 = vector.shape_cast %268 : vector<1x8x8x160xbf16> to vector<8x8x160xbf16>
    %270 = arith.extf %269 : vector<8x8x160xbf16> to vector<8x8x160xf32>
    %271 = vector.shape_cast %270 : vector<8x8x160xf32> to vector<64x160xf32>
    %272 = arith.truncf %271 : vector<64x160xf32> to vector<64x160xbf16>
    %c22 = arith.constant 22 : index
    %c0_178 = arith.constant 0 : index
    %c0_179 = arith.constant 0 : index
    %273 = vector.load %arg3[%c22, %c0_178, %c0_179] : memref<28x160x256xbf16, #tpu.memory_space<vmem>>, vector<1x160x256xbf16>
    %274 = vector.shape_cast %273 : vector<1x160x256xbf16> to vector<160x256xbf16>
    %cst_180 = arith.constant dense<0.000000e+00> : vector<64x256xf32>
    %275 = tpu.matmul %272, %274, %cst_180 {dimension_numbers = #tpu.dot_dimension_numbers<[1], [0], [0], [1], [0, 0, 1, 1], [], []>} : vector<64x160xbf16>, vector<160x256xbf16>, vector<64x256xf32> -> vector<64x256xf32>
    %276 = arith.addf %265, %275 : vector<64x256xf32>
    %c23 = arith.constant 23 : index
    %c0_181 = arith.constant 0 : index
    %c0_182 = arith.constant 0 : index
    %277 = vector.load %arg3[%c23, %c0_181, %c0_182] : memref<28x160x256xbf16, #tpu.memory_space<vmem>>, vector<1x160x256xbf16>
    %278 = vector.shape_cast %277 : vector<1x160x256xbf16> to vector<160x256xbf16>
    %cst_183 = arith.constant dense<0.000000e+00> : vector<64x256xf32>
    %279 = tpu.matmul %7, %278, %cst_183 {dimension_numbers = #tpu.dot_dimension_numbers<[1], [0], [0], [1], [0, 0, 1, 1], [], []>} : vector<64x160xbf16>, vector<160x256xbf16>, vector<64x256xf32> -> vector<64x256xf32>
    %280 = arith.addf %276, %279 : vector<64x256xf32>
    %c18_i32_184 = arith.constant 18 : i32
    %281 = arith.addi %0, %c18_i32_184 : i32
    %c0_185 = arith.constant 0 : index
    %282 = arith.index_cast %281 : i32 to index
    %c36_186 = arith.constant 36 : index
    %c0_187 = arith.constant 0 : index
    %283 = vector.load %arg2[%c0_185, %282, %c36_186, %c0_187] : memref<1x44x44x160xbf16, #tpu.memory_space<vmem>>, vector<1x8x8x160xbf16>
    %284 = vector.shape_cast %283 : vector<1x8x8x160xbf16> to vector<8x8x160xbf16>
    %285 = arith.extf %284 : vector<8x8x160xbf16> to vector<8x8x160xf32>
    %286 = vector.shape_cast %285 : vector<8x8x160xf32> to vector<64x160xf32>
    %287 = arith.truncf %286 : vector<64x160xf32> to vector<64x160xbf16>
    %c24_188 = arith.constant 24 : index
    %c0_189 = arith.constant 0 : index
    %c0_190 = arith.constant 0 : index
    %288 = vector.load %arg3[%c24_188, %c0_189, %c0_190] : memref<28x160x256xbf16, #tpu.memory_space<vmem>>, vector<1x160x256xbf16>
    %289 = vector.shape_cast %288 : vector<1x160x256xbf16> to vector<160x256xbf16>
    %cst_191 = arith.constant dense<0.000000e+00> : vector<64x256xf32>
    %290 = tpu.matmul %287, %289, %cst_191 {dimension_numbers = #tpu.dot_dimension_numbers<[1], [0], [0], [1], [0, 0, 1, 1], [], []>} : vector<64x160xbf16>, vector<160x256xbf16>, vector<64x256xf32> -> vector<64x256xf32>
    %291 = arith.addf %280, %290 : vector<64x256xf32>
    %c36_i32 = arith.constant 36 : i32
    %292 = arith.addi %0, %c36_i32 : i32
    %c0_192 = arith.constant 0 : index
    %293 = arith.index_cast %292 : i32 to index
    %c0_193 = arith.constant 0 : index
    %c0_194 = arith.constant 0 : index
    %294 = vector.load %arg2[%c0_192, %293, %c0_193, %c0_194] : memref<1x44x44x160xbf16, #tpu.memory_space<vmem>>, vector<1x8x8x160xbf16>
    %295 = vector.shape_cast %294 : vector<1x8x8x160xbf16> to vector<8x8x160xbf16>
    %296 = arith.extf %295 : vector<8x8x160xbf16> to vector<8x8x160xf32>
    %297 = vector.shape_cast %296 : vector<8x8x160xf32> to vector<64x160xf32>
    %298 = arith.truncf %297 : vector<64x160xf32> to vector<64x160xbf16>
    %c25 = arith.constant 25 : index
    %c0_195 = arith.constant 0 : index
    %c0_196 = arith.constant 0 : index
    %299 = vector.load %arg3[%c25, %c0_195, %c0_196] : memref<28x160x256xbf16, #tpu.memory_space<vmem>>, vector<1x160x256xbf16>
    %300 = vector.shape_cast %299 : vector<1x160x256xbf16> to vector<160x256xbf16>
    %cst_197 = arith.constant dense<0.000000e+00> : vector<64x256xf32>
    %301 = tpu.matmul %298, %300, %cst_197 {dimension_numbers = #tpu.dot_dimension_numbers<[1], [0], [0], [1], [0, 0, 1, 1], [], []>} : vector<64x160xbf16>, vector<160x256xbf16>, vector<64x256xf32> -> vector<64x256xf32>
    %302 = arith.addf %291, %301 : vector<64x256xf32>
    %c36_i32_198 = arith.constant 36 : i32
    %303 = arith.addi %0, %c36_i32_198 : i32
    %c0_199 = arith.constant 0 : index
    %304 = arith.index_cast %303 : i32 to index
    %c18_200 = arith.constant 18 : index
    %c0_201 = arith.constant 0 : index
    %305 = vector.load %arg2[%c0_199, %304, %c18_200, %c0_201] : memref<1x44x44x160xbf16, #tpu.memory_space<vmem>>, vector<1x8x8x160xbf16>
    %306 = vector.shape_cast %305 : vector<1x8x8x160xbf16> to vector<8x8x160xbf16>
    %307 = arith.extf %306 : vector<8x8x160xbf16> to vector<8x8x160xf32>
    %308 = vector.shape_cast %307 : vector<8x8x160xf32> to vector<64x160xf32>
    %309 = arith.truncf %308 : vector<64x160xf32> to vector<64x160xbf16>
    %c26 = arith.constant 26 : index
    %c0_202 = arith.constant 0 : index
    %c0_203 = arith.constant 0 : index
    %310 = vector.load %arg3[%c26, %c0_202, %c0_203] : memref<28x160x256xbf16, #tpu.memory_space<vmem>>, vector<1x160x256xbf16>
    %311 = vector.shape_cast %310 : vector<1x160x256xbf16> to vector<160x256xbf16>
    %cst_204 = arith.constant dense<0.000000e+00> : vector<64x256xf32>
    %312 = tpu.matmul %309, %311, %cst_204 {dimension_numbers = #tpu.dot_dimension_numbers<[1], [0], [0], [1], [0, 0, 1, 1], [], []>} : vector<64x160xbf16>, vector<160x256xbf16>, vector<64x256xf32> -> vector<64x256xf32>
    %313 = arith.addf %302, %312 : vector<64x256xf32>
    %c36_i32_205 = arith.constant 36 : i32
    %314 = arith.addi %0, %c36_i32_205 : i32
    %c0_206 = arith.constant 0 : index
    %315 = arith.index_cast %314 : i32 to index
    %c36_207 = arith.constant 36 : index
    %c0_208 = arith.constant 0 : index
    %316 = vector.load %arg2[%c0_206, %315, %c36_207, %c0_208] : memref<1x44x44x160xbf16, #tpu.memory_space<vmem>>, vector<1x8x8x160xbf16>
    %317 = vector.shape_cast %316 : vector<1x8x8x160xbf16> to vector<8x8x160xbf16>
    %318 = arith.extf %317 : vector<8x8x160xbf16> to vector<8x8x160xf32>
    %319 = vector.shape_cast %318 : vector<8x8x160xf32> to vector<64x160xf32>
    %320 = arith.truncf %319 : vector<64x160xf32> to vector<64x160xbf16>
    %c27 = arith.constant 27 : index
    %c0_209 = arith.constant 0 : index
    %c0_210 = arith.constant 0 : index
    %321 = vector.load %arg3[%c27, %c0_209, %c0_210] : memref<28x160x256xbf16, #tpu.memory_space<vmem>>, vector<1x160x256xbf16>
    %322 = vector.shape_cast %321 : vector<1x160x256xbf16> to vector<160x256xbf16>
    %cst_211 = arith.constant dense<0.000000e+00> : vector<64x256xf32>
    %323 = tpu.matmul %320, %322, %cst_211 {dimension_numbers = #tpu.dot_dimension_numbers<[1], [0], [0], [1], [0, 0, 1, 1], [], []>} : vector<64x160xbf16>, vector<160x256xbf16>, vector<64x256xf32> -> vector<64x256xf32>
    %324 = arith.addf %313, %323 : vector<64x256xf32>
    %325 = arith.truncf %324 : vector<64x256xf32> to vector<64x256xbf16>
    %c0_212 = arith.constant 0 : index
    %c0_213 = arith.constant 0 : index
    %c0_214 = arith.constant 0 : index
    %c0_215 = arith.constant 0 : index
    %326 = vector.load %arg6[%c0_212, %c0_213, %c0_214, %c0_215] : memref<1x1x64x256xbf16, #tpu.memory_space<vmem>>, vector<1x1x64x256xbf16>
    %327 = vector.shape_cast %326 : vector<1x1x64x256xbf16> to vector<64x256xbf16>
    %328 = vector.shape_cast %325 : vector<64x256xbf16> to vector<1x1x64x256xbf16>
    tpu.vector_store %arg6[%c0_212, %c0_213, %c0_214, %c0_215], %328 {strides = array<i32>} : memref<1x1x64x256xbf16, #tpu.memory_space<vmem>>, vector<1x1x64x256xbf16>,
    %cst_216 = arith.constant dense<0.000000e+00> : vector<256xf32>
    %329 = vector.multi_reduction <add>, %324, %cst_216 [0] : vector<64x256xf32> to vector<256xf32>
    %330 = vector.shape_cast %329 : vector<256xf32> to vector<1x256xf32>
    %c0_217 = arith.constant 0 : index
    %c0_218 = arith.constant 0 : index
    %c3_219 = arith.constant 3 : index
    %c0_220 = arith.constant 0 : index
    %331 = vector.load %arg7[%c0_217, %c0_218, %c3_219, %c0_220] : memref<1x1x4x256xf32, #tpu.memory_space<vmem>>, vector<1x1x1x256xf32>
    %332 = vector.shape_cast %331 : vector<1x1x1x256xf32> to vector<1x256xf32>
    %333 = vector.shape_cast %330 : vector<1x256xf32> to vector<1x1x1x256xf32>
    tpu.vector_store %arg7[%c0_217, %c0_218, %c3_219, %c0_220], %333 {strides = array<i32>} : memref<1x1x4x256xf32, #tpu.memory_space<vmem>>, vector<1x1x1x256xf32>,
    %334 = arith.mulf %324, %324 : vector<64x256xf32>
    %cst_221 = arith.constant dense<0.000000e+00> : vector<256xf32>
    %335 = vector.multi_reduction <add>, %334, %cst_221 [0] : vector<64x256xf32> to vector<256xf32>
    %336 = vector.shape_cast %335 : vector<256xf32> to vector<1x256xf32>
    %c0_222 = arith.constant 0 : index
    %c0_223 = arith.constant 0 : index
    %c3_224 = arith.constant 3 : index
    %c0_225 = arith.constant 0 : index
    %337 = vector.load %arg8[%c0_222, %c0_223, %c3_224, %c0_225] : memref<1x1x4x256xf32, #tpu.memory_space<vmem>>, vector<1x1x1x256xf32>
    %338 = vector.shape_cast %337 : vector<1x1x1x256xf32> to vector<1x256xf32>
    %339 = vector.shape_cast %336 : vector<1x256xf32> to vector<1x1x1x256xf32>
    tpu.vector_store %arg8[%c0_222, %c0_223, %c3_224, %c0_225], %339 {strides = array<i32>} : memref<1x1x4x256xf32, #tpu.memory_space<vmem>>, vector<1x1x1x256xf32>,
    return
  }
  func.func @transform_0(%arg0: i32, %arg1: i32) -> (i32, i32, i32, i32) {
    %c0_i32 = arith.constant 0 : i32
    %c0_i32_0 = arith.constant 0 : i32
    %c0_i32_1 = arith.constant 0 : i32
    %c0_i32_2 = arith.constant 0 : i32
    return %arg0, %c0_i32, %c0_i32_0, %c0_i32_1 : i32, i32, i32, i32
  }
  func.func @transform_1(%arg0: i32, %arg1: i32) -> (i32, i32, i32) {
    %c0_i32 = arith.constant 0 : i32
    %c0_i32_0 = arith.constant 0 : i32
    %c0_i32_1 = arith.constant 0 : i32
    %c0_i32_2 = arith.constant 0 : i32
    return %c0_i32, %c0_i32_0, %c0_i32_1 : i32, i32, i32
  }
  func.func @transform_2(%arg0: i32, %arg1: i32) -> (i32, i32, i32, i32) {
    %c0_i32 = arith.constant 0 : i32
    %c0_i32_0 = arith.constant 0 : i32
    %c0_i32_1 = arith.constant 0 : i32
    return %arg0, %arg1, %c0_i32, %c0_i32_0 : i32, i32, i32, i32
  }
  func.func @transform_3(%arg0: i32, %arg1: i32) -> (i32, i32, i32, i32) {
    %c0_i32 = arith.constant 0 : i32
    %c0_i32_0 = arith.constant 0 : i32
    %c0_i32_1 = arith.constant 0 : i32
    return %arg0, %arg1, %c0_i32, %c0_i32_0 : i32, i32, i32, i32
  }
  func.func @transform_4(%arg0: i32, %arg1: i32) -> (i32, i32, i32, i32) {
    %c0_i32 = arith.constant 0 : i32
    %c0_i32_0 = arith.constant 0 : i32
    %c0_i32_1 = arith.constant 0 : i32
    return %arg0, %arg1, %c0_i32, %c0_i32_0 : i32, i32, i32, i32
  }
  func.func @transform_5(%arg0: i32, %arg1: i32) -> (i32, i32, i32, i32) {
    %c0_i32 = arith.constant 0 : i32
    %c0_i32_0 = arith.constant 0 : i32
    %c0_i32_1 = arith.constant 0 : i32
    return %arg0, %arg1, %c0_i32, %c0_i32_0 : i32, i32, i32, i32
  }
  func.func @transform_6(%arg0: i32, %arg1: i32) -> (i32, i32, i32, i32) {
    %c0_i32 = arith.constant 0 : i32
    %c0_i32_0 = arith.constant 0 : i32
    %c0_i32_1 = arith.constant 0 : i32
    return %arg0, %arg1, %c0_i32, %c0_i32_0 : i32, i32, i32, i32
  }
}

module attributes {stable_mosaic.version = 11 : i64} {
  func.func @kernel(%arg0: i32, %arg1: i32, %arg2: memref<1x64x160xbf16, #tpu.memory_space<vmem>>, %arg3: memref<1x64x256xbf16, #tpu.memory_space<vmem>>, %arg4: memref<1x64x256xbf16, #tpu.memory_space<vmem>>, %arg5: memref<1x64x256xbf16, #tpu.memory_space<vmem>>, %arg6: memref<160x256xbf16, #tpu.memory_space<vmem>>, %arg7: memref<4x256xf32, #tpu.memory_space<vmem>>, %arg8: memref<4x256xf32, #tpu.memory_space<vmem>>, %arg9: memref<4x256x256xbf16, #tpu.memory_space<vmem>>, %arg10: memref<1x1x256xf32, #tpu.memory_space<vmem>>, %arg11: memref<1x64x256xf32, #tpu.memory_space<vmem>>, %arg12: memref<1x1x1x256xf32, #tpu.memory_space<vmem>>, %arg13: memref<1x1x1x256xf32, #tpu.memory_space<vmem>>) attributes {dimension_semantics = [#tpu.dimension_semantics<parallel>, #tpu.dimension_semantics<parallel>], iteration_bounds = array<i64: 2, 1>, scalar_prefetch = 0 : i64, scratch_operands = 0 : i64, tpu.core_type = #tpu.core_type<tc>, window_params = [{transform_indices = @transform_0, window_bounds = array<i64: 1, 64, 160>}, {transform_indices = @transform_1, window_bounds = array<i64: 1, 64, 256>}, {transform_indices = @transform_2, window_bounds = array<i64: 1, 64, 256>}, {transform_indices = @transform_3, window_bounds = array<i64: 1, 64, 256>}, {pipeline_mode = #tpu.pipeline_mode<synchronous>, transform_indices = @transform_4, window_bounds = array<i64: 160, 256>}, {pipeline_mode = #tpu.pipeline_mode<synchronous>, transform_indices = @transform_5, window_bounds = array<i64: 4, 256>}, {pipeline_mode = #tpu.pipeline_mode<synchronous>, transform_indices = @transform_6, window_bounds = array<i64: 4, 256>}, {pipeline_mode = #tpu.pipeline_mode<synchronous>, transform_indices = @transform_7, window_bounds = array<i64: 4, 256, 256>}, {transform_indices = @transform_8, window_bounds = array<i64: 1, 1, 256>}, {transform_indices = @transform_9, window_bounds = array<i64: 1, 64, 256>}, {transform_indices = @transform_10, window_bounds = array<i64: 1, 1, 1, 256>}, {transform_indices = @transform_11, window_bounds = array<i64: 1, 1, 1, 256>}]} {
    %cst = arith.constant 0.000000e+00 : f32
    %0 = vector.broadcast %cst : f32 to vector<64x256xf32>
    %c0 = arith.constant 0 : index
    %c0_0 = arith.constant 0 : index
    %c0_1 = arith.constant 0 : index
    %1 = vector.load %arg10[%c0, %c0_0, %c0_1] : memref<1x1x256xf32, #tpu.memory_space<vmem>>, vector<1x1x256xf32>
    %2 = vector.shape_cast %1 : vector<1x1x256xf32> to vector<1x256xf32>
    %3 = vector.broadcast %2 : vector<1x256xf32> to vector<64x256xf32>
    %4 = arith.addf %0, %3 : vector<64x256xf32>
    %c0_2 = arith.constant 0 : index
    %c0_3 = arith.constant 0 : index
    %c0_4 = arith.constant 0 : index
    %5 = vector.load %arg2[%c0_2, %c0_3, %c0_4] : memref<1x64x160xbf16, #tpu.memory_space<vmem>>, vector<1x64x160xbf16>
    %6 = vector.shape_cast %5 : vector<1x64x160xbf16> to vector<64x160xbf16>
    %c0_5 = arith.constant 0 : index
    %c0_6 = arith.constant 0 : index
    %7 = vector.load %arg6[%c0_5, %c0_6] : memref<160x256xbf16, #tpu.memory_space<vmem>>, vector<160x256xbf16>
    %cst_7 = arith.constant dense<0.000000e+00> : vector<64x256xf32>
    %8 = tpu.matmul %6, %7, %cst_7 {dimension_numbers = #tpu.dot_dimension_numbers<[1], [0], [0], [1], [0, 0, 1, 1], [], []>} : vector<64x160xbf16>, vector<160x256xbf16>, vector<64x256xf32> -> vector<64x256xf32>
    %c0_8 = arith.constant 0 : index
    %c0_9 = arith.constant 0 : index
    %9 = vector.load %arg7[%c0_8, %c0_9] : memref<4x256xf32, #tpu.memory_space<vmem>>, vector<1x256xf32>
    %10 = vector.broadcast %9 : vector<1x256xf32> to vector<64x256xf32>
    %11 = arith.mulf %8, %10 : vector<64x256xf32>
    %c0_10 = arith.constant 0 : index
    %c0_11 = arith.constant 0 : index
    %12 = vector.load %arg8[%c0_10, %c0_11] : memref<4x256xf32, #tpu.memory_space<vmem>>, vector<1x256xf32>
    %13 = vector.broadcast %12 : vector<1x256xf32> to vector<64x256xf32>
    %14 = arith.addf %11, %13 : vector<64x256xf32>
    %cst_12 = arith.constant 0.000000e+00 : f32
    %15 = vector.broadcast %cst_12 : f32 to vector<64x256xf32>
    %16 = arith.maximumf %14, %15 : vector<64x256xf32>
    %17 = arith.truncf %16 : vector<64x256xf32> to vector<64x256xbf16>
    %c0_13 = arith.constant 0 : index
    %c0_14 = arith.constant 0 : index
    %c0_15 = arith.constant 0 : index
    %18 = vector.load %arg9[%c0_13, %c0_14, %c0_15] : memref<4x256x256xbf16, #tpu.memory_space<vmem>>, vector<1x256x256xbf16>
    %19 = vector.shape_cast %18 : vector<1x256x256xbf16> to vector<256x256xbf16>
    %cst_16 = arith.constant dense<0.000000e+00> : vector<64x256xf32>
    %20 = tpu.matmul %17, %19, %cst_16 {dimension_numbers = #tpu.dot_dimension_numbers<[1], [0], [0], [1], [0, 0, 1, 1], [], []>} : vector<64x256xbf16>, vector<256x256xbf16>, vector<64x256xf32> -> vector<64x256xf32>
    %21 = arith.addf %4, %20 : vector<64x256xf32>
    %c0_17 = arith.constant 0 : index
    %c0_18 = arith.constant 0 : index
    %c0_19 = arith.constant 0 : index
    %22 = vector.load %arg3[%c0_17, %c0_18, %c0_19] : memref<1x64x256xbf16, #tpu.memory_space<vmem>>, vector<1x64x256xbf16>
    %23 = vector.shape_cast %22 : vector<1x64x256xbf16> to vector<64x256xbf16>
    %24 = arith.extf %23 : vector<64x256xbf16> to vector<64x256xf32>
    %c1 = arith.constant 1 : index
    %c0_20 = arith.constant 0 : index
    %25 = vector.load %arg7[%c1, %c0_20] : memref<4x256xf32, #tpu.memory_space<vmem>>, vector<1x256xf32>
    %26 = vector.broadcast %25 : vector<1x256xf32> to vector<64x256xf32>
    %27 = arith.mulf %24, %26 : vector<64x256xf32>
    %c1_21 = arith.constant 1 : index
    %c0_22 = arith.constant 0 : index
    %28 = vector.load %arg8[%c1_21, %c0_22] : memref<4x256xf32, #tpu.memory_space<vmem>>, vector<1x256xf32>
    %29 = vector.broadcast %28 : vector<1x256xf32> to vector<64x256xf32>
    %30 = arith.addf %27, %29 : vector<64x256xf32>
    %cst_23 = arith.constant 0.000000e+00 : f32
    %31 = vector.broadcast %cst_23 : f32 to vector<64x256xf32>
    %32 = arith.maximumf %30, %31 : vector<64x256xf32>
    %33 = arith.truncf %32 : vector<64x256xf32> to vector<64x256xbf16>
    %c1_24 = arith.constant 1 : index
    %c0_25 = arith.constant 0 : index
    %c0_26 = arith.constant 0 : index
    %34 = vector.load %arg9[%c1_24, %c0_25, %c0_26] : memref<4x256x256xbf16, #tpu.memory_space<vmem>>, vector<1x256x256xbf16>
    %35 = vector.shape_cast %34 : vector<1x256x256xbf16> to vector<256x256xbf16>
    %cst_27 = arith.constant dense<0.000000e+00> : vector<64x256xf32>
    %36 = tpu.matmul %33, %35, %cst_27 {dimension_numbers = #tpu.dot_dimension_numbers<[1], [0], [0], [1], [0, 0, 1, 1], [], []>} : vector<64x256xbf16>, vector<256x256xbf16>, vector<64x256xf32> -> vector<64x256xf32>
    %37 = arith.addf %21, %36 : vector<64x256xf32>
    %c0_28 = arith.constant 0 : index
    %c0_29 = arith.constant 0 : index
    %c0_30 = arith.constant 0 : index
    %38 = vector.load %arg4[%c0_28, %c0_29, %c0_30] : memref<1x64x256xbf16, #tpu.memory_space<vmem>>, vector<1x64x256xbf16>
    %39 = vector.shape_cast %38 : vector<1x64x256xbf16> to vector<64x256xbf16>
    %40 = arith.extf %39 : vector<64x256xbf16> to vector<64x256xf32>
    %c2 = arith.constant 2 : index
    %c0_31 = arith.constant 0 : index
    %41 = vector.load %arg7[%c2, %c0_31] : memref<4x256xf32, #tpu.memory_space<vmem>>, vector<1x256xf32>
    %42 = vector.broadcast %41 : vector<1x256xf32> to vector<64x256xf32>
    %43 = arith.mulf %40, %42 : vector<64x256xf32>
    %c2_32 = arith.constant 2 : index
    %c0_33 = arith.constant 0 : index
    %44 = vector.load %arg8[%c2_32, %c0_33] : memref<4x256xf32, #tpu.memory_space<vmem>>, vector<1x256xf32>
    %45 = vector.broadcast %44 : vector<1x256xf32> to vector<64x256xf32>
    %46 = arith.addf %43, %45 : vector<64x256xf32>
    %cst_34 = arith.constant 0.000000e+00 : f32
    %47 = vector.broadcast %cst_34 : f32 to vector<64x256xf32>
    %48 = arith.maximumf %46, %47 : vector<64x256xf32>
    %49 = arith.truncf %48 : vector<64x256xf32> to vector<64x256xbf16>
    %c2_35 = arith.constant 2 : index
    %c0_36 = arith.constant 0 : index
    %c0_37 = arith.constant 0 : index
    %50 = vector.load %arg9[%c2_35, %c0_36, %c0_37] : memref<4x256x256xbf16, #tpu.memory_space<vmem>>, vector<1x256x256xbf16>
    %51 = vector.shape_cast %50 : vector<1x256x256xbf16> to vector<256x256xbf16>
    %cst_38 = arith.constant dense<0.000000e+00> : vector<64x256xf32>
    %52 = tpu.matmul %49, %51, %cst_38 {dimension_numbers = #tpu.dot_dimension_numbers<[1], [0], [0], [1], [0, 0, 1, 1], [], []>} : vector<64x256xbf16>, vector<256x256xbf16>, vector<64x256xf32> -> vector<64x256xf32>
    %53 = arith.addf %37, %52 : vector<64x256xf32>
    %c0_39 = arith.constant 0 : index
    %c0_40 = arith.constant 0 : index
    %c0_41 = arith.constant 0 : index
    %54 = vector.load %arg5[%c0_39, %c0_40, %c0_41] : memref<1x64x256xbf16, #tpu.memory_space<vmem>>, vector<1x64x256xbf16>
    %55 = vector.shape_cast %54 : vector<1x64x256xbf16> to vector<64x256xbf16>
    %56 = arith.extf %55 : vector<64x256xbf16> to vector<64x256xf32>
    %c3 = arith.constant 3 : index
    %c0_42 = arith.constant 0 : index
    %57 = vector.load %arg7[%c3, %c0_42] : memref<4x256xf32, #tpu.memory_space<vmem>>, vector<1x256xf32>
    %58 = vector.broadcast %57 : vector<1x256xf32> to vector<64x256xf32>
    %59 = arith.mulf %56, %58 : vector<64x256xf32>
    %c3_43 = arith.constant 3 : index
    %c0_44 = arith.constant 0 : index
    %60 = vector.load %arg8[%c3_43, %c0_44] : memref<4x256xf32, #tpu.memory_space<vmem>>, vector<1x256xf32>
    %61 = vector.broadcast %60 : vector<1x256xf32> to vector<64x256xf32>
    %62 = arith.addf %59, %61 : vector<64x256xf32>
    %cst_45 = arith.constant 0.000000e+00 : f32
    %63 = vector.broadcast %cst_45 : f32 to vector<64x256xf32>
    %64 = arith.maximumf %62, %63 : vector<64x256xf32>
    %65 = arith.truncf %64 : vector<64x256xf32> to vector<64x256xbf16>
    %c3_46 = arith.constant 3 : index
    %c0_47 = arith.constant 0 : index
    %c0_48 = arith.constant 0 : index
    %66 = vector.load %arg9[%c3_46, %c0_47, %c0_48] : memref<4x256x256xbf16, #tpu.memory_space<vmem>>, vector<1x256x256xbf16>
    %67 = vector.shape_cast %66 : vector<1x256x256xbf16> to vector<256x256xbf16>
    %cst_49 = arith.constant dense<0.000000e+00> : vector<64x256xf32>
    %68 = tpu.matmul %65, %67, %cst_49 {dimension_numbers = #tpu.dot_dimension_numbers<[1], [0], [0], [1], [0, 0, 1, 1], [], []>} : vector<64x256xbf16>, vector<256x256xbf16>, vector<64x256xf32> -> vector<64x256xf32>
    %69 = arith.addf %53, %68 : vector<64x256xf32>
    %c0_50 = arith.constant 0 : index
    %c0_51 = arith.constant 0 : index
    %c0_52 = arith.constant 0 : index
    %70 = vector.load %arg11[%c0_50, %c0_51, %c0_52] : memref<1x64x256xf32, #tpu.memory_space<vmem>>, vector<1x64x256xf32>
    %71 = vector.shape_cast %70 : vector<1x64x256xf32> to vector<64x256xf32>
    %72 = vector.shape_cast %69 : vector<64x256xf32> to vector<1x64x256xf32>
    tpu.vector_store %arg11[%c0_50, %c0_51, %c0_52], %72 {strides = array<i32>} : memref<1x64x256xf32, #tpu.memory_space<vmem>>, vector<1x64x256xf32>,
    %cst_53 = arith.constant dense<0.000000e+00> : vector<256xf32>
    %73 = vector.multi_reduction <add>, %69, %cst_53 [0] : vector<64x256xf32> to vector<256xf32>
    %74 = vector.shape_cast %73 : vector<256xf32> to vector<1x256xf32>
    %c0_54 = arith.constant 0 : index
    %c0_55 = arith.constant 0 : index
    %c0_56 = arith.constant 0 : index
    %c0_57 = arith.constant 0 : index
    %75 = vector.load %arg12[%c0_54, %c0_55, %c0_56, %c0_57] : memref<1x1x1x256xf32, #tpu.memory_space<vmem>>, vector<1x1x1x256xf32>
    %76 = vector.shape_cast %75 : vector<1x1x1x256xf32> to vector<1x256xf32>
    %77 = vector.shape_cast %74 : vector<1x256xf32> to vector<1x1x1x256xf32>
    tpu.vector_store %arg12[%c0_54, %c0_55, %c0_56, %c0_57], %77 {strides = array<i32>} : memref<1x1x1x256xf32, #tpu.memory_space<vmem>>, vector<1x1x1x256xf32>,
    %78 = arith.mulf %69, %69 : vector<64x256xf32>
    %cst_58 = arith.constant dense<0.000000e+00> : vector<256xf32>
    %79 = vector.multi_reduction <add>, %78, %cst_58 [0] : vector<64x256xf32> to vector<256xf32>
    %80 = vector.shape_cast %79 : vector<256xf32> to vector<1x256xf32>
    %c0_59 = arith.constant 0 : index
    %c0_60 = arith.constant 0 : index
    %c0_61 = arith.constant 0 : index
    %c0_62 = arith.constant 0 : index
    %81 = vector.load %arg13[%c0_59, %c0_60, %c0_61, %c0_62] : memref<1x1x1x256xf32, #tpu.memory_space<vmem>>, vector<1x1x1x256xf32>
    %82 = vector.shape_cast %81 : vector<1x1x1x256xf32> to vector<1x256xf32>
    %83 = vector.shape_cast %80 : vector<1x256xf32> to vector<1x1x1x256xf32>
    tpu.vector_store %arg13[%c0_59, %c0_60, %c0_61, %c0_62], %83 {strides = array<i32>} : memref<1x1x1x256xf32, #tpu.memory_space<vmem>>, vector<1x1x1x256xf32>,
    return
  }
  func.func @transform_0(%arg0: i32, %arg1: i32) -> (i32, i32, i32) {
    %c0_i32 = arith.constant 0 : i32
    %c0_i32_0 = arith.constant 0 : i32
    return %arg0, %arg1, %c0_i32 : i32, i32, i32
  }
  func.func @transform_1(%arg0: i32, %arg1: i32) -> (i32, i32, i32) {
    %c0_i32 = arith.constant 0 : i32
    %c0_i32_0 = arith.constant 0 : i32
    return %arg0, %arg1, %c0_i32 : i32, i32, i32
  }
  func.func @transform_2(%arg0: i32, %arg1: i32) -> (i32, i32, i32) {
    %c0_i32 = arith.constant 0 : i32
    %c0_i32_0 = arith.constant 0 : i32
    return %arg0, %arg1, %c0_i32 : i32, i32, i32
  }
  func.func @transform_3(%arg0: i32, %arg1: i32) -> (i32, i32, i32) {
    %c0_i32 = arith.constant 0 : i32
    %c0_i32_0 = arith.constant 0 : i32
    return %arg0, %arg1, %c0_i32 : i32, i32, i32
  }
  func.func @transform_4(%arg0: i32, %arg1: i32) -> (i32, i32) {
    %c0_i32 = arith.constant 0 : i32
    %c0_i32_0 = arith.constant 0 : i32
    %c0_i32_1 = arith.constant 0 : i32
    return %c0_i32, %c0_i32_0 : i32, i32
  }
  func.func @transform_5(%arg0: i32, %arg1: i32) -> (i32, i32) {
    %c0_i32 = arith.constant 0 : i32
    %c0_i32_0 = arith.constant 0 : i32
    %c0_i32_1 = arith.constant 0 : i32
    return %c0_i32, %c0_i32_0 : i32, i32
  }
  func.func @transform_6(%arg0: i32, %arg1: i32) -> (i32, i32) {
    %c0_i32 = arith.constant 0 : i32
    %c0_i32_0 = arith.constant 0 : i32
    %c0_i32_1 = arith.constant 0 : i32
    return %c0_i32, %c0_i32_0 : i32, i32
  }
  func.func @transform_7(%arg0: i32, %arg1: i32) -> (i32, i32, i32) {
    %c0_i32 = arith.constant 0 : i32
    %c0_i32_0 = arith.constant 0 : i32
    %c0_i32_1 = arith.constant 0 : i32
    %c0_i32_2 = arith.constant 0 : i32
    return %c0_i32, %c0_i32_0, %c0_i32_1 : i32, i32, i32
  }
  func.func @transform_8(%arg0: i32, %arg1: i32) -> (i32, i32, i32) {
    %c0_i32 = arith.constant 0 : i32
    %c0_i32_0 = arith.constant 0 : i32
    %c0_i32_1 = arith.constant 0 : i32
    return %arg0, %c0_i32, %c0_i32_0 : i32, i32, i32
  }
  func.func @transform_9(%arg0: i32, %arg1: i32) -> (i32, i32, i32) {
    %c0_i32 = arith.constant 0 : i32
    %c0_i32_0 = arith.constant 0 : i32
    return %arg0, %arg1, %c0_i32 : i32, i32, i32
  }
  func.func @transform_10(%arg0: i32, %arg1: i32) -> (i32, i32, i32, i32) {
    %c0_i32 = arith.constant 0 : i32
    %c0_i32_0 = arith.constant 0 : i32
    %c0_i32_1 = arith.constant 0 : i32
    return %arg0, %arg1, %c0_i32, %c0_i32_0 : i32, i32, i32, i32
  }
  func.func @transform_11(%arg0: i32, %arg1: i32) -> (i32, i32, i32, i32) {
    %c0_i32 = arith.constant 0 : i32
    %c0_i32_0 = arith.constant 0 : i32
    %c0_i32_1 = arith.constant 0 : i32
    return %arg0, %arg1, %c0_i32, %c0_i32_0 : i32, i32, i32, i32
  }
}

module attributes {stable_mosaic.version = 11 : i64} {
  func.func @_bn_relu_kernel(%arg0: i32, %arg1: memref<128x256xf32, #tpu.memory_space<vmem>>, %arg2: memref<1x256xf32, #tpu.memory_space<vmem>>, %arg3: memref<1x256xf32, #tpu.memory_space<vmem>>, %arg4: memref<128x256xf32, #tpu.memory_space<vmem>>) attributes {dimension_semantics = [#tpu.dimension_semantics<parallel>], iteration_bounds = array<i64: 1>, scalar_prefetch = 0 : i64, scratch_operands = 0 : i64, tpu.core_type = #tpu.core_type<tc>, window_params = [{transform_indices = @transform_0, window_bounds = array<i64: 128, 256>}, {pipeline_mode = #tpu.pipeline_mode<synchronous>, transform_indices = @transform_1, window_bounds = array<i64: 1, 256>}, {pipeline_mode = #tpu.pipeline_mode<synchronous>, transform_indices = @transform_2, window_bounds = array<i64: 1, 256>}, {transform_indices = @transform_3, window_bounds = array<i64: 128, 256>}]} {
    %c0 = arith.constant 0 : index
    %c0_0 = arith.constant 0 : index
    %0 = vector.load %arg1[%c0, %c0_0] : memref<128x256xf32, #tpu.memory_space<vmem>>, vector<128x256xf32>
    %c0_1 = arith.constant 0 : index
    %c0_2 = arith.constant 0 : index
    %1 = vector.load %arg2[%c0_1, %c0_2] : memref<1x256xf32, #tpu.memory_space<vmem>>, vector<1x256xf32>
    %2 = vector.broadcast %1 : vector<1x256xf32> to vector<128x256xf32>
    %3 = arith.mulf %0, %2 : vector<128x256xf32>
    %c0_3 = arith.constant 0 : index
    %c0_4 = arith.constant 0 : index
    %4 = vector.load %arg3[%c0_3, %c0_4] : memref<1x256xf32, #tpu.memory_space<vmem>>, vector<1x256xf32>
    %5 = vector.broadcast %4 : vector<1x256xf32> to vector<128x256xf32>
    %6 = arith.addf %3, %5 : vector<128x256xf32>
    %cst = arith.constant 0.000000e+00 : f32
    %7 = vector.broadcast %cst : f32 to vector<128x256xf32>
    %8 = arith.maximumf %6, %7 : vector<128x256xf32>
    %c0_5 = arith.constant 0 : index
    %c0_6 = arith.constant 0 : index
    %9 = vector.load %arg4[%c0_5, %c0_6] : memref<128x256xf32, #tpu.memory_space<vmem>>, vector<128x256xf32>
    tpu.vector_store %arg4[%c0_5, %c0_6], %8 {strides = array<i32>} : memref<128x256xf32, #tpu.memory_space<vmem>>, vector<128x256xf32>,
    return
  }
  func.func @transform_0(%arg0: i32) -> (i32, i32) {
    %c0_i32 = arith.constant 0 : i32
    %c0_i32_0 = arith.constant 0 : i32
    return %arg0, %c0_i32 : i32, i32
  }
  func.func @transform_1(%arg0: i32) -> (i32, i32) {
    %c0_i32 = arith.constant 0 : i32
    %c0_i32_0 = arith.constant 0 : i32
    %c0_i32_1 = arith.constant 0 : i32
    return %c0_i32, %c0_i32_0 : i32, i32
  }
  func.func @transform_2(%arg0: i32) -> (i32, i32) {
    %c0_i32 = arith.constant 0 : i32
    %c0_i32_0 = arith.constant 0 : i32
    %c0_i32_1 = arith.constant 0 : i32
    return %c0_i32, %c0_i32_0 : i32, i32
  }
  func.func @transform_3(%arg0: i32) -> (i32, i32) {
    %c0_i32 = arith.constant 0 : i32
    %c0_i32_0 = arith.constant 0 : i32
    return %arg0, %c0_i32 : i32, i32
  }
}

</mosaic_0001>

<bundles_post_ra>
// kernel: aspp_forward.5
= control target key start
LH: loop header
LB: loop body
LE: loop exit
PB: predicated region body
PF: predicated region fallthrough
CT: control target
= control target key end

     0   :  { %v49_v0 = vlaneseq  ;;  %s451_s0 = inlined_call_operand.vmem [shape: f32[128,256], index: 0, kind: input, shape index: {}]   ;;  %s452_s1 = inlined_call_operand.vmem [shape: f32[1,256], index: 1, kind: input, shape index: {}]   ;;  %s453_s2 = inlined_call_operand.vmem [shape: f32[1,256], index: 2, kind: input, shape index: {}]   ;;  %s454_s3 = inlined_call_operand.hbm [shape: f32[128,256], index: 3, kind: output, shape index: {}]  }
   0x1   :  { %v47_v2 = vld [vmem:[%s452_s1] sm:$0x3]  ;;  %v16_v6 = vld [vmem:[%s451_s0 + $0x8] sm:$0xff]  ;;  %v17_v8 = vld [vmem:[%s451_s0 + $0x10] sm:$0xff] }
   0x2   :  { %v50_v1 = vshrl.u32 %v49_v0, 7  ;;  %v91_v3 = vld [vmem:[%s453_s2] sm:$0x3]  ;;  %v18_v9 = vld [vmem:[%s451_s0 + $0x18] sm:$0xff]  ;;  %v20_v15 = vld [vmem:[%s451_s0 + $0x28] sm:$0xff] }
   0x3   :  { %v15_v4 = vld [vmem:[%s451_s0] sm:$0xff]  ;;  %v21_v16 = vld [vmem:[%s451_s0 + $0x30] sm:$0xff]  ;;  %v22_v17 = vld [vmem:[%s451_s0 + $0x38] sm:$0xff] }
   0x4   :  { %v51_v5 = vsub.s32 0, %v50_v1  ;;  %v55_v7 = vsub.s32 1, %v50_v1  ;;  %v19_v10 = vld [vmem:[%s451_s0 + $0x20] sm:$0xff]  ;;  %v24_v31 = vld [vmem:[%s451_s0 + $0x48] sm:$0xff]  ;;  %v25_v32 = vld [vmem:[%s451_s0 + $0x50] sm:$0xff] }
   0x5   :  { %v23_v26 = vld [vmem:[%s451_s0 + $0x40] sm:$0xff]  ;;  %v26_v33 = vld [vmem:[%s451_s0 + $0x58] sm:$0xff]  ;;  %v28_v39 = vld [vmem:[%s451_s0 + $0x68] sm:$0xff] }
   0x6   :  { %v286_v11 = vrot.slane %v47_v2, %v51_v5  ;;  %v288_v12 = vrot.slane %v91_v3, %v51_v5  ;;  %v290_v13 = vrot.slane %v47_v2, %v55_v7  ;;  %v292_v14 = vrot.slane %v91_v3, %v55_v7  ;;  %v27_v38 = vld [vmem:[%s451_s0 + $0x60] sm:$0xff] }
   0x8   :  { %v59_v18 = vmul.f32 %v286_v11, %v15_v4  ;;  %v60_v19 = vmul.f32 %v290_v13, %v16_v6  ;;  %v61_v20 = vmul.f32 %v286_v11, %v17_v8  ;;  %v62_v21 = vmul.f32 %v290_v13, %v18_v9 }
   0x9   :  { %v63_v22 = vmul.f32 %v286_v11, %v19_v10  ;;  %v64_v23 = vmul.f32 %v290_v13, %v20_v15  ;;  %v65_v24 = vmul.f32 %v286_v11, %v21_v16  ;;  %v66_v25 = vmul.f32 %v290_v13, %v22_v17 }
   0xa   :  { %v103_v27 = vadd.f32 %v288_v12, %v59_v18  ;;  %v104_v28 = vadd.f32 %v292_v14, %v60_v19  ;;  %v105_v29 = vadd.f32 %v288_v12, %v61_v20  ;;  %v106_v30 = vadd.f32 %v292_v14, %v62_v21 }
   0xb   :  { %v107_v34 = vadd.f32 %v288_v12, %v63_v22  ;;  %v108_v35 = vadd.f32 %v292_v14, %v64_v23  ;;  %v109_v36 = vadd.f32 %v288_v12, %v65_v24  ;;  %v110_v37 = vadd.f32 %v292_v14, %v66_v25 }
   0xc   :  { %8 = vsyncpa [#allocation3], 0  ;;  %v135_v40 = vmax.f32 %v103_v27, 0.0  ;;  %v136_v41 = vmax.f32 %v104_v28, 0.0  ;;  %v137_v42 = vmax.f32 %v105_v29, 0.0  ;;  %v138_v43 = vmax.f32 %v106_v30, 0.0 }
   0xd   :  { %v29_v44 = vld [vmem:[%s451_s0 + $0x70] sm:$0xff]  ;;  %v30_v45 = vld [vmem:[%s451_s0 + $0x78] sm:$0xff]  ;;  %v139_v46 = vmax.f32 %v107_v34, 0.0  ;;  %v140_v47 = vmax.f32 %v108_v35, 0.0  ;;  %v141_v48 = vmax.f32 %v109_v36, 0.0  ;;  %v142_v49 = vmax.f32 %v110_v37, 0.0 }
   0xe   :  { %167 = vst [vmem:[#allocation2] sm:$0xff] %v135_v40  ;;  %168 = vst [vmem:[#allocation2 + $0x8] sm:$0xff] %v136_v41  ;;  %v67_v50 = vmul.f32 %v286_v11, %v23_v26  ;;  %v68_v51 = vmul.f32 %v290_v13, %v24_v31  ;;  %v69_v52 = vmul.f32 %v286_v11, %v25_v32  ;;  %v31_v62 = vld [vmem:[%s451_s0 + $0x80] sm:$0xff]  ;;  %v32_v63 = vld [vmem:[%s451_s0 + $0x88] sm:$0xff] }
   0xf   :  { %169 = vst [vmem:[#allocation2 + $0x10] sm:$0xff] %v137_v42  ;;  %170 = vst [vmem:[#allocation2 + $0x18] sm:$0xff] %v138_v43  ;;  %v70_v53 = vmul.f32 %v290_v13, %v26_v33  ;;  %v71_v54 = vmul.f32 %v286_v11, %v27_v38  ;;  %v72_v55 = vmul.f32 %v290_v13, %v28_v39  ;;  %v33_v0 = vld [vmem:[%s451_s0 + $0x90] sm:$0xff]  ;;  %v34_v5 = vld [vmem:[%s451_s0 + $0x98] sm:$0xff] }
  0x10   :  { %171 = vst [vmem:[#allocation2 + $0x20] sm:$0xff] %v139_v46  ;;  %172 = vst [vmem:[#allocation2 + $0x28] sm:$0xff] %v140_v47  ;;  %v73_v56 = vmul.f32 %v286_v11, %v29_v44  ;;  %v74_v57 = vmul.f32 %v290_v13, %v30_v45  ;;  %v111_v58 = vadd.f32 %v288_v12, %v67_v50  ;;  %v35_v6 = vld [vmem:[%s451_s0 + $0xa0] sm:$0xff]  ;;  %v36_v7 = vld [vmem:[%s451_s0 + $0xa8] sm:$0xff] }
  0x11   :  { %173 = vst [vmem:[#allocation2 + $0x30] sm:$0xff] %v141_v48  ;;  %174 = vst [vmem:[#allocation2 + $0x38] sm:$0xff] %v142_v49  ;;  %v112_v59 = vadd.f32 %v292_v14, %v68_v51  ;;  %v113_v60 = vadd.f32 %v288_v12, %v69_v52  ;;  %v114_v61 = vadd.f32 %v292_v14, %v70_v53  ;;  %v37_v16 = vld [vmem:[%s451_s0 + $0xb0] sm:$0xff]  ;;  %v38_v17 = vld [vmem:[%s451_s0 + $0xb8] sm:$0xff] }
  0x12   :  { %v115_v1 = vadd.f32 %v288_v12, %v71_v54  ;;  %v116_v2 = vadd.f32 %v292_v14, %v72_v55  ;;  %v117_v3 = vadd.f32 %v288_v12, %v73_v56  ;;  %v118_v4 = vadd.f32 %v292_v14, %v74_v57  ;;  %v39_v34 = vld [vmem:[%s451_s0 + $0xc0] sm:$0xff]  ;;  %v40_v35 = vld [vmem:[%s451_s0 + $0xc8] sm:$0xff]  ;;  %v41_v36 = vld [vmem:[%s451_s0 + $0xd0] sm:$0xff] }
  0x13   :  { %v143_v8 = vmax.f32 %v111_v58, 0.0  ;;  %v144_v9 = vmax.f32 %v112_v59, 0.0  ;;  %v145_v10 = vmax.f32 %v113_v60, 0.0  ;;  %v146_v15 = vmax.f32 %v114_v61, 0.0  ;;  %v42_v41 = vld [vmem:[%s451_s0 + $0xd8] sm:$0xff]  ;;  %v43_v42 = vld [vmem:[%s451_s0 + $0xe0] sm:$0xff] }
  0x14   :  { %v147_v18 = vmax.f32 %v115_v1, 0.0  ;;  %v148_v19 = vmax.f32 %v116_v2, 0.0  ;;  %v149_v20 = vmax.f32 %v117_v3, 0.0  ;;  %v150_v21 = vmax.f32 %v118_v4, 0.0  ;;  %v44_v43 = vld [vmem:[%s451_s0 + $0xe8] sm:$0xff]  ;;  %v45_v48 = vld [vmem:[%s451_s0 + $0xf0] sm:$0xff] }
  0x15   :  { %175 = vst [vmem:[#allocation2 + $0x40] sm:$0xff] %v143_v8  ;;  %176 = vst [vmem:[#allocation2 + $0x48] sm:$0xff] %v144_v9  ;;  %v75_v22 = vmul.f32 %v286_v11, %v31_v62  ;;  %v76_v23 = vmul.f32 %v290_v13, %v32_v63  ;;  %v77_v24 = vmul.f32 %v286_v11, %v33_v0  ;;  %v46_v49 = vld [vmem:[%s451_s0 + $0xf8] sm:$0xff]  ;;  %s242_s0 = smov [#allocation2]  }
  0x16   :  { %177 = vst [vmem:[#allocation2 + $0x50] sm:$0xff] %v145_v10  ;;  %178 = vst [vmem:[#allocation2 + $0x58] sm:$0xff] %v146_v15  ;;  %v78_v25 = vmul.f32 %v290_v13, %v34_v5  ;;  %v79_v26 = vmul.f32 %v286_v11, %v35_v6  ;;  %v80_v27 = vmul.f32 %v290_v13, %v36_v7  ;;  %s204_s22 = sshll.u32 %s242_s0, 4  ;;  %s205_s22 = int_to_ptr.vmem [resolvable:$true] %s204_s22 }
  0x17   :  { %179 = vst [vmem:[#allocation2 + $0x60] sm:$0xff] %v147_v18  ;;  %180 = vst [vmem:[#allocation2 + $0x68] sm:$0xff] %v148_v19  ;;  %v81_v28 = vmul.f32 %v286_v11, %v37_v16  ;;  %v82_v29 = vmul.f32 %v290_v13, %v38_v17  ;;  %v119_v30 = vadd.f32 %v288_v12, %v75_v22  ;;  %s218_s1 = scalar_lea.vmem %s205_s22, 4096  ;;  %p223_p1 = scmp.lt.s32.totalorder %s205_s22, %s205_s22 }
  0x18   :  { %181 = vst [vmem:[#allocation2 + $0x70] sm:$0xff] %v149_v20  ;;  %182 = vst [vmem:[#allocation2 + $0x78] sm:$0xff] %v150_v21  ;;  %v120_v31 = vadd.f32 %v292_v14, %v76_v23  ;;  %v121_v32 = vadd.f32 %v288_v12, %v77_v24  ;;  %v122_v33 = vadd.f32 %v292_v14, %v78_v25  ;;  %p219_p0 = scmp.ne.s32.totalorder %s205_s22, %s218_s1  ;;  %p224_p2 = scmp.lt.s32.totalorder %s218_s1, %s218_s1 }
  0x19   :  { %v123_v37 = vadd.f32 %v288_v12, %v79_v26  ;;  %v124_v38 = vadd.f32 %v292_v14, %v80_v27  ;;  %v125_v39 = vadd.f32 %v288_v12, %v81_v28  ;;  %v126_v40 = vadd.f32 %v292_v14, %v82_v29 }
  0x1a   :  { %v151_v44 = vmax.f32 %v119_v30, 0.0  ;;  %v152_v45 = vmax.f32 %v120_v31, 0.0  ;;  %v153_v46 = vmax.f32 %v121_v32, 0.0  ;;  %v154_v47 = vmax.f32 %v122_v33, 0.0  ;;  %p225_p3 = por %p224_p2, %p223_p1 }
  0x1b   :  { %v155_v50 = vmax.f32 %v123_v37, 0.0  ;;  %v156_v51 = vmax.f32 %v124_v38, 0.0  ;;  %v157_v52 = vmax.f32 %v125_v39, 0.0  ;;  %v158_v53 = vmax.f32 %v126_v40, 0.0 }
  0x1c   :  { %183 = vst [vmem:[#allocation2 + $0x80] sm:$0xff] %v151_v44  ;;  %184 = vst [vmem:[#allocation2 + $0x88] sm:$0xff] %v152_v45  ;;  %v83_v54 = vmul.f32 %v286_v11, %v39_v34  ;;  %v84_v55 = vmul.f32 %v290_v13, %v40_v35  ;;  %v85_v56 = vmul.f32 %v286_v11, %v41_v36  ;;  %p226_p4 = pnand %p225_p3, %p219_p0 }
  0x1d   :  { %185 = vst [vmem:[#allocation2 + $0x90] sm:$0xff] %v153_v46  ;;  %186 = vst [vmem:[#allocation2 + $0x98] sm:$0xff] %v154_v47  ;;  %v86_v57 = vmul.f32 %v290_v13, %v42_v41  ;;  %v87_v58 = vmul.f32 %v286_v11, %v43_v42  ;;  %v88_v59 = vmul.f32 %v290_v13, %v44_v43 }
  0x1e   :  { %187 = vst [vmem:[#allocation2 + $0xa0] sm:$0xff] %v155_v50  ;;  %188 = vst [vmem:[#allocation2 + $0xa8] sm:$0xff] %v156_v51  ;;  %v89_v60 = vmul.f32 %v286_v11, %v45_v48  ;;  %v90_v61 = vmul.f32 %v290_v13, %v46_v49  ;;  %v127_v62 = vadd.f32 %v288_v12, %v83_v54 }
  0x1f   :  { %189 = vst [vmem:[#allocation2 + $0xb0] sm:$0xff] %v157_v52  ;;  %190 = vst [vmem:[#allocation2 + $0xb8] sm:$0xff] %v158_v53  ;;  %v128_v63 = vadd.f32 %v292_v14, %v84_v55  ;;  %v129_v0 = vadd.f32 %v288_v12, %v85_v56  ;;  %v130_v1 = vadd.f32 %v292_v14, %v86_v57 }
  0x20   :  { %v131_v2 = vadd.f32 %v288_v12, %v87_v58  ;;  %v132_v3 = vadd.f32 %v292_v14, %v88_v59  ;;  %v133_v4 = vadd.f32 %v288_v12, %v89_v60  ;;  %v134_v11 = vadd.f32 %v292_v14, %v90_v61 }
  0x21   :  { %v159_v5 = vmax.f32 %v127_v62, 0.0  ;;  %v160_v13 = vmax.f32 %v128_v63, 0.0  ;;  %v161_v6 = vmax.f32 %v129_v0, 0.0  ;;  %v162_v7 = vmax.f32 %v130_v1, 0.0 }
  0x22   :  { %v163_v8 = vmax.f32 %v131_v2, 0.0  ;;  %v164_v9 = vmax.f32 %v132_v3, 0.0  ;;  %v165_v10 = vmax.f32 %v133_v4, 0.0  ;;  %v166_v15 = vmax.f32 %v134_v11, 0.0 }
  0x23   :  { %191 = vst [vmem:[#allocation2 + $0xc0] sm:$0xff] %v159_v5  ;;  %192 = vst [vmem:[#allocation2 + $0xc8] sm:$0xff] %v160_v13 }
  0x24   :  { %193 = vst [vmem:[#allocation2 + $0xd0] sm:$0xff] %v161_v6  ;;  %194 = vst [vmem:[#allocation2 + $0xd8] sm:$0xff] %v162_v7 }
  0x25   :  { %195 = vst [vmem:[#allocation2 + $0xe0] sm:$0xff] %v163_v8  ;;  %196 = vst [vmem:[#allocation2 + $0xe8] sm:$0xff] %v164_v9 }
  0x26   :  { %197 = vst [vmem:[#allocation2 + $0xf0] sm:$0xff] %v165_v10  ;;  %198 = vst [vmem:[#allocation2 + $0xf8] sm:$0xff] %v166_v15 }
  0x27   :  { %229 = shalt.err (!%p226_p4)
}
  0x28   :  { %s230_s24 = scalar_lea.hbm %s454_s3, 4096 }
  0x29   :  { %p231_p5 = scmp.ne.s32.totalorder %s454_s3, %s230_s24  ;;  %p234_p6 = scmp.lt.u32.totalorder %s230_s24, %s454_s3 }
  0x2b   :  { %p236_p7 = pnand %p234_p6, %p231_p5 }
  0x2d   :  { %239 = shalt.err (!%p236_p7)
}
  0x2e   :  { %s243_s29 = smov 256   ;;  %s244_s30 = smov 16  }
  0x2f   :  { %210 = dma.vmem_to_hbm [thread:$0]  %s205_s22, 4096, %s454_s3, [#allocation3], %s243_s29, %s243_s29, %s244_s30  }
  0x30   :  { %240 = dma.done.wait [#allocation3], 4096  }
  0x31   :  { %241 = vsyncadd [#allocation3], 4294963200 }
  0x32   :  { %214 = vsyncpa [#allocation3], 1 }

// kernel: aspp_forward.4
= control target key start
LH: loop header
LB: loop body
LE: loop exit
PB: predicated region body
PF: predicated region fallthrough
CT: control target
= control target key end

     0   :  { %s3482_s17 = smov 0   ;;  %s3484_s18 = smov 0   ;;  %s4344_s0 = inlined_call_operand.vmem [shape: bf16[2,64,160], index: 0, kind: input, shape index: {}]   ;;  %s4345_s1 = inlined_call_operand.vmem [shape: bf16[2,64,256], index: 1, kind: input, shape index: {}]   ;;  %s4346_s2 = inlined_call_operand.vmem [shape: bf16[2,64,256], index: 2, kind: input, shape index: {}]   ;;  %s4347_s3 = inlined_call_operand.vmem [shape: bf16[2,64,256], index: 3, kind: input, shape index: {}]   ;;  %s4348_s4 = inlined_call_operand.vmem [shape: bf16[160,256], index: 4, kind: input, shape index: {}]   ;;  %s4349_s5 = inlined_call_operand.vmem [shape: f32[4,256], index: 5, kind: input, shape index: {}]   ;;  %s4350_s6 = inlined_call_operand.vmem [shape: f32[4,256], index: 6, kind: input, shape index: {}]   ;;  %s4351_s7 = inlined_call_operand.vmem [shape: bf16[4,256,256], index: 7, kind: input, shape index: {}]   ;;  %s4352_s8 = inlined_call_operand.vmem [shape: f32[2,1,256], index: 8, kind: input, shape index: {}]   ;;  %s4353_s9 = inlined_call_operand.vmem [shape: f32[2,64,256], index: 9, kind: output, shape index: {0}]   ;;  %s4354_s10 = inlined_call_operand.vmem [shape: f32[2,1,1,256], index: 10, kind: output, shape index: {1}]   ;;  %s4355_s11 = inlined_call_operand.vmem [shape: f32[2,1,1,256], index: 11, kind: output, shape index: {2}]  }
   0x1   :  { %s3486_s19 = smov 0  }
   0x2 LB: > { %s34_s20 = sadd.s32 1, %s3415_s18  ;;  %p2791_p0 = scmp.ge.s32.totalorder %s3419_s19, 1  ;;  %s3419_s19 = sphi %s3486_s19, %s22_s19   ;;  %s3415_s18 = sphi %s3484_s18, %s4357_s18   ;;  %s3411_s17 = sphi %s3482_s17, %s4356_s17  }
   0x3   : > { %p36_p1 = scmp.ge.s32.totalorder %s34_s20, 2  ;;  %p431_p2 = scmp.lt.s32.totalorder %s3419_s19, 3 }
   0x5   : > { %s4359_s20 = smov (%p36_p1, %s34_s20), 0  ;;  %p432_p3 = pnand %p2791_p0, %p431_p2 }
   0x6   : > { %v3163_v0 = vld [vmem:[%s4348_s4 + $0x4] ss:$8 sps:$4 sm:$0xff] (!%p432_p3)   ;;  %p532_p4 = scmp.lt.s32.totalorder (!%p432_p3), %s3411_s17, 1  ;;  %v3165_v1 = vld [vmem:[%s4348_s4] ss:$8 sps:$4 sm:$0xff] (!%p432_p3)   ;;  %vm785_vm0 = vcmask (!%p432_p3), 261120   ;;  %v609_v28 = vlaneseq (!%p432_p3) }
   0x7   : > { %435 = sbr.rel (%p432_p3) target bundleno = 601 (0x259), region = 56  ;;  %798 = vmatprep.subr.bf16.mxu0 (!%p432_p3), %v3163_v0  ;;  %v3166_v2 = vld [vmem:[%s4348_s4 + $0x14] ss:$8 sps:$4 sm:$0xff] (!%p432_p3)   ;;  %v3168_v3 = vld [vmem:[%s4348_s4 + $0x10] ss:$8 sps:$4 sm:$0xff] (!%p432_p3)  }
   0x8   : > { %799 = vmatpush1.bf16.msra.mxu0 (!%p432_p3), %v3165_v1  ;;  %v3169_v4 = vld [vmem:[%s4348_s4 + $0x24] ss:$8 sps:$4 sm:$0xff] (!%p432_p3)   ;;  %v3171_v5 = vld [vmem:[%s4348_s4 + $0x20] ss:$8 sps:$4 sm:$0xff] (!%p432_p3)   ;;  %v3172_v6 = vld [vmem:[%s4348_s4 + $0x34] ss:$8 sps:$4 sm:$0xff] (!%p432_p3)  }
   0x9   : > { %800 = vmatprep.subr.bf16.mxu0 (!%p432_p3), %v3166_v2  ;;  %v3174_v7 = vld [vmem:[%s4348_s4 + $0x30] ss:$8 sps:$4 sm:$0xff] (!%p432_p3)   ;;  %v3175_v8 = vld [vmem:[%s4348_s4 + $0x44] ss:$8 sps:$4 sm:$0xff] (!%p432_p3)   ;;  %v3177_v10 = vld [vmem:[%s4348_s4 + $0x40] ss:$8 sps:$4 sm:$0xff] (!%p432_p3)  }
   0xa   : > { %v3178_v11 = vld [vmem:[%s4348_s4 + $0x54] ss:$8 sps:$4 sm:$0xff] (!%p432_p3)   ;;  %v3180_v12 = vld [vmem:[%s4348_s4 + $0x50] ss:$8 sps:$4 sm:$0xff] (!%p432_p3)   ;;  %v3181_v13 = vld [vmem:[%s4348_s4 + $0x64] ss:$8 sps:$4 sm:$0xff] (!%p432_p3)  }
   0xb   : > { %v3205_v14 = vld [vmem:[%s4351_s7 + $0x204] ss:$8 sps:$4 sm:$0xff] (!%p432_p3)   ;;  %v3207_v15 = vld [vmem:[%s4351_s7 + $0x200] ss:$8 sps:$4 sm:$0xff] (!%p432_p3)   ;;  %v3208_v16 = vld [vmem:[%s4351_s7 + $0x214] ss:$8 sps:$4 sm:$0xff] (!%p432_p3)  }
   0xc   : > { %801 = vmatpush1.bf16.msra.mxu0 (!%p432_p3), %v3168_v3  ;;  %1919 = vmatprep.subr.bf16.mxu1 (!%p432_p3), %v3205_v14  ;;  %v3210_v17 = vld [vmem:[%s4351_s7 + $0x210] ss:$8 sps:$4 sm:$0xff] (!%p432_p3)   ;;  %v3183_v18 = vld [vmem:[%s4348_s4 + $0x60] ss:$8 sps:$4 sm:$0xff] (!%p432_p3)   ;;  %v3211_v19 = vld [vmem:[%s4351_s7 + $0x224] ss:$8 sps:$4 sm:$0xff] (!%p432_p3)  }
   0xd   : > { %802 = vmatprep.subr.bf16.mxu0 (!%p432_p3), %v3169_v4  ;;  %1920 = vmatpush1.bf16.msra.mxu1 (!%p432_p3), %v3207_v15  ;;  %v3184_v20 = vld [vmem:[%s4348_s4 + $0x74] ss:$8 sps:$4 sm:$0xff] (!%p432_p3)   ;;  %v3213_v21 = vld [vmem:[%s4351_s7 + $0x220] ss:$8 sps:$4 sm:$0xff] (!%p432_p3)   ;;  %v3186_v22 = vld [vmem:[%s4348_s4 + $0x70] ss:$8 sps:$4 sm:$0xff] (!%p432_p3)  }
   0xe   : > { %s4361_s17 = smov (!%p532_p4, %s3411_s17), 1  ;;  %1921 = vmatprep.subr.bf16.mxu1 %v3208_v16  ;;  %v3214_v23 = vld [vmem:[%s4351_s7 + $0x234] ss:$8 sps:$4 sm:$0xff]   ;;  %v3187_v24 = vld [vmem:[%s4348_s4 + $0x84] ss:$8 sps:$4 sm:$0xff]   ;;  %v3607_v33 = vshrl.u32 %v609_v28, 7 }
   0xf   : > { %s3524_s16 = sshll.u32 %s4361_s17, 6  ;;  %v3216_v25 = vld [vmem:[%s4351_s7 + $0x230] ss:$8 sps:$4 sm:$0xff]   ;;  %v3189_v26 = vld [vmem:[%s4348_s4 + $0x80] ss:$8 sps:$4 sm:$0xff]   ;;  %vm2458_vm1 = vcmp.lt.s32.totalorder %v609_v28, 256 }
  0x10   : > { %803 = vmatpush1.bf16.msra.mxu0 %v3171_v5  ;;  %s3533_s25 = scalar_lea.vmem %s4344_s0, %s3524_s16  ;;  %v3217_v27 = vld [vmem:[%s4351_s7 + $0x244] ss:$8 sps:$4 sm:$0xff]   ;;  %v3190_v29 = vld [vmem:[%s4348_s4 + $0x94] ss:$8 sps:$4 sm:$0xff]   ;;  %v3219_v30 = vld [vmem:[%s4351_s7 + $0x240] ss:$8 sps:$4 sm:$0xff]   ;;  %s3617_s23 = scalar_lea.vmem %s4346_s2, %s3524_s16 }
  0x11   : > { %804 = vmatprep.subr.bf16.mxu0 %v3172_v6  ;;  %v3195_v9 = vld [vmem:[%s3533_s25 + $0x4] ss:$8 sps:$4 sm:$0xff]   ;;  %1922 = vmatpush1.bf16.msra.mxu1 %v3210_v17  ;;  %v3192_v31 = vld [vmem:[%s4348_s4 + $0x90] ss:$8 sps:$4 sm:$0xff]   ;;  %v3220_v32 = vld [vmem:[%s4351_s7 + $0x254] ss:$8 sps:$4 sm:$0xff]   ;;  %s3914_s27 = scalar_lea.vmem %s4347_s3, %s3524_s16  ;;  %s4062_s14 = scalar_lea.vmem %s4345_s1, %s3524_s16 }
  0x12   : > { %2833 = vmatprep.mubr.msk.bf16.mxu0 %vm785_vm0, %v3195_v9  ;;  %1923 = vmatprep.subr.bf16.mxu1 %v3211_v19  ;;  %v3193_v34 = vld [vmem:[%s3533_s25] ss:$8 sps:$4 sm:$0xff]   ;;  %v3222_v35 = vld [vmem:[%s4351_s7 + $0x250] ss:$8 sps:$4 sm:$0xff]   ;;  %v3196_v36 = vld [vmem:[%s3533_s25 + $0x14] ss:$8 sps:$4 sm:$0xff]  }
  0x13   : > { %v3223_v37 = vld [vmem:[%s4351_s7 + $0x264] ss:$8 sps:$4 sm:$0xff]   ;;  %v3624_v38 = vsub.s32 1, %v3607_v33  ;;  %v3225_v39 = vld [vmem:[%s4351_s7 + $0x260] ss:$8 sps:$4 sm:$0xff]   ;;  %v3728_v16 = vsub.s32 0, %v3607_v33 }
  0x14   : > { %805 = vmatpush1.bf16.msra.mxu0 %v3174_v7  ;;  %v3253_v40 = vld [vmem:[%s4351_s7] ss:$8 sps:$4 sm:$0xff]   ;;  %v3255_v41 = vld [vmem:[%s4351_s7 + $0x4] ss:$8 sps:$4 sm:$0xff]   ;;  %v3226_v48 = vld [vmem:[%s4351_s7 + $0x274] ss:$8 sps:$4 sm:$0xff]  }
  0x15   : > { %806 = vmatprep.subr.bf16.mxu0 %v3175_v8  ;;  %1924 = vmatpush1.bf16.msra.mxu1 %v3213_v21  ;;  %v3636_v42 = vld [vmem:[%s3617_s23] sm:$0xff]  ;;  %v3639_v43 = vld [vmem:[%s3617_s23 + $0x8] sm:$0xff]  ;;  %v3198_v50 = vld [vmem:[%s3533_s25 + $0x10] ss:$8 sps:$4 sm:$0xff]  }
  0x16   : > { %1925 = vmatprep.subr.bf16.mxu1 %v3214_v23  ;;  %v1629_v44 = vunpack.c.h.bf16 %v3636_v42  ;;  %v1631_v45 = vunpack.c.h.bf16 %v3639_v43  ;;  %v3646_v46 = vld [vmem:[%s4349_s5 + $0x2] ss:$4 sm:$0x3]  ;;  %v3259_v54 = vld [vmem:[%s4351_s7 + $0x10] ss:$8 sps:$4 sm:$0xff]   ;;  %v1630_v23 = vunpack.c.l.bf16 %v3639_v43 }
  0x17   : > { %v3651_v47 = vld [vmem:[%s4350_s6 + $0x2] ss:$4 sm:$0x3]  ;;  %v3659_v49 = vrot.slane %v3646_v46, %v3624_v38  ;;  %v3261_v55 = vld [vmem:[%s4351_s7 + $0x14] ss:$8 sps:$4 sm:$0xff]  }
  0x18   : > { %807 = vmatpush1.bf16.msra.mxu0 %v3177_v10  ;;  %v3664_v51 = vrot.slane %v3651_v47, %v3624_v38  ;;  %v3199_v56 = vld [vmem:[%s3533_s25 + $0x24] ss:$8 sps:$4 sm:$0xff]   ;;  %v3228_v57 = vld [vmem:[%s4351_s7 + $0x270] ss:$8 sps:$4 sm:$0xff]   ;;  %v3265_v0 = vld [vmem:[%s4351_s7 + $0x20] ss:$8 sps:$4 sm:$0xff]  }
  0x19   : > { %808 = vmatprep.subr.bf16.mxu0 %v3178_v11  ;;  %1926 = vmatpush1.bf16.msra.mxu1 %v3216_v25  ;;  %v1658_v52 = vmul.f32 %v3659_v49, %v1629_v44  ;;  %v1660_v53 = vmul.f32 %v3659_v49, %v1631_v45  ;;  %v3229_v58 = vld [vmem:[%s4351_s7 + $0x284] ss:$8 sps:$4 sm:$0xff]   ;;  %v3231_v1 = vld [vmem:[%s4351_s7 + $0x280] ss:$8 sps:$4 sm:$0xff]   ;;  %v3232_v2 = vld [vmem:[%s4351_s7 + $0x294] ss:$8 sps:$4 sm:$0xff]  }
  0x1a   : > { %1927 = vmatprep.subr.bf16.mxu1 %v3217_v27  ;;  %v3267_v61 = vld [vmem:[%s4351_s7 + $0x24] ss:$8 sps:$4 sm:$0xff]   ;;  %v3273_v4 = vld [vmem:[%s4351_s7 + $0x34] ss:$8 sps:$4 sm:$0xff]   ;;  %v3201_v5 = vld [vmem:[%s3533_s25 + $0x20] ss:$8 sps:$4 sm:$0xff]  }
  0x1b   : > { %v1687_v59 = vadd.f32 %v3664_v51, %v1658_v52  ;;  %v1689_v60 = vadd.f32 %v3664_v51, %v1660_v53  ;;  %v3271_v6 = vld [vmem:[%s4351_s7 + $0x30] ss:$8 sps:$4 sm:$0xff]   ;;  %v3202_v8 = vld [vmem:[%s3533_s25 + $0x34] ss:$8 sps:$4 sm:$0xff]   ;;  %v3235_v9 = vld [vmem:[%s4351_s7 + $0x2a4] ss:$8 sps:$4 sm:$0xff]  }
  0x1c   : > { %809 = vmatpush1.bf16.msra.mxu0 %v3180_v12  ;;  %v3234_v7 = vld [vmem:[%s4351_s7 + $0x290] ss:$8 sps:$4 sm:$0xff]   ;;  %v3237_v10 = vld [vmem:[%s4351_s7 + $0x2a0] ss:$8 sps:$4 sm:$0xff]   ;;  %v3279_v11 = vld [vmem:[%s4351_s7 + $0x44] ss:$8 sps:$4 sm:$0xff]  }
  0x1d   : > { %810 = vmatprep.subr.bf16.mxu0 %v3181_v13  ;;  %1928 = vmatpush1.bf16.msra.mxu1 %v3219_v30  ;;  %v1703_v62 = vmax.f32 %v1687_v59, 0.0  ;;  %v1705_v63 = vmax.f32 %v1689_v60, 0.0  ;;  %v3277_v12 = vld [vmem:[%s4351_s7 + $0x40] ss:$8 sps:$4 sm:$0xff]   ;;  %v3285_v13 = vld [vmem:[%s4351_s7 + $0x54] ss:$8 sps:$4 sm:$0xff]  }
  0x1e   : > { %1929 = vmatprep.subr.bf16.mxu1 %v3220_v32  ;;  %v3238_v14 = vld [vmem:[%s4351_s7 + $0x2b4] ss:$8 sps:$4 sm:$0xff]   ;;  %v3204_v15 = vld [vmem:[%s3533_s25 + $0x30] ss:$8 sps:$4 sm:$0xff]   ;;  %v3241_v19 = vld [vmem:[%s4351_s7 + $0x2c4] ss:$8 sps:$4 sm:$0xff]  }
  0x1f   : > { %v1719_v3 = vpack.c.bf16 %v1705_v63, %v1703_v62  ;;  %v3283_v17 = vld [vmem:[%s4351_s7 + $0x50] ss:$8 sps:$4 sm:$0xff]   ;;  %v3243_v21 = vld [vmem:[%s4351_s7 + $0x2c0] ss:$8 sps:$4 sm:$0xff]   ;;  %v3244_v27 = vld [vmem:[%s4351_s7 + $0x2d4] ss:$8 sps:$4 sm:$0xff]  }
  0x20   : > { %811 = vmatpush1.bf16.msra.mxu0 %v3183_v18  ;;  %v3240_v18 = vld [vmem:[%s4351_s7 + $0x2b0] ss:$8 sps:$4 sm:$0xff]   ;;  %v3289_v25 = vld [vmem:[%s4351_s7 + $0x60] ss:$8 sps:$4 sm:$0xff]   ;;  %v3250_v52 = vld [vmem:[%s4351_s7 + $0x2f4] ss:$8 sps:$4 sm:$0xff]  }
  0x21   : > { %812 = vmatprep.subr.bf16.mxu0 %v3184_v20  ;;  %1930 = vmatpush1.bf16.msra.mxu1 %v3222_v35  ;;  %v3291_v20 = vld [vmem:[%s4351_s7 + $0x64] ss:$8 sps:$4 sm:$0xff]   ;;  %v3295_v32 = vld [vmem:[%s4351_s7 + $0x70] ss:$8 sps:$4 sm:$0xff]   ;;  %v3309_v53 = vld [vmem:[%s4351_s7 + $0x94] ss:$8 sps:$4 sm:$0xff]  }
  0x22   : > { %1931 = vmatprep.subr.bf16.mxu1 %v3223_v37  ;;  %1951 = vmatprep.mubr.bf16.mxu1 %v1719_v3  ;;  %v1623_v35 = vld [vmem:[%s3617_s23 + $0x18] sm:$0xff]  ;;  %v3303_v37 = vld [vmem:[%s4351_s7 + $0x84] ss:$8 sps:$4 sm:$0xff]   ;;  %s3073_s25 = sshll.u32 %s4361_s17, 7 }
  0x23   : > { %v3258_v62 = vld [vmem:[%s4351_s7 + $0x304] ss:$8 sps:$4 sm:$0xff]   ;;  %v3307_v63 = vld [vmem:[%s4351_s7 + $0x90] ss:$8 sps:$4 sm:$0xff]   ;;  %s4284_s15 = scalar_lea.vmem %s4353_s9, %s3073_s25 }
  0x24   : > { %813 = vmatpush1.bf16.msra.mxu0 %v3186_v22  ;;  %v1628_v22 = vunpack.c.l.bf16 %v3636_v42 }
  0x25   : > { %814 = vmatprep.subr.bf16.mxu0 %v3187_v24  ;;  %1932 = vmatpush1.bf16.msra.mxu1 %v3225_v39  ;;  %v3749_v24 = vrot.slane %v3646_v46, %v3728_v16  ;;  %v3249_v46 = vld [vmem:[%s4351_s7 + $0x2e0] ss:$8 sps:$4 sm:$0xff]  }
  0x26   : > { %1933 = vmatprep.subr.bf16.mxu1 %v3226_v48 }
  0x27   : > { %v1657_v30 = vmul.f32 %v3749_v24, %v1628_v22  ;;  %v3262_v22 = vld [vmem:[%s4351_s7 + $0x310] ss:$8 sps:$4 sm:$0xff]  }
  0x28   : > { %815 = vmatpush1.bf16.msra.mxu0 %v3189_v26  ;;  %v3297_v26 = vld [vmem:[%s4351_s7 + $0x74] ss:$8 sps:$4 sm:$0xff]  }
  0x29   : > { %816 = vmatprep.subr.bf16.mxu0 %v3190_v29  ;;  %1934 = vmatpush1.bf16.msra.mxu1 %v3228_v57  ;;  %v3762_v29 = vrot.slane %v3651_v47, %v3728_v16  ;;  %v3301_v47 = vld [vmem:[%s4351_s7 + $0x80] ss:$8 sps:$4 sm:$0xff]  }
  0x2a   : > { %1935 = vmatprep.subr.bf16.mxu1 %v3229_v58  ;;  %v1625_v57 = vld [vmem:[%s3617_s23 + $0x28] sm:$0xff]  ;;  %v3252_v58 = vld [vmem:[%s4351_s7 + $0x2f0] ss:$8 sps:$4 sm:$0xff]  }
  0x2b   : > { %v1686_v42 = vadd.f32 %v3762_v29, %v1657_v30 }
  0x2c   : > { %817 = vmatpush1.bf16.msra.mxu0 %v3192_v31  ;;  %v1659_v31 = vmul.f32 %v3749_v24, %v1630_v23  ;;  %v3327_v23 = vld [vmem:[%s4351_s7 + $0xc4] ss:$8 sps:$4 sm:$0xff]  }
  0x2d   : > { %1143 = vmatprep.subr.bf16.mxu0 %v3255_v41  ;;  %1936 = vmatpush1.bf16.msra.mxu1 %v3231_v1  ;;  %v3247_v41 = vld [vmem:[%s4351_s7 + $0x2e4] ss:$8 sps:$4 sm:$0xff]   ;;  %v1702_v59 = vmax.f32 %v1686_v42, 0.0 }
  0x2e   : > { %1937 = vmatprep.subr.bf16.mxu1 %v3232_v2  ;;  %v1688_v43 = vadd.f32 %v3762_v29, %v1659_v31  ;;  %v1639_v2 = vunpack.c.h.bf16 %v1625_v57 }
  0x2f   : > { %831 = vmatmul.mubr.bf16.vlgmr.msra.gmra.mrb[0].mxu0 %v3193_v34  ;;  %v1622_v34 = vld [vmem:[%s3617_s23 + $0x10] sm:$0xff] }
  0x30   : > { %2834 = vmatprep.mubr.msk.bf16.mxu0 %vm785_vm0, %v3196_v36  ;;  %1144 = vmatpush1.bf16.msra.mxu0 %v3253_v40  ;;  %v3246_v36 = vld [vmem:[%s4351_s7 + $0x2d0] ss:$8 sps:$4 sm:$0xff]   ;;  %v1633_v39 = vunpack.c.h.bf16 %v1622_v34  ;;  %v1635_v40 = vunpack.c.h.bf16 %v1623_v35  ;;  %v1632_v48 = vunpack.c.l.bf16 %v1622_v34  ;;  %v1704_v60 = vmax.f32 %v1688_v43, 0.0 }
  0x31   : > { %1145 = vmatprep.subr.bf16.mxu0 %v3261_v55  ;;  %1938 = vmatpush1.bf16.msra.mxu1 %v3234_v7  ;;  %v3313_v7 = vld [vmem:[%s4351_s7 + $0xa0] ss:$8 sps:$4 sm:$0xff]  }
  0x32   : > { %1939 = vmatprep.subr.bf16.mxu1 %v3235_v9  ;;  %v1662_v44 = vmul.f32 %v3659_v49, %v1633_v39  ;;  %v1664_v45 = vmul.f32 %v3659_v49, %v1635_v40  ;;  %v3256_v9 = vld [vmem:[%s4351_s7 + $0x300] ss:$8 sps:$4 sm:$0xff]  }
  0x34   : > { %1146 = vmatpush1.bf16.msra.mxu0 %v3259_v54  ;;  %v1691_v54 = vadd.f32 %v3664_v51, %v1662_v44  ;;  %v1693_v55 = vadd.f32 %v3664_v51, %v1664_v45  ;;  %v3274_v45 = vld [vmem:[%s4351_s7 + $0x330] ss:$8 sps:$4 sm:$0xff]  }
  0x35   : > { %1147 = vmatprep.subr.bf16.mxu0 %v3267_v61  ;;  %1940 = vmatpush1.bf16.msra.mxu1 %v3237_v10  ;;  %v1718_v10 = vpack.c.bf16 %v1704_v60, %v1702_v59  ;;  %v3312_v59 = vld [vmem:[%s4351_s7 + $0x394] ss:$8 sps:$4 sm:$0xff]  }
  0x36   : > { %1941 = vmatprep.subr.bf16.mxu1 %v3238_v14  ;;  %v1707_v3 = vmax.f32 %v1691_v54, 0.0  ;;  %v3321_v14 = vld [vmem:[%s4351_s7 + $0xb4] ss:$8 sps:$4 sm:$0xff]   ;;  %v3292_v54 = vld [vmem:[%s4351_s7 + $0x360] ss:$8 sps:$4 sm:$0xff]  }
  0x37   : > { %841 = vmatmul.mubr.bf16.gmra.mrb[4].mxu0 %v3198_v50  ;;  %v1634_v50 = vunpack.c.l.bf16 %v1623_v35  ;;  %v3325_v35 = vld [vmem:[%s4351_s7 + $0xc0] ss:$8 sps:$4 sm:$0xff]   ;;  %v1626_v60 = vld [vmem:[%s3617_s23 + $0x30] sm:$0xff] }
  0x38   : > { %2835 = vmatprep.mubr.msk.bf16.mxu0 %vm785_vm0, %v3199_v56  ;;  %1148 = vmatpush1.bf16.msra.mxu0 %v3265_v0  ;;  %v1624_v56 = vld [vmem:[%s3617_s23 + $0x20] sm:$0xff]  ;;  %v1661_v0 = vmul.f32 %v3749_v24, %v1632_v48 }
  0x39   : > { %1149 = vmatprep.subr.bf16.mxu0 %v3273_v4  ;;  %1942 = vmatpush1.bf16.msra.mxu1 %v3240_v18  ;;  %v1637_v61 = vunpack.c.h.bf16 %v1624_v56  ;;  %v1663_v1 = vmul.f32 %v3749_v24, %v1634_v50  ;;  %v1709_v4 = vmax.f32 %v1693_v55, 0.0  ;;  %v3280_v48 = vld [vmem:[%s4351_s7 + $0x340] ss:$8 sps:$4 sm:$0xff]   ;;  %v3288_v50 = vld [vmem:[%s4351_s7 + $0x354] ss:$8 sps:$4 sm:$0xff]  }
  0x3a   : > { %1943 = vmatprep.subr.bf16.mxu1 %v3241_v19  ;;  %v3300_v55 = vld [vmem:[%s4351_s7 + $0x374] ss:$8 sps:$4 sm:$0xff]  }
  0x3b   : > { %v1721_v18 = vpack.c.bf16 %v1709_v4, %v1707_v3 }
  0x3c   : > { %1150 = vmatpush1.bf16.msra.mxu0 %v3271_v6  ;;  %v1666_v6 = vmul.f32 %v3659_v49, %v1637_v61  ;;  %v1627_v61 = vld [vmem:[%s3617_s23 + $0x38] sm:$0xff] }
  0x3d   : > { %1151 = vmatprep.subr.bf16.mxu0 %v3279_v11  ;;  %1944 = vmatpush1.bf16.msra.mxu1 %v3243_v21  ;;  %v3264_v11 = vld [vmem:[%s4351_s7 + $0x314] ss:$8 sps:$4 sm:$0xff]   ;;  %v3319_v21 = vld [vmem:[%s4351_s7 + $0xb0] ss:$8 sps:$4 sm:$0xff]   ;;  %v1642_v3 = vunpack.c.l.bf16 %v1627_v61 }
  0x3e   : > { %1945 = vmatprep.subr.bf16.mxu1 %v3244_v27  ;;  %v1695_v19 = vadd.f32 %v3664_v51, %v1666_v6 }
  0x3f   : > { %851 = vmatmul.mubr.bf16.gmra.mrb[8].mxu0 %v3201_v5  ;;  %v3315_v5 = vld [vmem:[%s4351_s7 + $0xa4] ss:$8 sps:$4 sm:$0xff]  }
  0x40   : > { %2836 = vmatprep.mubr.msk.bf16.mxu0 %vm785_vm0, %v3202_v8  ;;  %1152 = vmatpush1.bf16.msra.mxu0 %v3277_v12  ;;  %v1668_v8 = vmul.f32 %v3659_v49, %v1639_v2  ;;  %v1690_v12 = vadd.f32 %v3762_v29, %v1661_v0  ;;  %v1643_v0 = vunpack.c.h.bf16 %v1627_v61  ;;  %v1640_v2 = vunpack.c.l.bf16 %v1626_v60  ;;  %v3348_v61 = vld [vmem:[%s4351_s7 + $0x3f4] ss:$8 sps:$4 sm:$0xff]  }
  0x41   : > { %1153 = vmatprep.subr.bf16.mxu0 %v3285_v13  ;;  %1946 = vmatpush1.bf16.msra.mxu1 %v3246_v36  ;;  %v1692_v13 = vadd.f32 %v3762_v29, %v1663_v1  ;;  %v3268_v36 = vld [vmem:[%s4351_s7 + $0x320] ss:$8 sps:$4 sm:$0xff]   ;;  %v3318_v1 = vld [vmem:[%s4351_s7 + $0x3a4] ss:$8 sps:$4 sm:$0xff]  }
  0x42   : > { %1947 = vmatprep.subr.bf16.mxu1 %v3247_v41  ;;  %v1669_v6 = vmul.f32 %v3749_v24, %v1640_v2  ;;  %v2010_v2 = vld [vmem:[%s3914_s27 + $0x10] sm:$0xff] }
  0x43   : > { %v1708_v27 = vmax.f32 %v1692_v13, 0.0  ;;  %v3322_v13 = vld [vmem:[%s4351_s7 + $0x3b0] ss:$8 sps:$4 sm:$0xff]  }
  0x44   : > { %1154 = vmatpush1.bf16.msra.mxu0 %v3283_v17  ;;  %v1638_v17 = vunpack.c.l.bf16 %v1625_v57  ;;  %v3306_v57 = vld [vmem:[%s4351_s7 + $0x384] ss:$8 sps:$4 sm:$0xff]  }
  0x45   : > { %1155 = vmatprep.subr.bf16.mxu0 %v3291_v20  ;;  %1948 = vmatpush1.bf16.msra.mxu1 %v3249_v46  ;;  %v1697_v20 = vadd.f32 %v3664_v51, %v1668_v8  ;;  %v3282_v46 = vld [vmem:[%s4351_s7 + $0x344] ss:$8 sps:$4 sm:$0xff]   ;;  %v3316_v8 = vld [vmem:[%s4351_s7 + $0x3a0] ss:$8 sps:$4 sm:$0xff]  }
  0x46   : > { %1949 = vmatprep.subr.bf16.mxu1 %v3250_v52  ;;  %v1667_v31 = vmul.f32 %v3749_v24, %v1638_v17  ;;  %v3286_v52 = vld [vmem:[%s4351_s7 + $0x350] ss:$8 sps:$4 sm:$0xff]  }
  0x47   : > { %861 = vmatmul.mubr.bf16.gmra.mrb[12].mxu0 %v3204_v15  ;;  %v1636_v15 = vunpack.c.l.bf16 %v1624_v56  ;;  %v1713_v34 = vmax.f32 %v1697_v20, 0.0  ;;  %v3298_v56 = vld [vmem:[%s4351_s7 + $0x370] ss:$8 sps:$4 sm:$0xff]   ;;  %v2009_v20 = vld [vmem:[%s3914_s27 + $0x8] sm:$0xff] }
  0x48   : > { %1156 = vmatpush1.bf16.msra.mxu0 %v3289_v25  ;;  %v3270_v25 = vld [vmem:[%s4351_s7 + $0x324] ss:$8 sps:$4 sm:$0xff]   ;;  %v1696_v41 = vadd.f32 %v3762_v29, %v1667_v31  ;;  %v2019_v31 = vunpack.c.h.bf16 %v2009_v20 }
  0x49   : > { %1157 = vmatprep.subr.bf16.mxu0 %v3297_v26  ;;  %1950 = vmatpush1.bf16.msra.mxu1 %v3252_v58  ;;  %v1706_v26 = vmax.f32 %v1690_v12, 0.0  ;;  %v1665_v30 = vmul.f32 %v3749_v24, %v1636_v15  ;;  %v3304_v58 = vld [vmem:[%s4351_s7 + $0x380] ss:$8 sps:$4 sm:$0xff]   ;;  %v3331_v12 = vld [vmem:[%s4351_s7 + $0xd0] ss:$8 sps:$4 sm:$0xff]  }
  0x4a   : > { %2307 = vmatprep.subr.bf16.mxu1 %v3258_v62  ;;  %v1712_v44 = vmax.f32 %v1696_v41, 0.0  ;;  %v3310_v62 = vld [vmem:[%s4351_s7 + $0x390] ss:$8 sps:$4 sm:$0xff]  }
  0x4b   : > { %v1720_v39 = vpack.c.bf16 %v1708_v27, %v1706_v26  ;;  %v1694_v40 = vadd.f32 %v3762_v29, %v1665_v30  ;;  %v3337_v26 = vld [vmem:[%s4351_s7 + $0xe0] ss:$8 sps:$4 sm:$0xff]  }
  0x4c   : > { %1158 = vmatpush1.bf16.msra.mxu0 %v3295_v32  ;;  %1952 = vmatmul.mubr.bf16.vlgmr.msra.gmra.mrb[0].mxu1 %v1718_v10  ;;  %v1711_v32 = vmax.f32 %v1695_v19, 0.0  ;;  %v2008_v19 = vld [vmem:[%s3914_s27] sm:$0xff] }
  0x4d   : > { %1159 = vmatprep.subr.bf16.mxu0 %v3303_v37  ;;  %2308 = vmatpush1.bf16.msra.mxu1 %v3256_v9  ;;  %v3276_v37 = vld [vmem:[%s4351_s7 + $0x334] ss:$8 sps:$4 sm:$0xff]   ;;  %v1710_v43 = vmax.f32 %v1694_v40, 0.0  ;;  %v2016_v30 = vunpack.c.l.bf16 %v2008_v19 }
  0x4e   : > { %1961 = vmatprep.mubr.bf16.mxu1 %v1721_v18  ;;  %2309 = vmatprep.subr.bf16.mxu1 %v3264_v11  ;;  %v1723_v42 = vpack.c.bf16 %v1713_v34, %v1711_v32  ;;  %v1698_v11 = vadd.f32 %v3762_v29, %v1669_v6  ;;  %v2018_v34 = vunpack.c.l.bf16 %v2009_v20  ;;  %v3345_v40 = vld [vmem:[%s4351_s7 + $0xf4] ss:$8 sps:$4 sm:$0xff]   ;;  %v2020_v6 = vunpack.c.l.bf16 %v2010_v2 }
  0x50   : > { %1160 = vmatpush1.bf16.msra.mxu0 %v3301_v47  ;;  %v1722_v47 = vpack.c.bf16 %v1712_v44, %v1710_v43  ;;  %v1714_v17 = vmax.f32 %v1698_v11, 0.0  ;;  %v3343_v44 = vld [vmem:[%s4351_s7 + $0xf0] ss:$8 sps:$4 sm:$0xff]  }
  0x51   : > { %1161 = vmatprep.subr.bf16.mxu0 %v3309_v53  ;;  %2310 = vmatpush1.bf16.msra.mxu1 %v3262_v22  ;;  %v3294_v53 = vld [vmem:[%s4351_s7 + $0x364] ss:$8 sps:$4 sm:$0xff]  }
  0x52   : > { %2311 = vmatprep.subr.bf16.mxu1 %v3270_v25  ;;  %v2017_v25 = vunpack.c.h.bf16 %v2008_v19  ;;  %v2013_v19 = vld [vmem:[%s3914_s27 + $0x28] sm:$0xff] }
  0x54   : > { %1162 = vmatpush1.bf16.msra.mxu0 %v3307_v63  ;;  %1962 = vmatmul.mubr.bf16.gmra.mrb[4].mxu1 %v1720_v39  ;;  %v1641_v63 = vunpack.c.h.bf16 %v1626_v60  ;;  %v3336_v39 = vld [vmem:[%s4351_s7 + $0x3d4] ss:$8 sps:$4 sm:$0xff]   ;;  %v3340_v60 = vld [vmem:[%s4351_s7 + $0x3e0] ss:$8 sps:$4 sm:$0xff]  }
  0x55   : > { %1163 = vmatprep.subr.bf16.mxu0 %v3315_v5  ;;  %2312 = vmatpush1.bf16.msra.mxu1 %v3268_v36  ;;  %v1672_v5 = vmul.f32 %v3659_v49, %v1643_v0  ;;  %v3002_v36 = vld [vmem:[%s4350_s6 + $0x3] ss:$4 sm:$0x3]  ;;  %v3346_v0 = vld [vmem:[%s4351_s7 + $0x3f0] ss:$8 sps:$4 sm:$0xff]  }
  0x56   : > { %1971 = vmatprep.mubr.bf16.mxu1 %v1723_v42  ;;  %2313 = vmatprep.subr.bf16.mxu1 %v3276_v37  ;;  %v1670_v4 = vmul.f32 %v3659_v49, %v1641_v63  ;;  %v3324_v49 = vld [vmem:[%s4351_s7 + $0x3b4] ss:$8 sps:$4 sm:$0xff]   ;;  %v3328_v37 = vld [vmem:[%s4351_s7 + $0x3c0] ss:$8 sps:$4 sm:$0xff]   ;;  %v3965_v43 = vrot.slane %v3002_v36, %v3624_v38 }
  0x57   : > { %v1701_v10 = vadd.f32 %v3664_v51, %v1672_v5 }
  0x58   : > { %1164 = vmatpush1.bf16.msra.mxu0 %v3313_v7  ;;  %v1671_v7 = vmul.f32 %v3749_v24, %v1642_v3  ;;  %v1699_v9 = vadd.f32 %v3664_v51, %v1670_v4  ;;  %v3333_v24 = vld [vmem:[%s4351_s7 + $0xd4] ss:$8 sps:$4 sm:$0xff]   ;;  %v2021_v4 = vunpack.c.h.bf16 %v2010_v2 }
  0x59   : > { %1165 = vmatprep.subr.bf16.mxu0 %v3321_v14  ;;  %2314 = vmatpush1.bf16.msra.mxu1 %v3274_v45  ;;  %v1717_v15 = vmax.f32 %v1701_v10, 0.0  ;;  %v2011_v3 = vld [vmem:[%s3914_s27 + $0x18] sm:$0xff] }
  0x5a   : > { %2315 = vmatprep.subr.bf16.mxu1 %v3282_v46  ;;  %v1700_v51 = vadd.f32 %v3762_v29, %v1671_v7  ;;  %v1715_v14 = vmax.f32 %v1699_v9, 0.0  ;;  %v3001_v29 = vld [vmem:[%s4349_s5 + $0x3] ss:$4 sm:$0x3]  ;;  %v2023_v5 = vunpack.c.h.bf16 %v2011_v3  ;;  %v2022_v7 = vunpack.c.l.bf16 %v2011_v3 }
  0x5b   : > { %v3945_v32 = vrot.slane %v3001_v29, %v3728_v16 }
  0x5c   : > { %1166 = vmatpush1.bf16.msra.mxu0 %v3319_v21  ;;  %1972 = vmatmul.mubr.bf16.gmra.mrb[8].mxu1 %v1722_v47  ;;  %v1716_v18 = vmax.f32 %v1700_v51, 0.0  ;;  %v3330_v21 = vld [vmem:[%s4351_s7 + $0x3c4] ss:$8 sps:$4 sm:$0xff]   ;;  %v1725_v22 = vpack.c.bf16 %v1717_v15, %v1715_v14  ;;  %v3973_v47 = vrot.slane %v3002_v36, %v3728_v16 }
  0x5d   : > { %1167 = vmatprep.subr.bf16.mxu0 %v3327_v23  ;;  %2316 = vmatpush1.bf16.msra.mxu1 %v3280_v48  ;;  %v3339_v23 = vld [vmem:[%s4351_s7 + $0xe4] ss:$8 sps:$4 sm:$0xff]   ;;  %v2045_v45 = vmul.f32 %v3945_v32, %v2016_v30  ;;  %v2047_v46 = vmul.f32 %v3945_v32, %v2018_v34  ;;  %v2049_v10 = vmul.f32 %v3945_v32, %v2020_v6 }
  0x5e   : > { %2317 = vmatprep.subr.bf16.mxu1 %v3288_v50  ;;  %v1724_v27 = vpack.c.bf16 %v1716_v18, %v1714_v17  ;;  %1981 = vmatprep.mubr.bf16.mxu1 %v1725_v22  ;;  %v2012_v18 = vld [vmem:[%s3914_s27 + $0x20] sm:$0xff] }
  0x5f   : > { %v2078_v51 = vadd.f32 %v3973_v47, %v2049_v10 }
  0x60   : > { %1168 = vmatpush1.bf16.msra.mxu0 %v3325_v35  ;;  %v3948_v35 = vrot.slane %v3001_v29, %v3624_v38  ;;  %v2025_v29 = vunpack.c.h.bf16 %v2012_v18 }
  0x61   : > { %2318 = vmatpush1.bf16.msra.mxu1 %v3286_v52  ;;  %1169 = vmatprep.subr.bf16.mxu0 %v3333_v24  ;;  %v3334_v52 = vld [vmem:[%s4351_s7 + $0x3d0] ss:$8 sps:$4 sm:$0xff]   ;;  %v2094_v15 = vmax.f32 %v2078_v51, 0.0 }
  0x62   : > { %2319 = vmatprep.subr.bf16.mxu1 %v3294_v53  ;;  %v2046_v41 = vmul.f32 %v3948_v35, %v2017_v25  ;;  %v2048_v42 = vmul.f32 %v3948_v35, %v2019_v31  ;;  %v3342_v53 = vld [vmem:[%s4351_s7 + $0x3e4] ss:$8 sps:$4 sm:$0xff]   ;;  %v2052_v9 = vmul.f32 %v3948_v35, %v2023_v5  ;;  %v2026_v25 = vunpack.c.l.bf16 %v2013_v19 }
  0x64   : > { %1170 = vmatpush1.bf16.msra.mxu0 %v3331_v12  ;;  %1982 = vmatmul.mubr.bf16.gmra.mrb[12].mxu1 %v1724_v27  ;;  %v2075_v48 = vadd.f32 %v3965_v43, %v2046_v41  ;;  %v2077_v50 = vadd.f32 %v3965_v43, %v2048_v42  ;;  %v2081_v11 = vadd.f32 %v3965_v43, %v2052_v9 }
  0x65   : > { %2320 = vmatpush1.bf16.msra.mxu1 %v3292_v54  ;;  %1171 = vmatprep.subr.bf16.mxu0 %v3339_v23  ;;  %v2024_v23 = vunpack.c.l.bf16 %v2012_v18  ;;  %v2055_v31 = vmul.f32 %v3945_v32, %v2026_v25 }
  0x66   : > { %2321 = vmatprep.subr.bf16.mxu1 %v3300_v55  ;;  %v2091_v54 = vmax.f32 %v2075_v48, 0.0  ;;  %v2093_v55 = vmax.f32 %v2077_v50, 0.0  ;;  %v2097_v14 = vmax.f32 %v2081_v11, 0.0 }
  0x67   : > { %v2053_v30 = vmul.f32 %v3945_v32, %v2024_v23 }
  0x68   : > { %1172 = vmatpush1.bf16.msra.mxu0 %v3337_v26  ;;  %v2054_v26 = vmul.f32 %v3948_v35, %v2025_v29 }
  0x69   : > { %2322 = vmatpush1.bf16.msra.mxu1 %v3298_v56  ;;  %1173 = vmatprep.subr.bf16.mxu0 %v3345_v40  ;;  %v3351_v56 = vld [vmem:[%s4351_s7 + $0x104] ss:$8 sps:$4 sm:$0xff]  }
  0x6a   : > { %2323 = vmatprep.subr.bf16.mxu1 %v3306_v57  ;;  %v2107_v57 = vpack.c.bf16 %v2093_v55, %v2091_v54  ;;  %v2083_v34 = vadd.f32 %v3965_v43, %v2054_v26 }
  0x6c   : > { %1174 = vmatpush1.bf16.msra.mxu0 %v3343_v44  ;;  %2339 = vmatprep.mubr.bf16.mxu1 %v2107_v57  ;;  %v2099_v40 = vmax.f32 %v2083_v34, 0.0  ;;  %v3354_v34 = vld [vmem:[%s4351_s7 + $0x114] ss:$8 sps:$4 sm:$0xff]  }
  0x6d   : > { %2324 = vmatpush1.bf16.msra.mxu1 %v3304_v58  ;;  %1531 = vmatprep.subr.bf16.mxu0 %v3351_v56  ;;  %v2074_v58 = vadd.f32 %v3973_v47, %v2045_v45  ;;  %v2014_v45 = vld [vmem:[%s3914_s27 + $0x30] sm:$0xff] }
  0x6e   : > { %2325 = vmatprep.subr.bf16.mxu1 %v3312_v59  ;;  %v2076_v59 = vadd.f32 %v3973_v47, %v2047_v46  ;;  %v2015_v46 = vld [vmem:[%s3914_s27 + $0x38] sm:$0xff]  ;;  %v2029_v50 = vunpack.c.h.bf16 %v2014_v45  ;;  %v2028_v54 = vunpack.c.l.bf16 %v2014_v45 }
  0x6f   : > { %v2030_v55 = vunpack.c.l.bf16 %v2015_v46 }
  0x70   : > { %v2092_v63 = vmax.f32 %v2076_v59, 0.0  ;;  %v2058_v56 = vmul.f32 %v3948_v35, %v2029_v50  ;;  %v4077_v50 = vld [vmem:[%s4062_s14] sm:$0xff] }
  0x71   : > { %2326 = vmatpush1.bf16.msra.mxu1 %v3310_v62  ;;  %v2090_v62 = vmax.f32 %v2074_v58, 0.0  ;;  %v2057_v58 = vmul.f32 %v3945_v32, %v2028_v54  ;;  %v2059_v59 = vmul.f32 %v3945_v32, %v2030_v55  ;;  %v4088_v55 = vld [vmem:[%s4062_s14 + $0x8] sm:$0xff] }
  0x72   : > { %2327 = vmatprep.subr.bf16.mxu1 %v3318_v1 }
  0x73   : > { %v2106_v1 = vpack.c.bf16 %v2092_v63, %v2090_v62  ;;  %v2086_v62 = vadd.f32 %v3973_v47, %v2057_v58  ;;  %v2088_v63 = vadd.f32 %v3973_v47, %v2059_v59 }
  0x75   : > { %2328 = vmatpush1.bf16.msra.mxu1 %v3316_v8  ;;  %v2050_v8 = vmul.f32 %v3948_v35, %v2021_v4  ;;  %v2102_v2 = vmax.f32 %v2086_v62, 0.0  ;;  %v2104_v3 = vmax.f32 %v2088_v63, 0.0  ;;  %v3355_v63 = vld [vmem:[%s4351_s7 + $0x120] ss:$8 sps:$4 sm:$0xff]  }
  0x76   : > { %2329 = vmatprep.subr.bf16.mxu1 %v3324_v49  ;;  %v2051_v49 = vmul.f32 %v3945_v32, %v2022_v7  ;;  %v871_v32 = vld [vmem:[%s4349_s5] ss:$4 sm:$0x3] }
  0x77   : > { %v2079_v24 = vadd.f32 %v3965_v43, %v2050_v8  ;;  %v2112_v5 = vpack.c.bf16 %v2104_v3, %v2102_v2  ;;  %v1243_v3 = vunpack.c.h.bf16 %v4088_v55 }
  0x78   : > { %v2080_v12 = vadd.f32 %v3973_v47, %v2051_v49 }
  0x79   : > { %2330 = vmatpush1.bf16.msra.mxu1 %v3322_v13  ;;  %v2095_v13 = vmax.f32 %v2079_v24, 0.0 }
  0x7a   : > { %2331 = vmatprep.subr.bf16.mxu1 %v3330_v21  ;;  %v2096_v17 = vmax.f32 %v2080_v12, 0.0  ;;  %v2027_v21 = vunpack.c.h.bf16 %v2013_v19 }
  0x7b   : > { %v2109_v20 = vpack.c.bf16 %v2097_v14, %v2095_v13 }
  0x7c   : > { %v2108_v22 = vpack.c.bf16 %v2096_v17, %v2094_v15  ;;  %v2056_v27 = vmul.f32 %v3948_v35, %v2027_v21 }
  0x7d   : > { %2332 = vmatpush1.bf16.msra.mxu1 %v3328_v37  ;;  %v2082_v37 = vadd.f32 %v3973_v47, %v2053_v30 }
  0x7e   : > { %2333 = vmatprep.subr.bf16.mxu1 %v3336_v39  ;;  %v2085_v36 = vadd.f32 %v3965_v43, %v2056_v27  ;;  %v2084_v39 = vadd.f32 %v3973_v47, %v2055_v31  ;;  %v4037_v47 = vrot.slane %v871_v32, %v3624_v38  ;;  %v3349_v27 = vld [vmem:[%s4351_s7 + $0x100] ss:$8 sps:$4 sm:$0xff]  }
  0x7f   : > { %v2098_v42 = vmax.f32 %v2082_v37, 0.0 }
  0x80   : > { %v2101_v41 = vmax.f32 %v2085_v36, 0.0  ;;  %v2100_v44 = vmax.f32 %v2084_v39, 0.0 }
  0x81   : > { %2334 = vmatpush1.bf16.msra.mxu1 %v3334_v52  ;;  %v2031_v52 = vunpack.c.h.bf16 %v2015_v46 }
  0x82   : > { %2335 = vmatprep.subr.bf16.mxu1 %v3342_v53  ;;  %v2111_v48 = vpack.c.bf16 %v2101_v41, %v2099_v40  ;;  %v2110_v53 = vpack.c.bf16 %v2100_v44, %v2098_v42  ;;  %v3352_v42 = vld [vmem:[%s4351_s7 + $0x110] ss:$8 sps:$4 sm:$0xff]  }
  0x83   : > { %v2060_v57 = vmul.f32 %v3948_v35, %v2031_v52  ;;  %v899_v35 = vld [vmem:[%s4350_s6] ss:$4 sm:$0x3]  ;;  %v4082_v52 = vld [vmem:[%s4349_s5 + $0x1] ss:$4 sm:$0x3] }
  0x84   : > { %v4040_v6 = vrot.slane %v899_v35, %v3728_v16  ;;  %v4043_v8 = vrot.slane %v899_v35, %v3624_v38  ;;  %v4094_v62 = vrot.slane %v4082_v52, %v3624_v38 }
  0x85   : > { %2336 = vmatpush1.bf16.msra.mxu1 %v3340_v60  ;;  %v2087_v60 = vadd.f32 %v3965_v43, %v2058_v56 }
  0x86   : > { %2337 = vmatprep.subr.bf16.mxu1 %v3348_v61  ;;  %v2089_v61 = vadd.f32 %v3965_v43, %v2060_v57  ;;  %v4034_v43 = vrot.slane %v871_v32, %v3728_v16 }
  0x89   : > { %2338 = vmatpush1.bf16.msra.mxu1 %v3346_v0  ;;  %v2103_v0 = vmax.f32 %v2087_v60, 0.0 }
  0x8c   : > { %2340 = vmatmul.mubr.bf16.vlgmr.msra.gmra.mrb[0].mxu1 %v2106_v1  ;;  %v2105_v1 = vmax.f32 %v2089_v61, 0.0  ;;  %v1241_v61 = vunpack.c.h.bf16 %v4077_v50 }
  0x8d   : > { %2349 = vmatprep.mubr.bf16.mxu1 %v2109_v20 }
  0x8e   : > { %v2113_v4 = vpack.c.bf16 %v2105_v1, %v2103_v0 }
  0x94   : > { %2350 = vmatmul.mubr.bf16.gmra.mrb[4].mxu1 %v2108_v22 }
  0x95   : > { %2359 = vmatprep.mubr.bf16.mxu1 %v2111_v48 }
  0x9c   : > { %2360 = vmatmul.mubr.bf16.gmra.mrb[8].mxu1 %v2110_v53  ;;  %v3357_v53 = vld [vmem:[%s4351_s7 + $0x124] ss:$8 sps:$4 sm:$0xff]  }
  0x9d   : > { %2369 = vmatprep.mubr.bf16.mxu1 %v2113_v4  ;;  %v3360_v4 = vld [vmem:[%s4351_s7 + $0x134] ss:$8 sps:$4 sm:$0xff]  }
  0xa4   : > { %2370 = vmatmul.mubr.bf16.gmra.mrb[12].mxu1 %v2112_v5 }
 0x102   : > { %v832_v7 = vpop.f32.mrb[0].mxu0 }
 0x103   : > { %v883_v9 = vmul.f32 %v4034_v43, %v832_v7  ;;  %v834_v10 = vpop.f32.mrb[1].mxu0  ;;  %v4109_v7 = vld [vmem:[%s4350_s6 + $0x1] ss:$4 sm:$0x3] }
 0x104   : > { %v884_v49 = vmul.f32 %v4037_v47, %v834_v10  ;;  %v836_v24 = vpop.f32.mrb[2].mxu0 }
 0x105   : > { %v911_v11 = vadd.f32 %v4040_v6, %v883_v9  ;;  %v885_v51 = vmul.f32 %v4034_v43, %v836_v24  ;;  %v838_v12 = vpop.f32.mrb[3].mxu0 }
 0x106   : > { %v912_v13 = vadd.f32 %v4043_v8, %v884_v49  ;;  %v886_v14 = vmul.f32 %v4037_v47, %v838_v12 }
 0x107   : > { %v913_v15 = vadd.f32 %v4040_v6, %v885_v51  ;;  %v927_v18 = vmax.f32 %v911_v11, 0.0  ;;  %v1270_v11 = vmul.f32 %v4094_v62, %v1241_v61  ;;  %v3358_v51 = vld [vmem:[%s4351_s7 + $0x130] ss:$8 sps:$4 sm:$0xff]   ;;  %v3375_v61 = vld [vmem:[%s4351_s7 + $0x184] ss:$8 sps:$4 sm:$0xff]  }
 0x108   : > { %v914_v17 = vadd.f32 %v4043_v8, %v886_v14  ;;  %v928_v20 = vmax.f32 %v912_v13, 0.0  ;;  %v1272_v14 = vmul.f32 %v4094_v62, %v1243_v3  ;;  %v3379_v3 = vld [vmem:[%s4351_s7 + $0x1a0] ss:$8 sps:$4 sm:$0xff]  }
 0x109   : > { %v929_v19 = vmax.f32 %v913_v15, 0.0  ;;  %v4122_v15 = vrot.slane %v4109_v7, %v3624_v38 }
 0x10a   : > { %v930_v29 = vmax.f32 %v914_v17, 0.0  ;;  %v842_v21 = vpop.f32.mrb[4].mxu0  ;;  %v3363_v17 = vld [vmem:[%s4351_s7 + $0x144] ss:$8 sps:$4 sm:$0xff]  }
 0x10b   : > { %v943_v22 = vpack.c.bf16 %v929_v19, %v927_v18  ;;  %v887_v23 = vmul.f32 %v4034_v43, %v842_v21  ;;  %v844_v25 = vpop.f32.mrb[5].mxu0 }
 0x10c   : > { %v944_v26 = vpack.c.bf16 %v930_v29, %v928_v20  ;;  %v888_v30 = vmul.f32 %v4037_v47, %v844_v25  ;;  %v846_v31 = vpop.f32.mrb[6].mxu0 }
 0x10d   : > { %v915_v36 = vadd.f32 %v4040_v6, %v887_v23  ;;  %v889_v37 = vmul.f32 %v4034_v43, %v846_v31  ;;  %v848_v39 = vpop.f32.mrb[7].mxu0  ;;  %v3361_v23 = vld [vmem:[%s4351_s7 + $0x140] ss:$8 sps:$4 sm:$0xff]   ;;  %v1301_v31 = vadd.f32 %v4122_v15, %v1272_v14 }
 0x10e   : > { %1175 = vmatprep.mubr.bf16.mxu0 %v944_v26  ;;  %v916_v40 = vadd.f32 %v4043_v8, %v888_v30  ;;  %v890_v41 = vmul.f32 %v4037_v47, %v848_v39  ;;  %v1299_v30 = vadd.f32 %v4122_v15, %v1270_v11 }
 0x10f   : > { %1176 = vmatmul.mubr.bf16.vlgmr.msra.gmra.mrb[16].mxu0 %v943_v22  ;;  %v931_v44 = vmax.f32 %v915_v36, 0.0  ;;  %v917_v45 = vadd.f32 %v4040_v6, %v889_v37 }
 0x110   : > { %1532 = vmatpush1.bf16.msra.mxu0 %v3349_v27  ;;  %v932_v46 = vmax.f32 %v916_v40, 0.0  ;;  %v918_v48 = vadd.f32 %v4043_v8, %v890_v41 }
 0x111   : > { %1533 = vmatprep.subr.bf16.mxu0 %v3354_v34  ;;  %v933_v54 = vmax.f32 %v917_v45, 0.0  ;;  %v3366_v34 = vld [vmem:[%s4351_s7 + $0x154] ss:$8 sps:$4 sm:$0xff]   ;;  %v3364_v45 = vld [vmem:[%s4351_s7 + $0x150] ss:$8 sps:$4 sm:$0xff]  }
 0x112   : > { %v934_v56 = vmax.f32 %v918_v48, 0.0  ;;  %v852_v57 = vpop.f32.mrb[8].mxu0 }
 0x113   : > { %v891_v58 = vmul.f32 %v4034_v43, %v852_v57  ;;  %v854_v59 = vpop.f32.mrb[9].mxu0  ;;  %v945_v60 = vpack.c.bf16 %v933_v54, %v931_v44 }
 0x114   : > { %1534 = vmatpush1.bf16.msra.mxu0 %v3352_v42  ;;  %v892_v0 = vmul.f32 %v4037_v47, %v854_v59  ;;  %v856_v1 = vpop.f32.mrb[10].mxu0  ;;  %v946_v2 = vpack.c.bf16 %v934_v56, %v932_v46 }
 0x115   : > { %1535 = vmatprep.subr.bf16.mxu0 %v3357_v53  ;;  %v919_v5 = vadd.f32 %v4040_v6, %v891_v58  ;;  %v893_v32 = vmul.f32 %v4034_v43, %v856_v1  ;;  %v858_v35 = vpop.f32.mrb[11].mxu0  ;;  %v1315_v53 = vmax.f32 %v1299_v30, 0.0  ;;  %v3376_v1 = vld [vmem:[%s4351_s7 + $0x190] ss:$8 sps:$4 sm:$0xff]  }
 0x116   : > { %v920_v9 = vadd.f32 %v4043_v8, %v892_v0  ;;  %v894_v10 = vmul.f32 %v4037_v47, %v858_v35  ;;  %1185 = vmatprep.mubr.bf16.mxu0 %v946_v2  ;;  %v3378_v0 = vld [vmem:[%s4351_s7 + $0x194] ss:$8 sps:$4 sm:$0xff]   ;;  %v3381_v2 = vld [vmem:[%s4351_s7 + $0x1a4] ss:$8 sps:$4 sm:$0xff]  }
 0x117   : > { %v935_v49 = vmax.f32 %v919_v5, 0.0  ;;  %v921_v24 = vadd.f32 %v4040_v6, %v893_v32  ;;  %1186 = vmatmul.mubr.bf16.gmra.mrb[20].mxu0 %v945_v60  ;;  %v3370_v60 = vld [vmem:[%s4351_s7 + $0x170] ss:$8 sps:$4 sm:$0xff]  }
 0x118   : > { %1536 = vmatpush1.bf16.msra.mxu0 %v3355_v63  ;;  %v936_v12 = vmax.f32 %v920_v9, 0.0  ;;  %v922_v13 = vadd.f32 %v4043_v8, %v894_v10  ;;  %v3373_v63 = vld [vmem:[%s4351_s7 + $0x180] ss:$8 sps:$4 sm:$0xff]   ;;  %v3382_v5 = vld [vmem:[%s4351_s7 + $0x1b0] ss:$8 sps:$4 sm:$0xff]   ;;  %v1240_v10 = vunpack.c.l.bf16 %v4077_v50 }
 0x119   : > { %1537 = vmatprep.subr.bf16.mxu0 %v3360_v4  ;;  %v937_v18 = vmax.f32 %v921_v24, 0.0  ;;  %v3384_v4 = vld [vmem:[%s4351_s7 + $0x1b4] ss:$8 sps:$4 sm:$0xff]   ;;  %v3387_v9 = vld [vmem:[%s4351_s7 + $0x1c4] ss:$8 sps:$4 sm:$0xff]   ;;  %v1242_v24 = vunpack.c.l.bf16 %v4088_v55  ;;  %v4203_v55 = vrot.slane %v4109_v7, %v3728_v16 }
 0x11a   : > { %v938_v19 = vmax.f32 %v922_v13, 0.0  ;;  %v862_v20 = vpop.f32.mrb[12].mxu0  ;;  %v1234_v32 = vld [vmem:[%s4062_s14 + $0x10] sm:$0xff]  ;;  %v1235_v35 = vld [vmem:[%s4062_s14 + $0x18] sm:$0xff] }
 0x11b   : > { %v895_v29 = vmul.f32 %v4034_v43, %v862_v20  ;;  %v864_v21 = vpop.f32.mrb[13].mxu0  ;;  %v947_v22 = vpack.c.bf16 %v937_v18, %v935_v49  ;;  %v4190_v49 = vrot.slane %v4082_v52, %v3728_v16  ;;  %v1245_v11 = vunpack.c.h.bf16 %v1234_v32  ;;  %v3390_v50 = vld [vmem:[%s4351_s7 + $0x1d4] ss:$8 sps:$4 sm:$0xff]   ;;  %v3388_v18 = vld [vmem:[%s4351_s7 + $0x1d0] ss:$8 sps:$4 sm:$0xff]   ;;  %v1236_v20 = vld [vmem:[%s4062_s14 + $0x20] sm:$0xff] }
 0x11c   : > { %1538 = vmatpush1.bf16.msra.mxu0 %v3358_v51  ;;  %v896_v25 = vmul.f32 %v4037_v47, %v864_v21  ;;  %v866_v26 = vpop.f32.mrb[14].mxu0  ;;  %v948_v27 = vpack.c.bf16 %v938_v19, %v936_v12  ;;  %v1247_v51 = vunpack.c.h.bf16 %v1235_v35  ;;  %v3385_v12 = vld [vmem:[%s4351_s7 + $0x1c0] ss:$8 sps:$4 sm:$0xff]   ;;  %v3393_v19 = vld [vmem:[%s4351_s7 + $0x1e4] ss:$8 sps:$4 sm:$0xff]   ;;  %v1244_v21 = vunpack.c.l.bf16 %v1234_v32 }
 0x11d   : > { %1539 = vmatprep.subr.bf16.mxu0 %v3363_v17  ;;  %v923_v36 = vadd.f32 %v4040_v6, %v895_v29  ;;  %v897_v37 = vmul.f32 %v4034_v43, %v866_v26  ;;  %v868_v39 = vpop.f32.mrb[15].mxu0  ;;  %v1317_v43 = vmax.f32 %v1301_v31, 0.0  ;;  %v1269_v13 = vmul.f32 %v4190_v49, %v1240_v10  ;;  %v1237_v29 = vld [vmem:[%s4062_s14 + $0x28] sm:$0xff] }
 0x11e   : > { %v924_v40 = vadd.f32 %v4043_v8, %v896_v25  ;;  %v898_v41 = vmul.f32 %v4037_v47, %v868_v39  ;;  %1195 = vmatprep.mubr.bf16.mxu0 %v948_v27  ;;  %v3369_v47 = vld [vmem:[%s4351_s7 + $0x164] ss:$8 sps:$4 sm:$0xff]   ;;  %v1271_v52 = vmul.f32 %v4190_v49, %v1242_v24  ;;  %v1274_v14 = vmul.f32 %v4094_v62, %v1245_v11  ;;  %v3391_v27 = vld [vmem:[%s4351_s7 + $0x1e0] ss:$8 sps:$4 sm:$0xff]  }
 0x11f   : > { %v939_v42 = vmax.f32 %v923_v36, 0.0  ;;  %v925_v44 = vadd.f32 %v4040_v6, %v897_v37  ;;  %1196 = vmatmul.mubr.bf16.gmra.mrb[24].mxu0 %v947_v22  ;;  %v3367_v6 = vld [vmem:[%s4351_s7 + $0x160] ss:$8 sps:$4 sm:$0xff]   ;;  %v1331_v59 = vpack.c.bf16 %v1317_v43, %v1315_v53  ;;  %v1276_v17 = vmul.f32 %v4094_v62, %v1247_v51  ;;  %v1239_v53 = vld [vmem:[%s4062_s14 + $0x38] sm:$0xff] }
 0x120   : > { %1540 = vmatpush1.bf16.msra.mxu0 %v3361_v23  ;;  %v940_v46 = vmax.f32 %v924_v40, 0.0  ;;  %v926_v48 = vadd.f32 %v4043_v8, %v898_v41  ;;  %v3372_v8 = vld [vmem:[%s4351_s7 + $0x174] ss:$8 sps:$4 sm:$0xff]   ;;  %v1246_v22 = vunpack.c.l.bf16 %v1235_v35  ;;  %v1298_v7 = vadd.f32 %v4203_v55, %v1269_v13 }
 0x121   : > { %1541 = vmatprep.subr.bf16.mxu0 %v3366_v34  ;;  %v941_v54 = vmax.f32 %v925_v44, 0.0  ;;  %v1300_v23 = vadd.f32 %v4203_v55, %v1271_v52  ;;  %v1303_v25 = vadd.f32 %v4122_v15, %v1274_v14  ;;  %v1305_v26 = vadd.f32 %v4122_v15, %v1276_v17  ;;  %v3396_v34 = vld [vmem:[%s4351_s7 + $0x1f4] ss:$8 sps:$4 sm:$0xff]   ;;  %v3394_v44 = vld [vmem:[%s4351_s7 + $0x1f0] ss:$8 sps:$4 sm:$0xff]  }
 0x122   : > { %v942_v56 = vmax.f32 %v926_v48, 0.0  ;;  %v1249_v30 = vunpack.c.h.bf16 %v1236_v20  ;;  %v1251_v31 = vunpack.c.h.bf16 %v1237_v29  ;;  %v1273_v36 = vmul.f32 %v4190_v49, %v1244_v21  ;;  %v1238_v48 = vld [vmem:[%s4062_s14 + $0x30] sm:$0xff]  ;;  %s4267_s14 = sshll.u32 %s4361_s17, 1 }
 0x123   : > { %v949_v57 = vpack.c.bf16 %v941_v54, %v939_v42  ;;  %v1275_v37 = vmul.f32 %v4190_v49, %v1246_v22  ;;  %v1314_v39 = vmax.f32 %v1298_v7, 0.0  ;;  %v1316_v40 = vmax.f32 %v1300_v23, 0.0  ;;  %s578_s30 = scalar_lea.vmem %s4352_s8, %s4267_s14  ;;  %s597_s23 = scalar_lea.vmem %s4354_s10, %s4267_s14 }
 0x124   : > { %1542 = vmatpush1.bf16.msra.mxu0 %v3364_v45  ;;  %v950_v58 = vpack.c.bf16 %v942_v56, %v940_v46  ;;  %v1319_v41 = vmax.f32 %v1303_v25, 0.0  ;;  %v1321_v42 = vmax.f32 %v1305_v26, 0.0  ;;  %v1278_v45 = vmul.f32 %v4094_v62, %v1249_v30  ;;  %s605_s24 = scalar_lea.vmem %s4355_s11, %s4267_s14 }
 0x125   : > { %1543 = vmatprep.subr.bf16.mxu0 %v3369_v47  ;;  %v1280_v46 = vmul.f32 %v4094_v62, %v1251_v31  ;;  %v1302_v43 = vadd.f32 %v4203_v55, %v1273_v36  ;;  %v1304_v47 = vadd.f32 %v4203_v55, %v1275_v37  ;;  %v1330_v54 = vpack.c.bf16 %v1316_v40, %v1314_v39 }
 0x126   : > { %1205 = vmatprep.mubr.bf16.mxu0 %v950_v58  ;;  %v1333_v56 = vpack.c.bf16 %v1321_v42, %v1319_v41  ;;  %v1307_v58 = vadd.f32 %v4122_v15, %v1278_v45  ;;  %v1252_v10 = vunpack.c.l.bf16 %v1238_v48  ;;  %v1254_v24 = vunpack.c.l.bf16 %v1239_v53 }
 0x127   : > { %1206 = vmatmul.mubr.bf16.gmra.mrb[28].mxu0 %v949_v57  ;;  %v1248_v57 = vunpack.c.l.bf16 %v1236_v20 }
 0x128   : > { %1544 = vmatpush1.bf16.msra.mxu0 %v3367_v6  ;;  %1563 = vmatprep.mubr.bf16.mxu0 %v1331_v59  ;;  %v1250_v6 = vunpack.c.l.bf16 %v1237_v29  ;;  %v1309_v59 = vadd.f32 %v4122_v15, %v1280_v46  ;;  %v1281_v52 = vmul.f32 %v4190_v49, %v1252_v10  ;;  %v1283_v14 = vmul.f32 %v4190_v49, %v1254_v24 }
 0x129   : > { %1545 = vmatprep.subr.bf16.mxu0 %v3372_v8  ;;  %v1253_v8 = vunpack.c.h.bf16 %v1238_v48 }
 0x12a   : > { %v1312_v20 = vadd.f32 %v4203_v55, %v1283_v14 }
 0x12c   : > { %1546 = vmatpush1.bf16.msra.mxu0 %v3370_v60  ;;  %v1255_v60 = vunpack.c.h.bf16 %v1239_v53  ;;  %v1328_v22 = vmax.f32 %v1312_v20, 0.0 }
 0x12d   : > { %1547 = vmatprep.subr.bf16.mxu0 %v3375_v61  ;;  %v1318_v61 = vmax.f32 %v1302_v43, 0.0 }
 0x130   : > { %1548 = vmatpush1.bf16.msra.mxu0 %v3373_v63  ;;  %v1320_v63 = vmax.f32 %v1304_v47, 0.0 }
 0x131   : > { %1549 = vmatprep.subr.bf16.mxu0 %v3378_v0  ;;  %v1277_v0 = vmul.f32 %v4190_v49, %v1248_v57 }
 0x132   : > { %v1332_v32 = vpack.c.bf16 %v1320_v63, %v1318_v61 }
 0x133   : > { %v1306_v35 = vadd.f32 %v4203_v55, %v1277_v0 }
 0x134   : > { %1550 = vmatpush1.bf16.msra.mxu0 %v3376_v1  ;;  %v1279_v1 = vmul.f32 %v4190_v49, %v1250_v6 }
 0x135   : > { %1551 = vmatprep.subr.bf16.mxu0 %v3381_v2  ;;  %v1323_v2 = vmax.f32 %v1307_v58, 0.0 }
 0x138   : > { %1552 = vmatpush1.bf16.msra.mxu0 %v3379_v3  ;;  %v1325_v3 = vmax.f32 %v1309_v59, 0.0 }
 0x139   : > { %1553 = vmatprep.subr.bf16.mxu0 %v3384_v4  ;;  %v1282_v4 = vmul.f32 %v4094_v62, %v1253_v8 }
 0x13a   : > { %v1335_v11 = vpack.c.bf16 %v1325_v3, %v1323_v2 }
 0x13b   : > { %v1311_v51 = vadd.f32 %v4122_v15, %v1282_v4 }
 0x13c   : > { %1554 = vmatpush1.bf16.msra.mxu0 %v3382_v5  ;;  %v1284_v5 = vmul.f32 %v4094_v62, %v1255_v60 }
 0x13d   : > { %1555 = vmatprep.subr.bf16.mxu0 %v3387_v9  ;;  %v1308_v9 = vadd.f32 %v4203_v55, %v1279_v1  ;;  %v1327_v62 = vmax.f32 %v1311_v51, 0.0 }
 0x13f   : > { %v1324_v13 = vmax.f32 %v1308_v9, 0.0 }
 0x140   : > { %1556 = vmatpush1.bf16.msra.mxu0 %v3385_v12  ;;  %v1313_v12 = vadd.f32 %v4122_v15, %v1284_v5 }
 0x141   : > { %1557 = vmatprep.subr.bf16.mxu0 %v3390_v50  ;;  %v1322_v50 = vmax.f32 %v1306_v35, 0.0 }
 0x142   : > { %v1329_v17 = vmax.f32 %v1313_v12, 0.0 }
 0x144   : > { %1558 = vmatpush1.bf16.msra.mxu0 %v3388_v18  ;;  %v1334_v18 = vpack.c.bf16 %v1324_v13, %v1322_v50  ;;  %v1337_v29 = vpack.c.bf16 %v1329_v17, %v1327_v62 }
 0x145   : > { %1559 = vmatprep.subr.bf16.mxu0 %v3393_v19  ;;  %v1310_v19 = vadd.f32 %v4203_v55, %v1281_v52 }
 0x147   : > { %v1326_v21 = vmax.f32 %v1310_v19, 0.0 }
 0x148   : > { %1560 = vmatpush1.bf16.msra.mxu0 %v3391_v27 }
 0x149   : > { %1561 = vmatprep.subr.bf16.mxu0 %v3396_v34  ;;  %v1336_v15 = vpack.c.bf16 %v1328_v22, %v1326_v21 }
 0x14c   : > { %1562 = vmatpush1.bf16.msra.mxu0 %v3394_v44  ;;  %v607_v44 = vld [vmem:[%s578_s30] sm:$0x3] }
 0x14d   : > { %v4274_v45 = vrot.slane %v607_v44, %v3728_v16  ;;  %v4277_v46 = vrot.slane %v607_v44, %v3624_v38 }
 0x14f   : > { %1564 = vmatmul.mubr.bf16.vlgmr.msra.gmra.mrb[16].mxu0 %v1330_v54 }
 0x150   : > { %1573 = vmatprep.mubr.bf16.mxu0 %v1333_v56 }
 0x157   : > { %1574 = vmatmul.mubr.bf16.gmra.mrb[20].mxu0 %v1332_v32 }
 0x158   : > { %1583 = vmatprep.mubr.bf16.mxu0 %v1335_v11 }
 0x15f   : > { %1584 = vmatmul.mubr.bf16.gmra.mrb[24].mxu0 %v1334_v18  ;;  %v2341_v7 = vpop.f32.mrb[0].mxu1 }
 0x160   : > { %1593 = vmatprep.mubr.bf16.mxu0 %v1337_v29  ;;  %v2343_v23 = vpop.f32.mrb[1].mxu1 }
 0x161   : > { %v2345_v25 = vpop.f32.mrb[2].mxu1 }
 0x162   : > { %v2347_v49 = vpop.f32.mrb[3].mxu1 }
 0x167   : > { %1594 = vmatmul.mubr.bf16.gmra.mrb[28].mxu0 %v1336_v15  ;;  %v2351_v26 = vpop.f32.mrb[4].mxu1 }
 0x168   : > { %v2353_v27 = vpop.f32.mrb[5].mxu1 }
 0x169   : > { %v2355_v30 = vpop.f32.mrb[6].mxu1 }
 0x16a   : > { %v2357_v31 = vpop.f32.mrb[7].mxu1 }
 0x16f   : > { %v4250_v34 = vpop.f32.mrb[8].mxu1 }
 0x170   : > { %v4252_v55 = vpop.f32.mrb[9].mxu1 }
 0x171   : > { %v4254_v36 = vpop.f32.mrb[10].mxu1 }
 0x172   : > { %v4256_v37 = vpop.f32.mrb[11].mxu1 }
 0x177   : > { %v4258_v39 = vpop.f32.mrb[12].mxu1 }
 0x178   : > { %v4260_v40 = vpop.f32.mrb[13].mxu1 }
 0x179   : > { %v4262_v41 = vpop.f32.mrb[14].mxu1 }
 0x17a   : > { %v4264_v42 = vpop.f32.mrb[15].mxu1 }
 0x222   : > { %v1565_v48 = vpop.f32.mrb[16].mxu0 }
 0x223   : > { %v3074_v53 = vadd.f32 %v1565_v48, %v4274_v45  ;;  %v1567_v43 = vpop.f32.mrb[17].mxu0 }
 0x224   : > { %v3076_v47 = vadd.f32 %v1567_v43, %v4277_v46  ;;  %v1569_v16 = vpop.f32.mrb[18].mxu0 }
 0x225   : > { %v3075_v54 = vadd.f32 %v3074_v53, %v2341_v7  ;;  %v3078_v38 = vadd.f32 %v1569_v16, %v4274_v45  ;;  %v1571_v56 = vpop.f32.mrb[19].mxu0 }
 0x226   : > { %v3077_v57 = vadd.f32 %v3076_v47, %v2343_v23  ;;  %v3080_v6 = vadd.f32 %v1571_v56, %v4277_v46 }
 0x227   : > { %2396 = vst [vmem:[%s4284_s15] sm:$0xff] %v3075_v54  ;;  %v3079_v58 = vadd.f32 %v3078_v38, %v2345_v25  ;;  %v2461_v8 = vmul.f32 %v3075_v54, %v3075_v54 }
 0x228   : > { %2397 = vst [vmem:[%s4284_s15 + $0x8] sm:$0xff] %v3077_v57  ;;  %v3081_v59 = vadd.f32 %v3080_v6, %v2347_v49  ;;  %v2462_v63 = vmul.f32 %v3077_v57, %v3077_v57 }
 0x229   : > { %2398 = vst [vmem:[%s4284_s15 + $0x10] sm:$0xff] %v3079_v58  ;;  %v2412_v60 = vadd.f32 %v3079_v58, %v3075_v54  ;;  %v2463_v61 = vmul.f32 %v3079_v58, %v3079_v58 }
 0x22a   : > { %2399 = vst [vmem:[%s4284_s15 + $0x18] sm:$0xff] %v3081_v59  ;;  %v2425_v0 = vadd.f32 %v3081_v59, %v3077_v57  ;;  %v2464_v1 = vmul.f32 %v3081_v59, %v3081_v59  ;;  %v1575_v2 = vpop.f32.mrb[20].mxu0 }
 0x22b   : > { %v2477_v3 = vadd.f32 %v2463_v61, %v2461_v8  ;;  %v3082_v4 = vadd.f32 %v1575_v2, %v4274_v45  ;;  %v1577_v5 = vpop.f32.mrb[21].mxu0 }
 0x22c   : > { %v2490_v32 = vadd.f32 %v2464_v1, %v2462_v63  ;;  %v3084_v35 = vadd.f32 %v1577_v5, %v4277_v46  ;;  %v1579_v9 = vpop.f32.mrb[22].mxu0 }
 0x22d   : > { %v3083_v10 = vadd.f32 %v3082_v4, %v2351_v26  ;;  %v3086_v24 = vadd.f32 %v1579_v9, %v4274_v45  ;;  %v1581_v11 = vpop.f32.mrb[23].mxu0 }
 0x22e   : > { %v3085_v51 = vadd.f32 %v3084_v35, %v2353_v27  ;;  %v3088_v12 = vadd.f32 %v1581_v11, %v4277_v46 }
 0x22f   : > { %2400 = vst [vmem:[%s4284_s15 + $0x20] sm:$0xff] %v3083_v10  ;;  %v2413_v50 = vadd.f32 %v3083_v10, %v2412_v60  ;;  %v2465_v13 = vmul.f32 %v3083_v10, %v3083_v10  ;;  %v3087_v52 = vadd.f32 %v3086_v24, %v2355_v30 }
 0x230   : > { %2401 = vst [vmem:[%s4284_s15 + $0x28] sm:$0xff] %v3085_v51  ;;  %v2426_v14 = vadd.f32 %v3085_v51, %v2425_v0  ;;  %v2466_v62 = vmul.f32 %v3085_v51, %v3085_v51  ;;  %v3089_v17 = vadd.f32 %v3088_v12, %v2357_v31 }
 0x231   : > { %v2478_v18 = vadd.f32 %v2477_v3, %v2465_v13  ;;  %2402 = vst [vmem:[%s4284_s15 + $0x30] sm:$0xff] %v3087_v52  ;;  %v2414_v19 = vadd.f32 %v3087_v52, %v2413_v50  ;;  %v2467_v20 = vmul.f32 %v3087_v52, %v3087_v52 }
 0x232   : > { %v2491_v29 = vadd.f32 %v2490_v32, %v2466_v62  ;;  %2403 = vst [vmem:[%s4284_s15 + $0x38] sm:$0xff] %v3089_v17  ;;  %v2427_v21 = vadd.f32 %v3089_v17, %v2426_v14  ;;  %v2468_v22 = vmul.f32 %v3089_v17, %v3089_v17  ;;  %v1585_v15 = vpop.f32.mrb[24].mxu0 }
 0x233   : > { %v2479_v7 = vadd.f32 %v2478_v18, %v2467_v20  ;;  %v3090_v23 = vadd.f32 %v1585_v15, %v4274_v45  ;;  %v1587_v25 = vpop.f32.mrb[25].mxu0  ;;  %v3421_v18 = vmov 1966171168  }
 0x234   : > { %v2492_v49 = vadd.f32 %v2491_v29, %v2468_v22  ;;  %v3092_v26 = vadd.f32 %v1587_v25, %v4277_v46  ;;  %v1589_v27 = vpop.f32.mrb[26].mxu0 }
 0x235   : > { %v3091_v30 = vadd.f32 %v3090_v23, %v4250_v34  ;;  %v3094_v31 = vadd.f32 %v1589_v27, %v4274_v45  ;;  %v1591_v44 = vpop.f32.mrb[27].mxu0 }
 0x236   : > { %v3093_v48 = vadd.f32 %v3092_v26, %v4252_v55  ;;  %v3096_v53 = vadd.f32 %v1591_v44, %v4277_v46 }
 0x237   : > { %2404 = vst [vmem:[%s4284_s15 + $0x40] sm:$0xff] %v3091_v30  ;;  %v2415_v43 = vadd.f32 %v3091_v30, %v2414_v19  ;;  %v2469_v47 = vmul.f32 %v3091_v30, %v3091_v30  ;;  %v3095_v16 = vadd.f32 %v3094_v31, %v4254_v36  ;;  %v2442_v19 = vunpack.c.l.s4 %v3421_v18 }
 0x238   : > { %2405 = vst [vmem:[%s4284_s15 + $0x48] sm:$0xff] %v3093_v48  ;;  %v2428_v54 = vadd.f32 %v3093_v48, %v2427_v21  ;;  %v2470_v38 = vmul.f32 %v3093_v48, %v3093_v48  ;;  %v3097_v56 = vadd.f32 %v3096_v53, %v4256_v37 }
 0x239   : > { %v2480_v57 = vadd.f32 %v2479_v7, %v2469_v47  ;;  %2406 = vst [vmem:[%s4284_s15 + $0x50] sm:$0xff] %v3095_v16  ;;  %v2416_v34 = vadd.f32 %v3095_v16, %v2415_v43  ;;  %v2471_v6 = vmul.f32 %v3095_v16, %v3095_v16  ;;  %v2443_v25 = vunpack.c.0.s8 %v2442_v19 }
 0x23a   : > { %v2493_v58 = vadd.f32 %v2492_v49, %v2470_v38  ;;  %2407 = vst [vmem:[%s4284_s15 + $0x58] sm:$0xff] %v3097_v56  ;;  %v2429_v55 = vadd.f32 %v3097_v56, %v2428_v54  ;;  %v2472_v59 = vmul.f32 %v3097_v56, %v3097_v56  ;;  %v1595_v8 = vpop.f32.mrb[28].mxu0 }
 0x23b   : > { %v2481_v60 = vadd.f32 %v2480_v57, %v2471_v6  ;;  %v3098_v61 = vadd.f32 %v1595_v8, %v4274_v45  ;;  %v1597_v36 = vpop.f32.mrb[29].mxu0  ;;  %v2446_v43 = vsub.s32 %v2443_v25, %v3607_v33 }
 0x23c   : > { %v2494_v63 = vadd.f32 %v2493_v58, %v2472_v59  ;;  %v3100_v0 = vadd.f32 %v1597_v36, %v4277_v46  ;;  %v1599_v37 = vpop.f32.mrb[30].mxu0 }
 0x23d   : > { %v3099_v1 = vadd.f32 %v3098_v61, %v4258_v39  ;;  %v3102_v2 = vadd.f32 %v1599_v37, %v4274_v45  ;;  %v1601_v3 = vpop.f32.mrb[31].mxu0 }
 0x23e   : > { %v3101_v4 = vadd.f32 %v3100_v0, %v4260_v40  ;;  %v3104_v5 = vadd.f32 %v1601_v3, %v4277_v46 }
 0x23f   : > { %2408 = vst [vmem:[%s4284_s15 + $0x60] sm:$0xff] %v3099_v1  ;;  %v2417_v32 = vadd.f32 %v3099_v1, %v2416_v34  ;;  %v2473_v35 = vmul.f32 %v3099_v1, %v3099_v1  ;;  %v3103_v9 = vadd.f32 %v3102_v2, %v4262_v41 }
 0x240   : > { %2409 = vst [vmem:[%s4284_s15 + $0x68] sm:$0xff] %v3101_v4  ;;  %v2430_v10 = vadd.f32 %v3101_v4, %v2429_v55  ;;  %v2474_v24 = vmul.f32 %v3101_v4, %v3101_v4  ;;  %v3105_v11 = vadd.f32 %v3104_v5, %v4264_v42 }
 0x241   : > { %v2482_v51 = vadd.f32 %v2481_v60, %v2473_v35  ;;  %2410 = vst [vmem:[%s4284_s15 + $0x70] sm:$0xff] %v3103_v9  ;;  %v2418_v39 = vadd.f32 %v3103_v9, %v2417_v32  ;;  %v2475_v45 = vmul.f32 %v3103_v9, %v3103_v9 }
 0x242   : > { %v2495_v12 = vadd.f32 %v2494_v63, %v2474_v24  ;;  %2411 = vst [vmem:[%s4284_s15 + $0x78] sm:$0xff] %v3105_v11  ;;  %v2431_v50 = vadd.f32 %v3105_v11, %v2430_v10  ;;  %v2476_v40 = vmul.f32 %v3105_v11, %v3105_v11 }
 0x243   : > { %v2419_v13 = vrot.slane %v2418_v39, 4  ;;  %v2483_v46 = vadd.f32 %v2482_v51, %v2475_v45 }
 0x244   : > { %v2432_v52 = vrot.slane %v2431_v50, 4  ;;  %v2496_v14 = vadd.f32 %v2495_v12, %v2476_v40 }
 0x245   : > { %v2420_v62 = vadd.f32 %v2419_v13, %v2418_v39  ;;  %v2484_v17 = vrot.slane %v2483_v46, 4 }
 0x246   : > { %v2433_v41 = vadd.f32 %v2432_v52, %v2431_v50  ;;  %v2497_v20 = vrot.slane %v2496_v14, 4 }
 0x247   : > { %v2421_v29 = vrot.slane %v2420_v62, 2  ;;  %v2485_v42 = vadd.f32 %v2484_v17, %v2483_v46 }
 0x248   : > { %v2434_v21 = vrot.slane %v2433_v41, 2  ;;  %v2498_v22 = vadd.f32 %v2497_v20, %v2496_v14 }
 0x249   : > { %v2422_v15 = vadd.f32 %v2421_v29, %v2420_v62  ;;  %v2486_v7 = vrot.slane %v2485_v42, 2 }
 0x24a   : > { %v2435_v23 = vadd.f32 %v2434_v21, %v2433_v41  ;;  %v2499_v49 = vrot.slane %v2498_v22, 2 }
 0x24b   : > { %v2423_v26 = vrot.slane %v2422_v15, 1  ;;  %v2487_v27 = vadd.f32 %v2486_v7, %v2485_v42 }
 0x24c   : > { %v2436_v30 = vrot.slane %v2435_v23, 1  ;;  %v2500_v31 = vadd.f32 %v2499_v49, %v2498_v22 }
 0x24d   : > { %v2424_v44 = vadd.f32 %v2423_v26, %v2422_v15  ;;  %v2488_v48 = vrot.slane %v2487_v27, 1 }
 0x24e   : > { %v2437_v53 = vadd.f32 %v2436_v30, %v2435_v23  ;;  %v2501_v47 = vrot.slane %v2500_v31, 1 }
 0x24f   : > { %v2489_v16 = vadd.f32 %v2488_v48, %v2487_v27 }
 0x250   : > { %v2440_v54 = vcombine.low %v2424_v44, %v2437_v53  ;;  %v2502_v38 = vadd.f32 %v2501_v47, %v2500_v31 }
 0x252   : > { %v2447_v56 = vrot.slane %v2440_v54, %v2446_v43  ;;  %v2505_v57 = vcombine.low %v2489_v16, %v2502_v38 }
 0x254   : > { %v2454_v34 = vrot.slane %v2447_v56, %v2446_v43  ;;  %v2512_v6 = vrot.slane %v2505_v57, %v2446_v43 }
 0x256   : > { %2460 = vst.msk [vmem:[%s597_s23] sm:$0x3] %vm2458_vm1, %v2454_v34  ;;  %v2519_v33 = vrot.slane %v2512_v6, %v2446_v43 }
 0x258   : > { %2521 = vst.msk [vmem:[%s605_s24] sm:$0x3] %vm2458_vm1, %v2519_v33 }
 0x259 PF: > { %s22_s19 = sadd.s32 1, %s3419_s19   ;;  %s4356_s17 = smov %s3415_s18 }
 0x25a   : > { %p19_p5 = scmp.ge.s32.totalorder %s22_s19, 4   ;;  %s4357_s18 = smov %s4359_s20 }
 0x25c   :  { %21 = sbr.rel (!%p19_p5) target bundleno = 2 (0x2), region = 131 }

// kernel: aspp_forward.3
= control target key start
LH: loop header
LB: loop body
LE: loop exit
PB: predicated region body
PF: predicated region fallthrough
CT: control target
= control target key end

     0   :  { %s13497_s21 = smov 0   ;;  %s13499_s22 = smov 0   ;;  %s16811_s0 = inlined_call_operand.vmem [shape: bf16[2,44,44,160], index: 0, kind: input, shape index: {}]   ;;  %s16812_s1 = inlined_call_operand.vmem [shape: bf16[28,160,256], index: 1, kind: input, shape index: {}]   ;;  %s16813_s2 = inlined_call_operand.vmem [shape: bf16[2,1,64,256], index: 2, kind: output, shape index: {0}]   ;;  %s16814_s3 = inlined_call_operand.vmem [shape: bf16[2,1,64,256], index: 3, kind: output, shape index: {1}]   ;;  %s16815_s4 = inlined_call_operand.vmem [shape: bf16[2,1,64,256], index: 4, kind: output, shape index: {2}]   ;;  %s16816_s5 = inlined_call_operand.vmem [shape: f32[2,1,4,256], index: 5, kind: output, shape index: {3}]   ;;  %s16817_s6 = inlined_call_operand.vmem [shape: f32[2,1,4,256], index: 6, kind: output, shape index: {4}]  }
   0x1   :  { %s13501_s23 = smov 0  }
   0x2 LB: > { %s29_s24 = sadd.s32 1, %s13455_s22  ;;  %p10470_p0 = scmp.ge.s32.totalorder %s13459_s23, 1  ;;  %s13459_s23 = sphi %s13501_s23, %s17_s23   ;;  %s13455_s22 = sphi %s13499_s22, %s16821_s22   ;;  %s13451_s21 = sphi %s13497_s21, %s16820_s21  }
   0x3   : > { %p31_p1 = scmp.ge.s32.totalorder %s29_s24, 2  ;;  %p243_p2 = scmp.lt.s32.totalorder %s13459_s23, 3 }
   0x5   : > { %s16823_s24 = smov (%p31_p1, %s29_s24), 0  ;;  %p244_p3 = pnand %p10470_p0, %p243_p2 }
   0x6   : > { %v12525_v0 = vld [vmem:[%s16812_s1 + $0x4] ss:$8 sps:$4 sm:$0xff] (!%p244_p3)   ;;  %v12529_v2 = vld [vmem:[%s16812_s1] ss:$8 sps:$4 sm:$0xff] (!%p244_p3)   ;;  %v12531_v4 = vld [vmem:[%s16812_s1 + $0x14] ss:$8 sps:$4 sm:$0xff] (!%p244_p3)  }
   0x7   : > { %247 = sbr.rel (%p244_p3) target bundleno = 850 (0x352), region = 28  ;;  %v12527_v1 = vld [vmem:[%s16812_s1 + $0x324] ss:$8 sps:$4 sm:$0xff] (!%p244_p3)   ;;  %655 = vmatprep.subr.bf16.mxu0 (!%p244_p3), %v12525_v0  ;;  %v12530_v3 = vld [vmem:[%s16812_s1 + $0x320] ss:$8 sps:$4 sm:$0xff] (!%p244_p3)   ;;  %p313_p4 = scmp.lt.s32.totalorder (!%p244_p3), %s13451_s21, 1 }
   0x8   : > { %2308 = vmatprep.subr.bf16.mxu1 (!%p244_p3), %v12527_v1  ;;  %656 = vmatpush1.bf16.msra.mxu0 (!%p244_p3), %v12529_v2  ;;  %v12533_v5 = vld [vmem:[%s16812_s1 + $0x334] ss:$8 sps:$4 sm:$0xff] (!%p244_p3)   ;;  %v12535_v6 = vld [vmem:[%s16812_s1 + $0x10] ss:$8 sps:$4 sm:$0xff] (!%p244_p3)   ;;  %v12537_v8 = vld [vmem:[%s16812_s1 + $0x24] ss:$8 sps:$4 sm:$0xff] (!%p244_p3)  }
   0x9   : > { %2309 = vmatpush1.bf16.msra.mxu1 (!%p244_p3), %v12530_v3  ;;  %657 = vmatprep.subr.bf16.mxu0 (!%p244_p3), %v12531_v4  ;;  %v12536_v7 = vld [vmem:[%s16812_s1 + $0x330] ss:$8 sps:$4 sm:$0xff] (!%p244_p3)   ;;  %v12539_v9 = vld [vmem:[%s16812_s1 + $0x344] ss:$8 sps:$4 sm:$0xff] (!%p244_p3)   ;;  %v12541_v10 = vld [vmem:[%s16812_s1 + $0x20] ss:$8 sps:$4 sm:$0xff] (!%p244_p3)  }
   0xa   : > { %2310 = vmatprep.subr.bf16.mxu1 (!%p244_p3), %v12533_v5  ;;  %v12542_v11 = vld [vmem:[%s16812_s1 + $0x340] ss:$8 sps:$4 sm:$0xff] (!%p244_p3)   ;;  %v12543_v12 = vld [vmem:[%s16812_s1 + $0x34] ss:$8 sps:$4 sm:$0xff] (!%p244_p3)   ;;  %v12547_v14 = vld [vmem:[%s16812_s1 + $0x30] ss:$8 sps:$4 sm:$0xff] (!%p244_p3)  }
   0xb   : > { %v12545_v13 = vld [vmem:[%s16812_s1 + $0x354] ss:$8 sps:$4 sm:$0xff] (!%p244_p3)   ;;  %v12548_v15 = vld [vmem:[%s16812_s1 + $0x350] ss:$8 sps:$4 sm:$0xff] (!%p244_p3)   ;;  %v12549_v16 = vld [vmem:[%s16812_s1 + $0x44] ss:$8 sps:$4 sm:$0xff] (!%p244_p3)  }
   0xc   : > { %658 = vmatpush1.bf16.msra.mxu0 (!%p244_p3), %v12535_v6  ;;  %v12551_v17 = vld [vmem:[%s16812_s1 + $0x364] ss:$8 sps:$4 sm:$0xff] (!%p244_p3)   ;;  %v12553_v18 = vld [vmem:[%s16812_s1 + $0x40] ss:$8 sps:$4 sm:$0xff] (!%p244_p3)   ;;  %v12555_v20 = vld [vmem:[%s16812_s1 + $0x54] ss:$8 sps:$4 sm:$0xff] (!%p244_p3)  }
   0xd   : > { %2311 = vmatpush1.bf16.msra.mxu1 (!%p244_p3), %v12536_v7  ;;  %659 = vmatprep.subr.bf16.mxu0 (!%p244_p3), %v12537_v8  ;;  %v12554_v19 = vld [vmem:[%s16812_s1 + $0x360] ss:$8 sps:$4 sm:$0xff] (!%p244_p3)   ;;  %v12557_v21 = vld [vmem:[%s16812_s1 + $0x374] ss:$8 sps:$4 sm:$0xff] (!%p244_p3)   ;;  %v12559_v22 = vld [vmem:[%s16812_s1 + $0x50] ss:$8 sps:$4 sm:$0xff] (!%p244_p3)  }
   0xe   : > { %2312 = vmatprep.subr.bf16.mxu1 %v12539_v9  ;;  %s16825_s21 = smov (!%p313_p4, %s13451_s21), 1  ;;  %v12560_v23 = vld [vmem:[%s16812_s1 + $0x370] ss:$8 sps:$4 sm:$0xff]   ;;  %v12561_v24 = vld [vmem:[%s16812_s1 + $0x64] ss:$8 sps:$4 sm:$0xff]   ;;  %vm449_vm0 = vcmask 1045504  }
   0xf   : > { %s12499_s7 = smul.u32 2112, %s16825_s21  ;;  %v12563_v25 = vld [vmem:[%s16812_s1 + $0x384] ss:$8 sps:$4 sm:$0xff]   ;;  %v12565_v26 = vld [vmem:[%s16812_s1 + $0x60] ss:$8 sps:$4 sm:$0xff]   ;;  %vm642_vm1 = vcmask 261120  }
  0x10   : > { %660 = vmatpush1.bf16.msra.mxu0 %v12541_v10  ;;  %v12566_v27 = vld [vmem:[%s16812_s1 + $0x380] ss:$8 sps:$4 sm:$0xff]   ;;  %v12567_v28 = vld [vmem:[%s16812_s1 + $0x74] ss:$8 sps:$4 sm:$0xff]   ;;  %v12571_v30 = vld [vmem:[%s16812_s1 + $0x70] ss:$8 sps:$4 sm:$0xff]  }
  0x11   : > { %2313 = vmatpush1.bf16.msra.mxu1 %v12542_v11  ;;  %661 = vmatprep.subr.bf16.mxu0 %v12543_v12  ;;  %s13609_s20 = scalar_lea.vmem %s16811_s0, %s12499_s7  ;;  %v12569_v29 = vld [vmem:[%s16812_s1 + $0x394] ss:$8 sps:$4 sm:$0xff]   ;;  %v12572_v31 = vld [vmem:[%s16812_s1 + $0x390] ss:$8 sps:$4 sm:$0xff]   ;;  %v12573_v38 = vld [vmem:[%s16812_s1 + $0x84] ss:$8 sps:$4 sm:$0xff]  }
  0x12   : > { %2314 = vmatprep.subr.bf16.mxu1 %v12545_v13  ;;  %v10482_v32 = vld [vmem:[%s13609_s20 + $0x370] sm:$0xee]  ;;  %v10483_v33 = vld [vmem:[%s13609_s20 + $0x378] sm:$0x11]  ;;  %v10484_v34 = vld [vmem:[%s13609_s20 + $0x3a0] sm:$0xee] }
  0x13   : > { %v10485_v35 = vld [vmem:[%s13609_s20 + $0x3a8] sm:$0x11]  ;;  %v386_v36 = vunpack.c.h.bf16 %v10482_v32  ;;  %v385_v37 = vunpack.c.l.bf16 %v10482_v32  ;;  %v388_v39 = vunpack.c.h.bf16 %v10483_v33  ;;  %v390_v40 = vunpack.c.h.bf16 %v10484_v34  ;;  %v12579_v58 = vld [vmem:[%s16812_s1 + $0x94] ss:$8 sps:$4 sm:$0xff]   ;;  %v12583_v61 = vld [vmem:[%s16812_s1 + $0x90] ss:$8 sps:$4 sm:$0xff]  }
  0x14   : > { %662 = vmatpush1.bf16.msra.mxu0 %v12547_v14  ;;  %v392_v41 = vunpack.c.h.bf16 %v10485_v35  ;;  %v387_v42 = vunpack.c.l.bf16 %v10483_v33  ;;  %v12575_v43 = vld [vmem:[%s16812_s1 + $0x3a4] ss:$8 sps:$4 sm:$0xff]   ;;  %v389_v45 = vunpack.c.l.bf16 %v10484_v34  ;;  %v391_v46 = vunpack.c.l.bf16 %v10485_v35  ;;  %v12577_v54 = vld [vmem:[%s16812_s1 + $0x80] ss:$8 sps:$4 sm:$0xff]   ;;  %v12581_v59 = vld [vmem:[%s16812_s1 + $0x3b4] ss:$8 sps:$4 sm:$0xff]  }
  0x15   : > { %2315 = vmatpush1.bf16.msra.mxu1 %v12548_v15  ;;  %663 = vmatprep.subr.bf16.mxu0 %v12549_v16  ;;  %v453_v44 = vrot.slane %v386_v36, 2  ;;  %v450_v47 = vrot.slane %v385_v37, 2  ;;  %v454_v48 = vrot.slane %v388_v39, 2  ;;  %v459_v49 = vrot.slane %v390_v40, 2  ;;  %v12578_v55 = vld [vmem:[%s16812_s1 + $0x3a0] ss:$8 sps:$4 sm:$0xff]  }
  0x16   : > { %2316 = vmatprep.subr.bf16.mxu1 %v12551_v17  ;;  %v460_v50 = vrot.slane %v392_v41, 2  ;;  %v451_v51 = vrot.slane %v387_v42, 2  ;;  %v456_v52 = vrot.slane %v389_v45, 2  ;;  %v457_v53 = vrot.slane %v391_v46, 2  ;;  %v12584_v62 = vld [vmem:[%s16812_s1 + $0x3b0] ss:$8 sps:$4 sm:$0xff]  }
  0x17   : > { %v455_v56 = vsel %vm449_vm0, %v453_v44, %v454_v48  ;;  %v10486_v1 = vld [vmem:[%s13609_s20 + $0x3d0] sm:$0xee]  ;;  %v10487_v2 = vld [vmem:[%s13609_s20 + $0x3d8] sm:$0x11]  ;;  %v10488_v3 = vld [vmem:[%s13609_s20 + $0x400] sm:$0xee] }
  0x18   : > { %664 = vmatpush1.bf16.msra.mxu0 %v12553_v18  ;;  %v461_v57 = vsel %vm449_vm0, %v459_v49, %v460_v50  ;;  %v452_v63 = vsel %vm449_vm0, %v450_v47, %v451_v51  ;;  %v458_v0 = vsel %vm449_vm0, %v456_v52, %v457_v53  ;;  %v10489_v4 = vld [vmem:[%s13609_s20 + $0x408] sm:$0x11]  ;;  %v394_v5 = vunpack.c.h.bf16 %v10486_v1  ;;  %v12591_v32 = vld [vmem:[%s16812_s1 + $0x150] ss:$8 sps:$4 sm:$0xff]   ;;  %v10492_v36 = vld [vmem:[%s13609_s20 + $0x460] sm:$0xee] }
  0x19   : > { %2317 = vmatpush1.bf16.msra.mxu1 %v12554_v19  ;;  %665 = vmatprep.subr.bf16.mxu0 %v12555_v20  ;;  %v13647_v60 = vpack.c.bf16 %v461_v57, %v455_v56  ;;  %v396_v6 = vunpack.c.h.bf16 %v10487_v2  ;;  %v398_v7 = vunpack.c.h.bf16 %v10488_v3  ;;  %v393_v8 = vunpack.c.l.bf16 %v10486_v1  ;;  %v12587_v9 = vld [vmem:[%s16812_s1 + $0x144] ss:$8 sps:$4 sm:$0xff]   ;;  %v10491_v35 = vld [vmem:[%s13609_s20 + $0x438] sm:$0x11]  ;;  %s12089_s26 = sshll.u32 %s16825_s21, 3  ;;  %s15504_s18 = sshll.u32 %s16825_s21, 6 }
  0x1a   : > { %2318 = vmatprep.subr.bf16.mxu1 %v12557_v21  ;;  %v12590_v10 = vld [vmem:[%s16812_s1 + $0x3c4] ss:$8 sps:$4 sm:$0xff]   ;;  %v400_v11 = vunpack.c.h.bf16 %v10489_v4  ;;  %v395_v12 = vunpack.c.l.bf16 %v10487_v2  ;;  %v397_v13 = vunpack.c.l.bf16 %v10488_v3  ;;  %v399_v14 = vunpack.c.l.bf16 %v10489_v4  ;;  %v12594_v40 = vld [vmem:[%s16812_s1 + $0x3d0] ss:$8 sps:$4 sm:$0xff]   ;;  %s14914_s19 = scalar_lea.vmem %s16816_s5, %s12089_s26  ;;  %s14940_s12 = scalar_lea.vmem %s16817_s6, %s12089_s26 }
  0x1b   : > { %10518 = vmatprep.mubr.msk.bf16.mxu0 %vm642_vm1, %v13647_v60  ;;  %10802 = vmatprep.mubr.msk.bf16.mxu1 %vm642_vm1, %v13647_v60  ;;  %v465_v15 = vrot.slane %v394_v5, 2  ;;  %v466_v16 = vrot.slane %v396_v6, 2  ;;  %v471_v17 = vrot.slane %v398_v7, 2  ;;  %v462_v18 = vrot.slane %v393_v8, 2  ;;  %v10493_v37 = vld [vmem:[%s13609_s20 + $0x468] sm:$0x11]  ;;  %s15523_s11 = scalar_lea.vmem %s16813_s2, %s15504_s18  ;;  %s16758_s28 = scalar_lea.vmem %s16815_s4, %s15504_s18 }
  0x1c   : > { %666 = vmatpush1.bf16.msra.mxu0 %v12559_v22  ;;  %v472_v19 = vrot.slane %v400_v11, 2  ;;  %v463_v20 = vrot.slane %v395_v12, 2  ;;  %v468_v21 = vrot.slane %v397_v13, 2  ;;  %v469_v22 = vrot.slane %v399_v14, 2  ;;  %v12599_v45 = vld [vmem:[%s16812_s1 + $0x164] ss:$8 sps:$4 sm:$0xff]   ;;  %s16764_s7 = scalar_lea.vmem %s16814_s3, %s15504_s18 }
  0x1d   : > { %2319 = vmatpush1.bf16.msra.mxu1 %v12560_v23  ;;  %667 = vmatprep.subr.bf16.mxu0 %v12561_v24  ;;  %v13671_v23 = vpack.c.bf16 %v458_v0, %v452_v63  ;;  %v12585_v24 = vld [vmem:[%s16812_s1 + $0x140] ss:$8 sps:$4 sm:$0xff]   ;;  %v404_v41 = vunpack.c.h.bf16 %v10491_v35  ;;  %v406_v42 = vunpack.c.h.bf16 %v10492_v36  ;;  %v403_v44 = vunpack.c.l.bf16 %v10491_v35  ;;  %v12602_v50 = vld [vmem:[%s16812_s1 + $0x3e4] ss:$8 sps:$4 sm:$0xff]   ;;  %v12605_v63 = vld [vmem:[%s16812_s1 + $0x174] ss:$8 sps:$4 sm:$0xff]  }
  0x1e   : > { %2320 = vmatprep.subr.bf16.mxu1 %v12563_v25  ;;  %v467_v25 = vsel %vm449_vm0, %v465_v15, %v466_v16  ;;  %v470_v34 = vsel %vm449_vm0, %v468_v21, %v469_v22  ;;  %v405_v47 = vunpack.c.l.bf16 %v10492_v36  ;;  %v407_v48 = vunpack.c.l.bf16 %v10493_v37  ;;  %v12608_v0 = vld [vmem:[%s16812_s1 + $0x3f4] ss:$8 sps:$4 sm:$0xff]   ;;  %v10496_v5 = vld [vmem:[%s13609_s20 + $0x4c0] sm:$0xee]  ;;  %v10497_v7 = vld [vmem:[%s13609_s20 + $0x4c8] sm:$0x11] }
  0x1f   : > { %v478_v51 = vrot.slane %v404_v41, 2  ;;  %v483_v52 = vrot.slane %v406_v42, 2  ;;  %v10494_v3 = vld [vmem:[%s13609_s20 + $0x490] sm:$0xee]  ;;  %v10495_v4 = vld [vmem:[%s13609_s20 + $0x498] sm:$0x11]  ;;  %v416_v13 = vunpack.c.h.bf16 %v10497_v7  ;;  %v413_v16 = vunpack.c.l.bf16 %v10496_v5 }
  0x20   : > { %668 = vmatpush1.bf16.msra.mxu0 %v12565_v26  ;;  %v12588_v26 = vld [vmem:[%s16812_s1 + $0x3c0] ss:$8 sps:$4 sm:$0xff]   ;;  %v481_v56 = vrot.slane %v407_v48, 2  ;;  %v410_v8 = vunpack.c.h.bf16 %v10494_v3  ;;  %v12603_v11 = vld [vmem:[%s16812_s1 + $0x170] ss:$8 sps:$4 sm:$0xff]   ;;  %v409_v14 = vunpack.c.l.bf16 %v10494_v3  ;;  %v411_v15 = vunpack.c.l.bf16 %v10495_v4 }
  0x21   : > { %2321 = vmatpush1.bf16.msra.mxu1 %v12566_v27  ;;  %669 = vmatprep.subr.bf16.mxu0 %v12567_v28  ;;  %v473_v27 = vsel %vm449_vm0, %v471_v17, %v472_v19  ;;  %v12593_v28 = vld [vmem:[%s16812_s1 + $0x154] ss:$8 sps:$4 sm:$0xff]   ;;  %v12606_v12 = vld [vmem:[%s16812_s1 + $0x3f0] ss:$8 sps:$4 sm:$0xff]   ;;  %v12611_v21 = vld [vmem:[%s16812_s1 + $0x184] ss:$8 sps:$4 sm:$0xff]  }
  0x22   : > { %2322 = vmatprep.subr.bf16.mxu1 %v12569_v29  ;;  %v12596_v29 = vld [vmem:[%s16812_s1 + $0x3d4] ss:$8 sps:$4 sm:$0xff]   ;;  %v13692_v33 = vpack.c.bf16 %v473_v27, %v467_v25  ;;  %v489_v17 = vrot.slane %v410_v8, 2  ;;  %v12614_v22 = vld [vmem:[%s16812_s1 + $0x404] ss:$8 sps:$4 sm:$0xff]   ;;  %vm922_vm2 = vcmask 1043456  }
  0x23   : > { %v12609_v25 = vld [vmem:[%s16812_s1 + $0x180] ss:$8 sps:$4 sm:$0xff]   ;;  %v12617_v35 = vld [vmem:[%s16812_s1 + $0x194] ss:$8 sps:$4 sm:$0xff]   ;;  %v12623_v42 = vld [vmem:[%s16812_s1 + $0x1a4] ss:$8 sps:$4 sm:$0xff]  }
  0x24   : > { %670 = vmatpush1.bf16.msra.mxu0 %v12571_v30  ;;  %v464_v30 = vsel %vm449_vm0, %v462_v18, %v463_v20  ;;  %v415_v20 = vunpack.c.l.bf16 %v10497_v7  ;;  %v12612_v27 = vld [vmem:[%s16812_s1 + $0x400] ss:$8 sps:$4 sm:$0xff]   ;;  %v12620_v36 = vld [vmem:[%s16812_s1 + $0x414] ss:$8 sps:$4 sm:$0xff]   ;;  %vm3905_vm3 = vcmask 1041408  }
  0x25   : > { %2323 = vmatpush1.bf16.msra.mxu1 %v12572_v31  ;;  %671 = vmatprep.subr.bf16.mxu0 %v12573_v38  ;;  %v10490_v31 = vld [vmem:[%s13609_s20 + $0x430] sm:$0xee]  ;;  %v13713_v57 = vpack.c.bf16 %v470_v34, %v464_v30  ;;  %v486_v30 = vrot.slane %v409_v14, 2  ;;  %v12650_v3 = vld [vmem:[%s13609_s20 + $0x37c] ss:$48 sps:$4 sm:$0xff]  }
  0x26   : > { %2324 = vmatprep.subr.bf16.mxu1 %v12575_v43  ;;  %v402_v38 = vunpack.c.h.bf16 %v10490_v31  ;;  %v401_v39 = vunpack.c.l.bf16 %v10490_v31  ;;  %v408_v43 = vunpack.c.h.bf16 %v10493_v37  ;;  %v487_v31 = vrot.slane %v411_v15, 2 }
  0x27   : > { %v493_v34 = vrot.slane %v415_v20, 2  ;;  %v12639_v20 = vld [vmem:[%s16812_s1 + $0x1d0] ss:$8 sps:$4 sm:$0xff]  }
  0x28   : > { %672 = vmatpush1.bf16.msra.mxu0 %v12577_v54  ;;  %v477_v46 = vrot.slane %v402_v38, 2  ;;  %v474_v49 = vrot.slane %v401_v39, 2  ;;  %v484_v53 = vrot.slane %v408_v43, 2  ;;  %v475_v54 = vrot.slane %v403_v44, 2  ;;  %v12615_v38 = vld [vmem:[%s16812_s1 + $0x190] ss:$8 sps:$4 sm:$0xff]  }
  0x29   : > { %2325 = vmatpush1.bf16.msra.mxu1 %v12578_v55  ;;  %673 = vmatprep.subr.bf16.mxu0 %v12579_v58  ;;  %v480_v55 = vrot.slane %v405_v47, 2  ;;  %v12597_v58 = vld [vmem:[%s16812_s1 + $0x160] ss:$8 sps:$4 sm:$0xff]   ;;  %v12618_v39 = vld [vmem:[%s16812_s1 + $0x410] ss:$8 sps:$4 sm:$0xff]  }
  0x2a   : > { %2326 = vmatprep.subr.bf16.mxu1 %v12581_v59  ;;  %v12600_v59 = vld [vmem:[%s16812_s1 + $0x3e0] ss:$8 sps:$4 sm:$0xff]   ;;  %v476_v2 = vsel %vm449_vm0, %v474_v49, %v475_v54  ;;  %v12626_v43 = vld [vmem:[%s16812_s1 + $0x424] ss:$8 sps:$4 sm:$0xff]  }
  0x2b   : > { %v482_v6 = vsel %vm449_vm0, %v480_v55, %v481_v56  ;;  %v12621_v44 = vld [vmem:[%s16812_s1 + $0x1a0] ss:$8 sps:$4 sm:$0xff]   ;;  %v12632_v56 = vld [vmem:[%s16812_s1 + $0x434] ss:$8 sps:$4 sm:$0xff]  }
  0x2c   : > { %674 = vmatpush1.bf16.msra.mxu0 %v12583_v61  ;;  %v479_v61 = vsel %vm449_vm0, %v477_v46, %v478_v51  ;;  %v10559_v46 = vld [vmem:[%s13609_s20 + $0x258] sm:$0x11]  ;;  %v10560_v47 = vld [vmem:[%s13609_s20 + $0x280] sm:$0xee]  ;;  %v10561_v49 = vld [vmem:[%s13609_s20 + $0x288] sm:$0x11] }
  0x2d   : > { %2327 = vmatpush1.bf16.msra.mxu1 %v12584_v62  ;;  %1301 = vmatprep.subr.bf16.mxu0 %v12587_v9  ;;  %v485_v62 = vsel %vm449_vm0, %v483_v52, %v484_v53  ;;  %v412_v9 = vunpack.c.h.bf16 %v10495_v4  ;;  %v1035_v51 = vunpack.c.h.bf16 %v10559_v46  ;;  %v12624_v52 = vld [vmem:[%s16812_s1 + $0x420] ss:$8 sps:$4 sm:$0xff]   ;;  %v12629_v53 = vld [vmem:[%s16812_s1 + $0x1b4] ss:$8 sps:$4 sm:$0xff]   ;;  %v1037_v54 = vunpack.c.h.bf16 %v10560_v47  ;;  %v12630_v4 = vld [vmem:[%s16812_s1 + $0x430] ss:$8 sps:$4 sm:$0xff]  }
  0x2e   : > { %2562 = vmatprep.subr.bf16.mxu1 %v12590_v10  ;;  %v13729_v1 = vpack.c.bf16 %v485_v62, %v479_v61  ;;  %v414_v10 = vunpack.c.h.bf16 %v10496_v5  ;;  %v1039_v55 = vunpack.c.h.bf16 %v10561_v49  ;;  %v1034_v5 = vunpack.c.l.bf16 %v10559_v46 }
  0x2f   : > { %688 = vmatmul.mubr.bf16.vlgmr.msra.gmra.mrb[0].mxu0 %v13671_v23  ;;  %v490_v18 = vrot.slane %v412_v9, 2  ;;  %v1105_v61 = vrot.slane %v1037_v54, 2  ;;  %v1038_v7 = vunpack.c.l.bf16 %v10561_v49  ;;  %v12635_v9 = vld [vmem:[%s16812_s1 + $0x1c4] ss:$8 sps:$4 sm:$0xff]   ;;  %v12656_v49 = vld [vmem:[%s16812_s1 + $0xb4] ss:$8 sps:$4 sm:$0xff]  }
  0x30   : > { %2341 = vmatmul.mubr.bf16.vlgmr.msra.gmra.mrb[0].mxu1 %v13671_v23  ;;  %1302 = vmatpush1.bf16.msra.mxu0 %v12585_v24  ;;  %v495_v19 = vrot.slane %v414_v10, 2  ;;  %v496_v24 = vrot.slane %v416_v13, 2  ;;  %v1106_v62 = vrot.slane %v1039_v55, 2  ;;  %v12638_v10 = vld [vmem:[%s16812_s1 + $0x444] ss:$8 sps:$4 sm:$0xff]   ;;  %v1097_v15 = vrot.slane %v1034_v5, 2 }
  0x31   : > { %2563 = vmatpush1.bf16.msra.mxu1 %v12588_v26  ;;  %1303 = vmatprep.subr.bf16.mxu0 %v12593_v28  ;;  %v13758_v26 = vpack.c.bf16 %v482_v6, %v476_v2  ;;  %v491_v28 = vsel %vm449_vm0, %v489_v17, %v490_v18  ;;  %v1036_v6 = vunpack.c.l.bf16 %v10560_v47  ;;  %v12636_v13 = vld [vmem:[%s16812_s1 + $0x440] ss:$8 sps:$4 sm:$0xff]   ;;  %v1103_v17 = vrot.slane %v1038_v7, 2  ;;  %v12641_v18 = vld [vmem:[%s16812_s1 + $0x1d4] ss:$8 sps:$4 sm:$0xff]  }
  0x32   : > { %2564 = vmatprep.subr.bf16.mxu1 %v12596_v29  ;;  %10519 = vmatprep.mubr.msk.bf16.mxu0 %vm642_vm1, %v13692_v33  ;;  %v497_v29 = vsel %vm449_vm0, %v495_v19, %v496_v24  ;;  %v1107_v8 = vsel %vm449_vm0, %v1105_v61, %v1106_v62  ;;  %v12644_v19 = vld [vmem:[%s16812_s1 + $0x454] ss:$8 sps:$4 sm:$0xff]   ;;  %v12653_v24 = vld [vmem:[%s16812_s1 + $0x464] ss:$8 sps:$4 sm:$0xff]  }
  0x33   : > { %10803 = vmatprep.mubr.msk.bf16.mxu1 %vm642_vm1, %v13692_v33  ;;  %v13771_v37 = vpack.c.bf16 %v497_v29, %v491_v28  ;;  %v10562_v28 = vld [vmem:[%s13609_s20 + $0x2b0] sm:$0xee]  ;;  %v10563_v29 = vld [vmem:[%s13609_s20 + $0x2b8] sm:$0x11] }
  0x34   : > { %1304 = vmatpush1.bf16.msra.mxu0 %v12591_v32  ;;  %v492_v32 = vrot.slane %v413_v16, 2  ;;  %v1102_v16 = vrot.slane %v1036_v6, 2  ;;  %v12675_v61 = vld [vmem:[%s13609_s20 + $0x3dc] ss:$48 sps:$4 sm:$0xff]   ;;  %v10566_v6 = vld [vmem:[%s13609_s20 + $0x310] sm:$0xee] }
  0x35   : > { %2565 = vmatpush1.bf16.msra.mxu1 %v12594_v40  ;;  %1305 = vmatprep.subr.bf16.mxu0 %v12599_v45  ;;  %v488_v40 = vsel %vm449_vm0, %v486_v30, %v487_v31  ;;  %v10558_v45 = vld [vmem:[%s13609_s20 + $0x250] sm:$0xee]  ;;  %v10564_v30 = vld [vmem:[%s13609_s20 + $0x2e0] sm:$0xee]  ;;  %v10565_v31 = vld [vmem:[%s13609_s20 + $0x2e8] sm:$0x11] }
  0x36   : > { %2566 = vmatprep.subr.bf16.mxu1 %v12602_v50  ;;  %v494_v41 = vsel %vm449_vm0, %v492_v32, %v493_v34  ;;  %v1033_v50 = vunpack.c.h.bf16 %v10558_v45  ;;  %v1041_v32 = vunpack.c.h.bf16 %v10562_v28  ;;  %v1043_v34 = vunpack.c.h.bf16 %v10563_v29 }
  0x37   : > { %698 = vmatmul.mubr.bf16.gmra.mrb[4].mxu0 %v13713_v57  ;;  %v13799_v48 = vpack.c.bf16 %v494_v41, %v488_v40  ;;  %v1045_v40 = vunpack.c.h.bf16 %v10564_v30  ;;  %v1047_v41 = vunpack.c.h.bf16 %v10565_v31 }
  0x38   : > { %2351 = vmatmul.mubr.bf16.gmra.mrb[4].mxu1 %v13713_v57  ;;  %1306 = vmatpush1.bf16.msra.mxu0 %v12597_v58  ;;  %v1099_v58 = vrot.slane %v1033_v50, 2  ;;  %v1111_v46 = vrot.slane %v1041_v32, 2  ;;  %v1112_v47 = vrot.slane %v1043_v34, 2 }
  0x39   : > { %2567 = vmatpush1.bf16.msra.mxu1 %v12600_v59  ;;  %1307 = vmatprep.subr.bf16.mxu0 %v12605_v63  ;;  %v1100_v59 = vrot.slane %v1035_v51, 2  ;;  %v12627_v63 = vld [vmem:[%s16812_s1 + $0x1b0] ss:$8 sps:$4 sm:$0xff]   ;;  %v1117_v50 = vrot.slane %v1045_v40, 2  ;;  %v1118_v51 = vrot.slane %v1047_v41, 2 }
  0x3a   : > { %2568 = vmatprep.subr.bf16.mxu1 %v12608_v0  ;;  %10520 = vmatprep.mubr.msk.bf16.mxu0 %vm642_vm1, %v13729_v1  ;;  %v1032_v0 = vunpack.c.l.bf16 %v10558_v45  ;;  %v12669_v40 = vld [vmem:[%s16812_s1 + $0x490] ss:$8 sps:$4 sm:$0xff]  }
  0x3b   : > { %10804 = vmatprep.mubr.msk.bf16.mxu1 %vm642_vm1, %v13729_v1  ;;  %v1101_v2 = vsel %vm449_vm0, %v1099_v58, %v1100_v59  ;;  %v12654_v58 = vld [vmem:[%s16812_s1 + $0xb0] ss:$8 sps:$4 sm:$0xff]   ;;  %v1119_v59 = vsel %vm449_vm0, %v1117_v50, %v1118_v51  ;;  %v10572_v50 = vld [vmem:[%s13609_s20 + $0x3a0] sm:$0xee] }
  0x3c   : > { %1308 = vmatpush1.bf16.msra.mxu0 %v12603_v11  ;;  %v1161_v11 = vpack.c.bf16 %v1107_v8, %v1101_v2  ;;  %v1096_v14 = vrot.slane %v1032_v0, 2  ;;  %v10567_v8 = vld [vmem:[%s13609_s20 + $0x318] sm:$0x11]  ;;  %v12672_v51 = vld [vmem:[%s16812_s1 + $0xe0] ss:$8 sps:$4 sm:$0xff]  }
  0x3d   : > { %2569 = vmatpush1.bf16.msra.mxu1 %v12606_v12  ;;  %1309 = vmatprep.subr.bf16.mxu0 %v12611_v21  ;;  %v12633_v12 = vld [vmem:[%s16812_s1 + $0x1c0] ss:$8 sps:$4 sm:$0xff]   ;;  %v12642_v21 = vld [vmem:[%s16812_s1 + $0x450] ss:$8 sps:$4 sm:$0xff]  }
  0x3e   : > { %2570 = vmatprep.subr.bf16.mxu1 %v12614_v22  ;;  %v12647_v22 = vld [vmem:[%s16812_s1 + $0xa4] ss:$8 sps:$4 sm:$0xff]  }
  0x3f   : > { %708 = vmatmul.mubr.bf16.gmra.mrb[8].mxu0 %v13758_v26 }
  0x40   : > { %2361 = vmatmul.mubr.bf16.gmra.mrb[8].mxu1 %v13758_v26  ;;  %1310 = vmatpush1.bf16.msra.mxu0 %v12609_v25  ;;  %v1098_v25 = vsel %vm449_vm0, %v1096_v14, %v1097_v15  ;;  %v1051_v14 = vunpack.c.h.bf16 %v10567_v8 }
  0x41   : > { %2571 = vmatpush1.bf16.msra.mxu1 %v12612_v27  ;;  %1311 = vmatprep.subr.bf16.mxu0 %v12617_v35  ;;  %v1104_v27 = vsel %vm449_vm0, %v1102_v16, %v1103_v17  ;;  %v1040_v35 = vunpack.c.l.bf16 %v10562_v28  ;;  %v1050_v17 = vunpack.c.l.bf16 %v10567_v8 }
  0x42   : > { %2572 = vmatprep.subr.bf16.mxu1 %v12620_v36  ;;  %10521 = vmatprep.mubr.msk.bf16.mxu0 %vm642_vm1, %v13771_v37  ;;  %v1042_v36 = vunpack.c.l.bf16 %v10563_v29  ;;  %v1160_v45 = vpack.c.bf16 %v1104_v27, %v1098_v25  ;;  %v1124_v25 = vrot.slane %v1051_v14, 2  ;;  %v12668_v29 = vld [vmem:[%s16812_s1 + $0xd4] ss:$8 sps:$4 sm:$0xff]   ;;  %v12681_v14 = vld [vmem:[%s16812_s1 + $0xf0] ss:$8 sps:$4 sm:$0xff]  }
  0x43   : > { %10805 = vmatprep.mubr.msk.bf16.mxu1 %vm642_vm1, %v13771_v37  ;;  %v1108_v54 = vrot.slane %v1040_v35, 2  ;;  %v12690_v35 = vld [vmem:[%s13609_s20 + $0x43c] ss:$48 sps:$4 sm:$0xff]  }
  0x44   : > { %1312 = vmatpush1.bf16.msra.mxu0 %v12615_v38  ;;  %v12645_v38 = vld [vmem:[%s16812_s1 + $0xa0] ss:$8 sps:$4 sm:$0xff]   ;;  %v1109_v55 = vrot.slane %v1042_v36, 2 }
  0x45   : > { %2573 = vmatpush1.bf16.msra.mxu1 %v12618_v39  ;;  %1313 = vmatprep.subr.bf16.mxu0 %v12623_v42  ;;  %v12648_v39 = vld [vmem:[%s13609_s20 + $0x378] ss:$48 sps:$4 sm:$0xff]   ;;  %v1044_v42 = vunpack.c.l.bf16 %v10564_v30  ;;  %v12671_v30 = vld [vmem:[%s16812_s1 + $0x494] ss:$8 sps:$4 sm:$0xff]  }
  0x46   : > { %2574 = vmatprep.subr.bf16.mxu1 %v12626_v43  ;;  %v1046_v43 = vunpack.c.l.bf16 %v10565_v31  ;;  %v1110_v2 = vsel %vm449_vm0, %v1108_v54, %v1109_v55  ;;  %v1121_v31 = vrot.slane %v1050_v17, 2  ;;  %v1061_v55 = vunpack.c.h.bf16 %v10572_v50 }
  0x47   : > { %718 = vmatmul.mubr.bf16.gmra.mrb[12].mxu0 %v13799_v48 }
  0x48   : > { %2371 = vmatmul.mubr.bf16.gmra.mrb[12].mxu1 %v13799_v48  ;;  %1314 = vmatpush1.bf16.msra.mxu0 %v12621_v44  ;;  %v12651_v44 = vld [vmem:[%s16812_s1 + $0x460] ss:$8 sps:$4 sm:$0xff]   ;;  %v1115_v62 = vrot.slane %v1046_v43, 2  ;;  %v12674_v43 = vld [vmem:[%s16812_s1 + $0xe4] ss:$8 sps:$4 sm:$0xff]  }
  0x49   : > { %2575 = vmatpush1.bf16.msra.mxu1 %v12624_v52  ;;  %1315 = vmatprep.subr.bf16.mxu0 %v12629_v53  ;;  %v12659_v52 = vld [vmem:[%s16812_s1 + $0x474] ss:$8 sps:$4 sm:$0xff]   ;;  %v1113_v53 = vsel %vm449_vm0, %v1111_v46, %v1112_v47 }
  0x4a   : > { %2576 = vmatprep.subr.bf16.mxu1 %v12632_v56  ;;  %10862 = vmatprep.mubr.msk.bf16.mxu1 %vm642_vm1, %v12650_v3  ;;  %v1114_v56 = vrot.slane %v1044_v42, 2  ;;  %v1163_v0 = vpack.c.bf16 %v1119_v59, %v1113_v53  ;;  %v12662_v3 = vld [vmem:[%s16812_s1 + $0xc4] ss:$8 sps:$4 sm:$0xff]   ;;  %v10570_v47 = vld [vmem:[%s13609_s20 + $0x370] sm:$0xee] }
  0x4b   : > { %10614 = vmatprep.mubr.msk.bf16.mxu0 %vm642_vm1, %v1161_v11  ;;  %v1049_v11 = vunpack.c.h.bf16 %v10566_v6  ;;  %v1057_v53 = vunpack.c.h.bf16 %v10570_v47  ;;  %v12695_v59 = vld [vmem:[%s13609_s20 + $0x438] ss:$48 sps:$4 sm:$0xff]  }
  0x4c   : > { %1316 = vmatpush1.bf16.msra.mxu0 %v12627_v63  ;;  %v12657_v63 = vld [vmem:[%s16812_s1 + $0x470] ss:$8 sps:$4 sm:$0xff]   ;;  %v1116_v5 = vsel %vm449_vm0, %v1114_v56, %v1115_v62  ;;  %v1056_v56 = vunpack.c.l.bf16 %v10570_v47 }
  0x4d   : > { %2577 = vmatpush1.bf16.msra.mxu1 %v12630_v4  ;;  %1317 = vmatprep.subr.bf16.mxu0 %v12635_v9  ;;  %v12665_v4 = vld [vmem:[%s16812_s1 + $0x484] ss:$8 sps:$4 sm:$0xff]   ;;  %v1162_v7 = vpack.c.bf16 %v1116_v5, %v1110_v2  ;;  %v12683_v2 = vld [vmem:[%s16812_s1 + $0xf4] ss:$8 sps:$4 sm:$0xff]   ;;  %v1141_v5 = vrot.slane %v1061_v55, 2 }
  0x4e   : > { %2578 = vmatprep.subr.bf16.mxu1 %v12638_v10  ;;  %v10568_v9 = vld [vmem:[%s13609_s20 + $0x340] sm:$0xee]  ;;  %v10569_v10 = vld [vmem:[%s13609_s20 + $0x348] sm:$0x11]  ;;  %v1132_v8 = vrot.slane %v1056_v56, 2 }
  0x4f   : > { %v1053_v15 = vunpack.c.h.bf16 %v10568_v9  ;;  %v1055_v16 = vunpack.c.h.bf16 %v10569_v10  ;;  %v10867_v47 = vld [vmem:[%s13609_s20 + $0x490] sm:$0x33] }
  0x50   : > { %1318 = vmatpush1.bf16.msra.mxu0 %v12633_v12  ;;  %v1048_v12 = vunpack.c.l.bf16 %v10566_v6  ;;  %v12686_v6 = vld [vmem:[%s16812_s1 + $0x4b4] ss:$8 sps:$4 sm:$0xff]   ;;  %v12696_v55 = vld [vmem:[%s16812_s1 + $0x110] ss:$8 sps:$4 sm:$0xff]  }
  0x51   : > { %2579 = vmatpush1.bf16.msra.mxu1 %v12636_v13  ;;  %1319 = vmatprep.subr.bf16.mxu0 %v12641_v18  ;;  %v12660_v13 = vld [vmem:[%s16812_s1 + $0xc0] ss:$8 sps:$4 sm:$0xff]   ;;  %v1129_v27 = vrot.slane %v1053_v15, 2  ;;  %v1130_v28 = vrot.slane %v1055_v16, 2  ;;  %v12684_v16 = vld [vmem:[%s16812_s1 + $0x4b0] ss:$8 sps:$4 sm:$0xff]  }
  0x52   : > { %2580 = vmatprep.subr.bf16.mxu1 %v12644_v19  ;;  %v12680_v18 = vld [vmem:[%s13609_s20 + $0x3d8] ss:$48 sps:$4 sm:$0xff]   ;;  %v1123_v19 = vrot.slane %v1049_v11, 2 }
  0x53   : > { %v1131_v34 = vsel %vm449_vm0, %v1129_v27, %v1130_v28  ;;  %v10523_v27 = vld [vmem:[%s13609_s20 + $0x250] sm:$0x33]  ;;  %v10524_v28 = vld [vmem:[%s13609_s20 + $0x278] sm:$0xcc] }
  0x54   : > { %1320 = vmatpush1.bf16.msra.mxu0 %v12639_v20  ;;  %v1052_v20 = vunpack.c.l.bf16 %v10568_v9  ;;  %v1125_v32 = vsel %vm449_vm0, %v1123_v19, %v1124_v25  ;;  %v12692_v25 = vld [vmem:[%s16812_s1 + $0x4c0] ss:$8 sps:$4 sm:$0xff]  }
  0x55   : > { %2581 = vmatpush1.bf16.msra.mxu1 %v12642_v21  ;;  %1486 = vmatprep.subr.bf16.mxu0 %v12647_v22  ;;  %v1054_v21 = vunpack.c.l.bf16 %v10569_v10  ;;  %v1120_v22 = vrot.slane %v1048_v12, 2  ;;  %v1165_v41 = vpack.c.bf16 %v1131_v34, %v1125_v32  ;;  %v12705_v10 = vld [vmem:[%s13609_s20 + $0x49c] ss:$48 sps:$4 sm:$0xff]   ;;  %v12710_v32 = vld [vmem:[%s13609_s20 + $0x498] ss:$48 sps:$4 sm:$0xff]   ;;  %v861_v34 = vunpack.c.h.bf16 %v10523_v27 }
  0x56   : > { %2940 = vmatprep.subr.bf16.mxu1 %v12653_v24  ;;  %v12663_v24 = vld [vmem:[%s16812_s1 + $0x480] ss:$8 sps:$4 sm:$0xff]   ;;  %v1126_v36 = vrot.slane %v1052_v20, 2  ;;  %v12689_v20 = vld [vmem:[%s16812_s1 + $0x104] ss:$8 sps:$4 sm:$0xff]  }
  0x57   : > { %1334 = vmatmul.mubr.bf16.vlgmr.msra.gmra.mrb[16].mxu0 %v1160_v45  ;;  %v1122_v42 = vsel %vm449_vm0, %v1120_v22, %v1121_v31  ;;  %v10522_v22 = vld [vmem:[%s13609_s20 + $0x248] sm:$0xcc] }
  0x58   : > { %2595 = vmatmul.mubr.bf16.vlgmr.msra.gmra.mrb[0].mxu1 %v12648_v39  ;;  %1487 = vmatpush1.bf16.msra.mxu0 %v12645_v38  ;;  %v1127_v38 = vrot.slane %v1054_v21, 2  ;;  %v12666_v39 = vld [vmem:[%s16812_s1 + $0xd0] ss:$8 sps:$4 sm:$0xff]   ;;  %v12694_v21 = vld [vmem:[%s16812_s1 + $0x4c4] ss:$8 sps:$4 sm:$0xff]  }
  0x59   : > { %2941 = vmatpush1.bf16.msra.mxu1 %v12651_v44  ;;  %1488 = vmatprep.subr.bf16.mxu0 %v12656_v49  ;;  %v12679_v44 = vld [vmem:[%s16812_s1 + $0x4a4] ss:$8 sps:$4 sm:$0xff]   ;;  %v10571_v49 = vld [vmem:[%s13609_s20 + $0x378] sm:$0x11] }
  0x5a   : > { %2942 = vmatprep.subr.bf16.mxu1 %v12659_v52  ;;  %10615 = vmatprep.mubr.msk.bf16.mxu0 %vm642_vm1, %v1163_v0  ;;  %v1128_v45 = vsel %vm449_vm0, %v1126_v36, %v1127_v38  ;;  %v10573_v52 = vld [vmem:[%s13609_s20 + $0x3a8] sm:$0x11]  ;;  %v1059_v54 = vunpack.c.h.bf16 %v10571_v49  ;;  %v1058_v62 = vunpack.c.l.bf16 %v10571_v49  ;;  %v12698_v36 = vld [vmem:[%s16812_s1 + $0x114] ss:$8 sps:$4 sm:$0xff]   ;;  %v858_v38 = vunpack.c.l.bf16 %v10522_v22 }
  0x5b   : > { %10863 = vmatprep.mubr.msk.bf16.mxu1 %vm642_vm1, %v12675_v61  ;;  %v1164_v46 = vpack.c.bf16 %v1128_v45, %v1122_v42  ;;  %v1063_v61 = vunpack.c.h.bf16 %v10573_v52  ;;  %v1062_v0 = vunpack.c.l.bf16 %v10573_v52  ;;  %v12701_v42 = vld [vmem:[%s16812_s1 + $0x4d4] ss:$8 sps:$4 sm:$0xff]   ;;  %v927_v45 = vrot.slane %v861_v34, 4  ;;  %v10869_v52 = vld [vmem:[%s13609_s20 + $0x4c0] sm:$0x33] }
  0x5c   : > { %1489 = vmatpush1.bf16.msra.mxu0 %v12654_v58  ;;  %v12677_v58 = vld [vmem:[%s16812_s1 + $0x4a0] ss:$8 sps:$4 sm:$0xff]   ;;  %v1133_v11 = vrot.slane %v1058_v62, 2  ;;  %v12699_v62 = vld [vmem:[%s16812_s1 + $0x4d0] ss:$8 sps:$4 sm:$0xff]  }
  0x5d   : > { %2943 = vmatpush1.bf16.msra.mxu1 %v12657_v63  ;;  %1490 = vmatprep.subr.bf16.mxu0 %v12662_v3  ;;  %v1060_v63 = vunpack.c.l.bf16 %v10572_v50  ;;  %v1135_v3 = vrot.slane %v1057_v53, 2 }
  0x5e   : > { %2944 = vmatprep.subr.bf16.mxu1 %v12665_v4  ;;  %v1136_v4 = vrot.slane %v1059_v54, 2 }
  0x5f   : > { %1344 = vmatmul.mubr.bf16.gmra.mrb[20].mxu0 %v1162_v7  ;;  %v1142_v7 = vrot.slane %v1063_v61, 2  ;;  %v1138_v12 = vrot.slane %v1060_v63, 2 }
  0x60   : > { %2605 = vmatmul.mubr.bf16.gmra.mrb[4].mxu1 %v12680_v18  ;;  %1491 = vmatpush1.bf16.msra.mxu0 %v12660_v13  ;;  %v1137_v9 = vsel %vm449_vm0, %v1135_v3, %v1136_v4  ;;  %v1139_v13 = vrot.slane %v1062_v0, 2  ;;  %v1134_v18 = vsel %vm449_vm0, %v1132_v8, %v1133_v11  ;;  %v2678_v3 = vunpack.c.h.bf16 %v10869_v52  ;;  %v12704_v4 = vld [vmem:[%s16812_s1 + $0x124] ss:$8 sps:$4 sm:$0xff]   ;;  %v12702_v8 = vld [vmem:[%s16812_s1 + $0x120] ss:$8 sps:$4 sm:$0xff]  }
  0x61   : > { %2945 = vmatpush1.bf16.msra.mxu1 %v12663_v24  ;;  %1492 = vmatprep.subr.bf16.mxu0 %v12668_v29  ;;  %v1143_v15 = vsel %vm449_vm0, %v1141_v5, %v1142_v7  ;;  %v12687_v24 = vld [vmem:[%s16812_s1 + $0x100] ss:$8 sps:$4 sm:$0xff]   ;;  %v12709_v5 = vld [vmem:[%s16812_s1 + $0x4e4] ss:$8 sps:$4 sm:$0xff]  }
  0x62   : > { %2946 = vmatprep.subr.bf16.mxu1 %v12671_v30  ;;  %10616 = vmatprep.mubr.msk.bf16.mxu0 %vm642_vm1, %v1165_v41  ;;  %v1167_v17 = vpack.c.bf16 %v1143_v15, %v1137_v9  ;;  %v1140_v19 = vsel %vm449_vm0, %v1138_v12, %v1139_v13  ;;  %v10525_v29 = vld [vmem:[%s13609_s20 + $0x280] sm:$0x33]  ;;  %v859_v30 = vunpack.c.h.bf16 %v10522_v22  ;;  %v10866_v41 = vld [vmem:[%s13609_s20 + $0x488] sm:$0xcc] }
  0x63   : > { %10864 = vmatprep.mubr.msk.bf16.mxu1 %vm642_vm1, %v12690_v35  ;;  %v1166_v31 = vpack.c.bf16 %v1140_v19, %v1134_v18  ;;  %v863_v35 = vunpack.c.h.bf16 %v10524_v28  ;;  %v864_v49 = vunpack.c.l.bf16 %v10525_v29  ;;  %v2671_v53 = vunpack.c.l.bf16 %v10866_v41  ;;  %v12707_v9 = vld [vmem:[%s16812_s1 + $0x4e0] ss:$8 sps:$4 sm:$0xff]  }
  0x64   : > { %1493 = vmatpush1.bf16.msra.mxu0 %v12666_v39  ;;  %v865_v39 = vunpack.c.h.bf16 %v10525_v29  ;;  %v2672_v54 = vunpack.c.h.bf16 %v10866_v41  ;;  %v2745_v18 = vrot.slane %v2678_v3, 4  ;;  %v12714_v29 = vld [vmem:[%s16812_s1 + $0x4f0] ss:$8 sps:$4 sm:$0xff]   ;;  %v12720_v41 = vld [vmem:[%s16812_s1 + $0x500] ss:$8 sps:$4 sm:$0xff]  }
  0x65   : > { %2947 = vmatpush1.bf16.msra.mxu1 %v12669_v40  ;;  %1494 = vmatprep.subr.bf16.mxu0 %v12674_v43  ;;  %v926_v40 = vrot.slane %v859_v30, 4  ;;  %v860_v43 = vunpack.c.l.bf16 %v10523_v27  ;;  %v10873_v3 = vld [vmem:[%s13609_s20 + $0x520] sm:$0x33] }
  0x66   : > { %2948 = vmatprep.subr.bf16.mxu1 %v12679_v44  ;;  %v862_v44 = vunpack.c.l.bf16 %v10524_v28  ;;  %v933_v50 = vrot.slane %v865_v39, 4  ;;  %v2738_v7 = vrot.slane %v2672_v54, 4  ;;  %v12711_v28 = vld [vmem:[%s16812_s1 + $0x130] ss:$8 sps:$4 sm:$0xff]  }
  0x67   : > { %1354 = vmatmul.mubr.bf16.gmra.mrb[24].mxu0 %v1164_v46  ;;  %v932_v46 = vrot.slane %v863_v35, 4  ;;  %v928_v56 = vsel %vm922_vm2, %v926_v40, %v927_v45  ;;  %v924_v11 = vrot.slane %v860_v43, 4  ;;  %v10527_v39 = vld [vmem:[%s13609_s20 + $0x2b0] sm:$0x33]  ;;  %v12717_v40 = vld [vmem:[%s16812_s1 + $0x1e0] ss:$8 sps:$4 sm:$0xff]  }
  0x68   : > { %2615 = vmatmul.mubr.bf16.gmra.mrb[8].mxu1 %v12695_v59  ;;  %1495 = vmatpush1.bf16.msra.mxu0 %v12672_v51  ;;  %v10868_v51 = vld [vmem:[%s13609_s20 + $0x4b8] sm:$0xcc]  ;;  %v2674_v59 = vunpack.c.h.bf16 %v10867_v47  ;;  %v929_v15 = vrot.slane %v862_v44, 4  ;;  %v10529_v44 = vld [vmem:[%s13609_s20 + $0x2e0] sm:$0x33]  ;;  %v868_v54 = vunpack.c.l.bf16 %v10527_v39 }
  0x69   : > { %2949 = vmatpush1.bf16.msra.mxu1 %v12677_v58  ;;  %1496 = vmatprep.subr.bf16.mxu0 %v12683_v2  ;;  %v2673_v58 = vunpack.c.l.bf16 %v10867_v47  ;;  %v2675_v61 = vunpack.c.l.bf16 %v10868_v51  ;;  %v934_v63 = vsel %vm922_vm2, %v932_v46, %v933_v50  ;;  %v2676_v0 = vunpack.c.h.bf16 %v10868_v51  ;;  %v10528_v43 = vld [vmem:[%s13609_s20 + $0x2d8] sm:$0xcc] }
  0x6a   : > { %2950 = vmatprep.subr.bf16.mxu1 %v12686_v6  ;;  %10617 = vmatprep.mubr.msk.bf16.mxu0 %vm642_vm1, %v1167_v17  ;;  %v2677_v2 = vunpack.c.l.bf16 %v10869_v52  ;;  %v988_v6 = vpack.c.bf16 %v934_v63, %v928_v56  ;;  %v2739_v12 = vrot.slane %v2674_v59, 4  ;;  %v2735_v17 = vrot.slane %v2671_v53, 4  ;;  %v12725_v50 = vld [vmem:[%s16812_s1 + $0x1f4] ss:$8 sps:$4 sm:$0xff]  }
  0x6b   : > { %10865 = vmatprep.mubr.msk.bf16.mxu1 %vm642_vm1, %v12705_v10  ;;  %v923_v10 = vrot.slane %v858_v38, 4  ;;  %v2744_v13 = vrot.slane %v2676_v0, 4  ;;  %v2736_v19 = vrot.slane %v2673_v58, 4  ;;  %v10526_v38 = vld [vmem:[%s13609_s20 + $0x2a8] sm:$0xcc]  ;;  %v869_v46 = vunpack.c.h.bf16 %v10527_v39 }
  0x6c   : > { %1497 = vmatpush1.bf16.msra.mxu0 %v12681_v14  ;;  %v12713_v14 = vld [vmem:[%s16812_s1 + $0x134] ss:$8 sps:$4 sm:$0xff]   ;;  %v2742_v22 = vrot.slane %v2677_v2, 4  ;;  %v867_v45 = vunpack.c.h.bf16 %v10526_v38  ;;  %v866_v47 = vunpack.c.l.bf16 %v10526_v38  ;;  %v871_v52 = vunpack.c.h.bf16 %v10528_v43  ;;  %v10870_v58 = vld [vmem:[%s13609_s20 + $0x4e8] sm:$0xcc] }
  0x6d   : > { %2951 = vmatpush1.bf16.msra.mxu1 %v12684_v16  ;;  %1498 = vmatprep.subr.bf16.mxu0 %v12689_v20  ;;  %v930_v16 = vrot.slane %v864_v49, 4  ;;  %v2740_v20 = vsel %vm922_vm2, %v2738_v7, %v2739_v12  ;;  %v925_v30 = vsel %vm922_vm2, %v923_v10, %v924_v11  ;;  %v2737_v34 = vsel %vm922_vm2, %v2735_v17, %v2736_v19  ;;  %v12728_v51 = vld [vmem:[%s16812_s1 + $0x514] ss:$8 sps:$4 sm:$0xff]   ;;  %v12726_v11 = vld [vmem:[%s16812_s1 + $0x510] ss:$8 sps:$4 sm:$0xff]  }
  0x6e   : > { %2952 = vmatprep.subr.bf16.mxu1 %v12694_v21  ;;  %v2741_v21 = vrot.slane %v2675_v61, 4  ;;  %v873_v53 = vunpack.c.h.bf16 %v10529_v44  ;;  %v939_v56 = vrot.slane %v869_v46, 4  ;;  %v10871_v59 = vld [vmem:[%s13609_s20 + $0x4f0] sm:$0x33]  ;;  %v870_v61 = vunpack.c.l.bf16 %v10528_v43  ;;  %v10872_v2 = vld [vmem:[%s13609_s20 + $0x518] sm:$0xcc] }
  0x6f   : > { %1364 = vmatmul.mubr.bf16.gmra.mrb[28].mxu0 %v1166_v31  ;;  %v931_v31 = vsel %vm922_vm2, %v929_v15, %v930_v16  ;;  %v944_v63 = vrot.slane %v871_v52, 4  ;;  %v935_v10 = vrot.slane %v866_v47, 4  ;;  %v936_v15 = vrot.slane %v868_v54, 4  ;;  %v12731_v16 = vld [vmem:[%s16812_s1 + $0x204] ss:$8 sps:$4 sm:$0xff]  }
  0x70   : > { %2625 = vmatmul.mubr.bf16.gmra.mrb[12].mxu1 %v12710_v32  ;;  %1499 = vmatpush1.bf16.msra.mxu0 %v12687_v24  ;;  %v12716_v24 = vld [vmem:[%s16812_s1 + $0x4f4] ss:$8 sps:$4 sm:$0xff]   ;;  %v12719_v32 = vld [vmem:[%s16812_s1 + $0x1e4] ss:$8 sps:$4 sm:$0xff]   ;;  %v2743_v35 = vsel %vm922_vm2, %v2741_v21, %v2742_v22  ;;  %v945_v0 = vrot.slane %v873_v53, 4 }
  0x71   : > { %2953 = vmatpush1.bf16.msra.mxu1 %v12692_v25  ;;  %1500 = vmatprep.subr.bf16.mxu0 %v12698_v36  ;;  %v2746_v25 = vsel %vm922_vm2, %v2744_v13, %v2745_v18  ;;  %v12722_v36 = vld [vmem:[%s16812_s1 + $0x504] ss:$8 sps:$4 sm:$0xff]   ;;  %v2799_v49 = vpack.c.bf16 %v2743_v35, %v2737_v34  ;;  %v2685_v34 = vunpack.c.l.bf16 %v10873_v3 }
  0x72   : > { %2954 = vmatprep.subr.bf16.mxu1 %v12701_v42  ;;  %10638 = vmatprep.mubr.msk.bf16.mxu0 %vm642_vm1, %v988_v6  ;;  %v2800_v27 = vpack.c.bf16 %v2746_v25, %v2740_v20  ;;  %v987_v42 = vpack.c.bf16 %v931_v31, %v925_v30  ;;  %v12723_v6 = vld [vmem:[%s16812_s1 + $0x1f0] ss:$8 sps:$4 sm:$0xff]   ;;  %v946_v12 = vsel %vm922_vm2, %v944_v63, %v945_v0  ;;  %v941_v20 = vrot.slane %v870_v61, 4  ;;  %v12734_v21 = vld [vmem:[%s16812_s1 + $0x524] ss:$8 sps:$4 sm:$0xff]  }
  0x73   : > { %v2681_v31 = vunpack.c.l.bf16 %v10871_v59  ;;  %v10530_v35 = vld [vmem:[%s13609_s20 + $0x308] sm:$0xcc]  ;;  %v2754_v46 = vrot.slane %v2685_v34, 4  ;;  %v10533_v47 = vld [vmem:[%s13609_s20 + $0x340] sm:$0x33] }
  0x74   : > { %1501 = vmatpush1.bf16.msra.mxu0 %v12696_v55  ;;  %10922 = vmatprep.mubr.msk.bf16.mxu1 %vm642_vm1, %v2800_v27  ;;  %v938_v55 = vrot.slane %v867_v45, 4  ;;  %v2679_v27 = vunpack.c.l.bf16 %v10870_v58  ;;  %v881_v53 = vunpack.c.h.bf16 %v10533_v47  ;;  %v10876_v61 = vld [vmem:[%s13609_s20 + $0x578] sm:$0xcc] }
  0x75   : > { %2955 = vmatpush1.bf16.msra.mxu1 %v12699_v62  ;;  %1502 = vmatprep.subr.bf16.mxu0 %v12704_v4  ;;  %v872_v62 = vunpack.c.l.bf16 %v10529_v44  ;;  %v2680_v4 = vunpack.c.h.bf16 %v10870_v58  ;;  %v2748_v44 = vrot.slane %v2681_v31, 4  ;;  %v10874_v58 = vld [vmem:[%s13609_s20 + $0x548] sm:$0xcc]  ;;  %v12752_v31 = vld [vmem:[%s16812_s1 + $0x554] ss:$8 sps:$4 sm:$0xff]  }
  0x76   : > { %2956 = vmatprep.subr.bf16.mxu1 %v12709_v5  ;;  %v2682_v5 = vunpack.c.h.bf16 %v10871_v59  ;;  %v940_v7 = vsel %vm922_vm2, %v938_v55, %v939_v56  ;;  %v2747_v39 = vrot.slane %v2679_v27, 4  ;;  %v10875_v59 = vld [vmem:[%s13609_s20 + $0x550] sm:$0x33] }
  0x77   : > { %v2750_v13 = vrot.slane %v2680_v4, 4  ;;  %v990_v17 = vpack.c.bf16 %v946_v12, %v940_v7  ;;  %v942_v25 = vrot.slane %v872_v62, 4  ;;  %v874_v62 = vunpack.c.l.bf16 %v10530_v35  ;;  %v12738_v7 = vld [vmem:[%s16812_s1 + $0x530] ss:$8 sps:$4 sm:$0xff]   ;;  %v12743_v12 = vld [vmem:[%s16812_s1 + $0x224] ss:$8 sps:$4 sm:$0xff]  }
  0x78   : > { %1503 = vmatpush1.bf16.msra.mxu0 %v12702_v8  ;;  %v2684_v8 = vunpack.c.h.bf16 %v10872_v2  ;;  %v2749_v55 = vsel %vm922_vm2, %v2747_v39, %v2748_v44  ;;  %v957_v4 = vrot.slane %v881_v53, 4  ;;  %v14129_v44 = vld [vmem:[%s13609_s20 + $0x398] sm:$0xcc] }
  0x79   : > { %2957 = vmatpush1.bf16.msra.mxu1 %v12707_v9  ;;  %1504 = vmatprep.subr.bf16.mxu0 %v12713_v14  ;;  %v2686_v9 = vunpack.c.h.bf16 %v10873_v3  ;;  %v2751_v14 = vrot.slane %v2682_v5, 4  ;;  %v943_v38 = vsel %vm922_vm2, %v941_v20, %v942_v25  ;;  %v10877_v5 = vld [vmem:[%s13609_s20 + $0x580] sm:$0x33]  ;;  %v12749_v25 = vld [vmem:[%s16812_s1 + $0x234] ss:$8 sps:$4 sm:$0xff]  }
  0x7a   : > { %2958 = vmatprep.subr.bf16.mxu1 %v12716_v24  ;;  %v2756_v18 = vrot.slane %v2684_v8, 4  ;;  %v937_v24 = vsel %vm922_vm2, %v935_v10, %v936_v15  ;;  %v2688_v8 = vunpack.c.h.bf16 %v10874_v58  ;;  %v2692_v10 = vunpack.c.h.bf16 %v10876_v61 }
  0x7b   : > { %v2757_v19 = vrot.slane %v2686_v9, 4  ;;  %v2752_v22 = vsel %vm922_vm2, %v2750_v13, %v2751_v14  ;;  %v989_v43 = vpack.c.bf16 %v943_v38, %v937_v24  ;;  %v2690_v9 = vunpack.c.h.bf16 %v10875_v59  ;;  %v12746_v13 = vld [vmem:[%s16812_s1 + $0x544] ss:$8 sps:$4 sm:$0xff]  }
  0x7c   : > { %1505 = vmatpush1.bf16.msra.mxu0 %v12711_v28  ;;  %v12729_v28 = vld [vmem:[%s16812_s1 + $0x200] ss:$8 sps:$4 sm:$0xff]   ;;  %v2768_v24 = vrot.slane %v2692_v10, 4 }
  0x7d   : > { %2959 = vmatpush1.bf16.msra.mxu1 %v12714_v29  ;;  %1724 = vmatprep.subr.bf16.mxu0 %v12719_v32  ;;  %v12732_v29 = vld [vmem:[%s16812_s1 + $0x520] ss:$8 sps:$4 sm:$0xff]   ;;  %v2758_v30 = vsel %vm922_vm2, %v2756_v18, %v2757_v19  ;;  %v2683_v32 = vunpack.c.l.bf16 %v10872_v2 }
  0x7e   : > { %3314 = vmatprep.subr.bf16.mxu1 %v12722_v36  ;;  %v2802_v36 = vpack.c.bf16 %v2758_v30, %v2752_v22  ;;  %v12741_v18 = vld [vmem:[%s16812_s1 + $0x220] ss:$8 sps:$4 sm:$0xff]   ;;  %v2763_v22 = vrot.slane %v2690_v9, 4 }
  0x7f   : > { %1519 = vmatmul.mubr.bf16.vlgmr.msra.gmra.mrb[16].mxu0 %v987_v42  ;;  %v875_v42 = vunpack.c.h.bf16 %v10530_v35  ;;  %v2753_v45 = vrot.slane %v2683_v32, 4  ;;  %v12744_v19 = vld [vmem:[%s16812_s1 + $0x540] ss:$8 sps:$4 sm:$0xff]   ;;  %v2687_v35 = vunpack.c.l.bf16 %v10874_v58 }
  0x80   : > { %2973 = vmatmul.mubr.bf16.vlgmr.msra.gmra.mrb[0].mxu1 %v2799_v49  ;;  %1725 = vmatpush1.bf16.msra.mxu0 %v12717_v40  ;;  %v10531_v40 = vld [vmem:[%s13609_s20 + $0x310] sm:$0x33]  ;;  %v14121_v38 = vld [vmem:[%s13609_s20 + $0x368] sm:$0xcc] }
  0x81   : > { %3315 = vmatpush1.bf16.msra.mxu1 %v12720_v41  ;;  %1726 = vmatprep.subr.bf16.mxu0 %v12725_v50  ;;  %v10532_v41 = vld [vmem:[%s13609_s20 + $0x338] sm:$0xcc]  ;;  %v950_v54 = vrot.slane %v875_v42, 4  ;;  %v2755_v56 = vsel %vm922_vm2, %v2753_v45, %v2754_v46  ;;  %v876_v63 = vunpack.c.l.bf16 %v10531_v40  ;;  %v2693_v42 = vunpack.c.l.bf16 %v10877_v5  ;;  %v14132_v45 = vld [vmem:[%s13609_s20 + $0x3a0] sm:$0x33] }
  0x82   : > { %3316 = vmatprep.subr.bf16.mxu1 %v12728_v51  ;;  %10639 = vmatprep.mubr.msk.bf16.mxu0 %vm642_vm1, %v990_v17  ;;  %v12737_v49 = vld [vmem:[%s16812_s1 + $0x214] ss:$8 sps:$4 sm:$0xff]   ;;  %v877_v51 = vunpack.c.h.bf16 %v10531_v40  ;;  %v879_v52 = vunpack.c.h.bf16 %v10532_v41  ;;  %v2801_v0 = vpack.c.bf16 %v2755_v56, %v2749_v55  ;;  %v880_v17 = vunpack.c.l.bf16 %v10533_v47  ;;  %v12747_v46 = vld [vmem:[%s16812_s1 + $0x230] ss:$8 sps:$4 sm:$0xff]   ;;  %v14144_v58 = vld [vmem:[%s13609_s20 + $0x5a8] sm:$0xcc] }
  0x83   : > { %v12740_v50 = vld [vmem:[%s16812_s1 + $0x534] ss:$8 sps:$4 sm:$0xff]   ;;  %10923 = vmatprep.mubr.msk.bf16.mxu1 %vm642_vm1, %v2802_v36  ;;  %v2689_v36 = vunpack.c.l.bf16 %v10875_v59  ;;  %v12750_v47 = vld [vmem:[%s16812_s1 + $0x550] ss:$8 sps:$4 sm:$0xff]   ;;  %v2766_v55 = vrot.slane %v2693_v42, 4  ;;  %v883_v56 = vunpack.c.h.bf16 %v14121_v38 }
  0x84   : > { %1727 = vmatpush1.bf16.msra.mxu0 %v12723_v6  ;;  %v951_v2 = vrot.slane %v877_v51, 4  ;;  %v956_v3 = vrot.slane %v879_v52, 4  ;;  %v12735_v6 = vld [vmem:[%s16812_s1 + $0x210] ss:$8 sps:$4 sm:$0xff]   ;;  %v954_v34 = vrot.slane %v880_v17, 4  ;;  %v2759_v51 = vrot.slane %v2687_v35, 4 }
  0x85   : > { %3317 = vmatpush1.bf16.msra.mxu1 %v12726_v11  ;;  %1728 = vmatprep.subr.bf16.mxu0 %v12731_v16  ;;  %v2694_v11 = vunpack.c.h.bf16 %v10877_v5  ;;  %v878_v16 = vunpack.c.l.bf16 %v10532_v41  ;;  %v2691_v41 = vunpack.c.l.bf16 %v10876_v61  ;;  %v2760_v52 = vrot.slane %v2689_v36, 4  ;;  %v14147_v59 = vld [vmem:[%s13609_s20 + $0x5b0] sm:$0x33]  ;;  %v12758_v5 = vld [vmem:[%s16812_s1 + $0x564] ss:$8 sps:$4 sm:$0xff]  }
  0x86   : > { %3318 = vmatprep.subr.bf16.mxu1 %v12734_v21  ;;  %v952_v14 = vsel %vm922_vm2, %v950_v54, %v951_v2  ;;  %v958_v15 = vsel %vm922_vm2, %v956_v3, %v957_v4  ;;  %v2762_v21 = vrot.slane %v2688_v8, 4  ;;  %v14154_v2 = vld [vmem:[%s13609_s20 + $0x5d8] sm:$0xcc]  ;;  %v14157_v3 = vld [vmem:[%s13609_s20 + $0x5e0] sm:$0x33]  ;;  %v2696_v8 = vunpack.c.h.bf16 %v14144_v58 }
  0x87   : > { %1529 = vmatmul.mubr.bf16.gmra.mrb[20].mxu0 %v989_v43  ;;  %v992_v20 = vpack.c.bf16 %v958_v15, %v952_v14  ;;  %v2769_v27 = vrot.slane %v2694_v11, 4  ;;  %v953_v30 = vrot.slane %v878_v16, 4  ;;  %v14126_v43 = vld [vmem:[%s13609_s20 + $0x370] sm:$0x33]  ;;  %v2765_v54 = vrot.slane %v2691_v41, 4 }
  0x88   : > { %1729 = vmatpush1.bf16.msra.mxu0 %v12729_v28  ;;  %2983 = vmatmul.mubr.bf16.gmra.mrb[4].mxu1 %v2801_v0  ;;  %v947_v28 = vrot.slane %v874_v62, 4  ;;  %v2764_v32 = vsel %vm922_vm2, %v2762_v21, %v2763_v22  ;;  %v2761_v61 = vsel %vm922_vm2, %v2759_v51, %v2760_v52  ;;  %v885_v62 = vunpack.c.h.bf16 %v14126_v43  ;;  %v12755_v4 = vld [vmem:[%s16812_s1 + $0x244] ss:$8 sps:$4 sm:$0xff]   ;;  %v12753_v14 = vld [vmem:[%s16812_s1 + $0x240] ss:$8 sps:$4 sm:$0xff]  }
  0x89   : > { %3319 = vmatpush1.bf16.msra.mxu1 %v12732_v29  ;;  %1730 = vmatprep.subr.bf16.mxu0 %v12737_v49  ;;  %v948_v29 = vrot.slane %v876_v63, 4  ;;  %v2770_v39 = vsel %vm922_vm2, %v2768_v24, %v2769_v27  ;;  %v887_v63 = vunpack.c.h.bf16 %v14129_v44  ;;  %v889_v0 = vunpack.c.h.bf16 %v14132_v45  ;;  %v12764_v27 = vld [vmem:[%s16812_s1 + $0x574] ss:$8 sps:$4 sm:$0xff]   ;;  %v12770_v42 = vld [vmem:[%s16812_s1 + $0x584] ss:$8 sps:$4 sm:$0xff]  }
  0x8a   : > { %3320 = vmatprep.subr.bf16.mxu1 %v12740_v50  ;;  %10640 = vmatprep.mubr.msk.bf16.mxu0 %vm642_vm1, %v992_v20  ;;  %v2804_v49 = vpack.c.bf16 %v2770_v39, %v2764_v32  ;;  %v955_v50 = vsel %vm922_vm2, %v953_v30, %v954_v34  ;;  %v2698_v9 = vunpack.c.h.bf16 %v14147_v59  ;;  %v963_v11 = vrot.slane %v885_v62, 4  ;;  %v12761_v20 = vld [vmem:[%s16812_s1 + $0x254] ss:$8 sps:$4 sm:$0xff]   ;;  %v12759_v32 = vld [vmem:[%s16812_s1 + $0x250] ss:$8 sps:$4 sm:$0xff]  }
  0x8b   : > { %v949_v40 = vsel %vm922_vm2, %v947_v28, %v948_v29  ;;  %v2700_v15 = vunpack.c.h.bf16 %v14154_v2  ;;  %v2702_v16 = vunpack.c.h.bf16 %v14157_v3  ;;  %v2774_v17 = vrot.slane %v2696_v8, 4  ;;  %v12762_v34 = vld [vmem:[%s16812_s1 + $0x570] ss:$8 sps:$4 sm:$0xff]   ;;  %v12768_v8 = vld [vmem:[%s16812_s1 + $0x580] ss:$8 sps:$4 sm:$0xff]  }
  0x8c   : > { %1731 = vmatpush1.bf16.msra.mxu0 %v12735_v6  ;;  %v991_v53 = vpack.c.bf16 %v955_v50, %v949_v40  ;;  %v2767_v6 = vsel %vm922_vm2, %v2765_v54, %v2766_v55  ;;  %10924 = vmatprep.mubr.msk.bf16.mxu1 %vm642_vm1, %v2804_v49  ;;  %v882_v24 = vunpack.c.l.bf16 %v14121_v38  ;;  %v886_v35 = vunpack.c.l.bf16 %v14129_v44  ;;  %v12767_v40 = vld [vmem:[%s16812_s1 + $0x264] ss:$8 sps:$4 sm:$0xff]   ;;  %v10927_v52 = vld [vmem:[%s13609_s20 + $0x498] sm:$0x11] }
  0x8d   : > { %3321 = vmatpush1.bf16.msra.mxu1 %v12738_v7  ;;  %1732 = vmatprep.subr.bf16.mxu0 %v12743_v12  ;;  %v962_v7 = vrot.slane %v883_v56, 4  ;;  %v2803_v10 = vpack.c.bf16 %v2767_v6, %v2761_v61  ;;  %v968_v12 = vrot.slane %v887_v63, 4  ;;  %v2780_v30 = vrot.slane %v2700_v15, 4  ;;  %v12765_v61 = vld [vmem:[%s16812_s1 + $0x260] ss:$8 sps:$4 sm:$0xff]  }
  0x8e   : > { %3322 = vmatprep.subr.bf16.mxu1 %v12746_v13  ;;  %v969_v13 = vrot.slane %v889_v0, 4  ;;  %v888_v36 = vunpack.c.l.bf16 %v14132_v45  ;;  %v959_v38 = vrot.slane %v882_v24, 4  ;;  %v2697_v44 = vunpack.c.l.bf16 %v14147_v59  ;;  %v10929_v59 = vld [vmem:[%s13609_s20 + $0x4c8] sm:$0x11]  ;;  %v12771_v24 = vld [vmem:[%s16812_s1 + $0x270] ss:$8 sps:$4 sm:$0xff]  }
  0x8f   : > { %1539 = vmatmul.mubr.bf16.gmra.mrb[24].mxu0 %v991_v53  ;;  %v964_v21 = vsel %vm922_vm2, %v962_v7, %v963_v11  ;;  %v2699_v45 = vunpack.c.l.bf16 %v14154_v2  ;;  %v965_v50 = vrot.slane %v886_v35, 4  ;;  %v10928_v53 = vld [vmem:[%s13609_s20 + $0x4c0] sm:$0xee]  ;;  %v2701_v54 = vunpack.c.l.bf16 %v14157_v3  ;;  %v12779_v3 = vld [vmem:[%s13609_s20 + $0x25c] ss:$48 sps:$4 sm:$0xff]  }
  0x90   : > { %1733 = vmatpush1.bf16.msra.mxu0 %v12741_v18  ;;  %v2775_v18 = vrot.slane %v2698_v9, 4  ;;  %v970_v22 = vsel %vm922_vm2, %v968_v12, %v969_v13  ;;  %2993 = vmatmul.mubr.bf16.gmra.mrb[8].mxu1 %v2803_v10  ;;  %v966_v51 = vrot.slane %v888_v36, 4  ;;  %v2772_v56 = vrot.slane %v2697_v44, 4  ;;  %v12780_v36 = vld [vmem:[%s16812_s1 + $0x280] ss:$8 sps:$4 sm:$0xff]  }
  0x91   : > { %3323 = vmatpush1.bf16.msra.mxu1 %v12744_v19  ;;  %1734 = vmatprep.subr.bf16.mxu0 %v12749_v25  ;;  %v12756_v19 = vld [vmem:[%s16812_s1 + $0x560] ss:$8 sps:$4 sm:$0xff]   ;;  %v884_v25 = vunpack.c.l.bf16 %v14126_v43  ;;  %v994_v28 = vpack.c.bf16 %v970_v22, %v964_v21  ;;  %v2695_v43 = vunpack.c.l.bf16 %v14144_v58  ;;  %v2777_v58 = vrot.slane %v2699_v45, 4  ;;  %v10930_v44 = vld [vmem:[%s13609_s20 + $0x4f0] sm:$0xee] }
  0x92   : > { %3324 = vmatprep.subr.bf16.mxu1 %v12752_v31  ;;  %v2776_v29 = vsel %vm922_vm2, %v2774_v17, %v2775_v18  ;;  %v2781_v31 = vrot.slane %v2702_v16, 4  ;;  %v967_v62 = vsel %vm922_vm2, %v965_v50, %v966_v51  ;;  %v3047_v2 = vunpack.c.l.bf16 %v10927_v52  ;;  %v10931_v45 = vld [vmem:[%s13609_s20 + $0x4f8] sm:$0x11] }
  0x93   : > { %v960_v39 = vrot.slane %v884_v25, 4  ;;  %10641 = vmatprep.mubr.msk.bf16.mxu0 %vm642_vm1, %v994_v28  ;;  %v2771_v55 = vrot.slane %v2695_v43, 4  ;;  %v2778_v6 = vrot.slane %v2701_v54, 4  ;;  %v3048_v7 = vunpack.c.h.bf16 %v10927_v52  ;;  %v12774_v28 = vld [vmem:[%s16812_s1 + $0x590] ss:$8 sps:$4 sm:$0xff]  }
  0x94   : > { %1735 = vmatpush1.bf16.msra.mxu0 %v12747_v46  ;;  %v2782_v41 = vsel %vm922_vm2, %v2780_v30, %v2781_v31  ;;  %v10926_v46 = vld [vmem:[%s13609_s20 + $0x490] sm:$0xee]  ;;  %v3049_v9 = vunpack.c.l.bf16 %v10928_v53  ;;  %v3050_v10 = vunpack.c.h.bf16 %v10928_v53  ;;  %v3051_v11 = vunpack.c.l.bf16 %v10929_v59  ;;  %v12777_v30 = vld [vmem:[%s13609_s20 + $0x258] ss:$48 sps:$4 sm:$0xff]   ;;  %v12782_v31 = vld [vmem:[%s16812_s1 + $0x284] ss:$8 sps:$4 sm:$0xff]  }
  0x95   : > { %3325 = vmatpush1.bf16.msra.mxu1 %v12750_v47  ;;  %1736 = vmatprep.subr.bf16.mxu0 %v12755_v4  ;;  %v2806_v47 = vpack.c.bf16 %v2782_v41, %v2776_v29  ;;  %v961_v49 = vsel %vm922_vm2, %v959_v38, %v960_v39  ;;  %v3045_v63 = vunpack.c.l.bf16 %v10926_v46  ;;  %v3046_v0 = vunpack.c.h.bf16 %v10926_v46  ;;  %v12785_v39 = vld [vmem:[%s16812_s1 + $0x5a4] ss:$8 sps:$4 sm:$0xff]   ;;  %v12788_v41 = vld [vmem:[%s16812_s1 + $0x294] ss:$8 sps:$4 sm:$0xff]   ;;  %v12786_v54 = vld [vmem:[%s16812_s1 + $0x290] ss:$8 sps:$4 sm:$0xff]  }
  0x96   : > { %3326 = vmatprep.subr.bf16.mxu1 %v12758_v5  ;;  %v993_v4 = vpack.c.bf16 %v967_v62, %v961_v49  ;;  %v2773_v5 = vsel %vm922_vm2, %v2771_v55, %v2772_v56  ;;  %v3052_v12 = vunpack.c.h.bf16 %v10929_v59  ;;  %v2779_v13 = vsel %vm922_vm2, %v2777_v58, %v2778_v6  ;;  %v12791_v43 = vld [vmem:[%s16812_s1 + $0x5b4] ss:$8 sps:$4 sm:$0xff]   ;;  %v10932_v46 = vld [vmem:[%s13609_s20 + $0x520] sm:$0xee]  ;;  %v10933_v49 = vld [vmem:[%s13609_s20 + $0x528] sm:$0x11] }
  0x97   : > { %10925 = vmatprep.mubr.msk.bf16.mxu1 %vm642_vm1, %v2806_v47  ;;  %v3109_v15 = vrot.slane %v3045_v63, 2  ;;  %v3110_v16 = vrot.slane %v3047_v2, 2  ;;  %v3112_v17 = vrot.slane %v3046_v0, 2  ;;  %v2805_v18 = vpack.c.bf16 %v2779_v13, %v2773_v5  ;;  %v12804_v47 = vld [vmem:[%s13609_s20 + $0x2bc] ss:$48 sps:$4 sm:$0xff]  }
  0x98   : > { %1737 = vmatpush1.bf16.msra.mxu0 %v12753_v14  ;;  %v12773_v14 = vld [vmem:[%s16812_s1 + $0x274] ss:$8 sps:$4 sm:$0xff]   ;;  %v3115_v21 = vrot.slane %v3049_v9, 2  ;;  %v3116_v22 = vrot.slane %v3051_v11, 2  ;;  %v3118_v25 = vrot.slane %v3050_v10, 2  ;;  %v3054_v50 = vunpack.c.h.bf16 %v10930_v44 }
  0x99   : > { %3327 = vmatpush1.bf16.msra.mxu1 %v12756_v19  ;;  %1738 = vmatprep.subr.bf16.mxu0 %v12761_v20  ;;  %v12776_v19 = vld [vmem:[%s16812_s1 + $0x594] ss:$8 sps:$4 sm:$0xff]   ;;  %v3113_v20 = vrot.slane %v3048_v7, 2  ;;  %v3056_v51 = vunpack.c.h.bf16 %v10931_v45  ;;  %v3058_v52 = vunpack.c.h.bf16 %v10932_v46  ;;  %v3053_v53 = vunpack.c.l.bf16 %v10930_v44  ;;  %v12789_v55 = vld [vmem:[%s16812_s1 + $0x5b0] ss:$8 sps:$4 sm:$0xff]  }
  0x9a   : > { %3328 = vmatprep.subr.bf16.mxu1 %v12764_v27  ;;  %1549 = vmatmul.mubr.bf16.gmra.mrb[28].mxu0 %v993_v4  ;;  %v3119_v27 = vrot.slane %v3052_v12, 2  ;;  %v3117_v35 = vsel %vm449_vm0, %v3115_v21, %v3116_v22  ;;  %v3060_v56 = vunpack.c.h.bf16 %v10933_v49  ;;  %v3055_v58 = vunpack.c.l.bf16 %v10931_v45  ;;  %v12794_v4 = vld [vmem:[%s16812_s1 + $0x2a4] ss:$8 sps:$4 sm:$0xff]   ;;  %v12795_v11 = vld [vmem:[%s16812_s1 + $0x5c0] ss:$8 sps:$4 sm:$0xff]  }
  0x9b   : > { %10698 = vmatprep.mubr.msk.bf16.mxu0 %vm642_vm1, %v12779_v3  ;;  %3003 = vmatmul.mubr.bf16.gmra.mrb[12].mxu1 %v2805_v18  ;;  %v3114_v29 = vsel %vm449_vm0, %v3112_v17, %v3113_v20  ;;  %v3057_v59 = vunpack.c.l.bf16 %v10932_v46  ;;  %v3124_v62 = vrot.slane %v3054_v50, 2  ;;  %v3125_v63 = vrot.slane %v3056_v51, 2  ;;  %v12797_v9 = vld [vmem:[%s16812_s1 + $0x5c4] ss:$8 sps:$4 sm:$0xff]   ;;  %v12806_v13 = vld [vmem:[%s13609_s20 + $0x2b8] ss:$48 sps:$4 sm:$0xff]  }
  0x9c   : > { %1739 = vmatpush1.bf16.msra.mxu0 %v12759_v32  ;;  %v3120_v32 = vsel %vm449_vm0, %v3118_v25, %v3119_v27  ;;  %v3130_v0 = vrot.slane %v3058_v52, 2  ;;  %v3121_v2 = vrot.slane %v3053_v53, 2  ;;  %v3131_v5 = vrot.slane %v3060_v56, 2  ;;  %v12803_v17 = vld [vmem:[%s16812_s1 + $0x5d4] ss:$8 sps:$4 sm:$0xff]  }
  0x9d   : > { %3329 = vmatpush1.bf16.msra.mxu1 %v12762_v34  ;;  %1740 = vmatprep.subr.bf16.mxu0 %v12767_v40  ;;  %v3111_v34 = vsel %vm449_vm0, %v3109_v15, %v3110_v16  ;;  %v3174_v38 = vpack.c.bf16 %v3120_v32, %v3114_v29  ;;  %v12783_v40 = vld [vmem:[%s16812_s1 + $0x5a0] ss:$8 sps:$4 sm:$0xff]   ;;  %v3122_v6 = vrot.slane %v3055_v58, 2  ;;  %v3127_v3 = vrot.slane %v3057_v59, 2  ;;  %v12800_v16 = vld [vmem:[%s16812_s1 + $0x2b4] ss:$8 sps:$4 sm:$0xff]  }
  0x9e   : > { %3330 = vmatprep.subr.bf16.mxu1 %v12770_v42  ;;  %v3173_v42 = vpack.c.bf16 %v3117_v35, %v3111_v34  ;;  %v3126_v10 = vsel %vm449_vm0, %v3124_v62, %v3125_v63  ;;  %v3132_v12 = vsel %vm449_vm0, %v3130_v0, %v3131_v5  ;;  %v12819_v20 = vld [vmem:[%s13609_s20 + $0x31c] ss:$48 sps:$4 sm:$0xff]   ;;  %v10934_v21 = vld [vmem:[%s13609_s20 + $0x550] sm:$0xee]  ;;  %v12821_v51 = vld [vmem:[%s13609_s20 + $0x318] ss:$48 sps:$4 sm:$0xff]  }
  0x9f   : > { %10982 = vmatprep.mubr.msk.bf16.mxu1 %vm642_vm1, %v3174_v38  ;;  %v3176_v18 = vpack.c.bf16 %v3132_v12, %v3126_v10  ;;  %v10935_v22 = vld [vmem:[%s13609_s20 + $0x558] sm:$0x11]  ;;  %v10937_v27 = vld [vmem:[%s13609_s20 + $0x588] sm:$0x11]  ;;  %v10940_v5 = vld [vmem:[%s13609_s20 + $0x5e0] sm:$0xee] }
  0xa0   : > { %1741 = vmatpush1.bf16.msra.mxu0 %v12765_v61  ;;  %v3059_v61 = vunpack.c.l.bf16 %v10933_v49  ;;  %v12798_v25 = vld [vmem:[%s16812_s1 + $0x2b0] ss:$8 sps:$4 sm:$0xff]   ;;  %v3064_v29 = vunpack.c.h.bf16 %v10935_v22  ;;  %v12809_v34 = vld [vmem:[%s16812_s1 + $0x2c4] ss:$8 sps:$4 sm:$0xff]   ;;  %v3068_v35 = vunpack.c.h.bf16 %v10937_v27  ;;  %v12807_v52 = vld [vmem:[%s16812_s1 + $0x2c0] ss:$8 sps:$4 sm:$0xff]  }
  0xa1   : > { %3331 = vmatpush1.bf16.msra.mxu1 %v12768_v8  ;;  %1742 = vmatprep.subr.bf16.mxu0 %v12773_v14  ;;  %v12792_v8 = vld [vmem:[%s16812_s1 + $0x2a0] ss:$8 sps:$4 sm:$0xff]   ;;  %v3123_v14 = vsel %vm449_vm0, %v3121_v2, %v3122_v6  ;;  %v12801_v32 = vld [vmem:[%s16812_s1 + $0x5d0] ss:$8 sps:$4 sm:$0xff]   ;;  %v12812_v44 = vld [vmem:[%s16812_s1 + $0x5e4] ss:$8 sps:$4 sm:$0xff]  }
  0xa2   : > { %3332 = vmatprep.subr.bf16.mxu1 %v12776_v19  ;;  %v3128_v7 = vrot.slane %v3059_v61, 2  ;;  %v3143_v45 = vrot.slane %v3068_v35, 2  ;;  %v12810_v53 = vld [vmem:[%s16812_s1 + $0x5e0] ss:$8 sps:$4 sm:$0xff]   ;;  %v12815_v58 = vld [vmem:[%s16812_s1 + $0x2d4] ss:$8 sps:$4 sm:$0xff]  }
  0xa3   : > { %v12818_v59 = vld [vmem:[%s16812_s1 + $0x5f4] ss:$8 sps:$4 sm:$0xff]   ;;  %v12813_v63 = vld [vmem:[%s16812_s1 + $0x2d0] ss:$8 sps:$4 sm:$0xff]   ;;  %v12827_v12 = vld [vmem:[%s16812_s1 + $0x604] ss:$8 sps:$4 sm:$0xff]  }
  0xa4   : > { %1743 = vmatpush1.bf16.msra.mxu0 %v12771_v24  ;;  %v3129_v15 = vsel %vm449_vm0, %v3127_v3, %v3128_v7  ;;  %v10936_v24 = vld [vmem:[%s13609_s20 + $0x580] sm:$0xee]  ;;  %v12834_v0 = vld [vmem:[%s13609_s20 + $0x37c] ss:$48 sps:$4 sm:$0xff]   ;;  %v10938_v2 = vld [vmem:[%s13609_s20 + $0x5b0] sm:$0xee] }
  0xa5   : > { %3333 = vmatpush1.bf16.msra.mxu1 %v12774_v28  ;;  %2098 = vmatprep.subr.bf16.mxu0 %v12782_v31  ;;  %v3175_v19 = vpack.c.bf16 %v3129_v15, %v3123_v14  ;;  %v3062_v28 = vunpack.c.h.bf16 %v10934_v21  ;;  %v3061_v31 = vunpack.c.l.bf16 %v10934_v21  ;;  %v3065_v38 = vunpack.c.l.bf16 %v10936_v24  ;;  %v12816_v6 = vld [vmem:[%s16812_s1 + $0x5f0] ss:$8 sps:$4 sm:$0xff]   ;;  %v10941_v3 = vld [vmem:[%s13609_s20 + $0x5e8] sm:$0x11] }
  0xa6   : > { %3568 = vmatprep.subr.bf16.mxu1 %v12785_v39  ;;  %v3067_v39 = vunpack.c.l.bf16 %v10937_v27  ;;  %v3070_v7 = vunpack.c.h.bf16 %v10938_v2  ;;  %v3069_v10 = vunpack.c.l.bf16 %v10938_v2  ;;  %v3073_v15 = vunpack.c.l.bf16 %v10940_v5 }
  0xa7   : > { %1757 = vmatmul.mubr.bf16.vlgmr.msra.gmra.mrb[16].mxu0 %v12777_v30  ;;  %v3066_v30 = vunpack.c.h.bf16 %v10936_v24 }
  0xa8   : > { %2099 = vmatpush1.bf16.msra.mxu0 %v12780_v36  ;;  %3347 = vmatmul.mubr.bf16.vlgmr.msra.gmra.mrb[0].mxu1 %v3173_v42  ;;  %v3063_v36 = vunpack.c.l.bf16 %v10935_v22  ;;  %v3140_v49 = vrot.slane %v3067_v39, 2  ;;  %v12836_v22 = vld [vmem:[%s13609_s20 + $0x378] ss:$48 sps:$4 sm:$0xff]  }
  0xa9   : > { %3569 = vmatpush1.bf16.msra.mxu1 %v12783_v40  ;;  %2100 = vmatprep.subr.bf16.mxu0 %v12788_v41  ;;  %v3136_v40 = vrot.slane %v3062_v28, 2  ;;  %v3137_v41 = vrot.slane %v3064_v29, 2  ;;  %v3142_v42 = vrot.slane %v3066_v30, 2  ;;  %v12822_v28 = vld [vmem:[%s16812_s1 + $0x2e0] ss:$8 sps:$4 sm:$0xff]  }
  0xaa   : > { %3570 = vmatprep.subr.bf16.mxu1 %v12791_v43  ;;  %10699 = vmatprep.mubr.msk.bf16.mxu0 %vm642_vm1, %v12804_v47  ;;  %v3133_v43 = vrot.slane %v3061_v31, 2  ;;  %v3134_v46 = vrot.slane %v3063_v36, 2  ;;  %v3139_v47 = vrot.slane %v3065_v38, 2  ;;  %v12825_v30 = vld [vmem:[%s16812_s1 + $0x600] ss:$8 sps:$4 sm:$0xff]  }
  0xab   : > { %10983 = vmatprep.mubr.msk.bf16.mxu1 %vm642_vm1, %v3176_v18  ;;  %v3138_v50 = vsel %vm449_vm0, %v3136_v40, %v3137_v41  ;;  %v12830_v31 = vld [vmem:[%s16812_s1 + $0x2f4] ss:$8 sps:$4 sm:$0xff]   ;;  %v12828_v36 = vld [vmem:[%s16812_s1 + $0x2f0] ss:$8 sps:$4 sm:$0xff]  }
  0xac   : > { %2101 = vmatpush1.bf16.msra.mxu0 %v12786_v54  ;;  %v3144_v54 = vsel %vm449_vm0, %v3142_v42, %v3143_v45  ;;  %v3141_v56 = vsel %vm449_vm0, %v3139_v47, %v3140_v49  ;;  %v12833_v38 = vld [vmem:[%s16812_s1 + $0x614] ss:$8 sps:$4 sm:$0xff]   ;;  %v12831_v41 = vld [vmem:[%s16812_s1 + $0x610] ss:$8 sps:$4 sm:$0xff]   ;;  %v12839_v42 = vld [vmem:[%s16812_s1 + $0x304] ss:$8 sps:$4 sm:$0xff]  }
  0xad   : > { %3571 = vmatpush1.bf16.msra.mxu1 %v12789_v55  ;;  %2102 = vmatprep.subr.bf16.mxu0 %v12794_v4  ;;  %v3135_v55 = vsel %vm449_vm0, %v3133_v43, %v3134_v46  ;;  %v3178_v61 = vpack.c.bf16 %v3144_v54, %v3138_v50  ;;  %v10939_v4 = vld [vmem:[%s13609_s20 + $0x5b8] sm:$0x11]  ;;  %v10702_v43 = vld [vmem:[%s13609_s20 + $0x368] sm:$0xcc]  ;;  %v10704_v45 = vld [vmem:[%s13609_s20 + $0x398] sm:$0xcc] }
  0xae   : > { %3572 = vmatprep.subr.bf16.mxu1 %v12797_v9  ;;  %v3177_v62 = vpack.c.bf16 %v3141_v56, %v3135_v55  ;;  %v3074_v9 = vunpack.c.h.bf16 %v10940_v5  ;;  %v3071_v14 = vunpack.c.l.bf16 %v10939_v4  ;;  %v10705_v46 = vld [vmem:[%s13609_s20 + $0x3a0] sm:$0x33]  ;;  %v1829_v47 = vunpack.c.l.bf16 %v10702_v43 }
  0xaf   : > { %1767 = vmatmul.mubr.bf16.gmra.mrb[20].mxu0 %v12806_v13  ;;  %v3076_v13 = vunpack.c.h.bf16 %v10941_v3  ;;  %v1830_v49 = vunpack.c.h.bf16 %v10702_v43  ;;  %v1834_v54 = vunpack.c.h.bf16 %v10704_v45  ;;  %v1835_v55 = vunpack.c.l.bf16 %v10705_v46 }
  0xb0   : > { %2103 = vmatpush1.bf16.msra.mxu0 %v12792_v8  ;;  %3357 = vmatmul.mubr.bf16.gmra.mrb[4].mxu1 %v3175_v19  ;;  %v3072_v8 = vunpack.c.h.bf16 %v10939_v4  ;;  %v3154_v19 = vrot.slane %v3074_v9, 2  ;;  %v3146_v24 = vrot.slane %v3071_v14, 2  ;;  %v1836_v56 = vunpack.c.h.bf16 %v10705_v46  ;;  %v12860_v46 = vld [vmem:[%s16812_s1 + $0x6f4] ss:$8 sps:$4 sm:$0xff]  }
  0xb1   : > { %3573 = vmatpush1.bf16.msra.mxu1 %v12795_v11  ;;  %2104 = vmatprep.subr.bf16.mxu0 %v12800_v16  ;;  %v12824_v11 = vld [vmem:[%s16812_s1 + $0x2e4] ss:$8 sps:$4 sm:$0xff]   ;;  %v3075_v16 = vunpack.c.l.bf16 %v10941_v3  ;;  %v3155_v21 = vrot.slane %v3076_v13, 2  ;;  %v1900_v2 = vrot.slane %v1835_v55, 4  ;;  %v1902_v4 = vrot.slane %v1834_v54, 4 }
  0xb2   : > { %3574 = vmatprep.subr.bf16.mxu1 %v12803_v17  ;;  %10700 = vmatprep.mubr.msk.bf16.mxu0 %vm642_vm1, %v12819_v20  ;;  %v3148_v17 = vrot.slane %v3070_v7, 2  ;;  %v3149_v18 = vrot.slane %v3072_v8, 2  ;;  %v3145_v20 = vrot.slane %v3069_v10, 2  ;;  %v1903_v5 = vrot.slane %v1836_v56, 4  ;;  %v12840_v3 = vld [vmem:[%s16812_s1 + $0x620] ss:$8 sps:$4 sm:$0xff]  }
  0xb3   : > { %10984 = vmatprep.mubr.msk.bf16.mxu1 %vm642_vm1, %v3178_v61  ;;  %v3152_v27 = vrot.slane %v3075_v16, 2  ;;  %v12845_v8 = vld [vmem:[%s16812_s1 + $0x314] ss:$8 sps:$4 sm:$0xff]   ;;  %v12854_v16 = vld [vmem:[%s16812_s1 + $0x6e4] ss:$8 sps:$4 sm:$0xff]  }
  0xb4   : > { %2105 = vmatpush1.bf16.msra.mxu0 %v12798_v25  ;;  %v3151_v25 = vrot.slane %v3073_v15, 2  ;;  %v3150_v29 = vsel %vm449_vm0, %v3148_v17, %v3149_v18  ;;  %v1904_v9 = vsel %vm922_vm2, %v1902_v4, %v1903_v5  ;;  %v12848_v13 = vld [vmem:[%s16812_s1 + $0x634] ss:$8 sps:$4 sm:$0xff]   ;;  %v12846_v15 = vld [vmem:[%s16812_s1 + $0x630] ss:$8 sps:$4 sm:$0xff]  }
  0xb5   : > { %3575 = vmatpush1.bf16.msra.mxu1 %v12801_v32  ;;  %2106 = vmatprep.subr.bf16.mxu0 %v12809_v34  ;;  %v3156_v32 = vsel %vm449_vm0, %v3154_v19, %v3155_v21  ;;  %v3147_v34 = vsel %vm449_vm0, %v3145_v20, %v3146_v24  ;;  %v10706_v18 = vld [vmem:[%s13609_s20 + $0x3c8] sm:$0xcc]  ;;  %v10707_v19 = vld [vmem:[%s13609_s20 + $0x3d0] sm:$0x33]  ;;  %v10708_v20 = vld [vmem:[%s13609_s20 + $0x3f8] sm:$0xcc] }
  0xb6   : > { %3576 = vmatprep.subr.bf16.mxu1 %v12812_v44  ;;  %v3153_v35 = vsel %vm449_vm0, %v3151_v25, %v3152_v27  ;;  %v3180_v39 = vpack.c.bf16 %v3156_v32, %v3150_v29  ;;  %v10703_v44 = vld [vmem:[%s13609_s20 + $0x370] sm:$0x33]  ;;  %v10709_v21 = vld [vmem:[%s13609_s20 + $0x400] sm:$0x33]  ;;  %v1840_v24 = vunpack.c.h.bf16 %v10707_v19  ;;  %v1842_v25 = vunpack.c.h.bf16 %v10708_v20  ;;  %v12864_v56 = vld [vmem:[%s13609_s20 + $0x4fc] ss:$48 sps:$4 sm:$0xff]  }
  0xb7   : > { %1777 = vmatmul.mubr.bf16.gmra.mrb[24].mxu0 %v12821_v51  ;;  %v3179_v40 = vpack.c.bf16 %v3153_v35, %v3147_v34  ;;  %v1831_v50 = vunpack.c.l.bf16 %v10703_v44  ;;  %v1832_v51 = vunpack.c.h.bf16 %v10703_v44  ;;  %v1837_v27 = vunpack.c.l.bf16 %v10706_v18  ;;  %v12857_v29 = vld [vmem:[%s16812_s1 + $0xc84] ss:$8 sps:$4 sm:$0xff]   ;;  %v12861_v54 = vld [vmem:[%s16812_s1 + $0xc90] ss:$8 sps:$4 sm:$0xff]  }
  0xb8   : > { %2107 = vmatpush1.bf16.msra.mxu0 %v12807_v52  ;;  %3367 = vmatmul.mubr.bf16.gmra.mrb[8].mxu1 %v3177_v62  ;;  %v12842_v52 = vld [vmem:[%s16812_s1 + $0x624] ss:$8 sps:$4 sm:$0xff]   ;;  %v1896_v62 = vrot.slane %v1830_v49, 4  ;;  %v1841_v32 = vunpack.c.l.bf16 %v10708_v20  ;;  %v1843_v34 = vunpack.c.l.bf16 %v10709_v21  ;;  %v12858_v49 = vld [vmem:[%s16812_s1 + $0x6f0] ss:$8 sps:$4 sm:$0xff]  }
  0xb9   : > { %3577 = vmatpush1.bf16.msra.mxu1 %v12810_v53  ;;  %2108 = vmatprep.subr.bf16.mxu0 %v12815_v58  ;;  %v1833_v53 = vunpack.c.l.bf16 %v10704_v45  ;;  %v12851_v58 = vld [vmem:[%s13609_s20 + $0x49c] ss:$48 sps:$4 sm:$0xff]   ;;  %v1894_v61 = vrot.slane %v1831_v50, 4  ;;  %v12855_v45 = vld [vmem:[%s16812_s1 + $0xc80] ss:$8 sps:$4 sm:$0xff]  }
  0xba   : > { %3578 = vmatprep.subr.bf16.mxu1 %v12818_v59  ;;  %10701 = vmatprep.mubr.msk.bf16.mxu0 %vm642_vm1, %v12834_v0  ;;  %v1893_v59 = vrot.slane %v1829_v47, 4  ;;  %v1911_v43 = vrot.slane %v1841_v32, 4  ;;  %v1912_v44 = vrot.slane %v1843_v34, 4  ;;  %v12863_v50 = vld [vmem:[%s16812_s1 + $0xc94] ss:$8 sps:$4 sm:$0xff]  }
  0xbb   : > { %10985 = vmatprep.mubr.msk.bf16.mxu1 %vm642_vm1, %v3180_v39  ;;  %v1899_v0 = vrot.slane %v1833_v53, 4  ;;  %v1905_v39 = vrot.slane %v1837_v27, 4  ;;  %v10713_v4 = vld [vmem:[%s13609_s20 + $0x460] sm:$0x33]  ;;  %v12876_v32 = vld [vmem:[%s16812_s1 + $0xcb0] ss:$8 sps:$4 sm:$0xff]  }
  0xbc   : > { %2109 = vmatpush1.bf16.msra.mxu0 %v12813_v63  ;;  %v1897_v63 = vrot.slane %v1832_v51, 4  ;;  %v1895_v10 = vsel %vm922_vm2, %v1893_v59, %v1894_v61  ;;  %v1913_v53 = vsel %vm922_vm2, %v1911_v43, %v1912_v44  ;;  %v12872_v59 = vld [vmem:[%s16812_s1 + $0xca4] ss:$8 sps:$4 sm:$0xff]   ;;  %v10716_v43 = vld [vmem:[%s13609_s20 + $0x4b8] sm:$0xcc] }
  0xbd   : > { %3579 = vmatpush1.bf16.msra.mxu1 %v12816_v6  ;;  %2110 = vmatprep.subr.bf16.mxu0 %v12824_v11  ;;  %v12837_v6 = vld [vmem:[%s16812_s1 + $0x300] ss:$8 sps:$4 sm:$0xff]   ;;  %v1901_v11 = vsel %vm922_vm2, %v1899_v0, %v1900_v2  ;;  %v10712_v0 = vld [vmem:[%s13609_s20 + $0x458] sm:$0xcc] }
  0xbe   : > { %3580 = vmatprep.subr.bf16.mxu1 %v12827_v12  ;;  %v1898_v7 = vsel %vm922_vm2, %v1896_v62, %v1897_v63  ;;  %v12843_v12 = vld [vmem:[%s16812_s1 + $0x310] ss:$8 sps:$4 sm:$0xff]   ;;  %v1957_v17 = vpack.c.bf16 %v1901_v11, %v1895_v10  ;;  %v10710_v62 = vld [vmem:[%s13609_s20 + $0x428] sm:$0xcc]  ;;  %v1852_v10 = vunpack.c.h.bf16 %v10713_v4 }
  0xbf   : > { %1787 = vmatmul.mubr.bf16.gmra.mrb[28].mxu0 %v12836_v22  ;;  %v1958_v14 = vpack.c.bf16 %v1904_v9, %v1898_v7  ;;  %v1838_v22 = vunpack.c.h.bf16 %v10706_v18  ;;  %v10711_v63 = vld [vmem:[%s13609_s20 + $0x430] sm:$0x33]  ;;  %v12866_v2 = vld [vmem:[%s13609_s20 + $0x4f8] ss:$48 sps:$4 sm:$0xff]   ;;  %v1846_v5 = vunpack.c.h.bf16 %v10710_v62  ;;  %v1845_v7 = vunpack.c.l.bf16 %v10710_v62 }
  0xc0   : > { %2111 = vmatpush1.bf16.msra.mxu0 %v12822_v28  ;;  %3377 = vmatmul.mubr.bf16.gmra.mrb[12].mxu1 %v3179_v40  ;;  %v12849_v28 = vld [vmem:[%s13609_s20 + $0x498] ss:$48 sps:$4 sm:$0xff]   ;;  %v1847_v11 = vunpack.c.l.bf16 %v10711_v63  ;;  %v12875_v18 = vld [vmem:[%s16812_s1 + $0x714] ss:$8 sps:$4 sm:$0xff]  }
  0xc1   : > { %3581 = vmatpush1.bf16.msra.mxu1 %v12825_v30  ;;  %2112 = vmatprep.subr.bf16.mxu0 %v12830_v31  ;;  %v1844_v30 = vunpack.c.h.bf16 %v10709_v21  ;;  %v1839_v31 = vunpack.c.l.bf16 %v10707_v19  ;;  %v1908_v35 = vrot.slane %v1838_v22, 4  ;;  %v12852_v40 = vld [vmem:[%s16812_s1 + $0x6e0] ss:$8 sps:$4 sm:$0xff]   ;;  %v1927_v19 = vrot.slane %v1852_v10, 4  ;;  %v12891_v10 = vld [vmem:[%s16812_s1 + $0xcd0] ss:$8 sps:$4 sm:$0xff]  }
  0xc2   : > { %3582 = vmatprep.subr.bf16.mxu1 %v12833_v38  ;;  %11042 = vmatprep.mubr.msk.bf16.mxu1 %vm642_vm1, %v12851_v58  ;;  %v1914_v38 = vrot.slane %v1842_v25, 4  ;;  %v12869_v58 = vld [vmem:[%s16812_s1 + $0x704] ss:$8 sps:$4 sm:$0xff]   ;;  %v12870_v9 = vld [vmem:[%s16812_s1 + $0xca0] ss:$8 sps:$4 sm:$0xff]   ;;  %v1918_v20 = vrot.slane %v1847_v11, 4 }
  0xc3   : > { %10758 = vmatprep.mubr.msk.bf16.mxu0 %vm642_vm1, %v1958_v14  ;;  %v1920_v14 = vrot.slane %v1846_v5, 4  ;;  %v12885_v44 = vld [vmem:[%s16812_s1 + $0xcc0] ss:$8 sps:$4 sm:$0xff]  }
  0xc4   : > { %2113 = vmatpush1.bf16.msra.mxu0 %v12828_v36  ;;  %v1909_v36 = vrot.slane %v1840_v24, 4  ;;  %v12878_v24 = vld [vmem:[%s16812_s1 + $0xcb4] ss:$8 sps:$4 sm:$0xff]  }
  0xc5   : > { %3583 = vmatpush1.bf16.msra.mxu1 %v12831_v41  ;;  %2114 = vmatprep.subr.bf16.mxu0 %v12839_v42  ;;  %v1915_v41 = vrot.slane %v1844_v30, 4  ;;  %v1906_v42 = vrot.slane %v1839_v31, 4  ;;  %v12873_v31 = vld [vmem:[%s16812_s1 + $0x710] ss:$8 sps:$4 sm:$0xff]  }
  0xc6   : > { %3584 = vmatprep.subr.bf16.mxu1 %v12842_v52  ;;  %v1910_v47 = vsel %vm922_vm2, %v1908_v35, %v1909_v36  ;;  %v12884_v35 = vld [vmem:[%s16812_s1 + $0x724] ss:$8 sps:$4 sm:$0xff]  }
  0xc7   : > { %v1916_v51 = vsel %vm922_vm2, %v1914_v38, %v1915_v41  ;;  %v1907_v52 = vsel %vm922_vm2, %v1905_v39, %v1906_v42  ;;  %v12887_v36 = vld [vmem:[%s16812_s1 + $0xcc4] ss:$8 sps:$4 sm:$0xff]   ;;  %v12881_v39 = vld [vmem:[%s13609_s20 + $0x558] ss:$48 sps:$4 sm:$0xff]   ;;  %v10715_v42 = vld [vmem:[%s13609_s20 + $0x490] sm:$0x33] }
  0xc8   : > { %2115 = vmatpush1.bf16.msra.mxu0 %v12837_v6  ;;  %v1960_v55 = vpack.c.bf16 %v1916_v51, %v1910_v47  ;;  %v1959_v61 = vpack.c.bf16 %v1913_v53, %v1907_v52  ;;  %v1848_v6 = vunpack.c.h.bf16 %v10711_v63  ;;  %v10714_v41 = vld [vmem:[%s13609_s20 + $0x488] sm:$0xcc]  ;;  %v1856_v47 = vunpack.c.h.bf16 %v10715_v42  ;;  %v12890_v51 = vld [vmem:[%s16812_s1 + $0x734] ss:$8 sps:$4 sm:$0xff]  }
  0xc9   : > { %3585 = vmatpush1.bf16.msra.mxu1 %v12840_v3  ;;  %2116 = vmatprep.subr.bf16.mxu0 %v12845_v8  ;;  %v1850_v3 = vunpack.c.h.bf16 %v10712_v0  ;;  %v12867_v8 = vld [vmem:[%s16812_s1 + $0x700] ss:$8 sps:$4 sm:$0xff]   ;;  %v12893_v52 = vld [vmem:[%s16812_s1 + $0xcd4] ss:$8 sps:$4 sm:$0xff]  }
  0xca   : > { %3586 = vmatprep.subr.bf16.mxu1 %v12848_v13  ;;  %v1851_v13 = vunpack.c.l.bf16 %v10713_v4 }
  0xcc   : > { %2117 = vmatpush1.bf16.msra.mxu0 %v12843_v12  ;;  %v1849_v12 = vunpack.c.l.bf16 %v10712_v0  ;;  %v1924_v22 = vrot.slane %v1851_v13, 4  ;;  %v12894_v0 = vld [vmem:[%s13609_s20 + $0x5bc] ss:$48 sps:$4 sm:$0xff]  }
  0xcd   : > { %3587 = vmatpush1.bf16.msra.mxu1 %v12846_v15  ;;  %4284 = vmatprep.subr.bf16.mxu0 %v12854_v16  ;;  %v1921_v15 = vrot.slane %v1848_v6, 4  ;;  %v1926_v16 = vrot.slane %v1850_v3, 4  ;;  %v12888_v3 = vld [vmem:[%s16812_s1 + $0x730] ss:$8 sps:$4 sm:$0xff]   ;;  %v12902_v13 = vld [vmem:[%s16812_s1 + $0xce4] ss:$8 sps:$4 sm:$0xff]  }
  0xce   : > { %7505 = vmatprep.subr.bf16.mxu1 %v12857_v29  ;;  %v1923_v21 = vrot.slane %v1849_v12, 4  ;;  %v12899_v12 = vld [vmem:[%s16812_s1 + $0x744] ss:$8 sps:$4 sm:$0xff]  }
  0xcf   : > { %2131 = vmatmul.mubr.bf16.vlgmr.msra.gmra.mrb[16].mxu0 %v1957_v17  ;;  %v1917_v17 = vrot.slane %v1845_v7, 4  ;;  %v1922_v25 = vsel %vm922_vm2, %v1920_v14, %v1921_v15  ;;  %v1928_v27 = vsel %vm922_vm2, %v1926_v16, %v1927_v19  ;;  %v12896_v15 = vld [vmem:[%s13609_s20 + $0x5b8] ss:$48 sps:$4 sm:$0xff]  }
  0xd0   : > { %3601 = vmatmul.mubr.bf16.vlgmr.msra.gmra.mrb[0].mxu1 %v12849_v28  ;;  %4285 = vmatpush1.bf16.msra.mxu0 %v12852_v40  ;;  %v12879_v28 = vld [vmem:[%s13609_s20 + $0x55c] ss:$48 sps:$4 sm:$0xff]   ;;  %v1925_v30 = vsel %vm922_vm2, %v1923_v21, %v1924_v22  ;;  %v1962_v34 = vpack.c.bf16 %v1928_v27, %v1922_v25  ;;  %v12882_v40 = vld [vmem:[%s16812_s1 + $0x720] ss:$8 sps:$4 sm:$0xff]   ;;  %v12903_v19 = vld [vmem:[%s16812_s1 + $0x750] ss:$8 sps:$4 sm:$0xff]  }
  0xd1   : > { %7506 = vmatpush1.bf16.msra.mxu1 %v12855_v45  ;;  %4286 = vmatprep.subr.bf16.mxu0 %v12860_v46  ;;  %v1919_v29 = vsel %vm922_vm2, %v1917_v17, %v1918_v20  ;;  %v10717_v45 = vld [vmem:[%s13609_s20 + $0x4c0] sm:$0x33]  ;;  %v1854_v46 = vunpack.c.h.bf16 %v10714_v41  ;;  %v12908_v20 = vld [vmem:[%s16812_s1 + $0xcf4] ss:$8 sps:$4 sm:$0xff]   ;;  %v12906_v21 = vld [vmem:[%s16812_s1 + $0xcf0] ss:$8 sps:$4 sm:$0xff]  }
  0xd2   : > { %7507 = vmatprep.subr.bf16.mxu1 %v12863_v50  ;;  %10759 = vmatprep.mubr.msk.bf16.mxu0 %vm642_vm1, %v1960_v55  ;;  %v1961_v38 = vpack.c.bf16 %v1925_v30, %v1919_v29  ;;  %v1853_v50 = vunpack.c.l.bf16 %v10714_v41  ;;  %v1860_v53 = vunpack.c.h.bf16 %v10717_v45  ;;  %v1857_v55 = vunpack.c.l.bf16 %v10716_v43  ;;  %v12897_v16 = vld [vmem:[%s16812_s1 + $0x740] ss:$8 sps:$4 sm:$0xff]   ;;  %v12911_v22 = vld [vmem:[%s16812_s1 + $0x764] ss:$8 sps:$4 sm:$0xff]   ;;  %v11093_v25 = vld [vmem:[%s13609_s20 + $0x138] sm:$0x11] }
  0xd3   : > { %11043 = vmatprep.mubr.msk.bf16.mxu1 %vm642_vm1, %v12864_v56  ;;  %v1859_v56 = vunpack.c.l.bf16 %v10717_v45  ;;  %v12900_v17 = vld [vmem:[%s16812_s1 + $0xce0] ss:$8 sps:$4 sm:$0xff]   ;;  %v13461_v27 = vmov 1966171168   ;;  %v760_v29 = vlaneseq  ;;  %v12917_v45 = vld [vmem:[%s16812_s1 + $0x774] ss:$8 sps:$4 sm:$0xff]  }
  0xd4   : > { %4287 = vmatpush1.bf16.msra.mxu0 %v12858_v49  ;;  %v1858_v49 = vunpack.c.h.bf16 %v10716_v43  ;;  %v1929_v62 = vrot.slane %v1853_v50, 4  ;;  %v1939_v63 = vrot.slane %v1860_v53, 4  ;;  %v1935_v4 = vrot.slane %v1857_v55, 4  ;;  %v11094_v30 = vld [vmem:[%s13609_s20 + $0x160] sm:$0xee] }
  0xd5   : > { %7508 = vmatpush1.bf16.msra.mxu1 %v12861_v54  ;;  %4288 = vmatprep.subr.bf16.mxu0 %v12869_v58  ;;  %v1855_v54 = vunpack.c.l.bf16 %v10715_v42  ;;  %v1932_v58 = vrot.slane %v1854_v46, 4  ;;  %v1936_v5 = vrot.slane %v1859_v56, 4  ;;  %v4020_v41 = vunpack.c.h.bf16 %v11094_v30  ;;  %v7221_v56 = vld [vmem:[%s13609_s20 + $0x18] sm:$0x11] }
  0xd6   : > { %7509 = vmatprep.subr.bf16.mxu1 %v12872_v59  ;;  %v1933_v59 = vrot.slane %v1856_v47, 4  ;;  %vm14857_vm4 = vcmp.lt.s32.totalorder %v760_v29, 256 }
  0xd7   : > { %2141 = vmatmul.mubr.bf16.gmra.mrb[20].mxu0 %v1959_v61  ;;  %v1938_v61 = vrot.slane %v1858_v49, 4 }
  0xd8   : > { %3611 = vmatmul.mubr.bf16.gmra.mrb[4].mxu1 %v12866_v2  ;;  %4289 = vmatpush1.bf16.msra.mxu0 %v12867_v8  ;;  %v1930_v2 = vrot.slane %v1855_v54, 4  ;;  %v1934_v6 = vsel %vm922_vm2, %v1932_v58, %v1933_v59  ;;  %v4088_v54 = vrot.slane %v4020_v41, 2  ;;  %v7222_v59 = vld [vmem:[%s13609_s20 + $0x40] sm:$0xee]  ;;  %v761_v41 = vshrl.u32 %v760_v29, 7 }
  0xd9   : > { %7510 = vmatpush1.bf16.msra.mxu1 %v12870_v9  ;;  %4290 = vmatprep.subr.bf16.mxu0 %v12875_v18  ;;  %v1940_v7 = vsel %vm922_vm2, %v1938_v61, %v1939_v63  ;;  %v1937_v9 = vsel %vm922_vm2, %v1935_v4, %v1936_v5  ;;  %v12905_v18 = vld [vmem:[%s16812_s1 + $0x754] ss:$8 sps:$4 sm:$0xff]   ;;  %v7223_v61 = vld [vmem:[%s13609_s20 + $0x48] sm:$0x11] }
  0xda   : > { %7511 = vmatprep.subr.bf16.mxu1 %v12878_v24  ;;  %10760 = vmatprep.mubr.msk.bf16.mxu0 %vm642_vm1, %v1962_v34  ;;  %v1931_v8 = vsel %vm922_vm2, %v1929_v62, %v1930_v2  ;;  %v1964_v11 = vpack.c.bf16 %v1940_v7, %v1934_v6  ;;  %v11092_v24 = vld [vmem:[%s13609_s20 + $0x130] sm:$0xee]  ;;  %v7239_v6 = vunpack.c.h.bf16 %v7221_v56  ;;  %v7241_v7 = vunpack.c.h.bf16 %v7222_v59 }
  0xdb   : > { %11044 = vmatprep.mubr.msk.bf16.mxu1 %vm642_vm1, %v12879_v28  ;;  %v1963_v14 = vpack.c.bf16 %v1937_v9, %v1931_v8  ;;  %v14548_v28 = vunpack.c.l.s4 %v13461_v27  ;;  %v4016_v34 = vunpack.c.h.bf16 %v11092_v24  ;;  %v12915_v2 = vld [vmem:[%s16812_s1 + $0x770] ss:$8 sps:$4 sm:$0xff]   ;;  %v12920_v4 = vld [vmem:[%s16812_s1 + $0xd14] ss:$8 sps:$4 sm:$0xff]  }
  0xdc   : > { %4291 = vmatpush1.bf16.msra.mxu0 %v12873_v31  ;;  %v11095_v31 = vld [vmem:[%s13609_s20 + $0x168] sm:$0x11]  ;;  %v12918_v8 = vld [vmem:[%s16812_s1 + $0xd10] ss:$8 sps:$4 sm:$0xff]  }
  0xdd   : > { %7512 = vmatpush1.bf16.msra.mxu1 %v12876_v32  ;;  %4292 = vmatprep.subr.bf16.mxu0 %v12884_v35  ;;  %v4015_v32 = vunpack.c.l.bf16 %v11092_v24  ;;  %v4017_v35 = vunpack.c.l.bf16 %v11093_v25  ;;  %v4021_v42 = vunpack.c.l.bf16 %v11095_v31  ;;  %v4022_v43 = vunpack.c.h.bf16 %v11095_v31  ;;  %v12926_v24 = vld [vmem:[%s16812_s1 + $0xbe4] ss:$8 sps:$4 sm:$0xff]  }
  0xde   : > { %7513 = vmatprep.subr.bf16.mxu1 %v12887_v36  ;;  %v4018_v36 = vunpack.c.h.bf16 %v11093_v25  ;;  %v4082_v49 = vrot.slane %v4016_v34, 2  ;;  %v12921_v34 = vld [vmem:[%s16812_s1 + $0x640] ss:$8 sps:$4 sm:$0xff]  }
  0xdf   : > { %2151 = vmatmul.mubr.bf16.gmra.mrb[24].mxu0 %v1961_v38  ;;  %v12909_v38 = vld [vmem:[%s16812_s1 + $0x760] ss:$8 sps:$4 sm:$0xff]   ;;  %v4079_v46 = vrot.slane %v4015_v32, 2  ;;  %v4080_v47 = vrot.slane %v4017_v35, 2  ;;  %v4086_v53 = vrot.slane %v4021_v42, 2  ;;  %v4089_v55 = vrot.slane %v4022_v43, 2 }
  0xe0   : > { %3621 = vmatmul.mubr.bf16.gmra.mrb[8].mxu1 %v12881_v39  ;;  %4293 = vmatpush1.bf16.msra.mxu0 %v12882_v40  ;;  %v12914_v39 = vld [vmem:[%s16812_s1 + $0xd04] ss:$8 sps:$4 sm:$0xff]   ;;  %v4019_v40 = vunpack.c.l.bf16 %v11094_v30  ;;  %v4083_v50 = vrot.slane %v4018_v36, 2  ;;  %v12924_v36 = vld [vmem:[%s16812_s1 + $0xbe0] ss:$8 sps:$4 sm:$0xff]  }
  0xe1   : > { %7514 = vmatpush1.bf16.msra.mxu1 %v12885_v44  ;;  %4294 = vmatprep.subr.bf16.mxu0 %v12890_v51  ;;  %v12912_v44 = vld [vmem:[%s16812_s1 + $0xd00] ss:$8 sps:$4 sm:$0xff]   ;;  %v7220_v51 = vld [vmem:[%s13609_s20 + $0x10] sm:$0xee]  ;;  %v4090_v5 = vsel %vm449_vm0, %v4088_v54, %v4089_v55 }
  0xe2   : > { %7515 = vmatprep.subr.bf16.mxu1 %v12893_v52  ;;  %11045 = vmatprep.mubr.msk.bf16.mxu1 %vm642_vm1, %v12894_v0  ;;  %v4085_v52 = vrot.slane %v4019_v40, 2  ;;  %v4084_v58 = vsel %vm449_vm0, %v4082_v49, %v4083_v50  ;;  %v7236_v62 = vunpack.c.l.bf16 %v7220_v51  ;;  %v7237_v63 = vunpack.c.h.bf16 %v7220_v51  ;;  %v12932_v42 = vld [vmem:[%s16812_s1 + $0xbf4] ss:$8 sps:$4 sm:$0xff]   ;;  %v12927_v43 = vld [vmem:[%s16812_s1 + $0x650] ss:$8 sps:$4 sm:$0xff]  }
  0xe3   : > { %10761 = vmatprep.mubr.msk.bf16.mxu0 %vm642_vm1, %v1964_v11  ;;  %v7238_v0 = vunpack.c.l.bf16 %v7221_v56  ;;  %v4144_v9 = vpack.c.bf16 %v4090_v5, %v4084_v58  ;;  %v7243_v11 = vunpack.c.h.bf16 %v7223_v61  ;;  %v759_v40 = vunpack.c.0.s8 %v14548_v28  ;;  %v11097_v28 = vld [vmem:[%s13609_s20 + $0x198] sm:$0x11]  ;;  %v12935_v50 = vld [vmem:[%s16812_s1 + $0x664] ss:$8 sps:$4 sm:$0xff]   ;;  %v12933_v55 = vld [vmem:[%s16812_s1 + $0x660] ss:$8 sps:$4 sm:$0xff]  }
  0xe4   : > { %4295 = vmatpush1.bf16.msra.mxu0 %v12888_v3  ;;  %v7240_v3 = vunpack.c.l.bf16 %v7222_v59  ;;  %v4087_v25 = vsel %vm449_vm0, %v4085_v52, %v4086_v53  ;;  %v4026_v51 = vunpack.c.h.bf16 %v11097_v28  ;;  %v12938_v56 = vld [vmem:[%s16812_s1 + $0xc04] ss:$8 sps:$4 sm:$0xff]   ;;  %v7224_v59 = vld [vmem:[%s13609_s20 + $0x70] sm:$0xee]  ;;  %v7225_v5 = vld [vmem:[%s13609_s20 + $0x78] sm:$0x11] }
  0xe5   : > { %7516 = vmatpush1.bf16.msra.mxu1 %v12891_v10  ;;  %4296 = vmatprep.subr.bf16.mxu0 %v12899_v12  ;;  %v7242_v10 = vunpack.c.l.bf16 %v7223_v61  ;;  %v7300_v12 = vrot.slane %v7236_v62, 2  ;;  %v14620_v54 = vsub.s32 %v759_v40, %v761_v41  ;;  %v4025_v62 = vunpack.c.l.bf16 %v11097_v28  ;;  %v14663_v28 = vld [vmem:[%s13609_s20 + $0x1f8] sm:$0x11] }
  0xe6   : > { %7517 = vmatprep.subr.bf16.mxu1 %v12902_v13  ;;  %v12923_v13 = vld [vmem:[%s16812_s1 + $0x644] ss:$8 sps:$4 sm:$0xff]  }
  0xe7   : > { %2161 = vmatmul.mubr.bf16.gmra.mrb[28].mxu0 %v1963_v14  ;;  %v7301_v14 = vrot.slane %v7238_v0, 2  ;;  %v4095_v0 = vrot.slane %v4026_v51, 2 }
  0xe8   : > { %3631 = vmatmul.mubr.bf16.gmra.mrb[12].mxu1 %v12896_v15  ;;  %4297 = vmatpush1.bf16.msra.mxu0 %v12897_v16  ;;  %v7303_v15 = vrot.slane %v7237_v63, 2  ;;  %v7304_v16 = vrot.slane %v7239_v6, 2  ;;  %v7245_v6 = vunpack.c.h.bf16 %v7224_v59 }
  0xe9   : > { %7518 = vmatpush1.bf16.msra.mxu1 %v12900_v17  ;;  %4298 = vmatprep.subr.bf16.mxu0 %v12905_v18  ;;  %v7306_v17 = vrot.slane %v7240_v3, 2  ;;  %v7307_v18 = vrot.slane %v7242_v10, 2  ;;  %v7302_v27 = vsel %vm449_vm0, %v7300_v12, %v7301_v14  ;;  %v12936_v3 = vld [vmem:[%s16812_s1 + $0xc00] ss:$8 sps:$4 sm:$0xff]   ;;  %v7246_v12 = vunpack.c.l.bf16 %v7225_v5 }
  0xea   : > { %7519 = vmatprep.subr.bf16.mxu1 %v12908_v20  ;;  %v7310_v20 = vrot.slane %v7243_v11, 2  ;;  %11148 = vmatprep.mubr.msk.bf16.mxu0 %vm642_vm1, %v4144_v9  ;;  %v7247_v9 = vunpack.c.h.bf16 %v7225_v5  ;;  %v7244_v11 = vunpack.c.l.bf16 %v7224_v59  ;;  %v12953_v5 = vld [vmem:[%s16812_s1 + $0x694] ss:$8 sps:$4 sm:$0xff]  }
  0xeb   : > { %v7308_v32 = vsel %vm449_vm0, %v7306_v17, %v7307_v18  ;;  %v12939_v18 = vld [vmem:[%s16812_s1 + $0x670] ss:$8 sps:$4 sm:$0xff]  }
  0xec   : > { %4299 = vmatpush1.bf16.msra.mxu0 %v12903_v19  ;;  %v7309_v19 = vrot.slane %v7241_v7, 2  ;;  %v7226_v7 = vld [vmem:[%s13609_s20 + $0xa0] sm:$0xee] }
  0xed   : > { %7520 = vmatpush1.bf16.msra.mxu1 %v12906_v21  ;;  %4300 = vmatprep.subr.bf16.mxu0 %v12911_v22  ;;  %v4081_v21 = vsel %vm449_vm0, %v4079_v46, %v4080_v47  ;;  %v7305_v22 = vsel %vm449_vm0, %v7303_v15, %v7304_v16  ;;  %v11098_v46 = vld [vmem:[%s13609_s20 + $0x1c0] sm:$0xee]  ;;  %v11099_v47 = vld [vmem:[%s13609_s20 + $0x1c8] sm:$0x11]  ;;  %v7249_v16 = vunpack.c.h.bf16 %v7226_v7 }
  0xee   : > { %7521 = vmatprep.subr.bf16.mxu1 %v12914_v39  ;;  %v7311_v30 = vsel %vm449_vm0, %v7309_v19, %v7310_v20  ;;  %v4143_v31 = vpack.c.bf16 %v4087_v25, %v4081_v21  ;;  %v12929_v39 = vld [vmem:[%s16812_s1 + $0x654] ss:$8 sps:$4 sm:$0xff]   ;;  %v4028_v52 = vunpack.c.h.bf16 %v11098_v46  ;;  %v4030_v53 = vunpack.c.h.bf16 %v11099_v47  ;;  %v12942_v25 = vld [vmem:[%s16812_s1 + $0xc10] ss:$8 sps:$4 sm:$0xff]  }
  0xef   : > { %v7365_v35 = vpack.c.bf16 %v7311_v30, %v7305_v22  ;;  %v4027_v63 = vunpack.c.l.bf16 %v11098_v46  ;;  %v4029_v10 = vunpack.c.l.bf16 %v11099_v47  ;;  %v12944_v19 = vld [vmem:[%s16812_s1 + $0xc14] ss:$8 sps:$4 sm:$0xff]   ;;  %v7315_v21 = vrot.slane %v7245_v6, 2  ;;  %v12945_v47 = vld [vmem:[%s16812_s1 + $0x680] ss:$8 sps:$4 sm:$0xff]  }
  0xf0   : > { %4301 = vmatpush1.bf16.msra.mxu0 %v12909_v38  ;;  %v7364_v38 = vpack.c.bf16 %v7308_v32, %v7302_v27  ;;  %v7316_v22 = vrot.slane %v7247_v9, 2  ;;  %v7321_v27 = vrot.slane %v7249_v16, 2  ;;  %v4034_v6 = vunpack.c.h.bf16 %v14663_v28 }
  0xf1   : > { %7522 = vmatpush1.bf16.msra.mxu1 %v12912_v44  ;;  %4302 = vmatprep.subr.bf16.mxu0 %v12917_v45  ;;  %v12930_v44 = vld [vmem:[%s16812_s1 + $0xbf0] ss:$8 sps:$4 sm:$0xff]   ;;  %v4097_v32 = vrot.slane %v4027_v63, 2 }
  0xf2   : > { %7523 = vmatprep.subr.bf16.mxu1 %v12920_v4  ;;  %11658 = vmatprep.mubr.msk.bf16.mxu1 %vm642_vm1, %v7365_v35  ;;  %v11096_v45 = vld [vmem:[%s13609_s20 + $0x190] sm:$0xee]  ;;  %v4101_v4 = vrot.slane %v4030_v53, 2  ;;  %v7317_v35 = vsel %vm449_vm0, %v7315_v21, %v7316_v22  ;;  %v14670_v53 = vld [vmem:[%s13609_s20 + $0x220] sm:$0xee] }
  0xf3   : > { %v4024_v49 = vunpack.c.h.bf16 %v11096_v45  ;;  %v4023_v61 = vunpack.c.l.bf16 %v11096_v45  ;;  %v14660_v45 = vld [vmem:[%s13609_s20 + $0x1f0] sm:$0xee] }
  0xf4   : > { %4303 = vmatpush1.bf16.msra.mxu0 %v12915_v2  ;;  %v4100_v2 = vrot.slane %v4028_v52, 2  ;;  %v4032_v63 = vunpack.c.h.bf16 %v14660_v45 }
  0xf5   : > { %7524 = vmatpush1.bf16.msra.mxu1 %v12918_v8  ;;  %4469 = vmatprep.subr.bf16.mxu0 %v12923_v13  ;;  %v4094_v58 = vrot.slane %v4024_v49, 2  ;;  %v7227_v8 = vld [vmem:[%s13609_s20 + $0xa8] sm:$0x11]  ;;  %v12941_v13 = vld [vmem:[%s16812_s1 + $0x674] ss:$8 sps:$4 sm:$0xff]  }
  0xf6   : > { %7690 = vmatprep.subr.bf16.mxu1 %v12926_v24  ;;  %v4102_v15 = vsel %vm449_vm0, %v4100_v2, %v4101_v4  ;;  %v7251_v17 = vunpack.c.h.bf16 %v7227_v8  ;;  %v4091_v24 = vrot.slane %v4023_v61, 2  ;;  %v7250_v40 = vunpack.c.l.bf16 %v7227_v8 }
  0xf7   : > { %4317 = vmatmul.mubr.bf16.vlgmr.msra.gmra.mrb[32].mxu0 %v4143_v31  ;;  %v4096_v14 = vsel %vm449_vm0, %v4094_v58, %v4095_v0  ;;  %v4092_v31 = vrot.slane %v4025_v62, 2  ;;  %v12948_v58 = vld [vmem:[%s16812_s1 + $0xc20] ss:$8 sps:$4 sm:$0xff]  }
  0xf8   : > { %4470 = vmatpush1.bf16.msra.mxu0 %v12921_v34  ;;  %7538 = vmatmul.mubr.bf16.vlgmr.msra.gmra.mrb[16].mxu1 %v7364_v38  ;;  %v4146_v20 = vpack.c.bf16 %v4102_v15, %v4096_v14  ;;  %v7322_v30 = vrot.slane %v7251_v17, 2  ;;  %v12947_v34 = vld [vmem:[%s16812_s1 + $0x684] ss:$8 sps:$4 sm:$0xff]   ;;  %v4098_v38 = vrot.slane %v4029_v10, 2  ;;  %v7319_v52 = vrot.slane %v7250_v40, 2 }
  0xf9   : > { %7691 = vmatpush1.bf16.msra.mxu1 %v12924_v36  ;;  %4471 = vmatprep.subr.bf16.mxu0 %v12929_v39  ;;  %v12950_v36 = vld [vmem:[%s16812_s1 + $0xc24] ss:$8 sps:$4 sm:$0xff]   ;;  %v7248_v39 = vunpack.c.l.bf16 %v7226_v7  ;;  %v14688_v7 = vld [vmem:[%s13609_s20 + $0xd0] sm:$0xee] }
  0xfa   : > { %7692 = vmatprep.subr.bf16.mxu1 %v12932_v42  ;;  %11149 = vmatprep.mubr.msk.bf16.mxu0 %vm642_vm1, %v4146_v20  ;;  %v7323_v41 = vsel %vm449_vm0, %v7321_v27, %v7322_v30  ;;  %v4093_v42 = vsel %vm449_vm0, %v4091_v24, %v4092_v31  ;;  %v14677_v62 = vld [vmem:[%s13609_s20 + $0x228] sm:$0x11]  ;;  %v14695_v14 = vld [vmem:[%s13609_s20 + $0x100] sm:$0xee]  ;;  %v12956_v17 = vld [vmem:[%s16812_s1 + $0xc34] ss:$8 sps:$4 sm:$0xff]  }
  0xfb   : > { %v7367_v49 = vpack.c.bf16 %v7323_v41, %v7317_v35  ;;  %v7318_v51 = vrot.slane %v7248_v39, 2  ;;  %v14701_v20 = vld [vmem:[%s13609_s20 + $0x108] sm:$0x11]  ;;  %v12951_v30 = vld [vmem:[%s16812_s1 + $0x690] ss:$8 sps:$4 sm:$0xff]   ;;  %v4031_v41 = vunpack.c.l.bf16 %v14660_v45 }
  0xfc   : > { %4472 = vmatpush1.bf16.msra.mxu0 %v12927_v43  ;;  %v7312_v43 = vrot.slane %v7244_v11, 2  ;;  %v12954_v35 = vld [vmem:[%s16812_s1 + $0xc30] ss:$8 sps:$4 sm:$0xff]   ;;  %v7259_v39 = vunpack.c.h.bf16 %v14701_v20 }
  0xfd   : > { %7693 = vmatpush1.bf16.msra.mxu1 %v12930_v44  ;;  %4473 = vmatprep.subr.bf16.mxu0 %v12935_v50  ;;  %v7313_v44 = vrot.slane %v7246_v12, 2  ;;  %v4099_v50 = vsel %vm449_vm0, %v4097_v32, %v4098_v38  ;;  %v7320_v4 = vsel %vm449_vm0, %v7318_v51, %v7319_v52  ;;  %v4038_v12 = vunpack.c.h.bf16 %v14677_v62  ;;  %v12959_v38 = vld [vmem:[%s16812_s1 + $0x6a4] ss:$8 sps:$4 sm:$0xff]  }
  0xfe   : > { %7694 = vmatprep.subr.bf16.mxu1 %v12938_v56  ;;  %v4145_v59 = vpack.c.bf16 %v4099_v50, %v4093_v42  ;;  %11659 = vmatprep.mubr.msk.bf16.mxu1 %vm642_vm1, %v7367_v49  ;;  %v4033_v49 = vunpack.c.l.bf16 %v14663_v28  ;;  %v4037_v28 = vunpack.c.l.bf16 %v14677_v62  ;;  %v12965_v62 = vld [vmem:[%s16812_s1 + $0x6b4] ss:$8 sps:$4 sm:$0xff]  }
  0xff   : > { %v7314_v61 = vsel %vm449_vm0, %v7312_v43, %v7313_v44  ;;  %v4113_v24 = vrot.slane %v4038_v12, 2  ;;  %v14741_v12 = vld [vmem:[%s13609_s20 + $0x250] sm:$0xee] }
 0x100   : > { %4474 = vmatpush1.bf16.msra.mxu0 %v12933_v55  ;;  %v7366_v11 = vpack.c.bf16 %v7320_v4, %v7314_v61  ;;  %v12957_v61 = vld [vmem:[%s16812_s1 + $0x6a0] ss:$8 sps:$4 sm:$0xff]  }
 0x101   : > { %7695 = vmatpush1.bf16.msra.mxu1 %v12936_v3  ;;  %4475 = vmatprep.subr.bf16.mxu0 %v12941_v13  ;;  %v4036_v3 = vunpack.c.h.bf16 %v14670_v53  ;;  %v14692_v13 = vld [vmem:[%s13609_s20 + $0xd8] sm:$0x11] }
 0x102   : > { %v689_v46 = vpop.f32.mrb[0].mxu0  ;;  %7696 = vmatprep.subr.bf16.mxu1 %v12944_v19  ;;  %4327 = vmatmul.mubr.bf16.gmra.mrb[36].mxu0 %v4145_v59  ;;  %v4107_v19 = vrot.slane %v4034_v6, 2  ;;  %v7255_v32 = vunpack.c.h.bf16 %v14692_v13  ;;  %v4103_v6 = vrot.slane %v4031_v41, 2  ;;  %v12971_v41 = vld [vmem:[%s16812_s1 + $0x6c4] ss:$8 sps:$4 sm:$0xff]  }
 0x103   : > { %v777_v55 = vmul.f32 %v689_v46, %v689_v46  ;;  %v691_v56 = vpop.f32.mrb[1].mxu0  ;;  %7548 = vmatmul.mubr.bf16.gmra.mrb[20].mxu1 %v7366_v11  ;;  %v4112_v22 = vrot.slane %v4036_v3, 2  ;;  %v12968_v11 = vld [vmem:[%s16812_s1 + $0xc54] ss:$8 sps:$4 sm:$0xff]  }
 0x104   : > { %v778_v0 = vmul.f32 %v691_v56, %v691_v56  ;;  %v693_v2 = vpop.f32.mrb[2].mxu0  ;;  %4476 = vmatpush1.bf16.msra.mxu0 %v12939_v18  ;;  %v4106_v18 = vrot.slane %v4032_v63, 2  ;;  %v7328_v44 = vrot.slane %v7255_v32, 2  ;;  %v7258_v32 = vunpack.c.l.bf16 %v14701_v20  ;;  %v12969_v20 = vld [vmem:[%s16812_s1 + $0x6c0] ss:$8 sps:$4 sm:$0xff]  }
 0x105   : > { %v728_v8 = vadd.f32 %v693_v2, %v689_v46  ;;  %v779_v9 = vmul.f32 %v693_v2, %v693_v2  ;;  %7697 = vmatpush1.bf16.msra.mxu1 %v12942_v25  ;;  %v695_v10 = vpop.f32.mrb[3].mxu0  ;;  %4477 = vmatprep.subr.bf16.mxu0 %v12947_v34  ;;  %v7253_v25 = vunpack.c.h.bf16 %v14688_v7  ;;  %v7257_v34 = vunpack.c.h.bf16 %v14695_v14 }
 0x106   : > { %v741_v15 = vadd.f32 %v695_v10, %v691_v56  ;;  %v780_v16 = vmul.f32 %v695_v10, %v695_v10  ;;  %7698 = vmatprep.subr.bf16.mxu1 %v12950_v36  ;;  %v4108_v31 = vsel %vm449_vm0, %v4106_v18, %v4107_v19  ;;  %v4114_v36 = vsel %vm449_vm0, %v4112_v22, %v4113_v24  ;;  %v14744_v19 = vld [vmem:[%s13609_s20 + $0x258] sm:$0x11] }
 0x107   : > { %v793_v21 = vadd.f32 %v779_v9, %v777_v55  ;;  %v7327_v40 = vrot.slane %v7253_v25, 2  ;;  %v4148_v43 = vpack.c.bf16 %v4114_v36, %v4108_v31  ;;  %v7333_v46 = vrot.slane %v7257_v34, 2  ;;  %v14759_v34 = vld [vmem:[%s13609_s20 + $0x280] sm:$0xee] }
 0x108   : > { %v806_v27 = vadd.f32 %v780_v16, %v778_v0  ;;  %4478 = vmatpush1.bf16.msra.mxu0 %v12945_v47  ;;  %v12962_v47 = vld [vmem:[%s16812_s1 + $0xc44] ss:$8 sps:$4 sm:$0xff]   ;;  %v7334_v55 = vrot.slane %v7259_v39, 2  ;;  %v4035_v56 = vunpack.c.l.bf16 %v14670_v53  ;;  %v4110_v22 = vrot.slane %v4037_v28, 2 }
 0x109   : > { %7699 = vmatpush1.bf16.msra.mxu1 %v12948_v58  ;;  %4479 = vmatprep.subr.bf16.mxu0 %v12953_v5  ;;  %v7329_v63 = vsel %vm449_vm0, %v7327_v40, %v7328_v44  ;;  %v12960_v5 = vld [vmem:[%s16812_s1 + $0xc40] ss:$8 sps:$4 sm:$0xff]   ;;  %v7252_v24 = vunpack.c.l.bf16 %v14688_v7  ;;  %v7254_v25 = vunpack.c.l.bf16 %v14692_v13  ;;  %v7256_v31 = vunpack.c.l.bf16 %v14695_v14  ;;  %v12966_v7 = vld [vmem:[%s16812_s1 + $0xc50] ss:$8 sps:$4 sm:$0xff]  }
 0x10a   : > { %v699_v42 = vpop.f32.mrb[4].mxu0  ;;  %7700 = vmatprep.subr.bf16.mxu1 %v12956_v17  ;;  %11150 = vmatprep.mubr.msk.bf16.mxu0 %vm642_vm1, %v4148_v43  ;;  %v7335_v10 = vsel %vm449_vm0, %v7333_v46, %v7334_v55  ;;  %v4104_v17 = vrot.slane %v4033_v49, 2  ;;  %v4109_v18 = vrot.slane %v4035_v56, 2  ;;  %v4040_v13 = vunpack.c.h.bf16 %v14741_v12  ;;  %v14764_v40 = vld [vmem:[%s13609_s20 + $0x288] sm:$0x11] }
 0x10b   : > { %v729_v50 = vadd.f32 %v728_v8, %v699_v42  ;;  %v781_v51 = vmul.f32 %v699_v42, %v699_v42  ;;  %v701_v52 = vpop.f32.mrb[5].mxu0  ;;  %v7369_v16 = vpack.c.bf16 %v7335_v10, %v7329_v63  ;;  %v7324_v36 = vrot.slane %v7252_v24, 2  ;;  %v12974_v49 = vld [vmem:[%s16812_s1 + $0xc64] ss:$8 sps:$4 sm:$0xff]  }
 0x10c   : > { %v742_v58 = vadd.f32 %v741_v15, %v701_v52  ;;  %v782_v59 = vmul.f32 %v701_v52, %v701_v52  ;;  %v703_v45 = vpop.f32.mrb[6].mxu0  ;;  %4480 = vmatpush1.bf16.msra.mxu0 %v12951_v30  ;;  %v4105_v30 = vsel %vm449_vm0, %v4103_v6, %v4104_v17  ;;  %v4042_v14 = vunpack.c.h.bf16 %v14744_v19  ;;  %v7235_v17 = vld [vmem:[%s13609_s20 + $0x168] sm:$0x11] }
 0x10d   : > { %v794_v0 = vadd.f32 %v793_v21, %v781_v51  ;;  %v730_v2 = vadd.f32 %v729_v50, %v703_v45  ;;  %v783_v4 = vmul.f32 %v703_v45, %v703_v45  ;;  %7701 = vmatpush1.bf16.msra.mxu1 %v12954_v35  ;;  %v705_v53 = vpop.f32.mrb[7].mxu0  ;;  %4481 = vmatprep.subr.bf16.mxu0 %v12959_v38  ;;  %v7325_v38 = vrot.slane %v7254_v25, 2  ;;  %v12978_v25 = vld [vmem:[%s16812_s1 + $0xc70] ss:$8 sps:$4 sm:$0xff]  }
 0x10e   : > { %v807_v3 = vadd.f32 %v806_v27, %v782_v59  ;;  %v743_v8 = vadd.f32 %v742_v58, %v705_v53  ;;  %v784_v9 = vmul.f32 %v705_v53, %v705_v53  ;;  %7702 = vmatprep.subr.bf16.mxu1 %v12962_v47  ;;  %v12963_v27 = vld [vmem:[%s16812_s1 + $0x6b0] ss:$8 sps:$4 sm:$0xff]   ;;  %11660 = vmatprep.mubr.msk.bf16.mxu1 %vm642_vm1, %v7369_v16  ;;  %v7330_v43 = vrot.slane %v7256_v31, 2 }
 0x10f   : > { %v795_v15 = vadd.f32 %v794_v0, %v783_v4  ;;  %v4111_v35 = vsel %vm449_vm0, %v4109_v18, %v4110_v22  ;;  %v7331_v44 = vrot.slane %v7258_v32, 2  ;;  %v7326_v50 = vsel %vm449_vm0, %v7324_v36, %v7325_v38  ;;  %v14778_v58 = vld [vmem:[%s13609_s20 + $0x130] sm:$0xee]  ;;  %v14781_v59 = vld [vmem:[%s13609_s20 + $0x138] sm:$0x11] }
 0x110   : > { %v808_v21 = vadd.f32 %v807_v3, %v784_v9  ;;  %4482 = vmatpush1.bf16.msra.mxu0 %v12957_v61  ;;  %v4147_v42 = vpack.c.bf16 %v4111_v35, %v4105_v30  ;;  %v4044_v0 = vunpack.c.h.bf16 %v14759_v34  ;;  %v12977_v4 = vld [vmem:[%s16812_s1 + $0x6d4] ss:$8 sps:$4 sm:$0xff]   ;;  %v4119_v16 = vrot.slane %v4042_v14, 2  ;;  %v12989_v14 = vld [vmem:[%s16812_s1 + $0xd24] ss:$8 sps:$4 sm:$0xff]  }
 0x111   : > { %7703 = vmatpush1.bf16.msra.mxu1 %v12960_v5  ;;  %4483 = vmatprep.subr.bf16.mxu0 %v12965_v62  ;;  %v7332_v45 = vsel %vm449_vm0, %v7330_v43, %v7331_v44  ;;  %v12980_v9 = vld [vmem:[%s16812_s1 + $0xc74] ss:$8 sps:$4 sm:$0xff]   ;;  %v4046_v62 = vunpack.c.h.bf16 %v14764_v40  ;;  %v7261_v22 = vunpack.c.h.bf16 %v14778_v58  ;;  %v7263_v24 = vunpack.c.h.bf16 %v14781_v59 }
 0x112   : > { %v709_v39 = vpop.f32.mrb[8].mxu0  ;;  %7704 = vmatprep.subr.bf16.mxu1 %v12968_v11  ;;  %4337 = vmatmul.mubr.bf16.gmra.mrb[40].mxu0 %v4147_v42  ;;  %v7368_v53 = vpack.c.bf16 %v7332_v45, %v7326_v50  ;;  %v4118_v11 = vrot.slane %v4040_v13, 2  ;;  %v7267_v13 = vunpack.c.h.bf16 %v7235_v17  ;;  %v4039_v38 = vunpack.c.l.bf16 %v14741_v12 }
 0x113   : > { %v731_v46 = vadd.f32 %v730_v2, %v709_v39  ;;  %v711_v47 = vpop.f32.mrb[9].mxu0  ;;  %v785_v51 = vmul.f32 %v709_v39, %v709_v39  ;;  %v12972_v2 = vld [vmem:[%s16812_s1 + $0xc60] ss:$8 sps:$4 sm:$0xff]   ;;  %v4125_v31 = vrot.slane %v4046_v62, 2  ;;  %v7339_v35 = vrot.slane %v7261_v22, 2 }
 0x114   : > { %v744_v52 = vadd.f32 %v743_v8, %v711_v47  ;;  %v786_v55 = vmul.f32 %v711_v47, %v711_v47  ;;  %v713_v56 = vpop.f32.mrb[10].mxu0  ;;  %4484 = vmatpush1.bf16.msra.mxu0 %v12963_v27  ;;  %v7234_v8 = vld [vmem:[%s13609_s20 + $0x160] sm:$0xee]  ;;  %7558 = vmatmul.mubr.bf16.gmra.mrb[24].mxu1 %v7368_v53  ;;  %v4120_v30 = vsel %vm449_vm0, %v4118_v11, %v4119_v16  ;;  %v7340_v36 = vrot.slane %v7263_v24, 2 }
 0x115   : > { %v14784_v61 = vadd.f32 %v731_v46, %v713_v56  ;;  %v787_v63 = vmul.f32 %v713_v56, %v713_v56  ;;  %7705 = vmatpush1.bf16.msra.mxu1 %v12966_v7  ;;  %v715_v28 = vpop.f32.mrb[11].mxu0  ;;  %v796_v5 = vadd.f32 %v795_v15, %v785_v51  ;;  %4485 = vmatprep.subr.bf16.mxu0 %v12971_v41  ;;  %v12975_v15 = vld [vmem:[%s16812_s1 + $0x6d0] ss:$8 sps:$4 sm:$0xff]   ;;  %v7265_v32 = vunpack.c.h.bf16 %v7234_v8  ;;  %v12983_v7 = vld [vmem:[%s16812_s1 + $0x784] ss:$8 sps:$4 sm:$0xff]  }
 0x116   : > { %v809_v6 = vadd.f32 %v808_v21, %v786_v55  ;;  %v14793_v3 = vadd.f32 %v744_v52, %v715_v28  ;;  %v788_v10 = vmul.f32 %v715_v28, %v715_v28  ;;  %7706 = vmatprep.subr.bf16.mxu1 %v12974_v49  ;;  %v4124_v21 = vrot.slane %v4044_v0, 2  ;;  %v11056_v62 = vld [vmem:[%s13609_s20 + $0x120] sm:$0x88] }
 0x117   : > { %v14804_v18 = vadd.f32 %v796_v5, %v787_v63  ;;  %v7345_v41 = vrot.slane %v7265_v32, 2  ;;  %v4041_v42 = vunpack.c.l.bf16 %v14744_v19  ;;  %v4043_v43 = vunpack.c.l.bf16 %v14759_v34 }
 0x118   : > { %4486 = vmatpush1.bf16.msra.mxu0 %v12969_v20  ;;  %v14811_v27 = vadd.f32 %v809_v6, %v788_v10  ;;  %v4126_v20 = vsel %vm449_vm0, %v4124_v21, %v4125_v31  ;;  %v7341_v47 = vsel %vm449_vm0, %v7339_v35, %v7340_v36  ;;  %v7346_v49 = vrot.slane %v7267_v13, 2  ;;  %v11057_v21 = vld [vmem:[%s13609_s20 + $0x128] sm:$0x77]  ;;  %v12986_v31 = vld [vmem:[%s13609_s20 + $0x4] ss:$48 sps:$4 sm:$0xff]  }
 0x119   : > { %7707 = vmatpush1.bf16.msra.mxu1 %v12972_v2  ;;  %4487 = vmatprep.subr.bf16.mxu0 %v12977_v4  ;;  %v4150_v46 = vpack.c.bf16 %v4126_v20, %v4120_v30  ;;  %v4045_v12 = vunpack.c.l.bf16 %v14764_v40  ;;  %v4115_v51 = vrot.slane %v4039_v38, 2  ;;  %v4116_v52 = vrot.slane %v4041_v42, 2  ;;  %v11058_v30 = vld [vmem:[%s13609_s20 + $0x150] sm:$0x88]  ;;  %v11059_v13 = vld [vmem:[%s13609_s20 + $0x158] sm:$0x77] }
 0x11a   : > { %v719_v39 = vpop.f32.mrb[12].mxu0  ;;  %7708 = vmatprep.subr.bf16.mxu1 %v12980_v9  ;;  %v4121_v55 = vrot.slane %v4043_v43, 2  ;;  %v7260_v56 = vunpack.c.l.bf16 %v14778_v58  ;;  %v7347_v19 = vsel %vm449_vm0, %v7345_v41, %v7346_v49  ;;  %v7262_v63 = vunpack.c.l.bf16 %v14781_v59 }
 0x11b   : > { %v721_v44 = vpop.f32.mrb[13].mxu0  ;;  %11151 = vmatprep.mubr.msk.bf16.mxu0 %vm642_vm1, %v4150_v46  ;;  %v4122_v34 = vrot.slane %v4045_v12, 2  ;;  %v7264_v28 = vunpack.c.l.bf16 %v7234_v8  ;;  %v7371_v40 = vpack.c.bf16 %v7347_v19, %v7341_v47  ;;  %v4117_v0 = vsel %vm449_vm0, %v4115_v51, %v4116_v52  ;;  %v12984_v51 = vld [vmem:[%s13609_s20] ss:$48 sps:$4 sm:$0xff]  }
 0x11c   : > { %v723_v50 = vpop.f32.mrb[14].mxu0  ;;  %4488 = vmatpush1.bf16.msra.mxu0 %v12975_v15  ;;  %v7266_v2 = vunpack.c.l.bf16 %v7235_v17  ;;  %v7336_v4 = vrot.slane %v7260_v56, 2  ;;  %v7337_v53 = vrot.slane %v7262_v63, 2  ;;  %v733_v6 = vadd.f32 %v14784_v61, %v719_v39  ;;  %v12987_v19 = vld [vmem:[%s16812_s1 + $0xd20] ss:$8 sps:$4 sm:$0xff]  }
 0x11d   : > { %7709 = vmatpush1.bf16.msra.mxu1 %v12978_v25  ;;  %v725_v45 = vpop.f32.mrb[15].mxu0  ;;  %4827 = vmatprep.subr.bf16.mxu0 %v12983_v7  ;;  %v4123_v58 = vsel %vm449_vm0, %v4121_v55, %v4122_v34  ;;  %v7342_v5 = vrot.slane %v7264_v28, 2  ;;  %v789_v8 = vmul.f32 %v719_v39, %v719_v39  ;;  %v746_v10 = vadd.f32 %v14793_v3, %v721_v44 }
 0x11e   : > { %8048 = vmatprep.subr.bf16.mxu1 %v12989_v14  ;;  %11661 = vmatprep.mubr.msk.bf16.mxu1 %vm642_vm1, %v7371_v40  ;;  %v4149_v9 = vpack.c.bf16 %v4123_v58, %v4117_v0  ;;  %v7343_v59 = vrot.slane %v7266_v2, 2  ;;  %v7338_v11 = vsel %vm449_vm0, %v7336_v4, %v7337_v53  ;;  %v790_v16 = vmul.f32 %v721_v44, %v721_v44  ;;  %v12995_v0 = vld [vmem:[%s16812_s1 + $0xd34] ss:$8 sps:$4 sm:$0xff]   ;;  %v14853_v2 = vld [vmem:[%s13609_s20 + $0x180] sm:$0x88] }
 0x11f   : > { %v734_v17 = vadd.f32 %v733_v6, %v723_v50  ;;  %v791_v15 = vmul.f32 %v723_v50, %v723_v50  ;;  %v798_v22 = vadd.f32 %v14804_v18, %v789_v8  ;;  %v747_v24 = vadd.f32 %v746_v10, %v725_v45  ;;  %v13011_v6 = vld [vmem:[%s13609_s20 + $0x64] ss:$48 sps:$4 sm:$0xff]  }
 0x120   : > { %4347 = vmatmul.mubr.bf16.gmra.mrb[44].mxu0 %v4149_v9  ;;  %v7344_v61 = vsel %vm449_vm0, %v7342_v5, %v7343_v59  ;;  %v792_v25 = vmul.f32 %v725_v45, %v725_v45  ;;  %v811_v3 = vadd.f32 %v14811_v27, %v790_v16  ;;  %v3841_v35 = vunpack.c.l.bf16 %v11056_v62 }
 0x121   : > { %v7370_v32 = vpack.c.bf16 %v7344_v61, %v7338_v11  ;;  %v735_v7 = vrot.slane %v734_v17, 4  ;;  %v799_v36 = vadd.f32 %v798_v22, %v791_v15  ;;  %v748_v38 = vrot.slane %v747_v24, 4  ;;  %v14863_v11 = vld [vmem:[%s13609_s20 + $0x188] sm:$0x77]  ;;  %v11062_v61 = vld [vmem:[%s13609_s20 + $0x1b0] sm:$0x88] }
 0x122   : > { %v3842_v39 = vunpack.c.h.bf16 %v11056_v62  ;;  %v3843_v14 = vunpack.c.l.bf16 %v11057_v21  ;;  %v812_v41 = vadd.f32 %v811_v3, %v792_v25  ;;  %v3844_v42 = vunpack.c.h.bf16 %v11057_v21  ;;  %v14869_v22 = vld [vmem:[%s13609_s20 + $0x1b8] sm:$0x77] }
 0x123   : > { %7568 = vmatmul.mubr.bf16.gmra.mrb[28].mxu1 %v7370_v32  ;;  %v736_v20 = vadd.f32 %v735_v7, %v734_v17  ;;  %v3845_v18 = vunpack.c.l.bf16 %v11058_v30  ;;  %v800_v43 = vrot.slane %v799_v36, 4  ;;  %v749_v44 = vadd.f32 %v748_v38, %v747_v24  ;;  %v12992_v38 = vld [vmem:[%s16812_s1 + $0x794] ss:$8 sps:$4 sm:$0xff]  }
 0x124   : > { %v3846_v46 = vunpack.c.h.bf16 %v11058_v30  ;;  %v3847_v47 = vunpack.c.l.bf16 %v11059_v13  ;;  %11682 = vmatprep.mubr.msk.bf16.mxu1 %vm642_vm1, %v12986_v31  ;;  %v813_v49 = vrot.slane %v812_v41, 4  ;;  %v3848_v12 = vunpack.c.h.bf16 %v11059_v13  ;;  %v12981_v30 = vld [vmem:[%s16812_s1 + $0x780] ss:$8 sps:$4 sm:$0xff]   ;;  %v12993_v13 = vld [vmem:[%s16812_s1 + $0xd30] ss:$8 sps:$4 sm:$0xff]  }
 0x125   : > { %v737_v27 = vrot.slane %v736_v20, 2  ;;  %v3906_v50 = vrot.slane %v3841_v35, 6  ;;  %v801_v52 = vadd.f32 %v800_v43, %v799_v36  ;;  %v750_v55 = vrot.slane %v749_v44, 2  ;;  %v12990_v43 = vld [vmem:[%s16812_s1 + $0x790] ss:$8 sps:$4 sm:$0xff]  }
 0x126   : > { %v3907_v56 = vrot.slane %v3843_v14, 6  ;;  %v3909_v45 = vrot.slane %v3842_v39, 6  ;;  %v814_v63 = vadd.f32 %v813_v49, %v812_v41  ;;  %v3910_v28 = vrot.slane %v3844_v42, 6  ;;  %v13001_v39 = vld [vmem:[%s16812_s1 + $0xd44] ss:$8 sps:$4 sm:$0xff]  }
 0x127   : > { %v738_v34 = vadd.f32 %v737_v27, %v736_v20  ;;  %v3912_v40 = vrot.slane %v3845_v18, 6  ;;  %v802_v4 = vrot.slane %v801_v52, 2  ;;  %v751_v58 = vadd.f32 %v750_v55, %v749_v44  ;;  %v12999_v44 = vld [vmem:[%s16812_s1 + $0xd40] ss:$8 sps:$4 sm:$0xff]   ;;  %v12998_v49 = vld [vmem:[%s16812_s1 + $0x7a4] ss:$8 sps:$4 sm:$0xff]  }
 0x128   : > { %v3913_v53 = vrot.slane %v3847_v47, 6  ;;  %v3915_v5 = vrot.slane %v3846_v46, 6  ;;  %v815_v8 = vrot.slane %v814_v63, 2  ;;  %v3911_v10 = vsel %vm3905_vm3, %v3909_v45, %v3910_v28  ;;  %v13016_v55 = vld [vmem:[%s13609_s20 + $0x60] ss:$48 sps:$4 sm:$0xff]  }
 0x129   : > { %v739_v9 = vrot.slane %v738_v34, 1  ;;  %v3916_v62 = vrot.slane %v3848_v12, 6  ;;  %v803_v16 = vadd.f32 %v802_v4, %v801_v52  ;;  %v752_v17 = vrot.slane %v751_v58, 1  ;;  %v13007_v12 = vld [vmem:[%s16812_s1 + $0xd54] ss:$8 sps:$4 sm:$0xff]  }
 0x12a   : > { %v3908_v15 = vsel %vm3905_vm3, %v3906_v50, %v3907_v56  ;;  %v3914_v21 = vsel %vm3905_vm3, %v3912_v40, %v3913_v53  ;;  %v816_v24 = vadd.f32 %v815_v8, %v814_v63  ;;  %v3850_v35 = vunpack.c.h.bf16 %v14853_v2  ;;  %v11064_v63 = vld [vmem:[%s13609_s20 + $0x1e0] sm:$0x88]  ;;  %v11065_v28 = vld [vmem:[%s13609_s20 + $0x1e8] sm:$0x77]  ;;  %v11067_v53 = vld [vmem:[%s13609_s20 + $0x218] sm:$0x77] }
 0x12b   : > { %v740_v29 = vadd.f32 %v739_v9, %v738_v34  ;;  %v3917_v25 = vsel %vm3905_vm3, %v3915_v5, %v3916_v62  ;;  %v3970_v31 = vpack.c.bf16 %v3914_v21, %v3908_v15  ;;  %7723 = vmatmul.mubr.bf16.vlgmr.msra.gmra.mrb[16].mxu1 %v12984_v51  ;;  %v804_v32 = vrot.slane %v803_v16, 1  ;;  %v13026_v62 = vld [vmem:[%s13609_s20 + $0xc4] ss:$48 sps:$4 sm:$0xff]  }
 0x12c   : > { %v753_v3 = vadd.f32 %v752_v17, %v751_v58  ;;  %v3971_v7 = vpack.c.bf16 %v3917_v25, %v3911_v10  ;;  %8049 = vmatpush1.bf16.msra.mxu1 %v12987_v19  ;;  %11683 = vmatprep.mubr.msk.bf16.mxu1 %vm642_vm1, %v13011_v6  ;;  %v817_v36 = vrot.slane %v816_v24, 1  ;;  %v3852_v14 = vunpack.c.h.bf16 %v14863_v11  ;;  %v11066_v58 = vld [vmem:[%s13609_s20 + $0x210] sm:$0x88]  ;;  %v12996_v6 = vld [vmem:[%s16812_s1 + $0x7a0] ss:$8 sps:$4 sm:$0xff]  }
 0x12d   : > { %8050 = vmatprep.subr.bf16.mxu1 %v12995_v0  ;;  %v3854_v20 = vunpack.c.h.bf16 %v11062_v61  ;;  %v3856_v41 = vunpack.c.h.bf16 %v14869_v22  ;;  %v805_v42 = vadd.f32 %v804_v32, %v803_v16  ;;  %v3921_v46 = vrot.slane %v3850_v35, 6  ;;  %v13004_v16 = vld [vmem:[%s16812_s1 + $0x7b4] ss:$8 sps:$4 sm:$0xff]   ;;  %v13005_v17 = vld [vmem:[%s16812_s1 + $0xd50] ss:$8 sps:$4 sm:$0xff]  }
 0x12e   : > { %v756_v18 = vcombine.low %v740_v29, %v753_v3  ;;  %11172 = vmatprep.mubr.msk.bf16.mxu0 %vm642_vm1, %v3971_v7  ;;  %v3849_v47 = vunpack.c.l.bf16 %v14853_v2  ;;  %v818_v27 = vadd.f32 %v817_v36, %v816_v24  ;;  %v3922_v50 = vrot.slane %v3852_v14, 6  ;;  %v13015_v15 = vld [vmem:[%s16812_s1 + $0xd64] ss:$8 sps:$4 sm:$0xff]   ;;  %v13002_v36 = vld [vmem:[%s16812_s1 + $0x7b0] ss:$8 sps:$4 sm:$0xff]  }
 0x12f   : > { %4502 = vmatmul.mubr.bf16.vlgmr.msra.gmra.mrb[32].mxu0 %v3970_v31  ;;  %v3927_v51 = vrot.slane %v3854_v20, 6  ;;  %v3928_v52 = vrot.slane %v3856_v41, 6  ;;  %v3851_v45 = vunpack.c.l.bf16 %v14863_v11  ;;  %v3853_v19 = vunpack.c.l.bf16 %v11062_v61  ;;  %v14947_v31 = vld [vmem:[%s13609_s20 + $0x240] sm:$0x88]  ;;  %v11069_v35 = vld [vmem:[%s13609_s20 + $0x248] sm:$0x77] }
 0x130   : > { %v763_v56 = vrot.slane %v756_v18, %v14620_v54  ;;  %4828 = vmatpush1.bf16.msra.mxu0 %v12981_v30  ;;  %8051 = vmatpush1.bf16.msra.mxu1 %v12993_v13  ;;  %v3855_v34 = vunpack.c.l.bf16 %v14869_v22  ;;  %v821_v40 = vcombine.low %v805_v42, %v818_v27  ;;  %v3923_v0 = vsel %vm3905_vm3, %v3921_v46, %v3922_v50  ;;  %v13031_v41 = vld [vmem:[%s13609_s20 + $0xc0] ss:$48 sps:$4 sm:$0xff]  }
 0x131   : > { %4829 = vmatprep.subr.bf16.mxu0 %v12992_v38  ;;  %8052 = vmatprep.subr.bf16.mxu1 %v13001_v39  ;;  %v3929_v2 = vsel %vm3905_vm3, %v3927_v51, %v3928_v52  ;;  %v3918_v4 = vrot.slane %v3849_v47, 6  ;;  %v3919_v8 = vrot.slane %v3851_v45, 6  ;;  %v3924_v10 = vrot.slane %v3853_v19, 6  ;;  %v11070_v42 = vld [vmem:[%s13609_s20 + $0x270] sm:$0x88] }
 0x132   : > { %v770_v5 = vrot.slane %v763_v56, %v14620_v54  ;;  %v3973_v9 = vpack.c.bf16 %v3929_v2, %v3923_v0  ;;  %v828_v11 = vrot.slane %v821_v40, %v14620_v54  ;;  %v3925_v21 = vrot.slane %v3855_v34, 6  ;;  %v11071_v47 = vld [vmem:[%s13609_s20 + $0x278] sm:$0x77]  ;;  %v13013_v27 = vld [vmem:[%s16812_s1 + $0xd60] ss:$8 sps:$4 sm:$0xff]  }
 0x133   : > { %7733 = vmatmul.mubr.bf16.gmra.mrb[20].mxu1 %v13016_v55  ;;  %v3858_v61 = vunpack.c.h.bf16 %v11064_v63  ;;  %v3860_v22 = vunpack.c.h.bf16 %v11065_v28  ;;  %v3920_v29 = vsel %vm3905_vm3, %v3918_v4, %v3919_v8  ;;  %v3862_v24 = vunpack.c.h.bf16 %v11066_v58  ;;  %v13010_v52 = vld [vmem:[%s16812_s1 + $0x7c4] ss:$8 sps:$4 sm:$0xff]   ;;  %v13022_v55 = vld [vmem:[%s16812_s1 + $0xd74] ss:$8 sps:$4 sm:$0xff]  }
 0x134   : > { %776 = vst.msk [vmem:[%s14914_s19] ss:$4 sm:$0x3] %vm14857_vm4, %v770_v5  ;;  %4830 = vmatpush1.bf16.msra.mxu0 %v12990_v43  ;;  %8053 = vmatpush1.bf16.msra.mxu1 %v12999_v44  ;;  %v3864_v25 = vunpack.c.h.bf16 %v11067_v53  ;;  %v3857_v30 = vunpack.c.l.bf16 %v11064_v63  ;;  %v835_v32 = vrot.slane %v828_v11, %v14620_v54  ;;  %v3926_v3 = vsel %vm3905_vm3, %v3924_v10, %v3925_v21  ;;  %v13008_v63 = vld [vmem:[%s16812_s1 + $0x7c0] ss:$8 sps:$4 sm:$0xff]  }
 0x135   : > { %4831 = vmatprep.subr.bf16.mxu0 %v12998_v49  ;;  %8054 = vmatprep.subr.bf16.mxu1 %v13007_v12  ;;  %v3933_v7 = vrot.slane %v3858_v61, 6  ;;  %v3934_v13 = vrot.slane %v3860_v22, 6  ;;  %v3972_v38 = vpack.c.bf16 %v3926_v3, %v3920_v29  ;;  %v3939_v39 = vrot.slane %v3862_v24, 6  ;;  %v13041_v4 = vld [vmem:[%s13609_s20 + $0x124] ss:$48 sps:$4 sm:$0xff]  }
 0x136   : > { %11173 = vmatprep.mubr.msk.bf16.mxu0 %vm642_vm1, %v3973_v9  ;;  %v3940_v14 = vrot.slane %v3864_v25, 6  ;;  %11684 = vmatprep.mubr.msk.bf16.mxu1 %vm642_vm1, %v13026_v62  ;;  %v3859_v20 = vunpack.c.l.bf16 %v11065_v28  ;;  %837 = vst.msk [vmem:[%s14940_s12] ss:$4 sm:$0x3] %vm14857_vm4, %v835_v32  ;;  %v3861_v43 = vunpack.c.l.bf16 %v11066_v58  ;;  %v3863_v44 = vunpack.c.l.bf16 %v11067_v53  ;;  %v11176_v58 = vld [vmem:[%s13609_s20 + $0x138] sm:$0x88] }
 0x137   : > { %v3935_v18 = vsel %vm3905_vm3, %v3933_v7, %v3934_v13  ;;  %v3930_v46 = vrot.slane %v3857_v30, 6  ;;  %v3866_v50 = vunpack.c.h.bf16 %v14947_v31  ;;  %v3868_v51 = vunpack.c.h.bf16 %v11069_v35  ;;  %4512 = vmatmul.mubr.bf16.gmra.mrb[36].mxu0 %v3972_v38  ;;  %v13019_v53 = vld [vmem:[%s16812_s1 + $0x7d4] ss:$8 sps:$4 sm:$0xff]   ;;  %v11177_v10 = vld [vmem:[%s13609_s20 + $0x140] sm:$0x77] }
 0x138   : > { %4832 = vmatpush1.bf16.msra.mxu0 %v12996_v6  ;;  %8055 = vmatpush1.bf16.msra.mxu1 %v13005_v17  ;;  %v3941_v49 = vsel %vm3905_vm3, %v3939_v39, %v3940_v14  ;;  %v3931_v12 = vrot.slane %v3859_v20, 6  ;;  %v3936_v45 = vrot.slane %v3861_v43, 6  ;;  %v3937_v19 = vrot.slane %v3863_v44, 6  ;;  %v13020_v62 = vld [vmem:[%s16812_s1 + $0xd70] ss:$8 sps:$4 sm:$0xff]  }
 0x139   : > { %4833 = vmatprep.subr.bf16.mxu0 %v13004_v16  ;;  %8056 = vmatprep.subr.bf16.mxu1 %v13015_v15  ;;  %v3975_v56 = vpack.c.bf16 %v3941_v49, %v3935_v18  ;;  %v3870_v34 = vunpack.c.h.bf16 %v11070_v42  ;;  %v3872_v40 = vunpack.c.h.bf16 %v11071_v47  ;;  %v3945_v0 = vrot.slane %v3866_v50, 6  ;;  %v13030_v11 = vld [vmem:[%s16812_s1 + $0xd84] ss:$8 sps:$4 sm:$0xff]   ;;  %v11179_v25 = vld [vmem:[%s13609_s20 + $0x170] sm:$0x77] }
 0x13a   : > { %v3932_v28 = vsel %vm3905_vm3, %v3930_v46, %v3931_v12  ;;  %v3946_v2 = vrot.slane %v3868_v51, 6  ;;  %v3938_v5 = vsel %vm3905_vm3, %v3936_v45, %v3937_v19  ;;  %v3865_v9 = vunpack.c.l.bf16 %v14947_v31  ;;  %v11178_v24 = vld [vmem:[%s13609_s20 + $0x168] sm:$0x88]  ;;  %v13017_v31 = vld [vmem:[%s16812_s1 + $0x7d0] ss:$8 sps:$4 sm:$0xff]  }
 0x13b   : > { %11174 = vmatprep.mubr.msk.bf16.mxu0 %vm642_vm1, %v3975_v56  ;;  %7743 = vmatmul.mubr.bf16.gmra.mrb[24].mxu1 %v13031_v41  ;;  %v3951_v6 = vrot.slane %v3870_v34, 6  ;;  %v3867_v8 = vunpack.c.l.bf16 %v11069_v35  ;;  %v3974_v16 = vpack.c.bf16 %v3938_v5, %v3932_v28  ;;  %v3952_v15 = vrot.slane %v3872_v40, 6  ;;  %v13028_v32 = vld [vmem:[%s16812_s1 + $0xd80] ss:$8 sps:$4 sm:$0xff]   ;;  %v13037_v38 = vld [vmem:[%s16812_s1 + $0xd94] ss:$8 sps:$4 sm:$0xff]  }
 0x13c   : > { %4834 = vmatpush1.bf16.msra.mxu0 %v13002_v36  ;;  %8057 = vmatpush1.bf16.msra.mxu1 %v13013_v27  ;;  %v3947_v17 = vsel %vm3905_vm3, %v3945_v0, %v3946_v2  ;;  %v3869_v21 = vunpack.c.l.bf16 %v11070_v42  ;;  %v3871_v61 = vunpack.c.l.bf16 %v11071_v47  ;;  %v3942_v22 = vrot.slane %v3865_v9, 6  ;;  %v13025_v36 = vld [vmem:[%s16812_s1 + $0x7e4] ss:$8 sps:$4 sm:$0xff]   ;;  %v13046_v41 = vld [vmem:[%s13609_s20 + $0x120] ss:$48 sps:$4 sm:$0xff]  }
 0x13d   : > { %4835 = vmatprep.subr.bf16.mxu0 %v13010_v52  ;;  %8058 = vmatprep.subr.bf16.mxu1 %v13022_v55  ;;  %v3943_v29 = vrot.slane %v3867_v8, 6  ;;  %v4558_v30 = vunpack.c.l.bf16 %v11176_v58  ;;  %v3953_v3 = vsel %vm3905_vm3, %v3951_v6, %v3952_v15  ;;  %v4559_v13 = vunpack.c.h.bf16 %v11176_v58  ;;  %v7763_v18 = vld [vmem:[%s13609_s20 + $0x20] sm:$0xcc]  ;;  %v7764_v27 = vld [vmem:[%s13609_s20 + $0x28] sm:$0x33] }
 0x13e   : > { %11685 = vmatprep.mubr.msk.bf16.mxu1 %vm642_vm1, %v13041_v4  ;;  %v3948_v7 = vrot.slane %v3869_v21, 6  ;;  %v4560_v35 = vunpack.c.l.bf16 %v11177_v10  ;;  %v3977_v39 = vpack.c.bf16 %v3953_v3, %v3947_v17  ;;  %v3949_v20 = vrot.slane %v3871_v61, 6  ;;  %v7765_v52 = vld [vmem:[%s13609_s20 + $0x50] sm:$0xcc]  ;;  %v7766_v34 = vld [vmem:[%s13609_s20 + $0x58] sm:$0x33] }
 0x13f   : > { %v15012_v14 = vsel %vm3905_vm3, %v3942_v22, %v3943_v29  ;;  %v4561_v42 = vunpack.c.h.bf16 %v11177_v10  ;;  %v4562_v43 = vunpack.c.l.bf16 %v11178_v24  ;;  %v4563_v44 = vunpack.c.h.bf16 %v11178_v24  ;;  %4522 = vmatmul.mubr.bf16.gmra.mrb[40].mxu0 %v3974_v16  ;;  %v13023_v2 = vld [vmem:[%s16812_s1 + $0x7e0] ss:$8 sps:$4 sm:$0xff]   ;;  %v13035_v4 = vld [vmem:[%s16812_s1 + $0xd90] ss:$8 sps:$4 sm:$0xff]   ;;  %v13034_v9 = vld [vmem:[%s16812_s1 + $0x7f4] ss:$8 sps:$4 sm:$0xff]  }
 0x140   : > { %4836 = vmatpush1.bf16.msra.mxu0 %v13008_v63  ;;  %8059 = vmatpush1.bf16.msra.mxu1 %v13020_v62  ;;  %v4564_v46 = vunpack.c.l.bf16 %v11179_v25  ;;  %v4565_v47 = vunpack.c.h.bf16 %v11179_v25  ;;  %v3950_v49 = vsel %vm3905_vm3, %v3948_v7, %v3949_v20  ;;  %v4622_v12 = vrot.slane %v4558_v30, 6  ;;  %v13045_v8 = vld [vmem:[%s16812_s1 + $0xda4] ss:$8 sps:$4 sm:$0xff]   ;;  %v13032_v22 = vld [vmem:[%s16812_s1 + $0x7f0] ss:$8 sps:$4 sm:$0xff]  }
 0x141   : > { %4837 = vmatprep.subr.bf16.mxu0 %v13019_v53  ;;  %8060 = vmatprep.subr.bf16.mxu1 %v13030_v11  ;;  %v4623_v50 = vrot.slane %v4560_v35, 6  ;;  %v4625_v51 = vrot.slane %v4559_v13, 6  ;;  %v3976_v55 = vpack.c.bf16 %v3950_v49, %v15012_v14  ;;  %v4626_v56 = vrot.slane %v4561_v42, 6  ;;  %v11180_v20 = vld [vmem:[%s13609_s20 + $0x198] sm:$0x88] }
 0x142   : > { %v4628_v45 = vrot.slane %v4562_v43, 6  ;;  %v4629_v19 = vrot.slane %v4564_v46, 6  ;;  %11175 = vmatprep.mubr.msk.bf16.mxu0 %vm642_vm1, %v3977_v39  ;;  %v4631_v63 = vrot.slane %v4563_v44, 6  ;;  %v4632_v28 = vrot.slane %v4565_v47, 6  ;;  %v13038_v42 = vld [vmem:[%s16812_s1 + $0x800] ss:$8 sps:$4 sm:$0xff]  }
 0x143   : > { %7753 = vmatmul.mubr.bf16.gmra.mrb[28].mxu1 %v13046_v41  ;;  %v7779_v40 = vunpack.c.l.bf16 %v7763_v18  ;;  %v7780_v0 = vunpack.c.h.bf16 %v7763_v18  ;;  %v4627_v58 = vsel %vm3905_vm3, %v4625_v51, %v4626_v56  ;;  %v7781_v53 = vunpack.c.l.bf16 %v7764_v27  ;;  %v11181_v41 = vld [vmem:[%s13609_s20 + $0x1a0] sm:$0x77]  ;;  %v11182_v44 = vld [vmem:[%s13609_s20 + $0x1c8] sm:$0x88]  ;;  %v11183_v46 = vld [vmem:[%s13609_s20 + $0x1d0] sm:$0x77] }
 0x144   : > { %4838 = vmatpush1.bf16.msra.mxu0 %v13017_v31  ;;  %8061 = vmatpush1.bf16.msra.mxu1 %v13028_v32  ;;  %v7782_v5 = vunpack.c.h.bf16 %v7764_v27  ;;  %v7783_v6 = vunpack.c.l.bf16 %v7765_v52  ;;  %v4633_v10 = vsel %vm3905_vm3, %v4631_v63, %v4632_v28  ;;  %v7784_v62 = vunpack.c.h.bf16 %v7765_v52  ;;  %v13040_v31 = vld [vmem:[%s16812_s1 + $0x804] ss:$8 sps:$4 sm:$0xff]   ;;  %v13043_v32 = vld [vmem:[%s16812_s1 + $0xda0] ss:$8 sps:$4 sm:$0xff]   ;;  %v13049_v49 = vld [vmem:[%s16812_s1 + $0x814] ss:$8 sps:$4 sm:$0xff]  }
 0x145   : > { %4839 = vmatprep.subr.bf16.mxu0 %v13025_v36  ;;  %8062 = vmatprep.subr.bf16.mxu1 %v13037_v38  ;;  %v7785_v11 = vunpack.c.l.bf16 %v7766_v34  ;;  %v7786_v16 = vunpack.c.h.bf16 %v7766_v34  ;;  %v4687_v17 = vpack.c.bf16 %v4633_v10, %v4627_v58  ;;  %v7843_v15 = vrot.slane %v7779_v40, 4  ;;  %v13052_v36 = vld [vmem:[%s16812_s1 + $0xdb4] ss:$8 sps:$4 sm:$0xff]   ;;  %v13058_v51 = vld [vmem:[%s16812_s1 + $0xdc4] ss:$8 sps:$4 sm:$0xff]  }
 0x146   : > { %v7844_v21 = vrot.slane %v7781_v53, 4  ;;  %v7846_v61 = vrot.slane %v7780_v0, 4  ;;  %v7847_v29 = vrot.slane %v7782_v5, 4  ;;  %v7849_v24 = vrot.slane %v7783_v6, 4  ;;  %v7767_v34 = vld [vmem:[%s13609_s20 + $0x80] sm:$0xcc] }
 0x147   : > { %v7850_v25 = vrot.slane %v7785_v11, 4  ;;  %v7852_v30 = vrot.slane %v7784_v62, 4  ;;  %v7853_v3 = vrot.slane %v7786_v16, 4  ;;  %v15046_v7 = vsel %vm3905_vm3, %v4622_v12, %v4623_v50  ;;  %4532 = vmatmul.mubr.bf16.gmra.mrb[44].mxu0 %v3976_v55  ;;  %v13050_v12 = vld [vmem:[%s16812_s1 + $0xdb0] ss:$8 sps:$4 sm:$0xff]  }
 0x148   : > { %4840 = vmatpush1.bf16.msra.mxu0 %v13023_v2  ;;  %8063 = vmatpush1.bf16.msra.mxu1 %v13035_v4  ;;  %v15049_v13 = vsel %vm3905_vm3, %v4628_v45, %v4629_v19  ;;  %v15052_v35 = vsel %vm922_vm2, %v7843_v15, %v7844_v21  ;;  %v7848_v38 = vsel %vm922_vm2, %v7846_v61, %v7847_v29  ;;  %v4567_v47 = vunpack.c.h.bf16 %v11180_v20  ;;  %v7768_v63 = vld [vmem:[%s13609_s20 + $0x88] sm:$0x33]  ;;  %v7769_v4 = vld [vmem:[%s13609_s20 + $0xb0] sm:$0xcc]  ;;  %v7770_v58 = vld [vmem:[%s13609_s20 + $0xb8] sm:$0x33] }
 0x149   : > { %4841 = vmatprep.subr.bf16.mxu0 %v13034_v9  ;;  %8064 = vmatprep.subr.bf16.mxu1 %v13045_v8  ;;  %v4686_v39 = vpack.c.bf16 %v15049_v13, %v15046_v7  ;;  %v15061_v14 = vsel %vm922_vm2, %v7849_v24, %v7850_v25  ;;  %v7854_v18 = vsel %vm922_vm2, %v7852_v30, %v7853_v3  ;;  %v4569_v27 = vunpack.c.h.bf16 %v11181_v41  ;;  %v13047_v6 = vld [vmem:[%s16812_s1 + $0x810] ss:$8 sps:$4 sm:$0xff]   ;;  %v13055_v11 = vld [vmem:[%s16812_s1 + $0x824] ss:$8 sps:$4 sm:$0xff]   ;;  %v13056_v61 = vld [vmem:[%s16812_s1 + $0xdc0] ss:$8 sps:$4 sm:$0xff]  }
 0x14a   : > { %v7907_v43 = vpack.c.bf16 %v15061_v14, %v15052_v35  ;;  %11232 = vmatprep.mubr.msk.bf16.mxu0 %vm642_vm1, %v4687_v17  ;;  %v7908_v50 = vpack.c.bf16 %v7854_v18, %v7848_v38  ;;  %v4571_v52 = vunpack.c.h.bf16 %v11182_v44  ;;  %v4573_v55 = vunpack.c.h.bf16 %v11183_v46  ;;  %v13064_v30 = vld [vmem:[%s16812_s1 + $0xdd4] ss:$8 sps:$4 sm:$0xff]   ;;  %v13062_v38 = vld [vmem:[%s16812_s1 + $0xdd0] ss:$8 sps:$4 sm:$0xff]  }
 0x14b   : > { %v4566_v56 = vunpack.c.l.bf16 %v11180_v20  ;;  %v4637_v45 = vrot.slane %v4567_v47, 6  ;;  %v4638_v19 = vrot.slane %v4569_v27, 6  ;;  %v4568_v28 = vunpack.c.l.bf16 %v11181_v41  ;;  %v15120_v18 = vld [vmem:[%s13609_s20 + $0x1f8] sm:$0x88] }
 0x14c   : > { %4842 = vmatpush1.bf16.msra.mxu0 %v13032_v22  ;;  %8065 = vmatpush1.bf16.msra.mxu1 %v13043_v32  ;;  %v4570_v40 = vunpack.c.l.bf16 %v11182_v44  ;;  %v4643_v0 = vrot.slane %v4571_v52, 6  ;;  %v4644_v2 = vrot.slane %v4573_v55, 6  ;;  %v7788_v53 = vunpack.c.h.bf16 %v7767_v34  ;;  %v15132_v55 = vld [vmem:[%s13609_s20 + $0x230] sm:$0x77] }
 0x14d   : > { %4843 = vmatprep.subr.bf16.mxu0 %v13040_v31  ;;  %8066 = vmatprep.subr.bf16.mxu1 %v13052_v36  ;;  %v7790_v5 = vunpack.c.h.bf16 %v7768_v63  ;;  %v15092_v9 = vsel %vm3905_vm3, %v4637_v45, %v4638_v19  ;;  %v7792_v8 = vunpack.c.h.bf16 %v7769_v4  ;;  %v7794_v10 = vunpack.c.h.bf16 %v7770_v58  ;;  %v13053_v36 = vld [vmem:[%s16812_s1 + $0x820] ss:$8 sps:$4 sm:$0xff]   ;;  %v13070_v45 = vld [vmem:[%s16812_s1 + $0xde4] ss:$8 sps:$4 sm:$0xff]  }
 0x14e   : > { %11726 = vmatprep.mubr.msk.bf16.mxu1 %vm642_vm1, %v7908_v50  ;;  %v4572_v62 = vunpack.c.l.bf16 %v11183_v46  ;;  %v15098_v16 = vsel %vm3905_vm3, %v4643_v0, %v4644_v2  ;;  %v7858_v17 = vrot.slane %v7788_v53, 4  ;;  %v4634_v21 = vrot.slane %v4566_v56, 6  ;;  %v13061_v56 = vld [vmem:[%s16812_s1 + $0x834] ss:$8 sps:$4 sm:$0xff]   ;;  %v7771_v2 = vld [vmem:[%s13609_s20 + $0xe0] sm:$0xcc] }
 0x14f   : > { %v7859_v15 = vrot.slane %v7790_v5, 4  ;;  %v4689_v22 = vpack.c.bf16 %v15098_v16, %v15092_v9  ;;  %v7864_v29 = vrot.slane %v7792_v8, 4  ;;  %v7865_v24 = vrot.slane %v7794_v10, 4 }
 0x150   : > { %4844 = vmatpush1.bf16.msra.mxu0 %v13038_v42  ;;  %8067 = vmatpush1.bf16.msra.mxu1 %v13050_v12  ;;  %v4635_v25 = vrot.slane %v4568_v28, 6  ;;  %v4640_v32 = vrot.slane %v4570_v40, 6  ;;  %v4641_v3 = vrot.slane %v4572_v62, 6  ;;  %v7787_v35 = vunpack.c.l.bf16 %v7767_v34  ;;  %v15127_v12 = vld [vmem:[%s13609_s20 + $0x228] sm:$0x88] }
 0x151   : > { %4845 = vmatprep.subr.bf16.mxu0 %v13049_v49  ;;  %8302 = vmatprep.subr.bf16.mxu1 %v13058_v51  ;;  %v7860_v31 = vsel %vm922_vm2, %v7858_v17, %v7859_v15  ;;  %v7866_v14 = vsel %vm922_vm2, %v7864_v29, %v7865_v24  ;;  %v7789_v41 = vunpack.c.l.bf16 %v7768_v63  ;;  %v7791_v42 = vunpack.c.l.bf16 %v7769_v4  ;;  %v11185_v49 = vld [vmem:[%s13609_s20 + $0x200] sm:$0x77]  ;;  %v7772_v4 = vld [vmem:[%s13609_s20 + $0xe8] sm:$0x33]  ;;  %v7773_v62 = vld [vmem:[%s13609_s20 + $0x110] sm:$0xcc] }
 0x152   : > { %v15117_v20 = vsel %vm3905_vm3, %v4634_v21, %v4635_v25  ;;  %v7910_v44 = vpack.c.bf16 %v7866_v14, %v7860_v31  ;;  %v15123_v46 = vsel %vm3905_vm3, %v4640_v32, %v4641_v3  ;;  %v7793_v47 = vunpack.c.l.bf16 %v7770_v58  ;;  %v13068_v17 = vld [vmem:[%s16812_s1 + $0xde0] ss:$8 sps:$4 sm:$0xff]   ;;  %v7774_v21 = vld [vmem:[%s13609_s20 + $0x118] sm:$0x33] }
 0x153   : > { %8081 = vmatmul.mubr.bf16.vlgmr.msra.gmra.mrb[16].mxu1 %v7907_v43  ;;  %v7855_v27 = vrot.slane %v7787_v35, 4  ;;  %v4688_v50 = vpack.c.bf16 %v15123_v46, %v15117_v20  ;;  %v7856_v51 = vrot.slane %v7789_v41, 4  ;;  %v7861_v52 = vrot.slane %v7791_v42, 4  ;;  %v13076_v29 = vld [vmem:[%s16812_s1 + $0xdf4] ss:$8 sps:$4 sm:$0xff]  }
 0x154   : > { %4846 = vmatpush1.bf16.msra.mxu0 %v13047_v6  ;;  %8303 = vmatpush1.bf16.msra.mxu1 %v13056_v61  ;;  %v4575_v43 = vunpack.c.h.bf16 %v15120_v18  ;;  %v7862_v19 = vrot.slane %v7793_v47, 4  ;;  %v4577_v34 = vunpack.c.h.bf16 %v11185_v49  ;;  %v4579_v63 = vunpack.c.h.bf16 %v15127_v12  ;;  %v13067_v61 = vld [vmem:[%s16812_s1 + $0x844] ss:$8 sps:$4 sm:$0xff]   ;;  %v13065_v32 = vld [vmem:[%s16812_s1 + $0x840] ss:$8 sps:$4 sm:$0xff]  }
 0x155   : > { %5201 = vmatprep.subr.bf16.mxu0 %v13055_v11  ;;  %8304 = vmatprep.subr.bf16.mxu1 %v13064_v30  ;;  %v4581_v28 = vunpack.c.h.bf16 %v15132_v55  ;;  %v7857_v40 = vsel %vm922_vm2, %v7855_v27, %v7856_v51  ;;  %v4574_v58 = vunpack.c.l.bf16 %v15120_v18  ;;  %v4576_v53 = vunpack.c.l.bf16 %v11185_v49  ;;  %v13059_v11 = vld [vmem:[%s16812_s1 + $0x830] ss:$8 sps:$4 sm:$0xff]   ;;  %v13073_v14 = vld [vmem:[%s16812_s1 + $0x854] ss:$8 sps:$4 sm:$0xff]   ;;  %v13082_v51 = vld [vmem:[%s16812_s1 + $0xe04] ss:$8 sps:$4 sm:$0xff]  }
 0x156   : > { %11727 = vmatprep.mubr.msk.bf16.mxu1 %vm642_vm1, %v7910_v44  ;;  %v4649_v0 = vrot.slane %v4575_v43, 6  ;;  %v7863_v5 = vsel %vm922_vm2, %v7861_v52, %v7862_v19  ;;  %v4650_v6 = vrot.slane %v4577_v34, 6  ;;  %v4655_v8 = vrot.slane %v4579_v63, 6  ;;  %v13074_v41 = vld [vmem:[%s16812_s1 + $0xdf0] ss:$8 sps:$4 sm:$0xff]  }
 0x157   : > { %4860 = vmatmul.mubr.bf16.vlgmr.msra.gmra.mrb[32].mxu0 %v4686_v39  ;;  %v4656_v10 = vrot.slane %v4581_v28, 6  ;;  %v7909_v15 = vpack.c.bf16 %v7863_v5, %v7857_v40  ;;  %v7796_v7 = vunpack.c.h.bf16 %v7771_v2  ;;  %v7798_v13 = vunpack.c.h.bf16 %v7772_v4  ;;  %v15191_v49 = vld [vmem:[%s13609_s20 + $0x258] sm:$0x88]  ;;  %v13080_v34 = vld [vmem:[%s16812_s1 + $0xe00] ss:$8 sps:$4 sm:$0xff]  }
 0x158   : > { %5202 = vmatpush1.bf16.msra.mxu0 %v13053_v36  ;;  %8305 = vmatpush1.bf16.msra.mxu1 %v13062_v38  ;;  %v7800_v39 = vunpack.c.h.bf16 %v7773_v62  ;;  %v15167_v24 = vsel %vm3905_vm3, %v4649_v0, %v4650_v6  ;;  %v7802_v30 = vunpack.c.h.bf16 %v7774_v21  ;;  %v4578_v31 = vunpack.c.l.bf16 %v15127_v12  ;;  %v15194_v12 = vld [vmem:[%s13609_s20 + $0x260] sm:$0x77]  ;;  %v13071_v19 = vld [vmem:[%s16812_s1 + $0x850] ss:$8 sps:$4 sm:$0xff]  }
 0x159   : > { %5203 = vmatprep.subr.bf16.mxu0 %v13061_v56  ;;  %8306 = vmatprep.subr.bf16.mxu1 %v13070_v45  ;;  %v15170_v25 = vsel %vm3905_vm3, %v4655_v8, %v4656_v10  ;;  %v7870_v35 = vrot.slane %v7796_v7, 4  ;;  %v7871_v36 = vrot.slane %v7798_v13, 4  ;;  %v4580_v16 = vunpack.c.l.bf16 %v15132_v55  ;;  %v15204_v45 = vld [vmem:[%s13609_s20 + $0x288] sm:$0x88]  ;;  %v15222_v6 = vld [vmem:[%s13609_s20 + $0x140] sm:$0xcc] }
 0x15a   : > { %11233 = vmatprep.mubr.msk.bf16.mxu0 %vm642_vm1, %v4689_v22  ;;  %v4691_v3 = vpack.c.bf16 %v15170_v25, %v15167_v24  ;;  %v7876_v38 = vrot.slane %v7800_v39, 4  ;;  %v7877_v9 = vrot.slane %v7802_v30, 4  ;;  %v4646_v22 = vrot.slane %v4574_v58, 6  ;;  %v15225_v8 = vld [vmem:[%s13609_s20 + $0x148] sm:$0x33] }
 0x15b   : > { %8091 = vmatmul.mubr.bf16.gmra.mrb[20].mxu1 %v7909_v15  ;;  %v4647_v42 = vrot.slane %v4576_v53, 6  ;;  %v7872_v18 = vsel %vm922_vm2, %v7870_v35, %v7871_v36  ;;  %v4652_v44 = vrot.slane %v4578_v31, 6  ;;  %v7795_v47 = vunpack.c.l.bf16 %v7771_v2  ;;  %v15213_v2 = vld [vmem:[%s13609_s20 + $0x290] sm:$0x77]  ;;  %v13077_v30 = vld [vmem:[%s16812_s1 + $0x860] ss:$8 sps:$4 sm:$0xff]  }
 0x15c   : > { %5204 = vmatpush1.bf16.msra.mxu0 %v13059_v11  ;;  %8307 = vmatpush1.bf16.msra.mxu1 %v13068_v17  ;;  %v7797_v27 = vunpack.c.l.bf16 %v7772_v4  ;;  %v7878_v52 = vsel %vm922_vm2, %v7876_v38, %v7877_v9  ;;  %v4653_v43 = vrot.slane %v4580_v16, 6  ;;  %v7799_v56 = vunpack.c.l.bf16 %v7773_v62  ;;  %v15231_v46 = vld [vmem:[%s13609_s20 + $0x170] sm:$0xcc]  ;;  %v13079_v17 = vld [vmem:[%s16812_s1 + $0x864] ss:$8 sps:$4 sm:$0xff]  }
 0x15d   : > { %5205 = vmatprep.subr.bf16.mxu0 %v13067_v61  ;;  %8308 = vmatprep.subr.bf16.mxu1 %v13076_v29  ;;  %v15201_v55 = vsel %vm3905_vm3, %v4646_v22, %v4647_v42  ;;  %v7912_v63 = vpack.c.bf16 %v7878_v52, %v7872_v18  ;;  %v7801_v28 = vunpack.c.l.bf16 %v7774_v21  ;;  %v7867_v40 = vrot.slane %v7795_v47, 4  ;;  %v13088_v15 = vld [vmem:[%s16812_s1 + $0xe14] ss:$8 sps:$4 sm:$0xff]   ;;  %v13094_v22 = vld [vmem:[%s16812_s1 + $0xe24] ss:$8 sps:$4 sm:$0xff]  }
 0x15e   : > { %v7868_v0 = vrot.slane %v7797_v27, 4  ;;  %v4654_v4 = vsel %vm3905_vm3, %v4652_v44, %v4653_v43  ;;  %v7873_v58 = vrot.slane %v7799_v56, 4  ;;  %v4583_v53 = vunpack.c.h.bf16 %v15191_v49  ;;  %v13085_v16 = vld [vmem:[%s16812_s1 + $0x874] ss:$8 sps:$4 sm:$0xff]   ;;  %v13083_v27 = vld [vmem:[%s16812_s1 + $0x870] ss:$8 sps:$4 sm:$0xff]  }
 0x15f   : > { %4870 = vmatmul.mubr.bf16.gmra.mrb[36].mxu0 %v4688_v50  ;;  %v4585_v5 = vunpack.c.h.bf16 %v15194_v12  ;;  %v4690_v10 = vpack.c.bf16 %v4654_v4, %v15201_v55  ;;  %v7874_v11 = vrot.slane %v7801_v28, 4  ;;  %v4587_v20 = vunpack.c.h.bf16 %v15204_v45  ;;  %v15234_v50 = vld [vmem:[%s13609_s20 + $0x178] sm:$0x33]  ;;  %11728 = vmatprep.mubr.msk.bf16.mxu1 %vm642_vm1, %v7912_v63  ;;  %v13091_v43 = vld [vmem:[%s16812_s1 + $0x884] ss:$8 sps:$4 sm:$0xff]  }
 0x160   : > { %5206 = vmatpush1.bf16.msra.mxu0 %v13065_v32  ;;  %8309 = vmatpush1.bf16.msra.mxu1 %v13074_v41  ;;  %v7869_v62 = vsel %vm922_vm2, %v7867_v40, %v7868_v0  ;;  %v4589_v21 = vunpack.c.h.bf16 %v15213_v2  ;;  %v4661_v7 = vrot.slane %v4583_v53, 6  ;;  %v7804_v39 = vunpack.c.h.bf16 %v15222_v6  ;;  %v11236_v63 = vld [vmem:[%s13609_s20 + $0x360] sm:$0x88]  ;;  %v13100_v28 = vld [vmem:[%s16812_s1 + $0xe34] ss:$8 sps:$4 sm:$0xff]  }
 0x161   : > { %5207 = vmatprep.subr.bf16.mxu0 %v13073_v14  ;;  %8310 = vmatprep.subr.bf16.mxu1 %v13082_v51  ;;  %v4662_v13 = vrot.slane %v4585_v5, 6  ;;  %v7875_v61 = vsel %vm922_vm2, %v7873_v58, %v7874_v11  ;;  %v4667_v29 = vrot.slane %v4587_v20, 6  ;;  %v7806_v24 = vunpack.c.h.bf16 %v15225_v8  ;;  %v11237_v58 = vld [vmem:[%s13609_s20 + $0x368] sm:$0x77] }
 0x162   : > { %11234 = vmatprep.mubr.msk.bf16.mxu0 %vm642_vm1, %v4691_v3  ;;  %v7808_v25 = vunpack.c.h.bf16 %v15231_v46  ;;  %v7911_v31 = vpack.c.bf16 %v7875_v61, %v7869_v62  ;;  %v4668_v35 = vrot.slane %v4589_v21, 6  ;;  %v7810_v36 = vunpack.c.h.bf16 %v15234_v50  ;;  %v13086_v3 = vld [vmem:[%s16812_s1 + $0xe10] ss:$8 sps:$4 sm:$0xff]  }
 0x163   : > { %v4663_v32 = vsel %vm3905_vm3, %v4661_v7, %v4662_v13  ;;  %v7882_v38 = vrot.slane %v7804_v39, 4  ;;  %v7883_v14 = vrot.slane %v7806_v24, 4  ;;  %v4582_v9 = vunpack.c.l.bf16 %v15191_v49  ;;  %v13098_v13 = vld [vmem:[%s16812_s1 + $0xe30] ss:$8 sps:$4 sm:$0xff]  }
 0x164   : > { %5208 = vmatpush1.bf16.msra.mxu0 %v13071_v19  ;;  %8311 = vmatpush1.bf16.msra.mxu1 %v13080_v34  ;;  %v7888_v41 = vrot.slane %v7808_v25, 4  ;;  %v4669_v42 = vsel %vm3905_vm3, %v4667_v29, %v4668_v35  ;;  %v7889_v18 = vrot.slane %v7810_v36, 4  ;;  %v4584_v44 = vunpack.c.l.bf16 %v15194_v12  ;;  %v13092_v12 = vld [vmem:[%s16812_s1 + $0xe20] ss:$8 sps:$4 sm:$0xff]   ;;  %v13106_v25 = vld [vmem:[%s16812_s1 + $0xe44] ss:$8 sps:$4 sm:$0xff]  }
 0x165   : > { %5209 = vmatprep.subr.bf16.mxu0 %v13079_v17  ;;  %8312 = vmatprep.subr.bf16.mxu1 %v13088_v15  ;;  %v4586_v47 = vunpack.c.l.bf16 %v15204_v45  ;;  %v4693_v49 = vpack.c.bf16 %v4669_v42, %v4663_v32  ;;  %v7884_v51 = vsel %vm922_vm2, %v7882_v38, %v7883_v14  ;;  %v4588_v52 = vunpack.c.l.bf16 %v15213_v2  ;;  %v13095_v36 = vld [vmem:[%s16812_s1 + $0x890] ss:$8 sps:$4 sm:$0xff]   ;;  %v13104_v42 = vld [vmem:[%s16812_s1 + $0xe40] ss:$8 sps:$4 sm:$0xff]  }
 0x166   : > { %8101 = vmatmul.mubr.bf16.gmra.mrb[24].mxu1 %v7911_v31  ;;  %v4658_v55 = vrot.slane %v4582_v9, 6  ;;  %v7890_v56 = vsel %vm922_vm2, %v7888_v41, %v7889_v18  ;;  %v4659_v45 = vrot.slane %v4584_v44, 6  ;;  %v7803_v34 = vunpack.c.l.bf16 %v15222_v6  ;;  %v13103_v41 = vld [vmem:[%s16812_s1 + $0x8a4] ss:$8 sps:$4 sm:$0xff]  }
 0x167   : > { %4880 = vmatmul.mubr.bf16.gmra.mrb[40].mxu0 %v4690_v10  ;;  %v4664_v19 = vrot.slane %v4586_v47, 6  ;;  %v7914_v40 = vpack.c.bf16 %v7890_v56, %v7884_v51  ;;  %v4665_v0 = vrot.slane %v4588_v52, 6  ;;  %v7805_v2 = vunpack.c.l.bf16 %v15225_v8  ;;  %v11238_v10 = vld [vmem:[%s13609_s20 + $0x390] sm:$0x88]  ;;  %v11239_v8 = vld [vmem:[%s13609_s20 + $0x398] sm:$0x77] }
 0x168   : > { %5210 = vmatpush1.bf16.msra.mxu0 %v13077_v30  ;;  %8313 = vmatpush1.bf16.msra.mxu1 %v13086_v3  ;;  %v7807_v4 = vunpack.c.l.bf16 %v15231_v46  ;;  %v4660_v53 = vsel %vm3905_vm3, %v4658_v55, %v4659_v45  ;;  %v7809_v5 = vunpack.c.l.bf16 %v15234_v50  ;;  %v7879_v6 = vrot.slane %v7803_v34, 4  ;;  %v13089_v46 = vld [vmem:[%s16812_s1 + $0x880] ss:$8 sps:$4 sm:$0xff]   ;;  %v13097_v50 = vld [vmem:[%s16812_s1 + $0x894] ss:$8 sps:$4 sm:$0xff]  }
 0x169   : > { %5211 = vmatprep.subr.bf16.mxu0 %v13085_v16  ;;  %8314 = vmatprep.subr.bf16.mxu1 %v13094_v22  ;;  %v4666_v62 = vsel %vm3905_vm3, %v4664_v19, %v4665_v0  ;;  %v7880_v11 = vrot.slane %v7805_v2, 4  ;;  %v4933_v17 = vunpack.c.h.bf16 %v11236_v63  ;;  %v4935_v7 = vunpack.c.h.bf16 %v11237_v58  ;;  %v13118_v22 = vld [vmem:[%s13609_s20 + $0x364] ss:$48 sps:$4 sm:$0xff]   ;;  %v13101_v55 = vld [vmem:[%s16812_s1 + $0x8a0] ss:$8 sps:$4 sm:$0xff]  }
 0x16a   : > { %11235 = vmatprep.mubr.msk.bf16.mxu0 %vm642_vm1, %v4693_v49  ;;  %11729 = vmatprep.mubr.msk.bf16.mxu1 %vm642_vm1, %v7914_v40  ;;  %v7885_v20 = vrot.slane %v7807_v4, 4  ;;  %v4692_v15 = vpack.c.bf16 %v4666_v62, %v4660_v53  ;;  %v7886_v21 = vrot.slane %v7809_v5, 4  ;;  %v4932_v61 = vunpack.c.l.bf16 %v11236_v63  ;;  %v13112_v47 = vld [vmem:[%s16812_s1 + $0xe54] ss:$8 sps:$4 sm:$0xff]   ;;  %v11240_v56 = vld [vmem:[%s13609_s20 + $0x3c0] sm:$0x88] }
 0x16b   : > { %v7881_v39 = vsel %vm922_vm2, %v7879_v6, %v7880_v11  ;;  %v4934_v29 = vunpack.c.l.bf16 %v11237_v58  ;;  %v4937_v24 = vunpack.c.h.bf16 %v11238_v10  ;;  %v4936_v31 = vunpack.c.l.bf16 %v11238_v10  ;;  %v11241_v45 = vld [vmem:[%s13609_s20 + $0x3c8] sm:$0x77]  ;;  %v11242_v19 = vld [vmem:[%s13609_s20 + $0x3f0] sm:$0x88]  ;;  %v11243_v34 = vld [vmem:[%s13609_s20 + $0x3f8] sm:$0x77] }
 0x16c   : > { %5212 = vmatpush1.bf16.msra.mxu0 %v13083_v27  ;;  %8315 = vmatpush1.bf16.msra.mxu1 %v13092_v12  ;;  %v7887_v30 = vsel %vm922_vm2, %v7885_v20, %v7886_v21  ;;  %v4938_v32 = vunpack.c.l.bf16 %v11239_v8  ;;  %v4939_v35 = vunpack.c.h.bf16 %v11239_v8  ;;  %v4999_v38 = vrot.slane %v4933_v17, 6  ;;  %v13109_v0 = vld [vmem:[%s16812_s1 + $0x8b4] ss:$8 sps:$4 sm:$0xff]   ;;  %v13121_v2 = vld [vmem:[%s16812_s1 + $0xe64] ss:$8 sps:$4 sm:$0xff]  }
 0x16d   : > { %5213 = vmatprep.subr.bf16.mxu0 %v13091_v43  ;;  %8316 = vmatprep.subr.bf16.mxu1 %v13100_v28  ;;  %v7913_v3 = vpack.c.bf16 %v7887_v30, %v7881_v39  ;;  %v5000_v14 = vrot.slane %v4935_v7, 6  ;;  %v5005_v9 = vrot.slane %v4937_v24, 6  ;;  %v4996_v18 = vrot.slane %v4932_v61, 6  ;;  %v13110_v43 = vld [vmem:[%s16812_s1 + $0xe50] ss:$8 sps:$4 sm:$0xff]  }
 0x16e   : > { %v5006_v16 = vrot.slane %v4939_v35, 6  ;;  %v4997_v27 = vrot.slane %v4934_v29, 6  ;;  %v5002_v49 = vrot.slane %v4936_v31, 6  ;;  %v5003_v51 = vrot.slane %v4938_v32, 6  ;;  %v13116_v11 = vld [vmem:[%s13609_s20 + $0x360] ss:$48 sps:$4 sm:$0xff]  }
 0x16f   : > { %4890 = vmatmul.mubr.bf16.gmra.mrb[44].mxu0 %v4692_v15  ;;  %v5001_v44 = vsel %vm3905_vm3, %v4999_v38, %v5000_v14  ;;  %8111 = vmatmul.mubr.bf16.gmra.mrb[28].mxu1 %v7913_v3  ;;  %v4941_v63 = vunpack.c.h.bf16 %v11240_v56  ;;  %v4943_v28 = vunpack.c.h.bf16 %v11241_v45  ;;  %v4945_v40 = vunpack.c.h.bf16 %v11242_v19  ;;  %v13107_v15 = vld [vmem:[%s16812_s1 + $0x8b0] ss:$8 sps:$4 sm:$0xff]   ;;  %v13119_v21 = vld [vmem:[%s16812_s1 + $0xe60] ss:$8 sps:$4 sm:$0xff]   ;;  %v13115_v7 = vld [vmem:[%s16812_s1 + $0x8c4] ss:$8 sps:$4 sm:$0xff]  }
 0x170   : > { %5214 = vmatpush1.bf16.msra.mxu0 %v13089_v46  ;;  %8317 = vmatpush1.bf16.msra.mxu1 %v13098_v13  ;;  %v5007_v52 = vsel %vm3905_vm3, %v5005_v9, %v5006_v16  ;;  %v4998_v4 = vsel %vm3905_vm3, %v4996_v18, %v4997_v27  ;;  %v5004_v58 = vsel %vm3905_vm3, %v5002_v49, %v5003_v51  ;;  %v4947_v53 = vunpack.c.h.bf16 %v11243_v34  ;;  %v13113_v13 = vld [vmem:[%s16812_s1 + $0x8c0] ss:$8 sps:$4 sm:$0xff]   ;;  %v13125_v61 = vld [vmem:[%s16812_s1 + $0xe70] ss:$8 sps:$4 sm:$0xff]   ;;  %v13143_v24 = vld [vmem:[%s13609_s20 + $0x3c4] ss:$48 sps:$4 sm:$0xff]  }
 0x171   : > { %5215 = vmatprep.subr.bf16.mxu0 %v13097_v50  ;;  %8318 = vmatprep.subr.bf16.mxu1 %v13106_v25  ;;  %v5061_v12 = vpack.c.bf16 %v5007_v52, %v5001_v44  ;;  %v5011_v5 = vrot.slane %v4941_v63, 6  ;;  %v5012_v6 = vrot.slane %v4943_v28, 6  ;;  %v4940_v10 = vunpack.c.l.bf16 %v11240_v56  ;;  %v13127_v50 = vld [vmem:[%s16812_s1 + $0xe74] ss:$8 sps:$4 sm:$0xff]   ;;  %v11244_v3 = vld [vmem:[%s13609_s20 + $0x420] sm:$0x88] }
 0x172   : > { %11786 = vmatprep.mubr.msk.bf16.mxu1 %vm642_vm1, %v13118_v22  ;;  %v4942_v62 = vunpack.c.l.bf16 %v11241_v45  ;;  %v5017_v20 = vrot.slane %v4945_v40, 6  ;;  %v5018_v8 = vrot.slane %v4947_v53, 6  ;;  %v4944_v17 = vunpack.c.l.bf16 %v11242_v19  ;;  %v13124_v30 = vld [vmem:[%s16812_s1 + $0x8d4] ss:$8 sps:$4 sm:$0xff]   ;;  %v11245_v38 = vld [vmem:[%s13609_s20 + $0x428] sm:$0x77] }
 0x173   : > { %11292 = vmatprep.mubr.msk.bf16.mxu0 %vm642_vm1, %v5061_v12  ;;  %v4946_v46 = vunpack.c.l.bf16 %v11243_v34  ;;  %v5060_v39 = vpack.c.bf16 %v5004_v58, %v4998_v4  ;;  %v5013_v29 = vsel %vm3905_vm3, %v5011_v5, %v5012_v6  ;;  %v5008_v25 = vrot.slane %v4940_v10, 6  ;;  %v11246_v14 = vld [vmem:[%s13609_s20 + $0x450] sm:$0x88]  ;;  %v13133_v16 = vld [vmem:[%s16812_s1 + $0xe84] ss:$8 sps:$4 sm:$0xff]  }
 0x174   : > { %5216 = vmatpush1.bf16.msra.mxu0 %v13095_v36  ;;  %8319 = vmatpush1.bf16.msra.mxu1 %v13104_v42  ;;  %v5019_v31 = vsel %vm3905_vm3, %v5017_v20, %v5018_v8  ;;  %v5009_v32 = vrot.slane %v4942_v62, 6  ;;  %v5014_v35 = vrot.slane %v4944_v17, 6  ;;  %v4949_v9 = vunpack.c.h.bf16 %v11244_v3  ;;  %v13148_v49 = vld [vmem:[%s13609_s20 + $0x3c0] ss:$48 sps:$4 sm:$0xff]   ;;  %v13130_v19 = vld [vmem:[%s16812_s1 + $0x8e4] ss:$8 sps:$4 sm:$0xff]  }
 0x175   : > { %5217 = vmatprep.subr.bf16.mxu0 %v13103_v41  ;;  %8320 = vmatprep.subr.bf16.mxu1 %v13112_v47  ;;  %v5015_v36 = vrot.slane %v4946_v46, 6  ;;  %v11247_v41 = vld [vmem:[%s13609_s20 + $0x458] sm:$0x77]  ;;  %v4951_v22 = vunpack.c.h.bf16 %v11245_v38  ;;  %v4953_v42 = vunpack.c.h.bf16 %v11246_v14  ;;  %v4948_v44 = vunpack.c.l.bf16 %v11244_v3  ;;  %v13131_v34 = vld [vmem:[%s16812_s1 + $0xe80] ss:$8 sps:$4 sm:$0xff]  }
 0x176   : > { %v4955_v18 = vunpack.c.h.bf16 %v11247_v41  ;;  %v13122_v47 = vld [vmem:[%s16812_s1 + $0x8d0] ss:$8 sps:$4 sm:$0xff]   ;;  %v5063_v27 = vpack.c.bf16 %v5019_v31, %v5013_v29  ;;  %v4950_v51 = vunpack.c.l.bf16 %v11245_v38  ;;  %v4952_v52 = vunpack.c.l.bf16 %v11246_v14  ;;  %v13139_v40 = vld [vmem:[%s16812_s1 + $0xe94] ss:$8 sps:$4 sm:$0xff]   ;;  %v13147_v62 = vld [vmem:[%s16812_s1 + $0xea4] ss:$8 sps:$4 sm:$0xff]  }
 0x177   : > { %v5024_v12 = vrot.slane %v4951_v22, 6  ;;  %v5029_v56 = vrot.slane %v4953_v42, 6  ;;  %v5010_v63 = vsel %vm3905_vm3, %v5008_v25, %v5009_v32  ;;  %v5016_v28 = vsel %vm3905_vm3, %v5014_v35, %v5015_v36  ;;  %v13158_v4 = vld [vmem:[%s13609_s20 + $0x424] ss:$48 sps:$4 sm:$0xff]   ;;  %v13137_v10 = vld [vmem:[%s16812_s1 + $0xe90] ss:$8 sps:$4 sm:$0xff]  }
 0x178   : > { %5218 = vmatpush1.bf16.msra.mxu0 %v13101_v55  ;;  %8321 = vmatpush1.bf16.msra.mxu1 %v13110_v43  ;;  %v4954_v55 = vunpack.c.l.bf16 %v11247_v41  ;;  %v5023_v43 = vrot.slane %v4949_v9, 6  ;;  %v5030_v45 = vrot.slane %v4955_v18, 6  ;;  %v5021_v58 = vrot.slane %v4950_v51, 6  ;;  %v13136_v6 = vld [vmem:[%s16812_s1 + $0x8f4] ss:$8 sps:$4 sm:$0xff]  }
 0x179   : > { %5219 = vmatprep.subr.bf16.mxu0 %v13109_v0  ;;  %8512 = vmatprep.subr.bf16.mxu1 %v13121_v2  ;;  %v5020_v0 = vrot.slane %v4948_v44, 6  ;;  %v13128_v2 = vld [vmem:[%s16812_s1 + $0x8e0] ss:$8 sps:$4 sm:$0xff]   ;;  %v5026_v53 = vrot.slane %v4952_v52, 6  ;;  %v13154_v22 = vld [vmem:[%s16812_s1 + $0xeb4] ss:$8 sps:$4 sm:$0xff]  }
 0x17a   : > { %v5027_v5 = vrot.slane %v4954_v55, 6  ;;  %v5025_v20 = vsel %vm3905_vm3, %v5023_v43, %v5024_v12  ;;  %v5031_v8 = vsel %vm3905_vm3, %v5029_v56, %v5030_v45  ;;  %v11248_v17 = vld [vmem:[%s13609_s20 + $0x480] sm:$0x88]  ;;  %v11249_v46 = vld [vmem:[%s13609_s20 + $0x488] sm:$0x77] }
 0x17b   : > { %8335 = vmatmul.mubr.bf16.vlgmr.msra.gmra.mrb[16].mxu1 %v13116_v11  ;;  %v5062_v11 = vpack.c.bf16 %v5016_v28, %v5010_v63  ;;  %v5022_v29 = vsel %vm3905_vm3, %v5020_v0, %v5021_v58  ;;  %v4956_v36 = vunpack.c.l.bf16 %v11248_v17  ;;  %v13145_v3 = vld [vmem:[%s16812_s1 + $0xea0] ss:$8 sps:$4 sm:$0xff]   ;;  %v4958_v14 = vunpack.c.l.bf16 %v11249_v46  ;;  %v13173_v18 = vld [vmem:[%s13609_s20 + $0x484] ss:$48 sps:$4 sm:$0xff]   ;;  %v13152_v44 = vld [vmem:[%s16812_s1 + $0xeb0] ss:$8 sps:$4 sm:$0xff]  }
 0x17c   : > { %5220 = vmatpush1.bf16.msra.mxu0 %v13107_v15  ;;  %8513 = vmatpush1.bf16.msra.mxu1 %v13119_v21  ;;  %v11250_v15 = vld [vmem:[%s13609_s20 + $0x4b0] sm:$0x88]  ;;  %v11251_v21 = vld [vmem:[%s13609_s20 + $0x4b8] sm:$0x77]  ;;  %v13140_v42 = vld [vmem:[%s16812_s1 + $0x900] ss:$8 sps:$4 sm:$0xff]  }
 0x17d   : > { %5411 = vmatprep.subr.bf16.mxu0 %v13115_v7  ;;  %8514 = vmatprep.subr.bf16.mxu1 %v13127_v50  ;;  %v4957_v7 = vunpack.c.h.bf16 %v11248_v17  ;;  %v4959_v50 = vunpack.c.h.bf16 %v11249_v46  ;;  %v4963_v25 = vunpack.c.h.bf16 %v11251_v21  ;;  %v4960_v41 = vunpack.c.l.bf16 %v11250_v15  ;;  %v13151_v12 = vld [vmem:[%s16812_s1 + $0x914] ss:$8 sps:$4 sm:$0xff]   ;;  %v13162_v56 = vld [vmem:[%s16812_s1 + $0xec4] ss:$8 sps:$4 sm:$0xff]   ;;  %v13160_v63 = vld [vmem:[%s16812_s1 + $0xec0] ss:$8 sps:$4 sm:$0xff]  }
 0x17e   : > { %11787 = vmatprep.mubr.msk.bf16.mxu1 %vm642_vm1, %v13143_v24  ;;  %v5028_v24 = vsel %vm3905_vm3, %v5026_v53, %v5027_v5  ;;  %v4962_v9 = vunpack.c.l.bf16 %v11251_v21  ;;  %v5032_v51 = vrot.slane %v4956_v36, 6  ;;  %v5033_v52 = vrot.slane %v4958_v14, 6  ;;  %v13157_v0 = vld [vmem:[%s16812_s1 + $0x924] ss:$8 sps:$4 sm:$0xff]   ;;  %v13155_v58 = vld [vmem:[%s16812_s1 + $0x920] ss:$8 sps:$4 sm:$0xff]  }
 0x17f   : > { %5234 = vmatmul.mubr.bf16.vlgmr.msra.gmra.mrb[32].mxu0 %v5060_v39  ;;  %v13134_v39 = vld [vmem:[%s16812_s1 + $0x8f0] ss:$8 sps:$4 sm:$0xff]   ;;  %v5035_v31 = vrot.slane %v4957_v7, 6  ;;  %v5036_v32 = vrot.slane %v4959_v50, 6  ;;  %v5042_v38 = vrot.slane %v4963_v25, 6  ;;  %v5038_v55 = vrot.slane %v4960_v41, 6 }
 0x180   : > { %5412 = vmatpush1.bf16.msra.mxu0 %v13113_v13  ;;  %8515 = vmatpush1.bf16.msra.mxu1 %v13125_v61  ;;  %v4961_v13 = vunpack.c.h.bf16 %v11250_v15  ;;  %v5065_v61 = vpack.c.bf16 %v5031_v8, %v5025_v20  ;;  %v5039_v43 = vrot.slane %v4962_v9, 6  ;;  %v5034_v28 = vsel %vm3905_vm3, %v5032_v51, %v5033_v52  ;;  %v13167_v53 = vld [vmem:[%s16812_s1 + $0xed0] ss:$8 sps:$4 sm:$0xff]   ;;  %v13166_v5 = vld [vmem:[%s16812_s1 + $0x934] ss:$8 sps:$4 sm:$0xff]  }
 0x181   : > { %5413 = vmatprep.subr.bf16.mxu0 %v13124_v30  ;;  %8516 = vmatprep.subr.bf16.mxu1 %v13133_v16  ;;  %v13163_v30 = vld [vmem:[%s13609_s20 + $0x420] ss:$48 sps:$4 sm:$0xff]   ;;  %v13142_v16 = vld [vmem:[%s16812_s1 + $0x904] ss:$8 sps:$4 sm:$0xff]   ;;  %v13184_v20 = vld [vmem:[%s16812_s1 + $0xef4] ss:$8 sps:$4 sm:$0xff]  }
 0x182   : > { %11293 = vmatprep.mubr.msk.bf16.mxu0 %vm642_vm1, %v5063_v27  ;;  %v5041_v35 = vrot.slane %v4961_v13, 6  ;;  %v5037_v27 = vsel %vm3905_vm3, %v5035_v31, %v5036_v32  ;;  %v13170_v8 = vld [vmem:[%s16812_s1 + $0x940] ss:$8 sps:$4 sm:$0xff]   ;;  %v13182_v17 = vld [vmem:[%s16812_s1 + $0xef0] ss:$8 sps:$4 sm:$0xff]  }
 0x183   : > { %8345 = vmatmul.mubr.bf16.gmra.mrb[20].mxu1 %v13148_v49  ;;  %v13181_v46 = vld [vmem:[%s16812_s1 + $0x954] ss:$8 sps:$4 sm:$0xff]   ;;  %v13179_v15 = vld [vmem:[%s16812_s1 + $0x950] ss:$8 sps:$4 sm:$0xff]   ;;  %v13187_v7 = vld [vmem:[%s16812_s1 + $0x964] ss:$8 sps:$4 sm:$0xff]  }
 0x184   : > { %5414 = vmatpush1.bf16.msra.mxu0 %v13122_v47  ;;  %8517 = vmatpush1.bf16.msra.mxu1 %v13131_v34  ;;  %v5064_v47 = vpack.c.bf16 %v5028_v24, %v5022_v29  ;;  %v5043_v49 = vsel %vm3905_vm3, %v5041_v35, %v5042_v38  ;;  %v13149_v34 = vld [vmem:[%s16812_s1 + $0x910] ss:$8 sps:$4 sm:$0xff]   ;;  %v13188_v50 = vld [vmem:[%s16812_s1 + $0xf00] ss:$8 sps:$4 sm:$0xff]   ;;  %v13193_v38 = vld [vmem:[%s16812_s1 + $0x974] ss:$8 sps:$4 sm:$0xff]  }
 0x185   : > { %5415 = vmatprep.subr.bf16.mxu0 %v13130_v19  ;;  %8518 = vmatprep.subr.bf16.mxu1 %v13139_v40  ;;  %v5067_v45 = vpack.c.bf16 %v5043_v49, %v5037_v27  ;;  %v13178_v19 = vld [vmem:[%s13609_s20 + $0x480] ss:$48 sps:$4 sm:$0xff]   ;;  %v5040_v40 = vsel %vm3905_vm3, %v5038_v55, %v5039_v43  ;;  %v13199_v52 = vld [vmem:[%s16812_s1 + $0x984] ss:$8 sps:$4 sm:$0xff]   ;;  %v13208_v43 = vld [vmem:[%s16812_s1 + $0xf34] ss:$8 sps:$4 sm:$0xff]  }
 0x186   : > { %11788 = vmatprep.mubr.msk.bf16.mxu1 %vm642_vm1, %v13158_v4  ;;  %v5066_v4 = vpack.c.bf16 %v5040_v40, %v5034_v28  ;;  %v13185_v35 = vld [vmem:[%s16812_s1 + $0x960] ss:$8 sps:$4 sm:$0xff]   ;;  %v13194_v14 = vld [vmem:[%s16812_s1 + $0xf10] ss:$8 sps:$4 sm:$0xff]  }
 0x187   : > { %5244 = vmatmul.mubr.bf16.gmra.mrb[36].mxu0 %v5062_v11  ;;  %v13172_v11 = vld [vmem:[%s16812_s1 + $0x944] ss:$8 sps:$4 sm:$0xff]   ;;  %v13200_v55 = vld [vmem:[%s16812_s1 + $0xf20] ss:$8 sps:$4 sm:$0xff]  }
 0x188   : > { %5416 = vmatpush1.bf16.msra.mxu0 %v13128_v2  ;;  %8519 = vmatpush1.bf16.msra.mxu1 %v13137_v10  ;;  %v13169_v2 = vld [vmem:[%s16812_s1 + $0xed4] ss:$8 sps:$4 sm:$0xff]   ;;  %v13164_v10 = vld [vmem:[%s16812_s1 + $0x930] ss:$8 sps:$4 sm:$0xff]  }
 0x189   : > { %5417 = vmatprep.subr.bf16.mxu0 %v13136_v6  ;;  %8520 = vmatprep.subr.bf16.mxu1 %v13147_v62  ;;  %v13177_v6 = vld [vmem:[%s16812_s1 + $0xee4] ss:$8 sps:$4 sm:$0xff]   ;;  %v13175_v62 = vld [vmem:[%s16812_s1 + $0xee0] ss:$8 sps:$4 sm:$0xff]  }
 0x18a   : > { %11294 = vmatprep.mubr.msk.bf16.mxu0 %vm642_vm1, %v5065_v61  ;;  %v13196_v61 = vld [vmem:[%s16812_s1 + $0xf14] ss:$8 sps:$4 sm:$0xff]  }
 0x18b   : > { %8355 = vmatmul.mubr.bf16.gmra.mrb[24].mxu1 %v13163_v30 }
 0x18c   : > { %5418 = vmatpush1.bf16.msra.mxu0 %v13134_v39  ;;  %8521 = vmatpush1.bf16.msra.mxu1 %v13145_v3 }
 0x18d   : > { %5419 = vmatprep.subr.bf16.mxu0 %v13142_v16  ;;  %8522 = vmatprep.subr.bf16.mxu1 %v13154_v22  ;;  %v13202_v16 = vld [vmem:[%s16812_s1 + $0xf24] ss:$8 sps:$4 sm:$0xff]  }
 0x18e   : > { %11789 = vmatprep.mubr.msk.bf16.mxu1 %vm642_vm1, %v13173_v18 }
 0x18f   : > { %5254 = vmatmul.mubr.bf16.gmra.mrb[40].mxu0 %v5064_v47 }
 0x190   : > { %5420 = vmatpush1.bf16.msra.mxu0 %v13140_v42  ;;  %8523 = vmatpush1.bf16.msra.mxu1 %v13152_v44  ;;  %v13191_v44 = vld [vmem:[%s16812_s1 + $0x970] ss:$8 sps:$4 sm:$0xff]  }
 0x191   : > { %5421 = vmatprep.subr.bf16.mxu0 %v13151_v12  ;;  %8524 = vmatprep.subr.bf16.mxu1 %v13162_v56 }
 0x192   : > { %11295 = vmatprep.mubr.msk.bf16.mxu0 %vm642_vm1, %v5067_v45 }
 0x193   : > { %8365 = vmatmul.mubr.bf16.gmra.mrb[28].mxu1 %v13178_v19 }
 0x194   : > { %5422 = vmatpush1.bf16.msra.mxu0 %v13149_v34  ;;  %8525 = vmatpush1.bf16.msra.mxu1 %v13160_v63  ;;  %v11340_v34 = vld [vmem:[%s13609_s20 + $0x378] sm:$0x88]  ;;  %v11341_v63 = vld [vmem:[%s13609_s20 + $0x380] sm:$0x77] }
 0x195   : > { %5423 = vmatprep.subr.bf16.mxu0 %v13157_v0  ;;  %8526 = vmatprep.subr.bf16.mxu1 %v13169_v2  ;;  %v11342_v2 = vld [vmem:[%s13609_s20 + $0x3a8] sm:$0x88] }
 0x196   : > { %11830 = vmatprep.mubr.msk.bf16.mxu1 %vm642_vm1, %v13647_v60 }
 0x197   : > { %5264 = vmatmul.mubr.bf16.gmra.mrb[44].mxu0 %v5066_v4  ;;  %v15555_v4 = vld [vmem:[%s13609_s20 + $0x3b0] sm:$0x77] }
 0x198   : > { %5424 = vmatpush1.bf16.msra.mxu0 %v13155_v58  ;;  %8527 = vmatpush1.bf16.msra.mxu1 %v13167_v53  ;;  %v5516_v58 = vunpack.c.l.bf16 %v11340_v34  ;;  %v5517_v53 = vunpack.c.h.bf16 %v11340_v34 }
 0x199   : > { %5425 = vmatprep.subr.bf16.mxu0 %v13166_v5  ;;  %8528 = vmatprep.subr.bf16.mxu1 %v13177_v6  ;;  %v5518_v5 = vunpack.c.l.bf16 %v11341_v63 }
 0x19a   : > { %11336 = vmatprep.mubr.msk.bf16.mxu0 %vm642_vm1, %v13647_v60  ;;  %v13190_v60 = vld [vmem:[%s16812_s1 + $0xf04] ss:$8 sps:$4 sm:$0xff]  }
 0x19c   : > { %5426 = vmatpush1.bf16.msra.mxu0 %v13164_v10  ;;  %8529 = vmatpush1.bf16.msra.mxu1 %v13175_v62 }
 0x19d   : > { %5427 = vmatprep.subr.bf16.mxu0 %v13172_v11  ;;  %8530 = vmatprep.subr.bf16.mxu1 %v13184_v20  ;;  %v5519_v11 = vunpack.c.h.bf16 %v11341_v63  ;;  %v5520_v20 = vunpack.c.l.bf16 %v11342_v2 }
 0x1a0   : > { %5428 = vmatpush1.bf16.msra.mxu0 %v13170_v8  ;;  %8531 = vmatpush1.bf16.msra.mxu1 %v13182_v17  ;;  %v5521_v8 = vunpack.c.h.bf16 %v11342_v2 }
 0x1a1   : > { %5429 = vmatprep.subr.bf16.mxu0 %v13181_v46  ;;  %8886 = vmatprep.subr.bf16.mxu1 %v13190_v60 }
 0x1a2   : > { %v2132_v21 = vpop.f32.mrb[16].mxu0 }
 0x1a3   : > { %v3602_v13 = vpop.f32.mrb[0].mxu1  ;;  %v2134_v39 = vpop.f32.mrb[17].mxu0  ;;  %8545 = vmatmul.mubr.bf16.vlgmr.msra.gmra.mrb[16].mxu1 %v13671_v23 }
 0x1a4   : > { %v12115_v29 = vadd.f32 %v3602_v13, %v2132_v21  ;;  %v3604_v24 = vpop.f32.mrb[1].mxu1  ;;  %v2136_v25 = vpop.f32.mrb[18].mxu0  ;;  %5430 = vmatpush1.bf16.msra.mxu0 %v13179_v15  ;;  %8887 = vmatpush1.bf16.msra.mxu1 %v13188_v50  ;;  %v5522_v21 = vunpack.c.l.bf16 %v15555_v4 }
 0x1a5   : > { %v12116_v30 = vadd.f32 %v3604_v24, %v2134_v39  ;;  %v3606_v31 = vpop.f32.mrb[2].mxu1  ;;  %v2138_v32 = vpop.f32.mrb[19].mxu0  ;;  %5785 = vmatprep.subr.bf16.mxu0 %v13187_v7  ;;  %8888 = vmatprep.subr.bf16.mxu1 %v13196_v61  ;;  %v13197_v7 = vld [vmem:[%s16812_s1 + $0x980] ss:$8 sps:$4 sm:$0xff]   ;;  %v5523_v61 = vunpack.c.h.bf16 %v15555_v4  ;;  %v13214_v24 = vld [vmem:[%s16812_s1 + $0xf44] ss:$8 sps:$4 sm:$0xff]  }
 0x1a6   : > { %v12117_v36 = vadd.f32 %v3606_v31, %v2136_v25  ;;  %v3608_v3 = vpop.f32.mrb[3].mxu1  ;;  %v3759_v22 = vmul.f32 %v12115_v29, %v12115_v29  ;;  %11831 = vmatprep.mubr.msk.bf16.mxu1 %vm642_vm1, %v13692_v33  ;;  %v15612_v4 = vld [vmem:[%s13609_s20 + $0x3b0] sm:$0xcc] }
 0x1a7   : > { %v12091_v41 = vpack.c.bf16 %v12116_v30, %v12115_v29  ;;  %v12118_v9 = vadd.f32 %v3608_v3, %v2138_v32  ;;  %v3760_v47 = vmul.f32 %v12116_v30, %v12116_v30  ;;  %5444 = vmatmul.mubr.bf16.vlgmr.msra.gmra.mrb[32].mxu0 %v13671_v23  ;;  %v15574_v32 = vrot.slane %v5516_v58, 6 }
 0x1a8   : > { %v3713_v42 = vadd.f32 %v12117_v36, %v12115_v29  ;;  %v3761_v18 = vmul.f32 %v12117_v36, %v12117_v36  ;;  %5786 = vmatpush1.bf16.msra.mxu0 %v13185_v35  ;;  %8889 = vmatpush1.bf16.msra.mxu1 %v13194_v14  ;;  %v13205_v29 = vld [vmem:[%s16812_s1 + $0x994] ss:$8 sps:$4 sm:$0xff]   ;;  %v13203_v35 = vld [vmem:[%s16812_s1 + $0x990] ss:$8 sps:$4 sm:$0xff]   ;;  %v5583_v14 = vrot.slane %v5517_v53, 6  ;;  %v5590_v34 = vrot.slane %v5523_v61, 6 }
 0x1a9   : > { %3705 = vst [vmem:[%s15523_s11] sm:$0xff] %v12091_v41  ;;  %v12092_v27 = vpack.c.bf16 %v12118_v9, %v12117_v36  ;;  %v3726_v49 = vadd.f32 %v12118_v9, %v12116_v30  ;;  %v3762_v51 = vmul.f32 %v12118_v9, %v12118_v9  ;;  %5787 = vmatprep.subr.bf16.mxu0 %v13193_v38  ;;  %v15582_v38 = vrot.slane %v5518_v5, 6  ;;  %v15585_v41 = vld [vmem:[%s13609_s20 + $0x380] sm:$0xcc]  ;;  %v13215_v61 = vld [vmem:[%s16812_s1 + $0x9b0] ss:$8 sps:$4 sm:$0xff]  }
 0x1aa   : > { %v3775_v12 = vadd.f32 %v3761_v18, %v3759_v22  ;;  %v2142_v56 = vpop.f32.mrb[20].mxu0  ;;  %8890 = vmatprep.subr.bf16.mxu1 %v13202_v16  ;;  %11337 = vmatprep.mubr.msk.bf16.mxu0 %vm642_vm1, %v13692_v33  ;;  %v13206_v33 = vld [vmem:[%s16812_s1 + $0xf30] ss:$8 sps:$4 sm:$0xff]   ;;  %v13211_v9 = vld [vmem:[%s16812_s1 + $0x9a4] ss:$8 sps:$4 sm:$0xff]   ;;  %v15591_v18 = vrot.slane %v5520_v20, 6  ;;  %v8617_v63 = vunpack.c.l.bf16 %v15585_v41  ;;  %v8618_v58 = vunpack.c.h.bf16 %v15585_v41 }
 0x1ab   : > { %3706 = vst [vmem:[%s15523_s11 + $0x8] sm:$0xff] %v12092_v27  ;;  %v3788_v23 = vadd.f32 %v3762_v51, %v3760_v47  ;;  %v3612_v45 = vpop.f32.mrb[4].mxu1  ;;  %v2144_v19 = vpop.f32.mrb[21].mxu0  ;;  %8555 = vmatmul.mubr.bf16.gmra.mrb[20].mxu1 %v13713_v57  ;;  %v15596_v47 = vld [vmem:[%s13609_s20 + $0x388] sm:$0x33] }
 0x1ac   : > { %v12119_v28 = vadd.f32 %v3612_v45, %v2142_v56  ;;  %v3614_v40 = vpop.f32.mrb[5].mxu1  ;;  %v2146_v0 = vpop.f32.mrb[22].mxu0  ;;  %5788 = vmatpush1.bf16.msra.mxu0 %v13191_v44  ;;  %8891 = vmatpush1.bf16.msra.mxu1 %v13200_v55  ;;  %v15593_v44 = vrot.slane %v5522_v21, 6  ;;  %v13212_v27 = vld [vmem:[%s16812_s1 + $0xf40] ss:$8 sps:$4 sm:$0xff]   ;;  %v8619_v53 = vunpack.c.l.bf16 %v15596_v47 }
 0x1ad   : > { %v12120_v6 = vadd.f32 %v3614_v40, %v2144_v19  ;;  %v3616_v10 = vpop.f32.mrb[6].mxu1  ;;  %v2148_v62 = vpop.f32.mrb[23].mxu0  ;;  %5789 = vmatprep.subr.bf16.mxu0 %v13199_v52  ;;  %8892 = vmatprep.subr.bf16.mxu1 %v13208_v43  ;;  %v5589_v43 = vrot.slane %v5521_v8, 6  ;;  %v13209_v5 = vld [vmem:[%s16812_s1 + $0x9a0] ss:$8 sps:$4 sm:$0xff]  }
 0x1ae   : > { %v3714_v17 = vadd.f32 %v12119_v28, %v3713_v42  ;;  %v3763_v46 = vmul.f32 %v12119_v28, %v12119_v28  ;;  %v12121_v60 = vadd.f32 %v3616_v10, %v2146_v0  ;;  %v3618_v15 = vpop.f32.mrb[7].mxu1  ;;  %11832 = vmatprep.mubr.msk.bf16.mxu1 %vm642_vm1, %v13729_v1  ;;  %v5584_v42 = vrot.slane %v5519_v11, 6  ;;  %v13217_v21 = vld [vmem:[%s16812_s1 + $0x9b4] ss:$8 sps:$4 sm:$0xff]  }
 0x1af   : > { %v12093_v50 = vpack.c.bf16 %v12120_v6, %v12119_v28  ;;  %v3727_v13 = vadd.f32 %v12120_v6, %v3726_v49  ;;  %v3764_v39 = vmul.f32 %v12120_v6, %v12120_v6  ;;  %v12122_v3 = vadd.f32 %v3618_v15, %v2148_v62  ;;  %5454 = vmatmul.mubr.bf16.gmra.mrb[36].mxu0 %v13713_v57  ;;  %v13218_v6 = vld [vmem:[%s16812_s1 + $0xf50] ss:$8 sps:$4 sm:$0xff]  }
 0x1b0   : > { %v3776_v25 = vadd.f32 %v3775_v12, %v3763_v46  ;;  %v3715_v30 = vadd.f32 %v12121_v60, %v3714_v17  ;;  %v3765_v31 = vmul.f32 %v12121_v60, %v12121_v60  ;;  %5790 = vmatpush1.bf16.msra.mxu0 %v13197_v7  ;;  %8893 = vmatpush1.bf16.msra.mxu1 %v13206_v33  ;;  %v13220_v12 = vld [vmem:[%s16812_s1 + $0xf54] ss:$8 sps:$4 sm:$0xff]   ;;  %v8620_v15 = vunpack.c.h.bf16 %v15596_v47  ;;  %v13226_v7 = vld [vmem:[%s16812_s1 + $0xf64] ss:$8 sps:$4 sm:$0xff]  }
 0x1b1   : > { %3707 = vst [vmem:[%s15523_s11 + $0x10] sm:$0xff] %v12093_v50  ;;  %v3789_v36 = vadd.f32 %v3788_v23, %v3764_v39  ;;  %v12094_v49 = vpack.c.bf16 %v12122_v3, %v12121_v60  ;;  %v3728_v51 = vadd.f32 %v12122_v3, %v3727_v13  ;;  %v3766_v52 = vmul.f32 %v12122_v3, %v12122_v3  ;;  %v15627_v60 = vld [vmem:[%s13609_s20 + $0x3b8] sm:$0x33] }
 0x1b2   : > { %v3777_v16 = vadd.f32 %v3776_v25, %v3765_v31  ;;  %v2152_v22 = vpop.f32.mrb[24].mxu0  ;;  %5791 = vmatprep.subr.bf16.mxu0 %v13205_v29  ;;  %8894 = vmatprep.subr.bf16.mxu1 %v13214_v24  ;;  %v15605_v19 = vsel %vm3905_vm3, %v5583_v14, %v5584_v42  ;;  %v15624_v20 = vsel %vm3905_vm3, %v5589_v43, %v5590_v34  ;;  %v8621_v39 = vunpack.c.l.bf16 %v15612_v4  ;;  %v13223_v31 = vld [vmem:[%s16812_s1 + $0x9c4] ss:$8 sps:$4 sm:$0xff]  }
 0x1b3   : > { %v3622_v57 = vpop.f32.mrb[8].mxu1  ;;  %v2154_v55 = vpop.f32.mrb[25].mxu0  ;;  %3708 = vst [vmem:[%s15523_s11 + $0x18] sm:$0xff] %v12094_v49  ;;  %v3790_v28 = vadd.f32 %v3789_v36, %v3766_v52  ;;  %11338 = vmatprep.mubr.msk.bf16.mxu0 %vm642_vm1, %v13729_v1  ;;  %8565 = vmatmul.mubr.bf16.gmra.mrb[24].mxu1 %v13758_v26  ;;  %v5645_v25 = vpack.c.bf16 %v15624_v20, %v15605_v19  ;;  %v8623_v14 = vunpack.c.l.bf16 %v15627_v60  ;;  %v8624_v41 = vunpack.c.h.bf16 %v15627_v60  ;;  %v13250_v19 = vld [vmem:[%s16812_s1 + $0xfa4] ss:$8 sps:$4 sm:$0xff]  }
 0x1b4   : > { %v12123_v56 = vadd.f32 %v3622_v57, %v2152_v22  ;;  %v3624_v23 = vpop.f32.mrb[9].mxu1  ;;  %v2156_v45 = vpop.f32.mrb[26].mxu0  ;;  %5792 = vmatpush1.bf16.msra.mxu0 %v13203_v35  ;;  %8895 = vmatpush1.bf16.msra.mxu1 %v13212_v27  ;;  %v13224_v35 = vld [vmem:[%s16812_s1 + $0xf60] ss:$8 sps:$4 sm:$0xff]   ;;  %v15660_v49 = vrot.slane %v8619_v53, 4  ;;  %v8685_v43 = vrot.slane %v8620_v15, 4 }
 0x1b5   : > { %v12124_v40 = vadd.f32 %v3624_v23, %v2154_v55  ;;  %v3626_v0 = vpop.f32.mrb[10].mxu1  ;;  %v2158_v2 = vpop.f32.mrb[27].mxu0  ;;  %5793 = vmatprep.subr.bf16.mxu0 %v13211_v9  ;;  %8896 = vmatprep.subr.bf16.mxu1 %v13220_v12  ;;  %v15655_v9 = vrot.slane %v8617_v63, 4  ;;  %v8684_v55 = vrot.slane %v8618_v58, 4  ;;  %v15662_v12 = vrot.slane %v8621_v39, 4 }
 0x1b6   : > { %v3716_v1 = vadd.f32 %v12123_v56, %v3715_v30  ;;  %v3767_v10 = vmul.f32 %v12123_v56, %v12123_v56  ;;  %v12125_v62 = vadd.f32 %v3626_v0, %v2156_v45  ;;  %v3628_v11 = vpop.f32.mrb[11].mxu1  ;;  %11833 = vmatprep.mubr.msk.bf16.mxu1 %vm642_vm1, %v13771_v37  ;;  %v8622_v30 = vunpack.c.h.bf16 %v15612_v4  ;;  %v15685_v15 = vld [vmem:[%s13609_s20 + $0x3e0] sm:$0x77]  ;;  %v13227_v39 = vld [vmem:[%s16812_s1 + $0x9d0] ss:$8 sps:$4 sm:$0xff]  }
 0x1b7   : > { %v12095_v8 = vpack.c.bf16 %v12124_v40, %v12123_v56  ;;  %v3729_v17 = vadd.f32 %v12124_v40, %v3728_v51  ;;  %v3768_v46 = vmul.f32 %v12124_v40, %v12124_v40  ;;  %v12126_v24 = vadd.f32 %v3628_v11, %v2158_v2  ;;  %5464 = vmatmul.mubr.bf16.gmra.mrb[40].mxu0 %v13758_v26  ;;  %v15668_v40 = vld [vmem:[%s13609_s20 + $0x3d8] sm:$0x88] }
 0x1b8   : > { %v3778_v33 = vadd.f32 %v3777_v16, %v3767_v10  ;;  %v3717_v50 = vadd.f32 %v12125_v62, %v3716_v1  ;;  %v3769_v13 = vmul.f32 %v12125_v62, %v12125_v62  ;;  %5794 = vmatpush1.bf16.msra.mxu0 %v13209_v5  ;;  %8897 = vmatpush1.bf16.msra.mxu1 %v13218_v6  ;;  %v13232_v16 = vld [vmem:[%s16812_s1 + $0xf74] ss:$8 sps:$4 sm:$0xff]   ;;  %v8688_v63 = vrot.slane %v8623_v14, 4  ;;  %v13230_v5 = vld [vmem:[%s16812_s1 + $0xf70] ss:$8 sps:$4 sm:$0xff]  }
 0x1b9   : > { %3709 = vst [vmem:[%s15523_s11 + $0x20] sm:$0xff] %v12095_v8  ;;  %v3791_v29 = vadd.f32 %v3790_v28, %v3768_v46  ;;  %v12096_v22 = vpack.c.bf16 %v12126_v24, %v12125_v62  ;;  %v3730_v42 = vadd.f32 %v12126_v24, %v3729_v17  ;;  %v3770_v47 = vmul.f32 %v12126_v24, %v12126_v24  ;;  %v13229_v11 = vld [vmem:[%s16812_s1 + $0x9d4] ss:$8 sps:$4 sm:$0xff]   ;;  %v13238_v8 = vld [vmem:[%s16812_s1 + $0xf84] ss:$8 sps:$4 sm:$0xff]  }
 0x1ba   : > { %v3779_v36 = vadd.f32 %v3778_v33, %v3769_v13  ;;  %v2162_v3 = vpop.f32.mrb[28].mxu0  ;;  %5795 = vmatprep.subr.bf16.mxu0 %v13217_v21  ;;  %8898 = vmatprep.subr.bf16.mxu1 %v13226_v7  ;;  %v8690_v28 = vrot.slane %v8622_v30, 4  ;;  %v8686_v53 = vsel %vm922_vm2, %v8684_v55, %v8685_v43  ;;  %v8691_v62 = vrot.slane %v8624_v41, 4  ;;  %v15748_v55 = vld [vmem:[%s13609_s20 + $0x3e0] sm:$0xcc] }
 0x1bb   : > { %v3632_v27 = vpop.f32.mrb[12].mxu1  ;;  %v2164_v26 = vpop.f32.mrb[29].mxu0  ;;  %3710 = vst [vmem:[%s15523_s11 + $0x28] sm:$0xff] %v12096_v22  ;;  %v3792_v56 = vadd.f32 %v3791_v29, %v3770_v47  ;;  %11339 = vmatprep.mubr.msk.bf16.mxu0 %vm642_vm1, %v13771_v37  ;;  %8575 = vmatmul.mubr.bf16.gmra.mrb[28].mxu1 %v13799_v48  ;;  %v13221_v37 = vld [vmem:[%s16812_s1 + $0x9c0] ss:$8 sps:$4 sm:$0xff]   ;;  %v5525_v21 = vunpack.c.h.bf16 %v15668_v40  ;;  %v15693_v13 = vsel %vm3905_vm3, %v15574_v32, %v15582_v38 }
 0x1bc   : > { %v12127_v51 = vadd.f32 %v3632_v27, %v2162_v3  ;;  %v3634_v52 = vpop.f32.mrb[13].mxu1  ;;  %v2166_v57 = vpop.f32.mrb[30].mxu0  ;;  %5796 = vmatpush1.bf16.msra.mxu0 %v13215_v61  ;;  %8899 = vmatpush1.bf16.msra.mxu1 %v13224_v35  ;;  %v15702_v30 = vsel %vm3905_vm3, %v15591_v18, %v15593_v44  ;;  %v13236_v32 = vld [vmem:[%s16812_s1 + $0xf80] ss:$8 sps:$4 sm:$0xff]   ;;  %v5527_v3 = vunpack.c.h.bf16 %v15685_v15  ;;  %v13235_v18 = vld [vmem:[%s16812_s1 + $0x9e4] ss:$8 sps:$4 sm:$0xff]   ;;  %v8683_v22 = vsel %vm922_vm2, %v15655_v9, %v15660_v49 }
 0x1bd   : > { %v12128_v23 = vadd.f32 %v3634_v52, %v2164_v26  ;;  %v3636_v45 = vpop.f32.mrb[14].mxu1  ;;  %v2168_v34 = vpop.f32.mrb[31].mxu0  ;;  %5797 = vmatprep.subr.bf16.mxu0 %v13223_v31  ;;  %8900 = vmatprep.subr.bf16.mxu1 %v13232_v16  ;;  %v15705_v31 = vld [vmem:[%s13609_s20 + $0x408] sm:$0x88]  ;;  %v13244_v44 = vld [vmem:[%s16812_s1 + $0xf94] ss:$8 sps:$4 sm:$0xff]   ;;  %v5644_v16 = vpack.c.bf16 %v15702_v30, %v15693_v13  ;;  %v8689_v9 = vsel %vm922_vm2, %v15662_v12, %v8688_v63 }
 0x1be   : > { %v3718_v0 = vadd.f32 %v12127_v51, %v3717_v50  ;;  %v3771_v2 = vmul.f32 %v12127_v51, %v12127_v51  ;;  %v12129_v4 = vadd.f32 %v3636_v45, %v2166_v57  ;;  %v3638_v58 = vpop.f32.mrb[15].mxu1  ;;  %v8692_v50 = vsel %vm922_vm2, %v8690_v28, %v8691_v62  ;;  %v13242_v47 = vld [vmem:[%s16812_s1 + $0xf90] ss:$8 sps:$4 sm:$0xff]   ;;  %v15751_v45 = vld [vmem:[%s13609_s20 + $0x3e8] sm:$0x33] }
 0x1bf   : > { %v12097_v6 = vpack.c.bf16 %v12128_v23, %v12127_v51  ;;  %v3731_v1 = vadd.f32 %v12128_v23, %v3730_v42  ;;  %v3772_v10 = vmul.f32 %v12128_v23, %v12128_v23  ;;  %v12130_v33 = vadd.f32 %v3638_v58, %v2168_v34  ;;  %5474 = vmatmul.mubr.bf16.gmra.mrb[44].mxu0 %v13799_v48  ;;  %v13233_v42 = vld [vmem:[%s16812_s1 + $0x9e0] ss:$8 sps:$4 sm:$0xff]   ;;  %v13241_v51 = vld [vmem:[%s16812_s1 + $0x9f4] ss:$8 sps:$4 sm:$0xff]  }
 0x1c0   : > { %v3780_v17 = vadd.f32 %v3779_v36, %v3771_v2  ;;  %v3719_v46 = vadd.f32 %v12129_v4, %v3718_v0  ;;  %v3773_v60 = vmul.f32 %v12129_v4, %v12129_v4  ;;  %v8746_v24 = vpack.c.bf16 %v8692_v50, %v8686_v53  ;;  %5798 = vmatpush1.bf16.msra.mxu0 %v13221_v37  ;;  %v15711_v36 = vld [vmem:[%s13609_s20 + $0x410] sm:$0x77]  ;;  %v15760_v37 = vld [vmem:[%s13609_s20 + $0x418] sm:$0x33]  ;;  %v13247_v50 = vld [vmem:[%s16812_s1 + $0xa04] ss:$8 sps:$4 sm:$0xff]  }
 0x1c1   : > { %3711 = vst [vmem:[%s15523_s11 + $0x30] sm:$0xff] %v12097_v6  ;;  %v3793_v7 = vadd.f32 %v3792_v56, %v3772_v10  ;;  %8901 = vmatpush1.bf16.msra.mxu1 %v13230_v5  ;;  %v12098_v38 = vpack.c.bf16 %v12130_v33, %v12129_v4  ;;  %v3732_v35 = vadd.f32 %v12130_v33, %v3731_v1  ;;  %v5529_v49 = vunpack.c.h.bf16 %v15705_v31  ;;  %v15754_v2 = vld [vmem:[%s13609_s20 + $0x410] sm:$0xcc] }
 0x1c2   : > { %v3720_v61 = vrot.slane %v3719_v46, 4  ;;  %v3781_v29 = vadd.f32 %v3780_v17, %v3773_v60  ;;  %v3774_v48 = vmul.f32 %v12130_v33, %v12130_v33  ;;  %5799 = vmatprep.subr.bf16.mxu0 %v13229_v11  ;;  %8902 = vmatprep.subr.bf16.mxu1 %v13238_v8  ;;  %v8745_v20 = vpack.c.bf16 %v8689_v9, %v8683_v22  ;;  %v13239_v11 = vld [vmem:[%s16812_s1 + $0x9f0] ss:$8 sps:$4 sm:$0xff]   ;;  %v13245_v22 = vld [vmem:[%s16812_s1 + $0xa00] ss:$8 sps:$4 sm:$0xff]  }
 0x1c3   : > { %3712 = vst [vmem:[%s15523_s11 + $0x38] sm:$0xff] %v12098_v38  ;;  %v3733_v27 = vrot.slane %v3732_v35, 4  ;;  %11396 = vmatprep.mubr.msk.bf16.mxu0 %vm642_vm1, %v5645_v25  ;;  %11890 = vmatprep.mubr.msk.bf16.mxu1 %vm642_vm1, %v8746_v24  ;;  %v5531_v25 = vunpack.c.h.bf16 %v15711_v36  ;;  %v5595_v56 = vrot.slane %v5525_v21, 6  ;;  %v5596_v23 = vrot.slane %v5527_v3, 6 }
 0x1c4   : > { %v3721_v14 = vadd.f32 %v3720_v61, %v3719_v46  ;;  %v3782_v41 = vrot.slane %v3781_v29, 4  ;;  %v3794_v26 = vadd.f32 %v3793_v7, %v3774_v48  ;;  %5800 = vmatpush1.bf16.msra.mxu0 %v13227_v39  ;;  %v5601_v28 = vrot.slane %v5529_v49, 6  ;;  %v13248_v46 = vld [vmem:[%s16812_s1 + $0xfa0] ss:$8 sps:$4 sm:$0xff]   ;;  %v13256_v39 = vld [vmem:[%s16812_s1 + $0xfb4] ss:$8 sps:$4 sm:$0xff]  }
 0x1c5   : > { %8903 = vmatpush1.bf16.msra.mxu1 %v13236_v32  ;;  %v3734_v43 = vadd.f32 %v3733_v27, %v3732_v35  ;;  %5801 = vmatprep.subr.bf16.mxu0 %v13235_v18  ;;  %v5602_v0 = vrot.slane %v5531_v25, 6  ;;  %v15757_v53 = vsel %vm3905_vm3, %v5595_v56, %v5596_v23  ;;  %v8626_v5 = vunpack.c.h.bf16 %v15748_v55 }
 0x1c6   : > { %v3722_v52 = vrot.slane %v3721_v14, 2  ;;  %v3783_v57 = vadd.f32 %v3782_v41, %v3781_v29  ;;  %v3795_v12 = vrot.slane %v3794_v26, 4  ;;  %8904 = vmatprep.subr.bf16.mxu1 %v13244_v44  ;;  %v8628_v62 = vunpack.c.h.bf16 %v15751_v45 }
 0x1c7   : > { %v3735_v4 = vrot.slane %v3734_v43, 2  ;;  %v15764_v10 = vsel %vm3905_vm3, %v5601_v28, %v5602_v0  ;;  %v8630_v21 = vunpack.c.h.bf16 %v15754_v2  ;;  %v8632_v61 = vunpack.c.h.bf16 %v15760_v37  ;;  %v15823_v28 = vld [vmem:[%s13609_s20 + $0x440] sm:$0x77] }
 0x1c8   : > { %v3723_v34 = vadd.f32 %v3722_v52, %v3721_v14  ;;  %v3784_v63 = vrot.slane %v3783_v57, 2  ;;  %v3796_v58 = vadd.f32 %v3795_v12, %v3794_v26  ;;  %5802 = vmatpush1.bf16.msra.mxu0 %v13233_v42  ;;  %v5647_v60 = vpack.c.bf16 %v15764_v10, %v15757_v53  ;;  %v13254_v42 = vld [vmem:[%s16812_s1 + $0xfb0] ss:$8 sps:$4 sm:$0xff]   ;;  %v13268_v12 = vld [vmem:[%s16812_s1 + $0xfd4] ss:$8 sps:$4 sm:$0xff]  }
 0x1c9   : > { %8905 = vmatpush1.bf16.msra.mxu1 %v13242_v47  ;;  %v3736_v8 = vadd.f32 %v3735_v4, %v3734_v43  ;;  %5803 = vmatprep.subr.bf16.mxu0 %v13241_v51  ;;  %v8696_v29 = vrot.slane %v8626_v5, 4  ;;  %v8697_v38 = vrot.slane %v8628_v62, 4  ;;  %v8702_v35 = vrot.slane %v8630_v21, 4  ;;  %v15808_v43 = vld [vmem:[%s13609_s20 + $0x438] sm:$0x88] }
 0x1ca   : > { %v3724_v6 = vrot.slane %v3723_v34, 1  ;;  %v3785_v1 = vadd.f32 %v3784_v63, %v3783_v57  ;;  %v3797_v17 = vrot.slane %v3796_v58, 2  ;;  %9144 = vmatprep.subr.bf16.mxu1 %v13250_v19  ;;  %v8703_v3 = vrot.slane %v8632_v61, 4  ;;  %v13260_v19 = vld [vmem:[%s16812_s1 + $0xfc0] ss:$8 sps:$4 sm:$0xff]  }
 0x1cb   : > { %v3737_v24 = vrot.slane %v3736_v8, 1  ;;  %v5524_v18 = vunpack.c.l.bf16 %v15668_v40  ;;  %v5526_v44 = vunpack.c.l.bf16 %v15685_v15  ;;  %v8698_v47 = vsel %vm922_vm2, %v8696_v29, %v8697_v38  ;;  %v13253_v40 = vld [vmem:[%s16812_s1 + $0xa14] ss:$8 sps:$4 sm:$0xff]   ;;  %v13262_v15 = vld [vmem:[%s16812_s1 + $0xfc4] ss:$8 sps:$4 sm:$0xff]  }
 0x1cc   : > { %v3725_v7 = vadd.f32 %v3724_v6, %v3723_v34  ;;  %v3786_v33 = vrot.slane %v3785_v1, 1  ;;  %v3798_v32 = vadd.f32 %v3797_v17, %v3796_v58  ;;  %8919 = vmatmul.mubr.bf16.vlgmr.msra.gmra.mrb[16].mxu1 %v8745_v20  ;;  %5804 = vmatpush1.bf16.msra.mxu0 %v13239_v11  ;;  %v5528_v27 = vunpack.c.l.bf16 %v15705_v31  ;;  %v13251_v31 = vld [vmem:[%s16812_s1 + $0xa10] ss:$8 sps:$4 sm:$0xff]   ;;  %v15829_v4 = vld [vmem:[%s13609_s20 + $0x468] sm:$0x88] }
 0x1cd   : > { %v3738_v14 = vadd.f32 %v3737_v24, %v3736_v8  ;;  %9145 = vmatpush1.bf16.msra.mxu1 %v13248_v46  ;;  %6163 = vmatprep.subr.bf16.mxu0 %v13247_v50  ;;  %v8704_v26 = vsel %vm922_vm2, %v8702_v35, %v8703_v3  ;;  %v5530_v9 = vunpack.c.l.bf16 %v15711_v36  ;;  %v5592_v49 = vrot.slane %v5524_v18, 6  ;;  %v13259_v36 = vld [vmem:[%s16812_s1 + $0xa24] ss:$8 sps:$4 sm:$0xff]   ;;  %v15832_v58 = vld [vmem:[%s13609_s20 + $0x470] sm:$0x77] }
 0x1ce   : > { %v3787_v48 = vadd.f32 %v3786_v33, %v3785_v1  ;;  %v3799_v41 = vrot.slane %v3798_v32, 1  ;;  %9146 = vmatprep.subr.bf16.mxu1 %v13256_v39  ;;  %v5593_v51 = vrot.slane %v5526_v44, 6  ;;  %v8748_v20 = vpack.c.bf16 %v8704_v26, %v8698_v47  ;;  %v15837_v1 = vld [vmem:[%s13609_s20 + $0x440] sm:$0xcc]  ;;  %v15847_v8 = vld [vmem:[%s13609_s20 + $0x448] sm:$0x33] }
 0x1cf   : > { %v3741_v52 = vcombine.low %v3725_v7, %v3738_v14  ;;  %v5598_v25 = vrot.slane %v5528_v27, 6  ;;  %5818 = vmatmul.mubr.bf16.vlgmr.msra.gmra.mrb[32].mxu0 %v5644_v16  ;;  %v5599_v23 = vrot.slane %v5530_v9, 6  ;;  %v8625_v34 = vunpack.c.l.bf16 %v15748_v55  ;;  %v15853_v33 = vld [vmem:[%s13609_s20 + $0x470] sm:$0xcc]  ;;  %v15856_v50 = vld [vmem:[%s13609_s20 + $0x478] sm:$0x33] }
 0x1d0   : > { %v3800_v57 = vadd.f32 %v3799_v41, %v3798_v32  ;;  %v5594_v56 = vsel %vm3905_vm3, %v5592_v49, %v5593_v51  ;;  %v8627_v63 = vunpack.c.l.bf16 %v15751_v45  ;;  %6164 = vmatpush1.bf16.msra.mxu0 %v13245_v22  ;;  %v8629_v16 = vunpack.c.l.bf16 %v15754_v2  ;;  %11397 = vmatprep.mubr.msk.bf16.mxu0 %vm642_vm1, %v5647_v60  ;;  %v13257_v10 = vld [vmem:[%s16812_s1 + $0xa20] ss:$8 sps:$4 sm:$0xff]   ;;  %v13266_v60 = vld [vmem:[%s16812_s1 + $0xfd0] ss:$8 sps:$4 sm:$0xff]   ;;  %v13265_v24 = vld [vmem:[%s16812_s1 + $0xa34] ss:$8 sps:$4 sm:$0xff]  }
 0x1d1   : > { %v3748_v13 = vrot.slane %v3741_v52, %v14620_v54  ;;  %9147 = vmatpush1.bf16.msra.mxu1 %v13254_v42  ;;  %v8631_v0 = vunpack.c.l.bf16 %v15760_v37  ;;  %6165 = vmatprep.subr.bf16.mxu0 %v13253_v40  ;;  %v5600_v55 = vsel %vm3905_vm3, %v5598_v25, %v5599_v23  ;;  %v8693_v45 = vrot.slane %v8625_v34, 4  ;;  %v13274_v32 = vld [vmem:[%s16812_s1 + $0xfe4] ss:$8 sps:$4 sm:$0xff]   ;;  %v13263_v18 = vld [vmem:[%s16812_s1 + $0xa30] ss:$8 sps:$4 sm:$0xff]  }
 0x1d2   : > { %v3803_v30 = vcombine.low %v3787_v48, %v3800_v57  ;;  %9148 = vmatprep.subr.bf16.mxu1 %v13262_v15  ;;  %v8694_v5 = vrot.slane %v8627_v63, 4  ;;  %v5533_v6 = vunpack.c.h.bf16 %v15808_v43  ;;  %11891 = vmatprep.mubr.msk.bf16.mxu1 %vm642_vm1, %v8748_v20  ;;  %v5646_v62 = vpack.c.bf16 %v5600_v55, %v5594_v56  ;;  %v13271_v42 = vld [vmem:[%s16812_s1 + $0xa44] ss:$8 sps:$4 sm:$0xff]   ;;  %v13272_v26 = vld [vmem:[%s16812_s1 + $0xfe0] ss:$8 sps:$4 sm:$0xff]  }
 0x1d3   : > { %v3755_v2 = vrot.slane %v3748_v13, %v14620_v54  ;;  %v8699_v11 = vrot.slane %v8629_v16, 4  ;;  %v8700_v46 = vrot.slane %v8631_v0, 4  ;;  %v5535_v21 = vunpack.c.h.bf16 %v15823_v28  ;;  %v13280_v57 = vld [vmem:[%s16812_s1 + $0xff4] ss:$8 sps:$4 sm:$0xff]   ;;  %v13286_v55 = vld [vmem:[%s16812_s1 + $0x1004] ss:$8 sps:$4 sm:$0xff]  }
 0x1d4   : > { %v3810_v37 = vrot.slane %v3803_v30, %v14620_v54  ;;  %v8695_v17 = vsel %vm922_vm2, %v8693_v45, %v8694_v5  ;;  %v5537_v7 = vunpack.c.h.bf16 %v15829_v4  ;;  %6166 = vmatpush1.bf16.msra.mxu0 %v13251_v31  ;;  %v5539_v39 = vunpack.c.h.bf16 %v15832_v58  ;;  %v13277_v13 = vld [vmem:[%s16812_s1 + $0xa54] ss:$8 sps:$4 sm:$0xff]  }
 0x1d5   : > { %11054 = vst.msk [vmem:[%s14914_s19 + $0x1] ss:$4 sm:$0x3] %vm14857_vm4, %v3755_v2  ;;  %9149 = vmatpush1.bf16.msra.mxu1 %v13260_v19  ;;  %v5607_v61 = vrot.slane %v5533_v6, 6  ;;  %v8634_v29 = vunpack.c.h.bf16 %v15837_v1  ;;  %6167 = vmatprep.subr.bf16.mxu0 %v13259_v36  ;;  %v8701_v38 = vsel %vm922_vm2, %v8699_v11, %v8700_v46  ;;  %v5608_v35 = vrot.slane %v5535_v21, 6 }
 0x1d6   : > { %v3817_v53 = vrot.slane %v3810_v37, %v14620_v54  ;;  %9150 = vmatprep.subr.bf16.mxu1 %v13268_v12  ;;  %v5613_v48 = vrot.slane %v5537_v7, 6  ;;  %v8636_v3 = vunpack.c.h.bf16 %v15847_v8  ;;  %v8747_v44 = vpack.c.bf16 %v8701_v38, %v8695_v17  ;;  %v13269_v36 = vld [vmem:[%s16812_s1 + $0xa40] ss:$8 sps:$4 sm:$0xff]   ;;  %v13278_v12 = vld [vmem:[%s16812_s1 + $0xff0] ss:$8 sps:$4 sm:$0xff]  }
 0x1d7   : > { %v5614_v14 = vrot.slane %v5539_v39, 6  ;;  %v8638_v41 = vunpack.c.h.bf16 %v15853_v33  ;;  %v8640_v22 = vunpack.c.h.bf16 %v15856_v50  ;;  %5828 = vmatmul.mubr.bf16.gmra.mrb[36].mxu0 %v5646_v62  ;;  %v5609_v47 = vsel %vm3905_vm3, %v5607_v61, %v5608_v35  ;;  %v15931_v2 = vld [vmem:[%s13609_s20 + $0x4d0] sm:$0x77]  ;;  %v15937_v17 = vld [vmem:[%s13609_s20 + $0x4a0] sm:$0xcc] }
 0x1d8   : > { %11055 = vst.msk [vmem:[%s14940_s12 + $0x1] ss:$4 sm:$0x3] %vm14857_vm4, %v3817_v53  ;;  %v8708_v27 = vrot.slane %v8634_v29, 4  ;;  %v8709_v40 = vrot.slane %v8636_v3, 4  ;;  %v5532_v15 = vunpack.c.l.bf16 %v15808_v43  ;;  %6168 = vmatpush1.bf16.msra.mxu0 %v13257_v10  ;;  %v5534_v52 = vunpack.c.l.bf16 %v15823_v28  ;;  %8929 = vmatmul.mubr.bf16.gmra.mrb[20].mxu1 %v8747_v44 }
 0x1d9   : > { %9151 = vmatpush1.bf16.msra.mxu1 %v13266_v60  ;;  %v5615_v9 = vsel %vm3905_vm3, %v5613_v48, %v5614_v14  ;;  %v8714_v49 = vrot.slane %v8638_v41, 4  ;;  %v8715_v51 = vrot.slane %v8640_v22, 4  ;;  %6169 = vmatprep.subr.bf16.mxu0 %v13265_v24  ;;  %v5536_v20 = vunpack.c.l.bf16 %v15829_v4  ;;  %v15903_v43 = vld [vmem:[%s13609_s20 + $0x498] sm:$0x88]  ;;  %v15914_v28 = vld [vmem:[%s13609_s20 + $0x4a0] sm:$0x77] }
 0x1da   : > { %9152 = vmatprep.subr.bf16.mxu1 %v13274_v32  ;;  %v5649_v31 = vpack.c.bf16 %v5615_v9, %v5609_v47  ;;  %v8710_v19 = vsel %vm922_vm2, %v8708_v27, %v8709_v40  ;;  %v5538_v25 = vunpack.c.l.bf16 %v15832_v58  ;;  %v5604_v23 = vrot.slane %v5532_v15, 6  ;;  %v15922_v58 = vld [vmem:[%s13609_s20 + $0x4c8] sm:$0x88]  ;;  %v15940_v46 = vld [vmem:[%s13609_s20 + $0x4a8] sm:$0x33] }
 0x1db   : > { %v8716_v56 = vsel %vm922_vm2, %v8714_v49, %v8715_v51  ;;  %v5605_v34 = vrot.slane %v5534_v52, 6  ;;  %v8633_v63 = vunpack.c.l.bf16 %v15837_v1  ;;  %v5610_v16 = vrot.slane %v5536_v20, 6  ;;  %v15945_v53 = vld [vmem:[%s13609_s20 + $0x4d0] sm:$0xcc]  ;;  %v15950_v29 = vld [vmem:[%s13609_s20 + $0x4d8] sm:$0x33] }
 0x1dc   : > { %11398 = vmatprep.mubr.msk.bf16.mxu0 %vm642_vm1, %v5649_v31  ;;  %v8750_v30 = vpack.c.bf16 %v8716_v56, %v8710_v19  ;;  %v5611_v0 = vrot.slane %v5538_v25, 6  ;;  %v8635_v4 = vunpack.c.l.bf16 %v15847_v8  ;;  %6170 = vmatpush1.bf16.msra.mxu0 %v13263_v18  ;;  %v8637_v5 = vunpack.c.l.bf16 %v15853_v33  ;;  %v13275_v24 = vld [vmem:[%s16812_s1 + $0xa50] ss:$8 sps:$4 sm:$0xff]   ;;  %v13284_v32 = vld [vmem:[%s16812_s1 + $0x1000] ss:$8 sps:$4 sm:$0xff]  }
 0x1dd   : > { %9153 = vmatpush1.bf16.msra.mxu1 %v13272_v26  ;;  %v5606_v45 = vsel %vm3905_vm3, %v5604_v23, %v5605_v34  ;;  %v8639_v6 = vunpack.c.l.bf16 %v15856_v50  ;;  %v8705_v1 = vrot.slane %v8633_v63, 4  ;;  %6171 = vmatprep.subr.bf16.mxu0 %v13271_v42  ;;  %v5541_v11 = vunpack.c.h.bf16 %v15903_v43  ;;  %v13283_v18 = vld [vmem:[%s16812_s1 + $0xa64] ss:$8 sps:$4 sm:$0xff]   ;;  %v13292_v14 = vld [vmem:[%s16812_s1 + $0x1014] ss:$8 sps:$4 sm:$0xff]  }
 0x1de   : > { %9154 = vmatprep.subr.bf16.mxu1 %v13280_v57  ;;  %v5612_v37 = vsel %vm3905_vm3, %v5610_v16, %v5611_v0  ;;  %v8706_v62 = vrot.slane %v8635_v4, 4  ;;  %v5543_v8 = vunpack.c.h.bf16 %v15914_v28  ;;  %11892 = vmatprep.mubr.msk.bf16.mxu1 %vm642_vm1, %v8750_v30  ;;  %v8711_v7 = vrot.slane %v8637_v5, 4  ;;  %v13281_v26 = vld [vmem:[%s16812_s1 + $0xa60] ss:$8 sps:$4 sm:$0xff]   ;;  %v13289_v9 = vld [vmem:[%s16812_s1 + $0xa74] ss:$8 sps:$4 sm:$0xff]  }
 0x1df   : > { %v5648_v21 = vpack.c.bf16 %v5612_v37, %v5606_v45  ;;  %v8712_v33 = vrot.slane %v8639_v6, 4  ;;  %v5545_v50 = vunpack.c.h.bf16 %v15922_v58  ;;  %v5547_v60 = vunpack.c.h.bf16 %v15931_v2  ;;  %v13290_v31 = vld [vmem:[%s16812_s1 + $0x1010] ss:$8 sps:$4 sm:$0xff]   ;;  %v11400_v34 = vld [vmem:[%s13609_s20 + $0x5a0] sm:$0x88] }
 0x1e0   : > { %v8707_v10 = vsel %vm922_vm2, %v8705_v1, %v8706_v62  ;;  %v5619_v39 = vrot.slane %v5541_v11, 6  ;;  %v5620_v61 = vrot.slane %v5543_v8, 6  ;;  %6172 = vmatpush1.bf16.msra.mxu0 %v13269_v36  ;;  %v8642_v48 = vunpack.c.h.bf16 %v15937_v17  ;;  %v13287_v63 = vld [vmem:[%s16812_s1 + $0xa70] ss:$8 sps:$4 sm:$0xff]   ;;  %v11401_v4 = vld [vmem:[%s13609_s20 + $0x5a8] sm:$0x77] }
 0x1e1   : > { %9155 = vmatpush1.bf16.msra.mxu1 %v13278_v12  ;;  %v8713_v38 = vsel %vm922_vm2, %v8711_v7, %v8712_v33  ;;  %v5625_v35 = vrot.slane %v5545_v50, 6  ;;  %v8644_v3 = vunpack.c.h.bf16 %v15940_v46  ;;  %6173 = vmatprep.subr.bf16.mxu0 %v13277_v13  ;;  %v5626_v22 = vrot.slane %v5547_v60, 6  ;;  %v13298_v13 = vld [vmem:[%s16812_s1 + $0x1024] ss:$8 sps:$4 sm:$0xff]   ;;  %v11402_v1 = vld [vmem:[%s13609_s20 + $0x5d0] sm:$0x88] }
 0x1e2   : > { %9156 = vmatprep.subr.bf16.mxu1 %v13286_v55  ;;  %v8749_v44 = vpack.c.bf16 %v8713_v38, %v8707_v10  ;;  %v5621_v41 = vsel %vm3905_vm3, %v5619_v39, %v5620_v61  ;;  %v8646_v42 = vunpack.c.h.bf16 %v15945_v53  ;;  %5838 = vmatmul.mubr.bf16.gmra.mrb[40].mxu0 %v5648_v21  ;;  %v8648_v47 = vunpack.c.h.bf16 %v15950_v29  ;;  %v13296_v55 = vld [vmem:[%s16812_s1 + $0x1020] ss:$8 sps:$4 sm:$0xff]   ;;  %v11403_v11 = vld [vmem:[%s13609_s20 + $0x5d8] sm:$0x77] }
 0x1e3   : > { %v8720_v27 = vrot.slane %v8642_v48, 4  ;;  %v8721_v40 = vrot.slane %v8644_v3, 4  ;;  %v5540_v15 = vunpack.c.l.bf16 %v15903_v43  ;;  %v5627_v49 = vsel %vm3905_vm3, %v5625_v35, %v5626_v22  ;;  %v13304_v7 = vld [vmem:[%s16812_s1 + $0x1034] ss:$8 sps:$4 sm:$0xff]   ;;  %v13302_v60 = vld [vmem:[%s16812_s1 + $0x1030] ss:$8 sps:$4 sm:$0xff]  }
 0x1e4   : > { %8939 = vmatmul.mubr.bf16.gmra.mrb[24].mxu1 %v8749_v44  ;;  %v8726_v51 = vrot.slane %v8646_v42, 4  ;;  %v5542_v52 = vunpack.c.l.bf16 %v15914_v28  ;;  %v5544_v57 = vunpack.c.l.bf16 %v15922_v58  ;;  %6174 = vmatpush1.bf16.msra.mxu0 %v13275_v24  ;;  %v5651_v19 = vpack.c.bf16 %v5627_v49, %v5621_v41  ;;  %v13310_v24 = vld [vmem:[%s13609_s20 + $0x6c4] ss:$48 sps:$4 sm:$0xff]  }
 0x1e5   : > { %9157 = vmatpush1.bf16.msra.mxu1 %v13284_v32  ;;  %v8722_v20 = vsel %vm922_vm2, %v8720_v27, %v8721_v40  ;;  %v8727_v25 = vrot.slane %v8648_v47, 4  ;;  %v5546_v43 = vunpack.c.l.bf16 %v15931_v2  ;;  %6175 = vmatprep.subr.bf16.mxu0 %v13283_v18  ;;  %v5616_v36 = vrot.slane %v5540_v15, 6  ;;  %v16022_v32 = vld [vmem:[%s13609_s20 + $0x600] sm:$0x88]  ;;  %v13301_v35 = vld [vmem:[%s16812_s1 + $0xa94] ss:$8 sps:$4 sm:$0xff]  }
 0x1e6   : > { %9158 = vmatprep.subr.bf16.mxu1 %v13292_v14  ;;  %v5617_v12 = vrot.slane %v5542_v52, 6  ;;  %v5622_v56 = vrot.slane %v5544_v57, 6  ;;  %v8641_v23 = vunpack.c.l.bf16 %v15937_v17  ;;  %11399 = vmatprep.mubr.msk.bf16.mxu0 %vm642_vm1, %v5651_v19  ;;  %v8643_v16 = vunpack.c.l.bf16 %v15940_v46  ;;  %v13295_v17 = vld [vmem:[%s16812_s1 + $0xa84] ss:$8 sps:$4 sm:$0xff]   ;;  %v11406_v41 = vld [vmem:[%s13609_s20 + $0x630] sm:$0x88] }
 0x1e7   : > { %v8728_v28 = vsel %vm922_vm2, %v8726_v51, %v8727_v25  ;;  %v5623_v30 = vrot.slane %v5546_v43, 6  ;;  %v8645_v0 = vunpack.c.l.bf16 %v15945_v53  ;;  %v8647_v5 = vunpack.c.l.bf16 %v15950_v29  ;;  %v13293_v53 = vld [vmem:[%s16812_s1 + $0xa80] ss:$8 sps:$4 sm:$0xff]   ;;  %v13313_v44 = vld [vmem:[%s16812_s1 + $0x1044] ss:$8 sps:$4 sm:$0xff]  }
 0x1e8   : > { %v8752_v58 = vpack.c.bf16 %v8728_v28, %v8722_v20  ;;  %v5618_v45 = vsel %vm3905_vm3, %v5616_v36, %v5617_v12  ;;  %v8717_v6 = vrot.slane %v8641_v23, 4  ;;  %6176 = vmatpush1.bf16.msra.mxu0 %v13281_v26  ;;  %v8718_v37 = vrot.slane %v8643_v16, 4  ;;  %v11405_v14 = vld [vmem:[%s13609_s20 + $0x608] sm:$0x77]  ;;  %v11407_v40 = vld [vmem:[%s13609_s20 + $0x638] sm:$0x77] }
 0x1e9   : > { %9159 = vmatpush1.bf16.msra.mxu1 %v13290_v31  ;;  %v5624_v2 = vsel %vm3905_vm3, %v5622_v56, %v5623_v30  ;;  %v8723_v62 = vrot.slane %v8645_v0, 4  ;;  %v5894_v8 = vunpack.c.l.bf16 %v11400_v34  ;;  %6177 = vmatprep.subr.bf16.mxu0 %v13289_v9  ;;  %v8724_v21 = vrot.slane %v8647_v5, 4  ;;  %v13299_v51 = vld [vmem:[%s16812_s1 + $0xa90] ss:$8 sps:$4 sm:$0xff]   ;;  %v11408_v12 = vld [vmem:[%s13609_s20 + $0x660] sm:$0x88] }
 0x1ea   : > { %11893 = vmatprep.mubr.msk.bf16.mxu1 %vm642_vm1, %v8752_v58  ;;  %v5650_v46 = vpack.c.bf16 %v5624_v2, %v5618_v45  ;;  %v5895_v33 = vunpack.c.h.bf16 %v11400_v34  ;;  %v5896_v50 = vunpack.c.l.bf16 %v11401_v4  ;;  %9160 = vmatprep.subr.bf16.mxu1 %v13298_v13  ;;  %v8719_v10 = vsel %vm922_vm2, %v8717_v6, %v8718_v37  ;;  %v11409_v28 = vld [vmem:[%s13609_s20 + $0x668] sm:$0x77]  ;;  %v11410_v58 = vld [vmem:[%s13609_s20 + $0x690] sm:$0x88]  ;;  %v11411_v37 = vld [vmem:[%s13609_s20 + $0x698] sm:$0x77] }
 0x1eb   : > { %v5897_v39 = vunpack.c.h.bf16 %v11401_v4  ;;  %v5898_v61 = vunpack.c.l.bf16 %v11402_v1  ;;  %v5899_v29 = vunpack.c.h.bf16 %v11402_v1  ;;  %v8725_v38 = vsel %vm922_vm2, %v8723_v62, %v8724_v21  ;;  %v13307_v13 = vld [vmem:[%s16812_s1 + $0xaa4] ss:$8 sps:$4 sm:$0xff]   ;;  %v13308_v45 = vld [vmem:[%s13609_s20 + $0x6c0] ss:$48 sps:$4 sm:$0xff]  }
 0x1ec   : > { %5848 = vmatmul.mubr.bf16.gmra.mrb[44].mxu0 %v5650_v46  ;;  %v5900_v48 = vunpack.c.l.bf16 %v11403_v11  ;;  %v5901_v3 = vunpack.c.h.bf16 %v11403_v11  ;;  %v5958_v18 = vrot.slane %v5894_v8, 6  ;;  %v8751_v22 = vpack.c.bf16 %v8725_v38, %v8719_v10  ;;  %v13311_v5 = vld [vmem:[%s16812_s1 + $0x1040] ss:$8 sps:$4 sm:$0xff]   ;;  %v13316_v11 = vld [vmem:[%s16812_s1 + $0xab4] ss:$8 sps:$4 sm:$0xff]  }
 0x1ed   : > { %6178 = vmatpush1.bf16.msra.mxu0 %v13287_v63  ;;  %9161 = vmatpush1.bf16.msra.mxu1 %v13296_v55  ;;  %v5959_v42 = vrot.slane %v5896_v50, 6  ;;  %v5961_v47 = vrot.slane %v5895_v33, 6  ;;  %v5962_v27 = vrot.slane %v5897_v39, 6  ;;  %v5964_v15 = vrot.slane %v5898_v61, 6  ;;  %v13305_v55 = vld [vmem:[%s16812_s1 + $0xaa0] ss:$8 sps:$4 sm:$0xff]  }
 0x1ee   : > { %6179 = vmatprep.subr.bf16.mxu0 %v13295_v17  ;;  %9162 = vmatprep.subr.bf16.mxu1 %v13304_v7  ;;  %v5965_v26 = vrot.slane %v5900_v48, 6  ;;  %v5967_v9 = vrot.slane %v5899_v29, 6  ;;  %v5968_v49 = vrot.slane %v5901_v3, 6  ;;  %v5903_v31 = vunpack.c.h.bf16 %v16022_v32  ;;  %v13319_v8 = vld [vmem:[%s16812_s1 + $0x1054] ss:$8 sps:$4 sm:$0xff]  }
 0x1ef   : > { %8949 = vmatmul.mubr.bf16.gmra.mrb[28].mxu1 %v8751_v22  ;;  %v5963_v52 = vsel %vm3905_vm3, %v5961_v47, %v5962_v27  ;;  %v5960_v57 = vsel %vm3905_vm3, %v5958_v18, %v5959_v42  ;;  %v5905_v19 = vunpack.c.h.bf16 %v11405_v14  ;;  %v5907_v43 = vunpack.c.h.bf16 %v11406_v41  ;;  %v13335_v50 = vld [vmem:[%s13609_s20 + $0x724] ss:$48 sps:$4 sm:$0xff]   ;;  %v16073_v38 = vld [vmem:[%s13609_s20 + $0x6c8] sm:$0x77]  ;;  %v11415_v27 = vld [vmem:[%s13609_s20 + $0x6f8] sm:$0x77] }
 0x1f0   : > { %v5969_v20 = vsel %vm3905_vm3, %v5967_v9, %v5968_v49  ;;  %11950 = vmatprep.mubr.msk.bf16.mxu1 %vm642_vm1, %v13310_v24  ;;  %v5966_v25 = vsel %vm3905_vm3, %v5964_v15, %v5965_v26  ;;  %v5909_v36 = vunpack.c.h.bf16 %v11407_v40  ;;  %v5973_v34 = vrot.slane %v5903_v31, 6  ;;  %v11412_v39 = vld [vmem:[%s13609_s20 + $0x6c0] sm:$0x88] }
 0x1f1   : > { %6180 = vmatpush1.bf16.msra.mxu0 %v13293_v53  ;;  %9163 = vmatpush1.bf16.msra.mxu1 %v13302_v60  ;;  %v6023_v56 = vpack.c.bf16 %v5969_v20, %v5963_v52  ;;  %v6022_v23 = vpack.c.bf16 %v5966_v25, %v5960_v57  ;;  %v5974_v63 = vrot.slane %v5905_v19, 6  ;;  %v5979_v30 = vrot.slane %v5907_v43, 6  ;;  %v13320_v20 = vld [vmem:[%s16812_s1 + $0xac0] ss:$8 sps:$4 sm:$0xff]  }
 0x1f2   : > { %6181 = vmatprep.subr.bf16.mxu0 %v13301_v35  ;;  %9518 = vmatprep.subr.bf16.mxu1 %v13313_v44  ;;  %v5980_v16 = vrot.slane %v5909_v36, 6  ;;  %v5902_v0 = vunpack.c.l.bf16 %v16022_v32  ;;  %v5904_v4 = vunpack.c.l.bf16 %v11405_v14  ;;  %v5906_v1 = vunpack.c.l.bf16 %v11406_v41  ;;  %v13314_v35 = vld [vmem:[%s16812_s1 + $0xab0] ss:$8 sps:$4 sm:$0xff]   ;;  %v13323_v25 = vld [vmem:[%s16812_s1 + $0x1060] ss:$8 sps:$4 sm:$0xff]  }
 0x1f3   : > { %11456 = vmatprep.mubr.msk.bf16.mxu0 %vm642_vm1, %v6023_v56  ;;  %v5975_v6 = vsel %vm3905_vm3, %v5973_v34, %v5974_v63  ;;  %v5908_v2 = vunpack.c.l.bf16 %v11407_v40  ;;  %v5911_v62 = vunpack.c.h.bf16 %v11408_v12  ;;  %v5913_v7 = vunpack.c.h.bf16 %v11409_v28  ;;  %v11414_v14 = vld [vmem:[%s13609_s20 + $0x6f0] sm:$0x88]  ;;  %v13325_v40 = vld [vmem:[%s16812_s1 + $0x1064] ss:$8 sps:$4 sm:$0xff]  }
 0x1f4   : > { %v5981_v17 = vsel %vm3905_vm3, %v5979_v30, %v5980_v16  ;;  %v5970_v46 = vrot.slane %v5902_v0, 6  ;;  %v5971_v21 = vrot.slane %v5904_v4, 6  ;;  %v5976_v53 = vrot.slane %v5906_v1, 6  ;;  %v13317_v41 = vld [vmem:[%s16812_s1 + $0x1050] ss:$8 sps:$4 sm:$0xff]  }
 0x1f5   : > { %6182 = vmatpush1.bf16.msra.mxu0 %v13299_v51  ;;  %v6025_v33 = vpack.c.bf16 %v5981_v17, %v5975_v6  ;;  %v5977_v10 = vrot.slane %v5908_v2, 6  ;;  %v5915_v60 = vunpack.c.h.bf16 %v11410_v58  ;;  %v5917_v29 = vunpack.c.h.bf16 %v11411_v37  ;;  %v13322_v51 = vld [vmem:[%s16812_s1 + $0xac4] ss:$8 sps:$4 sm:$0xff]   ;;  %v13340_v43 = vld [vmem:[%s13609_s20 + $0x720] ss:$48 sps:$4 sm:$0xff]  }
 0x1f6   : > { %6537 = vmatprep.subr.bf16.mxu0 %v13307_v13  ;;  %v16070_v61 = vsel %vm3905_vm3, %v5970_v46, %v5971_v21  ;;  %v5985_v24 = vrot.slane %v5911_v62, 6  ;;  %v5986_v32 = vrot.slane %v5913_v7, 6  ;;  %v5910_v18 = vunpack.c.l.bf16 %v11408_v12  ;;  %v11460_v30 = vld [vmem:[%s13609_s20 + $0x5b0] sm:$0xee]  ;;  %v11462_v62 = vld [vmem:[%s13609_s20 + $0x5e0] sm:$0xee] }
 0x1f7   : > { %9177 = vmatmul.mubr.bf16.vlgmr.msra.gmra.mrb[16].mxu1 %v13308_v45  ;;  %v16079_v48 = vsel %vm3905_vm3, %v5976_v53, %v5977_v10  ;;  %v5991_v3 = vrot.slane %v5915_v60, 6  ;;  %v5912_v44 = vunpack.c.l.bf16 %v11409_v28  ;;  %v5992_v42 = vrot.slane %v5917_v29, 6  ;;  %v13331_v16 = vld [vmem:[%s16812_s1 + $0x1074] ss:$8 sps:$4 sm:$0xff]   ;;  %v11463_v7 = vld [vmem:[%s13609_s20 + $0x5e8] sm:$0x11] }
 0x1f8   : > { %6196 = vmatmul.mubr.bf16.vlgmr.msra.gmra.mrb[32].mxu0 %v6022_v23  ;;  %9519 = vmatpush1.bf16.msra.mxu1 %v13311_v5  ;;  %v6024_v22 = vpack.c.bf16 %v16079_v48, %v16070_v61  ;;  %v5914_v47 = vunpack.c.l.bf16 %v11410_v58  ;;  %v5916_v15 = vunpack.c.l.bf16 %v11411_v37  ;;  %v5982_v26 = vrot.slane %v5910_v18, 6  ;;  %v11461_v45 = vld [vmem:[%s13609_s20 + $0x5b8] sm:$0x11]  ;;  %v13334_v53 = vld [vmem:[%s16812_s1 + $0xae4] ss:$8 sps:$4 sm:$0xff]  }
 0x1f9   : > { %6538 = vmatpush1.bf16.msra.mxu0 %v13305_v55  ;;  %9520 = vmatprep.subr.bf16.mxu1 %v13319_v8  ;;  %v5983_v9 = vrot.slane %v5912_v44, 6  ;;  %v5919_v49 = vunpack.c.h.bf16 %v11412_v39  ;;  %v5987_v52 = vsel %vm3905_vm3, %v5985_v24, %v5986_v32  ;;  %v5921_v31 = vunpack.c.h.bf16 %v16073_v38  ;;  %v13328_v5 = vld [vmem:[%s16812_s1 + $0xad4] ss:$8 sps:$4 sm:$0xff]   ;;  %v13339_v29 = vld [vmem:[%s16812_s1 + $0x1084] ss:$8 sps:$4 sm:$0xff]  }
 0x1fa   : > { %6539 = vmatprep.subr.bf16.mxu0 %v13316_v11  ;;  %11457 = vmatprep.mubr.msk.bf16.mxu0 %vm642_vm1, %v6025_v33  ;;  %v5988_v57 = vrot.slane %v5914_v47, 6  ;;  %v5923_v19 = vunpack.c.h.bf16 %v11414_v14  ;;  %v5993_v36 = vsel %vm3905_vm3, %v5991_v3, %v5992_v42  ;;  %v5989_v56 = vrot.slane %v5916_v15, 6  ;;  %v13326_v11 = vld [vmem:[%s16812_s1 + $0xad0] ss:$8 sps:$4 sm:$0xff]   ;;  %v13350_v8 = vld [vmem:[%s13609_s20 + $0x784] ss:$48 sps:$4 sm:$0xff]  }
 0x1fb   : > { %11951 = vmatprep.mubr.msk.bf16.mxu1 %vm642_vm1, %v13335_v50  ;;  %v16107_v12 = vsel %vm3905_vm3, %v5982_v26, %v5983_v9  ;;  %v5925_v23 = vunpack.c.h.bf16 %v11415_v27  ;;  %v5997_v34 = vrot.slane %v5919_v49, 6  ;;  %v5998_v63 = vrot.slane %v5921_v31, 6  ;;  %v13329_v50 = vld [vmem:[%s16812_s1 + $0x1070] ss:$8 sps:$4 sm:$0xff]   ;;  %v13337_v3 = vld [vmem:[%s16812_s1 + $0x1080] ss:$8 sps:$4 sm:$0xff]  }
 0x1fc   : > { %9521 = vmatpush1.bf16.msra.mxu1 %v13317_v41  ;;  %v6003_v28 = vrot.slane %v5923_v19, 6  ;;  %v5918_v13 = vunpack.c.l.bf16 %v11412_v39  ;;  %v16114_v0 = vsel %vm3905_vm3, %v5988_v57, %v5989_v56  ;;  %v5920_v58 = vunpack.c.l.bf16 %v16073_v38  ;;  %v13355_v24 = vld [vmem:[%s13609_s20 + $0x780] ss:$48 sps:$4 sm:$0xff]   ;;  %v11955_v42 = vld [vmem:[%s13609_s20 + $0x6d8] sm:$0x11] }
 0x1fd   : > { %6540 = vmatpush1.bf16.msra.mxu0 %v13314_v35  ;;  %9522 = vmatprep.subr.bf16.mxu1 %v13325_v40  ;;  %v6004_v4 = vrot.slane %v5925_v23, 6  ;;  %v5922_v55 = vunpack.c.l.bf16 %v11414_v14  ;;  %v6027_v6 = vpack.c.bf16 %v5993_v36, %v5987_v52  ;;  %v16122_v1 = vsel %vm3905_vm3, %v5997_v34, %v5998_v63  ;;  %v13332_v47 = vld [vmem:[%s16812_s1 + $0xae0] ss:$8 sps:$4 sm:$0xff]   ;;  %v13346_v19 = vld [vmem:[%s16812_s1 + $0x1094] ss:$8 sps:$4 sm:$0xff]  }
 0x1fe   : > { %6541 = vmatprep.subr.bf16.mxu0 %v13322_v51  ;;  %v5924_v2 = vunpack.c.l.bf16 %v11415_v27  ;;  %v5994_v37 = vrot.slane %v5918_v13, 6  ;;  %v5995_v46 = vrot.slane %v5920_v58, 6  ;;  %v6268_v33 = vunpack.c.l.bf16 %v11460_v30  ;;  %v11956_v9 = vld [vmem:[%s13609_s20 + $0x700] sm:$0xee]  ;;  %v11957_v31 = vld [vmem:[%s13609_s20 + $0x708] sm:$0x11] }
 0x1ff   : > { %9187 = vmatmul.mubr.bf16.gmra.mrb[20].mxu1 %v13340_v43  ;;  %v16130_v17 = vsel %vm3905_vm3, %v6003_v28, %v6004_v4  ;;  %v6000_v21 = vrot.slane %v5922_v55, 6  ;;  %v6026_v10 = vpack.c.bf16 %v16114_v0, %v16107_v12  ;;  %v6269_v39 = vunpack.c.h.bf16 %v11460_v30  ;;  %v13343_v12 = vld [vmem:[%s16812_s1 + $0xaf4] ss:$8 sps:$4 sm:$0xff]   ;;  %v13341_v28 = vld [vmem:[%s16812_s1 + $0xaf0] ss:$8 sps:$4 sm:$0xff]  }
 0x200   : > { %9523 = vmatpush1.bf16.msra.mxu1 %v13323_v25  ;;  %6206 = vmatmul.mubr.bf16.gmra.mrb[36].mxu0 %v6024_v22  ;;  %v6001_v60 = vrot.slane %v5924_v2, 6  ;;  %v6270_v61 = vunpack.c.l.bf16 %v11461_v45  ;;  %v16146_v32 = vsel %vm3905_vm3, %v5994_v37, %v5995_v46  ;;  %v6271_v38 = vunpack.c.h.bf16 %v11461_v45  ;;  %v11954_v22 = vld [vmem:[%s13609_s20 + $0x6d0] sm:$0xee] }
 0x201   : > { %6542 = vmatpush1.bf16.msra.mxu0 %v13320_v20  ;;  %9524 = vmatprep.subr.bf16.mxu1 %v13331_v16  ;;  %v6272_v35 = vunpack.c.l.bf16 %v11462_v62  ;;  %v6273_v48 = vunpack.c.h.bf16 %v11462_v62  ;;  %v6029_v18 = vpack.c.bf16 %v16130_v17, %v16122_v1  ;;  %v6274_v14 = vunpack.c.l.bf16 %v11463_v7  ;;  %v13344_v13 = vld [vmem:[%s16812_s1 + $0x1090] ss:$8 sps:$4 sm:$0xff]   ;;  %v13365_v30 = vld [vmem:[%s13609_s20 + $0x7e4] ss:$48 sps:$4 sm:$0xff]   ;;  %v13352_v17 = vld [vmem:[%s16812_s1 + $0x10a0] ss:$8 sps:$4 sm:$0xff]  }
 0x202   : > { %6543 = vmatprep.subr.bf16.mxu0 %v13328_v5  ;;  %11458 = vmatprep.mubr.msk.bf16.mxu0 %vm642_vm1, %v6027_v6  ;;  %v16155_v44 = vsel %vm3905_vm3, %v6000_v21, %v6001_v60  ;;  %v6275_v41 = vunpack.c.h.bf16 %v11463_v7  ;;  %v6332_v40 = vrot.slane %v6268_v33, 2  ;;  %v6335_v15 = vrot.slane %v6269_v39, 2  ;;  %v13354_v1 = vld [vmem:[%s16812_s1 + $0x10a4] ss:$8 sps:$4 sm:$0xff]   ;;  %v13370_v46 = vld [vmem:[%s13609_s20 + $0x7e0] ss:$48 sps:$4 sm:$0xff]  }
 0x203   : > { %11952 = vmatprep.mubr.msk.bf16.mxu1 %vm642_vm1, %v13350_v8  ;;  %v6028_v27 = vpack.c.bf16 %v16155_v44, %v16146_v32  ;;  %v6336_v26 = vrot.slane %v6271_v38, 2  ;;  %v6333_v49 = vrot.slane %v6270_v61, 2  ;;  %v6338_v51 = vrot.slane %v6272_v35, 2  ;;  %v13349_v8 = vld [vmem:[%s16812_s1 + $0xb04] ss:$8 sps:$4 sm:$0xff]  }
 0x204   : > { %9525 = vmatpush1.bf16.msra.mxu1 %v13329_v50  ;;  %v6341_v52 = vrot.slane %v6273_v48, 2  ;;  %v6342_v57 = vrot.slane %v6275_v41, 2  ;;  %v6339_v20 = vrot.slane %v6274_v14, 2  ;;  %v9249_v25 = vunpack.c.l.bf16 %v11954_v22  ;;  %v13347_v50 = vld [vmem:[%s16812_s1 + $0xb00] ss:$8 sps:$4 sm:$0xff]  }
 0x205   : > { %6544 = vmatpush1.bf16.msra.mxu0 %v13326_v11  ;;  %9526 = vmatprep.subr.bf16.mxu1 %v13339_v29  ;;  %v9250_v43 = vunpack.c.h.bf16 %v11954_v22  ;;  %v9251_v36 = vunpack.c.l.bf16 %v11955_v42  ;;  %v16174_v56 = vsel %vm449_vm0, %v6335_v15, %v6336_v26  ;;  %v9252_v23 = vunpack.c.h.bf16 %v11955_v42  ;;  %v11464_v29 = vld [vmem:[%s13609_s20 + $0x610] sm:$0xee]  ;;  %v11466_v38 = vld [vmem:[%s13609_s20 + $0x640] sm:$0xee]  ;;  %v16235_v22 = vld [vmem:[%s13609_s20 + $0x738] sm:$0x11] }
 0x206   : > { %6545 = vmatprep.subr.bf16.mxu0 %v13334_v53  ;;  %v9253_v34 = vunpack.c.l.bf16 %v11956_v9  ;;  %v9254_v63 = vunpack.c.h.bf16 %v11956_v9  ;;  %v16184_v16 = vsel %vm449_vm0, %v6341_v52, %v6342_v57  ;;  %v9255_v0 = vunpack.c.l.bf16 %v11957_v31  ;;  %v13361_v53 = vld [vmem:[%s16812_s1 + $0x10b4] ss:$8 sps:$4 sm:$0xff]   ;;  %v16241_v15 = vld [vmem:[%s13609_s20 + $0x768] sm:$0x11] }
 0x207   : > { %9197 = vmatmul.mubr.bf16.gmra.mrb[24].mxu1 %v13355_v24  ;;  %v9256_v4 = vunpack.c.h.bf16 %v11957_v31  ;;  %v9313_v58 = vrot.slane %v9249_v25, 2  ;;  %v9314_v55 = vrot.slane %v9251_v36, 2  ;;  %v9316_v45 = vrot.slane %v9250_v43, 2  ;;  %v11465_v24 = vld [vmem:[%s13609_s20 + $0x618] sm:$0x11] }
 0x208   : > { %9527 = vmatpush1.bf16.msra.mxu1 %v13337_v3  ;;  %6216 = vmatmul.mubr.bf16.gmra.mrb[40].mxu0 %v6026_v10  ;;  %v9317_v5 = vrot.slane %v9252_v23, 2  ;;  %v9319_v6 = vrot.slane %v9253_v34, 2  ;;  %v9320_v2 = vrot.slane %v9255_v0, 2  ;;  %v9322_v37 = vrot.slane %v9254_v63, 2  ;;  %v11467_v3 = vld [vmem:[%s13609_s20 + $0x648] sm:$0x11] }
 0x209   : > { %6546 = vmatpush1.bf16.msra.mxu0 %v13332_v47  ;;  %9528 = vmatprep.subr.bf16.mxu1 %v13346_v19  ;;  %v9323_v62 = vrot.slane %v9256_v4, 2  ;;  %v16190_v11 = vsel %vm449_vm0, %v6332_v40, %v6333_v49  ;;  %v16204_v7 = vsel %vm449_vm0, %v6338_v51, %v6339_v20  ;;  %v16207_v33 = vsel %vm449_vm0, %v9313_v58, %v9314_v55  ;;  %v16232_v41 = vld [vmem:[%s13609_s20 + $0x730] sm:$0xee]  ;;  %v16238_v40 = vld [vmem:[%s13609_s20 + $0x760] sm:$0xee] }
 0x20a   : > { %6547 = vmatprep.subr.bf16.mxu0 %v13343_v12  ;;  %11459 = vmatprep.mubr.msk.bf16.mxu0 %vm642_vm1, %v6029_v18  ;;  %v16201_v21 = vsel %vm449_vm0, %v9316_v45, %v9317_v5  ;;  %v6397_v10 = vpack.c.bf16 %v16184_v16, %v16174_v56  ;;  %v6396_v39 = vpack.c.bf16 %v16204_v7, %v16190_v11  ;;  %v6277_v18 = vunpack.c.h.bf16 %v11464_v29  ;;  %v13358_v49 = vld [vmem:[%s16812_s1 + $0xb14] ss:$8 sps:$4 sm:$0xff]   ;;  %v13359_v36 = vld [vmem:[%s16812_s1 + $0x10b0] ss:$8 sps:$4 sm:$0xff]   ;;  %v13362_v55 = vld [vmem:[%s16812_s1 + $0xb20] ss:$8 sps:$4 sm:$0xff]  }
 0x20b   : > { %11953 = vmatprep.mubr.msk.bf16.mxu1 %vm642_vm1, %v13365_v30  ;;  %v9324_v60 = vsel %vm449_vm0, %v9322_v37, %v9323_v62  ;;  %v16222_v61 = vsel %vm449_vm0, %v9319_v6, %v9320_v2  ;;  %v6279_v14 = vunpack.c.h.bf16 %v11465_v24  ;;  %v6281_v42 = vunpack.c.h.bf16 %v11466_v38  ;;  %v13356_v63 = vld [vmem:[%s16812_s1 + $0xb10] ss:$8 sps:$4 sm:$0xff]   ;;  %v13364_v30 = vld [vmem:[%s16812_s1 + $0xb24] ss:$8 sps:$4 sm:$0xff]   ;;  %v13367_v45 = vld [vmem:[%s16812_s1 + $0x10c0] ss:$8 sps:$4 sm:$0xff]  }
 0x20c   : > { %9529 = vmatpush1.bf16.msra.mxu1 %v13344_v13  ;;  %v9378_v35 = vpack.c.bf16 %v9324_v60, %v16201_v21  ;;  %v9377_v48 = vpack.c.bf16 %v16222_v61, %v16207_v33  ;;  %v6283_v47 = vunpack.c.h.bf16 %v11467_v3  ;;  %v9258_v26 = vunpack.c.h.bf16 %v16232_v41  ;;  %v13376_v5 = vld [vmem:[%s16812_s1 + $0x10d4] ss:$8 sps:$4 sm:$0xff]   ;;  %v16404_v33 = vld [vmem:[%s13609_s20 + $0x708] sm:$0x11] }
 0x20d   : > { %6548 = vmatpush1.bf16.msra.mxu0 %v13341_v28  ;;  %9530 = vmatprep.subr.bf16.mxu1 %v13354_v1  ;;  %v9260_v9 = vunpack.c.h.bf16 %v16235_v22  ;;  %v6347_v51 = vrot.slane %v6277_v18, 2  ;;  %v6348_v52 = vrot.slane %v6279_v14, 2  ;;  %v9262_v57 = vunpack.c.h.bf16 %v16238_v40  ;;  %v13369_v28 = vld [vmem:[%s16812_s1 + $0x10c4] ss:$8 sps:$4 sm:$0xff]   ;;  %v13373_v62 = vld [vmem:[%s16812_s1 + $0xb34] ss:$8 sps:$4 sm:$0xff]  }
 0x20e   : > { %6549 = vmatprep.subr.bf16.mxu0 %v13349_v8  ;;  %v9264_v31 = vunpack.c.h.bf16 %v16241_v15  ;;  %v6353_v19 = vrot.slane %v6281_v42, 2  ;;  %v6354_v20 = vrot.slane %v6283_v47, 2  ;;  %v9328_v25 = vrot.slane %v9258_v26, 2  ;;  %v16318_v26 = vld [vmem:[%s13609_s20 + $0x798] sm:$0x11] }
 0x20f   : > { %9207 = vmatmul.mubr.bf16.gmra.mrb[28].mxu1 %v13370_v46  ;;  %v9329_v43 = vrot.slane %v9260_v9, 2  ;;  %v16257_v12 = vsel %vm449_vm0, %v6347_v51, %v6348_v52  ;;  %v9334_v56 = vrot.slane %v9262_v57, 2  ;;  %v6276_v34 = vunpack.c.l.bf16 %v11464_v29  ;;  %v11470_v29 = vld [vmem:[%s13609_s20 + $0x6a0] sm:$0xee] }
 0x210   : > { %9531 = vmatpush1.bf16.msra.mxu1 %v13352_v17  ;;  %6226 = vmatmul.mubr.bf16.gmra.mrb[44].mxu0 %v6028_v27  ;;  %v9335_v23 = vrot.slane %v9264_v31, 2  ;;  %v16266_v13 = vsel %vm449_vm0, %v6353_v19, %v6354_v20  ;;  %v6278_v44 = vunpack.c.l.bf16 %v11465_v24  ;;  %v6280_v27 = vunpack.c.l.bf16 %v11466_v38  ;;  %v16306_v24 = vld [vmem:[%s13609_s20 + $0x6a8] sm:$0x11]  ;;  %v16321_v9 = vld [vmem:[%s13609_s20 + $0x7c0] sm:$0xee] }
 0x211   : > { %6550 = vmatpush1.bf16.msra.mxu0 %v13347_v50  ;;  %9532 = vmatprep.subr.bf16.mxu1 %v13361_v53  ;;  %v16269_v32 = vsel %vm449_vm0, %v9328_v25, %v9329_v43  ;;  %v6399_v16 = vpack.c.bf16 %v16266_v13, %v16257_v12  ;;  %v6282_v4 = vunpack.c.l.bf16 %v11467_v3  ;;  %v6344_v58 = vrot.slane %v6276_v34, 2  ;;  %v11468_v50 = vld [vmem:[%s13609_s20 + $0x670] sm:$0xee]  ;;  %v11469_v53 = vld [vmem:[%s13609_s20 + $0x678] sm:$0x11] }
 0x212   : > { %6551 = vmatprep.subr.bf16.mxu0 %v13358_v49  ;;  %11516 = vmatprep.mubr.msk.bf16.mxu0 %vm642_vm1, %v6397_v10  ;;  %v16278_v0 = vsel %vm449_vm0, %v9334_v56, %v9335_v23  ;;  %v6345_v1 = vrot.slane %v6278_v44, 2  ;;  %v6350_v2 = vrot.slane %v6280_v27, 2  ;;  %v9257_v37 = vunpack.c.l.bf16 %v16232_v41  ;;  %v13374_v49 = vld [vmem:[%s16812_s1 + $0x10d0] ss:$8 sps:$4 sm:$0xff]   ;;  %v16333_v31 = vld [vmem:[%s13609_s20 + $0x7c8] sm:$0x11] }
 0x213   : > { %12010 = vmatprep.mubr.msk.bf16.mxu1 %vm642_vm1, %v9378_v35  ;;  %v9380_v6 = vpack.c.bf16 %v16278_v0, %v16269_v32  ;;  %v6351_v8 = vrot.slane %v6282_v4, 2  ;;  %v9259_v17 = vunpack.c.l.bf16 %v16235_v22  ;;  %v9261_v46 = vunpack.c.l.bf16 %v16238_v40  ;;  %v16312_v22 = vld [vmem:[%s13609_s20 + $0x790] sm:$0xee]  ;;  %v13382_v25 = vld [vmem:[%s16812_s1 + $0x10e4] ss:$8 sps:$4 sm:$0xff]  }
 0x214   : > { %9533 = vmatpush1.bf16.msra.mxu1 %v13359_v36  ;;  %v9263_v21 = vunpack.c.l.bf16 %v16241_v15  ;;  %v16302_v10 = vsel %vm449_vm0, %v6344_v58, %v6345_v1  ;;  %v9325_v60 = vrot.slane %v9257_v37, 2  ;;  %v6285_v38 = vunpack.c.h.bf16 %v11468_v50  ;;  %v13371_v20 = vld [vmem:[%s16812_s1 + $0xb30] ss:$8 sps:$4 sm:$0xff]   ;;  %v13379_v34 = vld [vmem:[%s16812_s1 + $0xb44] ss:$8 sps:$4 sm:$0xff]  }
 0x215   : > { %6552 = vmatpush1.bf16.msra.mxu0 %v13356_v63  ;;  %9534 = vmatprep.subr.bf16.mxu1 %v13369_v28  ;;  %v6287_v35 = vunpack.c.h.bf16 %v11469_v53  ;;  %v16309_v3 = vsel %vm449_vm0, %v6350_v2, %v6351_v8  ;;  %v9326_v18 = vrot.slane %v9259_v17, 2  ;;  %v9331_v14 = vrot.slane %v9261_v46, 2  ;;  %v13385_v1 = vld [vmem:[%s16812_s1 + $0xb54] ss:$8 sps:$4 sm:$0xff]   ;;  %v13394_v61 = vld [vmem:[%s16812_s1 + $0x1104] ss:$8 sps:$4 sm:$0xff]  }
 0x216   : > { %6553 = vmatprep.subr.bf16.mxu0 %v13364_v30  ;;  %v9332_v41 = vrot.slane %v9263_v21, 2  ;;  %v6398_v42 = vpack.c.bf16 %v16309_v3, %v16302_v10  ;;  %v6289_v47 = vunpack.c.h.bf16 %v11470_v29  ;;  %v6291_v40 = vunpack.c.h.bf16 %v16306_v24  ;;  %v13377_v30 = vld [vmem:[%s16812_s1 + $0xb40] ss:$8 sps:$4 sm:$0xff]   ;;  %v13388_v17 = vld [vmem:[%s16812_s1 + $0x10f4] ss:$8 sps:$4 sm:$0xff]  }
 0x217   : > { %v6359_v15 = vrot.slane %v6285_v38, 2  ;;  %v16327_v51 = vsel %vm449_vm0, %v9325_v60, %v9326_v18  ;;  %v6360_v57 = vrot.slane %v6287_v35, 2  ;;  %v9266_v19 = vunpack.c.h.bf16 %v16312_v22  ;;  %v16375_v60 = vld [vmem:[%s13609_s20 + $0x6d0] sm:$0xee]  ;;  %v13389_v0 = vld [vmem:[%s16812_s1 + $0xb60] ss:$8 sps:$4 sm:$0xff]  }
 0x218   : > { %9535 = vmatpush1.bf16.msra.mxu1 %v13367_v45  ;;  %v16330_v52 = vsel %vm449_vm0, %v9331_v14, %v9332_v41  ;;  %v6365_v36 = vrot.slane %v6289_v47, 2  ;;  %v6366_v56 = vrot.slane %v6291_v40, 2  ;;  %v9268_v23 = vunpack.c.h.bf16 %v16318_v26  ;;  %v16383_v14 = vld [vmem:[%s13609_s20 + $0x6d8] sm:$0x11]  ;;  %v16386_v41 = vld [vmem:[%s13609_s20 + $0x700] sm:$0xee] }
 0x219   : > { %6554 = vmatpush1.bf16.msra.mxu0 %v13362_v55  ;;  %9536 = vmatprep.subr.bf16.mxu1 %v13376_v5  ;;  %v9379_v43 = vpack.c.bf16 %v16330_v52, %v16327_v51  ;;  %v16349_v63 = vsel %vm449_vm0, %v6359_v15, %v6360_v57  ;;  %v9270_v28 = vunpack.c.h.bf16 %v16321_v9  ;;  %v9272_v44 = vunpack.c.h.bf16 %v16333_v31  ;;  %v13380_v5 = vld [vmem:[%s16812_s1 + $0x10e0] ss:$8 sps:$4 sm:$0xff]   ;;  %v13386_v47 = vld [vmem:[%s16812_s1 + $0x10f0] ss:$8 sps:$4 sm:$0xff]   ;;  %v13406_v10 = vld [vmem:[%s16812_s1 + $0x1124] ss:$8 sps:$4 sm:$0xff]  }
 0x21a   : > { %6555 = vmatprep.subr.bf16.mxu0 %v13373_v62  ;;  %v9340_v27 = vrot.slane %v9266_v19, 2  ;;  %v16357_v4 = vsel %vm449_vm0, %v6365_v36, %v6366_v56  ;;  %v9341_v58 = vrot.slane %v9268_v23, 2  ;;  %v6284_v55 = vunpack.c.l.bf16 %v11468_v50  ;;  %v13391_v36 = vld [vmem:[%s16812_s1 + $0xb64] ss:$8 sps:$4 sm:$0xff]  }
 0x21b   : > { %v6286_v45 = vunpack.c.l.bf16 %v11469_v53  ;;  %v6401_v2 = vpack.c.bf16 %v16357_v4, %v16349_v63  ;;  %v9346_v37 = vrot.slane %v9270_v28, 2  ;;  %v9347_v62 = vrot.slane %v9272_v44, 2  ;;  %v16442_v44 = vld [vmem:[%s13609_s20 + $0x828] sm:$0x11] }
 0x21c   : > { %9537 = vmatpush1.bf16.msra.mxu1 %v13374_v49  ;;  %v6288_v8 = vunpack.c.l.bf16 %v11470_v29  ;;  %v16371_v46 = vsel %vm449_vm0, %v9340_v27, %v9341_v58  ;;  %v6290_v21 = vunpack.c.l.bf16 %v16306_v24  ;;  %v6356_v50 = vrot.slane %v6284_v55, 2  ;;  %v13383_v24 = vld [vmem:[%s16812_s1 + $0xb50] ss:$8 sps:$4 sm:$0xff]  }
 0x21d   : > { %6556 = vmatpush1.bf16.msra.mxu0 %v13371_v20  ;;  %9892 = vmatprep.subr.bf16.mxu1 %v13382_v25  ;;  %v6357_v53 = vrot.slane %v6286_v45, 2  ;;  %v16378_v38 = vsel %vm449_vm0, %v9346_v37, %v9347_v62  ;;  %v9265_v35 = vunpack.c.l.bf16 %v16312_v22  ;;  %v9267_v18 = vunpack.c.l.bf16 %v16318_v26  ;;  %v16423_v25 = vld [vmem:[%s13609_s20 + $0x7f8] sm:$0x11] }
 0x21e   : > { %6911 = vmatprep.subr.bf16.mxu0 %v13379_v34  ;;  %v6362_v29 = vrot.slane %v6288_v8, 2  ;;  %v9382_v22 = vpack.c.bf16 %v16378_v38, %v16371_v46  ;;  %v6363_v15 = vrot.slane %v6290_v21, 2  ;;  %v9269_v26 = vunpack.c.l.bf16 %v16321_v9  ;;  %v16415_v9 = vld [vmem:[%s13609_s20 + $0x7f0] sm:$0xee] }
 0x21f   : > { %9551 = vmatmul.mubr.bf16.vlgmr.msra.gmra.mrb[16].mxu1 %v9377_v48  ;;  %v16400_v40 = vsel %vm449_vm0, %v6356_v50, %v6357_v53  ;;  %v9271_v48 = vunpack.c.l.bf16 %v16333_v31  ;;  %v9337_v49 = vrot.slane %v9265_v35, 2  ;;  %v9338_v57 = vrot.slane %v9267_v18, 2  ;;  %v16426_v31 = vld [vmem:[%s13609_s20 + $0x820] sm:$0xee]  ;;  %v13397_v8 = vld [vmem:[%s16812_s1 + $0xb74] ss:$8 sps:$4 sm:$0xff]  }
 0x220   : > { %6570 = vmatmul.mubr.bf16.vlgmr.msra.gmra.mrb[32].mxu0 %v6396_v39  ;;  %9893 = vmatpush1.bf16.msra.mxu1 %v13380_v5  ;;  %v6293_v19 = vunpack.c.h.bf16 %v16375_v60  ;;  %v16418_v11 = vsel %vm449_vm0, %v6362_v29, %v6363_v15  ;;  %v9343_v7 = vrot.slane %v9269_v26, 2  ;;  %v6295_v39 = vunpack.c.h.bf16 %v16383_v14 }
 0x221   : > { %6912 = vmatpush1.bf16.msra.mxu0 %v13377_v30  ;;  %9894 = vmatprep.subr.bf16.mxu1 %v13388_v17  ;;  %v6297_v20 = vunpack.c.h.bf16 %v16386_v41  ;;  %v6400_v56 = vpack.c.bf16 %v16418_v11, %v16400_v40  ;;  %v16438_v23 = vsel %vm449_vm0, %v9337_v49, %v9338_v57  ;;  %v9344_v34 = vrot.slane %v9271_v48, 2  ;;  %v13392_v30 = vld [vmem:[%s16812_s1 + $0x1100] ss:$8 sps:$4 sm:$0xff]   ;;  %v13415_v11 = vld [vmem:[%s16812_s1 + $0xba4] ss:$8 sps:$4 sm:$0xff]  }
 0x222   : > { %6913 = vmatprep.subr.bf16.mxu0 %v13385_v1  ;;  %11517 = vmatprep.mubr.msk.bf16.mxu0 %vm642_vm1, %v6399_v16  ;;  %v6299_v28 = vunpack.c.h.bf16 %v16404_v33  ;;  %v6371_v27 = vrot.slane %v6293_v19, 2  ;;  %v6372_v12 = vrot.slane %v6295_v39, 2  ;;  %v9274_v16 = vunpack.c.h.bf16 %v16415_v9  ;;  %v11521_v19 = vld [vmem:[%s13609_s20 + $0x5c0] sm:$0x77] }
 0x223   : > { %12011 = vmatprep.mubr.msk.bf16.mxu1 %vm642_vm1, %v9380_v6  ;;  %v6377_v13 = vrot.slane %v6297_v20, 2  ;;  %v16453_v58 = vsel %vm449_vm0, %v9343_v7, %v9344_v34  ;;  %v9276_v45 = vunpack.c.h.bf16 %v16423_v25  ;;  %v9278_v32 = vunpack.c.h.bf16 %v16426_v31  ;;  %v13400_v6 = vld [vmem:[%s16812_s1 + $0x1114] ss:$8 sps:$4 sm:$0xff]   ;;  %v13404_v20 = vld [vmem:[%s16812_s1 + $0x1120] ss:$8 sps:$4 sm:$0xff]  }
 0x224   : > { %9895 = vmatpush1.bf16.msra.mxu1 %v13386_v47  ;;  %v6378_v55 = vrot.slane %v6299_v28, 2  ;;  %v9381_v5 = vpack.c.bf16 %v16453_v58, %v16438_v23  ;;  %v16466_v1 = vsel %vm449_vm0, %v6371_v27, %v6372_v12  ;;  %v9280_v37 = vunpack.c.h.bf16 %v16442_v44  ;;  %v13398_v47 = vld [vmem:[%s16812_s1 + $0x1110] ss:$8 sps:$4 sm:$0xff]   ;;  %v13409_v12 = vld [vmem:[%s16812_s1 + $0xb94] ss:$8 sps:$4 sm:$0xff]  }
 0x225   : > { %6914 = vmatpush1.bf16.msra.mxu0 %v13383_v24  ;;  %9896 = vmatprep.subr.bf16.mxu1 %v13394_v61  ;;  %v9352_v62 = vrot.slane %v9274_v16, 2  ;;  %v9353_v21 = vrot.slane %v9276_v45, 2  ;;  %v9358_v50 = vrot.slane %v9278_v32, 2  ;;  %v6292_v53 = vunpack.c.l.bf16 %v16375_v60  ;;  %v11523_v7 = vld [vmem:[%s13609_s20 + $0x5f0] sm:$0x77] }
 0x226   : > { %6915 = vmatprep.subr.bf16.mxu0 %v13391_v36  ;;  %v16473_v17 = vsel %vm449_vm0, %v6377_v13, %v6378_v55  ;;  %v9359_v35 = vrot.slane %v9280_v37, 2  ;;  %v6294_v18 = vunpack.c.l.bf16 %v16383_v14  ;;  %v6296_v24 = vunpack.c.l.bf16 %v16386_v41  ;;  %v11520_v14 = vld [vmem:[%s13609_s20 + $0x5b8] sm:$0x88]  ;;  %v12014_v32 = vld [vmem:[%s13609_s20 + $0x6e0] sm:$0xcc] }
 0x227   : > { %9561 = vmatmul.mubr.bf16.gmra.mrb[20].mxu1 %v9379_v43  ;;  %v6403_v29 = vpack.c.bf16 %v16473_v17, %v16466_v1  ;;  %v16490_v51 = vsel %vm449_vm0, %v9352_v62, %v9353_v21  ;;  %v6298_v52 = vunpack.c.l.bf16 %v16404_v33  ;;  %v6368_v43 = vrot.slane %v6292_v53, 2  ;;  %v13395_v41 = vld [vmem:[%s16812_s1 + $0xb70] ss:$8 sps:$4 sm:$0xff]   ;;  %v13403_v33 = vld [vmem:[%s16812_s1 + $0xb84] ss:$8 sps:$4 sm:$0xff]  }
 0x228   : > { %9897 = vmatpush1.bf16.msra.mxu1 %v13392_v30  ;;  %6580 = vmatmul.mubr.bf16.gmra.mrb[36].mxu0 %v6398_v42  ;;  %v9273_v60 = vunpack.c.l.bf16 %v16415_v9  ;;  %v16502_v3 = vsel %vm449_vm0, %v9358_v50, %v9359_v35  ;;  %v6369_v42 = vrot.slane %v6294_v18, 2  ;;  %v6374_v15 = vrot.slane %v6296_v24, 2  ;;  %v13412_v36 = vld [vmem:[%s16812_s1 + $0x1134] ss:$8 sps:$4 sm:$0xff]   ;;  %v13410_v13 = vld [vmem:[%s16812_s1 + $0x1130] ss:$8 sps:$4 sm:$0xff]  }
 0x229   : > { %6916 = vmatpush1.bf16.msra.mxu0 %v13389_v0  ;;  %9898 = vmatprep.subr.bf16.mxu1 %v13400_v6  ;;  %v9275_v26 = vunpack.c.l.bf16 %v16423_v25  ;;  %v9384_v61 = vpack.c.bf16 %v16502_v3, %v16490_v51  ;;  %v6375_v48 = vrot.slane %v6298_v52, 2  ;;  %v9277_v49 = vunpack.c.l.bf16 %v16426_v31  ;;  %v12016_v21 = vld [vmem:[%s13609_s20 + $0x710] sm:$0xcc]  ;;  %v12017_v24 = vld [vmem:[%s13609_s20 + $0x718] sm:$0x33] }
 0x22a   : > { %6917 = vmatprep.subr.bf16.mxu0 %v13397_v8  ;;  %11518 = vmatprep.mubr.msk.bf16.mxu0 %vm642_vm1, %v6401_v2  ;;  %v9279_v57 = vunpack.c.l.bf16 %v16442_v44  ;;  %v16522_v9 = vsel %vm449_vm0, %v6368_v43, %v6369_v42  ;;  %v9349_v63 = vrot.slane %v9273_v60, 2  ;;  %v11522_v2 = vld [vmem:[%s13609_s20 + $0x5e8] sm:$0x88]  ;;  %v6642_v39 = vunpack.c.l.bf16 %v11520_v14  ;;  %v12015_v8 = vld [vmem:[%s13609_s20 + $0x6e8] sm:$0x33] }
 0x22b   : > { %12012 = vmatprep.mubr.msk.bf16.mxu1 %vm642_vm1, %v9382_v22  ;;  %v9350_v4 = vrot.slane %v9275_v26, 2  ;;  %v16530_v25 = vsel %vm449_vm0, %v6374_v15, %v6375_v48  ;;  %v9355_v31 = vrot.slane %v9277_v49, 2  ;;  %v6643_v38 = vunpack.c.h.bf16 %v11520_v14  ;;  %v13401_v22 = vld [vmem:[%s16812_s1 + $0xb80] ss:$8 sps:$4 sm:$0xff]   ;;  %v13407_v23 = vld [vmem:[%s16812_s1 + $0xb90] ss:$8 sps:$4 sm:$0xff]  }
 0x22c   : > { %9899 = vmatpush1.bf16.msra.mxu1 %v13398_v47  ;;  %v9356_v46 = vrot.slane %v9279_v57, 2  ;;  %v6402_v34 = vpack.c.bf16 %v16530_v25, %v16522_v9  ;;  %v6644_v44 = vunpack.c.l.bf16 %v11521_v19  ;;  %v6645_v27 = vunpack.c.h.bf16 %v11521_v19  ;;  %v13418_v58 = vld [vmem:[%s16812_s1 + $0x1144] ss:$8 sps:$4 sm:$0xff]   ;;  %v13424_v1 = vld [vmem:[%s16812_s1 + $0x1154] ss:$8 sps:$4 sm:$0xff]  }
 0x22d   : > { %6918 = vmatpush1.bf16.msra.mxu0 %v13395_v41  ;;  %9900 = vmatprep.subr.bf16.mxu1 %v13406_v10  ;;  %v16541_v28 = vsel %vm449_vm0, %v9349_v63, %v9350_v4  ;;  %v6646_v30 = vunpack.c.l.bf16 %v11522_v2  ;;  %v6647_v55 = vunpack.c.h.bf16 %v11522_v2  ;;  %v6648_v45 = vunpack.c.l.bf16 %v11523_v7  ;;  %v13413_v41 = vld [vmem:[%s16812_s1 + $0xba0] ss:$8 sps:$4 sm:$0xff]   ;;  %v16593_v26 = vld [vmem:[%s13609_s20 + $0x618] sm:$0x88]  ;;  %v13430_v9 = vld [vmem:[%s16812_s1 + $0x1164] ss:$8 sps:$4 sm:$0xff]  }
 0x22e   : > { %6919 = vmatprep.subr.bf16.mxu0 %v13403_v33  ;;  %v16550_v16 = vsel %vm449_vm0, %v9355_v31, %v9356_v46  ;;  %v6649_v6 = vunpack.c.h.bf16 %v11523_v7  ;;  %v6706_v37 = vrot.slane %v6642_v39, 6  ;;  %v6707_v62 = vrot.slane %v6644_v44, 6  ;;  %v13416_v10 = vld [vmem:[%s16812_s1 + $0x1140] ss:$8 sps:$4 sm:$0xff]   ;;  %v13421_v33 = vld [vmem:[%s16812_s1 + $0xbb4] ss:$8 sps:$4 sm:$0xff]  }
 0x22f   : > { %9571 = vmatmul.mubr.bf16.gmra.mrb[24].mxu1 %v9381_v5  ;;  %v9383_v0 = vpack.c.bf16 %v16550_v16, %v16541_v28  ;;  %v6709_v50 = vrot.slane %v6643_v38, 6  ;;  %v6710_v53 = vrot.slane %v6645_v27, 6  ;;  %v6712_v35 = vrot.slane %v6646_v30, 6  ;;  %v16599_v3 = vld [vmem:[%s13609_s20 + $0x620] sm:$0x77] }
 0x230   : > { %9901 = vmatpush1.bf16.msra.mxu1 %v13404_v20  ;;  %6590 = vmatmul.mubr.bf16.gmra.mrb[40].mxu0 %v6400_v56  ;;  %v6713_v18 = vrot.slane %v6648_v45, 6  ;;  %v6715_v5 = vrot.slane %v6647_v55, 6  ;;  %v6716_v47 = vrot.slane %v6649_v6, 6  ;;  %v9623_v52 = vunpack.c.l.bf16 %v12014_v32  ;;  %v16602_v2 = vld [vmem:[%s13609_s20 + $0x648] sm:$0x88] }
 0x231   : > { %6920 = vmatpush1.bf16.msra.mxu0 %v13401_v22  ;;  %9902 = vmatprep.subr.bf16.mxu1 %v13412_v36  ;;  %v9624_v40 = vunpack.c.h.bf16 %v12014_v32  ;;  %v6711_v56 = vsel %vm3905_vm3, %v6709_v50, %v6710_v53  ;;  %v9625_v43 = vunpack.c.l.bf16 %v12015_v8  ;;  %v9626_v60 = vunpack.c.h.bf16 %v12015_v8  ;;  %v11527_v46 = vld [vmem:[%s13609_s20 + $0x650] sm:$0x77]  ;;  %v16615_v38 = vld [vmem:[%s13609_s20 + $0x740] sm:$0xcc]  ;;  %v16625_v27 = vld [vmem:[%s13609_s20 + $0x748] sm:$0x33] }
 0x232   : > { %6921 = vmatprep.subr.bf16.mxu0 %v13409_v12  ;;  %11519 = vmatprep.mubr.msk.bf16.mxu0 %vm642_vm1, %v6403_v29  ;;  %v9627_v14 = vunpack.c.l.bf16 %v12016_v21  ;;  %v6717_v17 = vsel %vm3905_vm3, %v6715_v5, %v6716_v47  ;;  %v9628_v29 = vunpack.c.h.bf16 %v12016_v21  ;;  %v9629_v42 = vunpack.c.l.bf16 %v12017_v24  ;;  %v16628_v12 = vld [vmem:[%s13609_s20 + $0x770] sm:$0xcc]  ;;  %v16642_v32 = vld [vmem:[%s13609_s20 + $0x778] sm:$0x33] }
 0x233   : > { %12013 = vmatprep.mubr.msk.bf16.mxu1 %vm642_vm1, %v9384_v61  ;;  %v9630_v15 = vunpack.c.h.bf16 %v12017_v24  ;;  %v6771_v48 = vpack.c.bf16 %v6717_v17, %v6711_v56  ;;  %v9687_v49 = vrot.slane %v9623_v52, 4  ;;  %v9688_v57 = vrot.slane %v9625_v43, 4  ;;  %v13436_v56 = vld [vmem:[%s16812_s1 + $0x1174] ss:$8 sps:$4 sm:$0xff]  }
 0x234   : > { %9903 = vmatpush1.bf16.msra.mxu1 %v13410_v13  ;;  %v9690_v51 = vrot.slane %v9624_v40, 4  ;;  %v9691_v61 = vrot.slane %v9626_v60, 4  ;;  %v9693_v19 = vrot.slane %v9627_v14, 4  ;;  %v9694_v63 = vrot.slane %v9629_v42, 4  ;;  %v13422_v13 = vld [vmem:[%s16812_s1 + $0x1150] ss:$8 sps:$4 sm:$0xff]  }
 0x235   : > { %6922 = vmatpush1.bf16.msra.mxu0 %v13407_v23  ;;  %9904 = vmatprep.subr.bf16.mxu1 %v13418_v58  ;;  %v9696_v4 = vrot.slane %v9628_v29, 4  ;;  %v9697_v7 = vrot.slane %v9630_v15, 4  ;;  %v16605_v39 = vsel %vm3905_vm3, %v6706_v37, %v6707_v62  ;;  %v16608_v20 = vsel %vm3905_vm3, %v6712_v35, %v6713_v18  ;;  %v13427_v62 = vld [vmem:[%s16812_s1 + $0xbc4] ss:$8 sps:$4 sm:$0xff]   ;;  %v13428_v58 = vld [vmem:[%s16812_s1 + $0x1160] ss:$8 sps:$4 sm:$0xff]  }
 0x236   : > { %6923 = vmatprep.subr.bf16.mxu0 %v13415_v11  ;;  %v16611_v31 = vsel %vm922_vm2, %v9687_v49, %v9688_v57  ;;  %v9692_v22 = vsel %vm922_vm2, %v9690_v51, %v9691_v61  ;;  %v6770_v36 = vpack.c.bf16 %v16608_v20, %v16605_v39  ;;  %v16621_v28 = vsel %vm922_vm2, %v9693_v19, %v9694_v63  ;;  %v13425_v11 = vld [vmem:[%s16812_s1 + $0xbc0] ss:$8 sps:$4 sm:$0xff]   ;;  %v11528_v15 = vld [vmem:[%s13609_s20 + $0x678] sm:$0x88] }
 0x237   : > { %9581 = vmatmul.mubr.bf16.gmra.mrb[28].mxu1 %v9383_v0  ;;  %v6651_v44 = vunpack.c.h.bf16 %v16593_v26  ;;  %v9698_v16 = vsel %vm922_vm2, %v9696_v4, %v9697_v7  ;;  %v9751_v30 = vpack.c.bf16 %v16621_v28, %v16611_v31  ;;  %v6653_v55 = vunpack.c.h.bf16 %v16599_v3  ;;  %v13419_v0 = vld [vmem:[%s16812_s1 + $0xbb0] ss:$8 sps:$4 sm:$0xff]   ;;  %v11529_v51 = vld [vmem:[%s13609_s20 + $0x680] sm:$0x77] }
 0x238   : > { %9905 = vmatpush1.bf16.msra.mxu1 %v13416_v10  ;;  %6600 = vmatmul.mubr.bf16.gmra.mrb[44].mxu0 %v6402_v34  ;;  %v6655_v45 = vunpack.c.h.bf16 %v16602_v2  ;;  %v9752_v25 = vpack.c.bf16 %v9698_v16, %v9692_v22  ;;  %v6657_v34 = vunpack.c.h.bf16 %v11527_v46  ;;  %v9632_v37 = vunpack.c.h.bf16 %v16615_v38  ;;  %v13433_v10 = vld [vmem:[%s16812_s1 + $0xbd4] ss:$8 sps:$4 sm:$0xff]   ;;  %v12023_v16 = vld [vmem:[%s13609_s20 + $0x7a8] sm:$0x33] }
 0x239   : > { %6924 = vmatpush1.bf16.msra.mxu0 %v13413_v41  ;;  %9906 = vmatprep.subr.bf16.mxu1 %v13424_v1  ;;  %v6721_v6 = vrot.slane %v6651_v44, 6  ;;  %v6722_v8 = vrot.slane %v6653_v55, 6  ;;  %v9634_v50 = vunpack.c.h.bf16 %v16625_v27  ;;  %v9636_v53 = vunpack.c.h.bf16 %v16628_v12  ;;  %v11531_v7 = vld [vmem:[%s13609_s20 + $0x6b0] sm:$0x77]  ;;  %v11532_v20 = vld [vmem:[%s13609_s20 + $0x6d8] sm:$0x88] }
 0x23a   : > { %6925 = vmatprep.subr.bf16.mxu0 %v13421_v33  ;;  %11576 = vmatprep.mubr.msk.bf16.mxu0 %vm642_vm1, %v6771_v48  ;;  %v6727_v21 = vrot.slane %v6655_v45, 6  ;;  %v6728_v35 = vrot.slane %v6657_v34, 6  ;;  %v9638_v18 = vunpack.c.h.bf16 %v16642_v32  ;;  %v9702_v24 = vrot.slane %v9632_v37, 4  ;;  %v12025_v37 = vld [vmem:[%s13609_s20 + $0x7d8] sm:$0x33] }
 0x23b   : > { %12070 = vmatprep.mubr.msk.bf16.mxu1 %vm642_vm1, %v9752_v25  ;;  %v6650_v23 = vunpack.c.l.bf16 %v16593_v26  ;;  %v16664_v5 = vsel %vm3905_vm3, %v6721_v6, %v6722_v8  ;;  %v9703_v47 = vrot.slane %v9634_v50, 4  ;;  %v9708_v52 = vrot.slane %v9636_v53, 4  ;;  %v13431_v26 = vld [vmem:[%s16812_s1 + $0xbd0] ss:$8 sps:$4 sm:$0xff]  }
 0x23c   : > { %9907 = vmatpush1.bf16.msra.mxu1 %v13422_v13  ;;  %v6652_v40 = vunpack.c.l.bf16 %v16599_v3  ;;  %v16674_v43 = vsel %vm3905_vm3, %v6727_v21, %v6728_v35  ;;  %v9709_v60 = vrot.slane %v9638_v18, 4  ;;  %v6654_v14 = vunpack.c.l.bf16 %v16602_v2  ;;  %v13434_v3 = vld [vmem:[%s16812_s1 + $0x1170] ss:$8 sps:$4 sm:$0xff]   ;;  %v11530_v2 = vld [vmem:[%s13609_s20 + $0x6a8] sm:$0x88] }
 0x23d   : > { %6926 = vmatpush1.bf16.msra.mxu0 %v13419_v0  ;;  %9908 = vmatprep.subr.bf16.mxu1 %v13430_v9  ;;  %v6656_v41 = vunpack.c.l.bf16 %v11527_v46  ;;  %v6773_v1 = vpack.c.bf16 %v16674_v43, %v16664_v5  ;;  %v9704_v17 = vsel %vm922_vm2, %v9702_v24, %v9703_v47  ;;  %v6718_v29 = vrot.slane %v6650_v23, 6  ;;  %v12022_v13 = vld [vmem:[%s13609_s20 + $0x7a0] sm:$0xcc]  ;;  %v12024_v0 = vld [vmem:[%s13609_s20 + $0x7d0] sm:$0xcc] }
 0x23e   : > { %6927 = vmatprep.subr.bf16.mxu0 %v13427_v62  ;;  %v6719_v42 = vrot.slane %v6652_v40, 6  ;;  %v9710_v33 = vsel %vm922_vm2, %v9708_v52, %v9709_v60  ;;  %v6724_v48 = vrot.slane %v6654_v14, 6  ;;  %v9631_v57 = vunpack.c.l.bf16 %v16615_v38 }
 0x23f   : > { %v6725_v49 = vrot.slane %v6656_v41, 6  ;;  %v9754_v61 = vpack.c.bf16 %v9710_v33, %v9704_v17  ;;  %v9633_v63 = vunpack.c.l.bf16 %v16625_v27  ;;  %v9635_v4 = vunpack.c.l.bf16 %v16628_v12 }
 0x240   : > { %9909 = vmatpush1.bf16.msra.mxu1 %v13428_v58  ;;  %v16694_v19 = vsel %vm3905_vm3, %v6718_v29, %v6719_v42  ;;  %v9637_v38 = vunpack.c.l.bf16 %v16642_v32  ;;  %v9699_v22 = vrot.slane %v9631_v57, 4  ;;  %v6659_v44 = vunpack.c.h.bf16 %v11528_v15 }
 0x241   : > { %6928 = vmatpush1.bf16.msra.mxu0 %v13425_v11  ;;  %9910 = vmatprep.subr.bf16.mxu1 %v13436_v56  ;;  %v16701_v46 = vsel %vm3905_vm3, %v6724_v48, %v6725_v49  ;;  %v9700_v12 = vrot.slane %v9633_v63, 4  ;;  %v9705_v55 = vrot.slane %v9635_v4, 4  ;;  %v6661_v45 = vunpack.c.h.bf16 %v11529_v51  ;;  %v11535_v48 = vld [vmem:[%s13609_s20 + $0x710] sm:$0x77] }
 0x242   : > { %6929 = vmatprep.subr.bf16.mxu0 %v13433_v10  ;;  %v6772_v27 = vpack.c.bf16 %v16701_v46, %v16694_v19  ;;  %v9706_v9 = vrot.slane %v9637_v38, 4  ;;  %v6663_v25 = vunpack.c.h.bf16 %v11530_v2  ;;  %v6665_v34 = vunpack.c.h.bf16 %v11531_v7  ;;  %v12027_v38 = vld [vmem:[%s13609_s20 + $0x808] sm:$0x33] }
 0x243   : > { %v6733_v6 = vrot.slane %v6659_v44, 6  ;;  %v9701_v32 = vsel %vm922_vm2, %v9699_v22, %v9700_v12  ;;  %v6734_v62 = vrot.slane %v6661_v45, 6  ;;  %v9640_v8 = vunpack.c.h.bf16 %v12022_v13  ;;  %v12028_v12 = vld [vmem:[%s13609_s20 + $0x830] sm:$0xcc] }
 0x244   : > { %9911 = vmatpush1.bf16.msra.mxu1 %v13434_v3  ;;  %v9642_v21 = vunpack.c.h.bf16 %v12023_v16  ;;  %v9707_v50 = vsel %vm922_vm2, %v9705_v55, %v9706_v9  ;;  %v6739_v53 = vrot.slane %v6663_v25, 6  ;;  %v6740_v35 = vrot.slane %v6665_v34, 6  ;;  %v12029_v55 = vld [vmem:[%s13609_s20 + $0x838] sm:$0x33] }
 0x245   : > { %6930 = vmatpush1.bf16.msra.mxu0 %v13431_v26  ;;  %v9644_v18 = vunpack.c.h.bf16 %v12024_v0  ;;  %v9753_v24 = vpack.c.bf16 %v9707_v50, %v9701_v32  ;;  %v6735_v23 = vsel %vm3905_vm3, %v6733_v6, %v6734_v62  ;;  %v9646_v58 = vunpack.c.h.bf16 %v12025_v37 }
 0x246   : > { %v9714_v47 = vrot.slane %v9640_v8, 4  ;;  %v6741_v52 = vsel %vm3905_vm3, %v6739_v53, %v6740_v35  ;;  %v9715_v40 = vrot.slane %v9642_v21, 4  ;;  %v6658_v56 = vunpack.c.l.bf16 %v11528_v15  ;;  %v11533_v15 = vld [vmem:[%s13609_s20 + $0x6e0] sm:$0x77] }
 0x247   : > { %9925 = vmatmul.mubr.bf16.vlgmr.msra.gmra.mrb[16].mxu1 %v9751_v30  ;;  %v9720_v11 = vrot.slane %v9644_v18, 4  ;;  %v6775_v60 = vpack.c.bf16 %v6741_v52, %v6735_v23  ;;  %v9721_v14 = vrot.slane %v9646_v58, 4  ;;  %v6660_v41 = vunpack.c.l.bf16 %v11529_v51 }
 0x248   : > { %6944 = vmatmul.mubr.bf16.vlgmr.msra.gmra.mrb[32].mxu0 %v6770_v36  ;;  %12071 = vmatprep.mubr.msk.bf16.mxu1 %vm642_vm1, %v9754_v61  ;;  %v6662_v10 = vunpack.c.l.bf16 %v11530_v2  ;;  %v9716_v31 = vsel %vm922_vm2, %v9714_v47, %v9715_v40  ;;  %v6664_v28 = vunpack.c.l.bf16 %v11531_v7  ;;  %v6730_v30 = vrot.slane %v6658_v56, 6  ;;  %v12026_v61 = vld [vmem:[%s13609_s20 + $0x800] sm:$0xcc] }
 0x249   : > { %11577 = vmatprep.mubr.msk.bf16.mxu0 %vm642_vm1, %v6773_v1  ;;  %v9639_v39 = vunpack.c.l.bf16 %v12022_v13  ;;  %v9722_v36 = vsel %vm922_vm2, %v9720_v11, %v9721_v14  ;;  %v6731_v17 = vrot.slane %v6660_v41, 6  ;;  %v9641_v42 = vunpack.c.l.bf16 %v12023_v16  ;;  %v11534_v1 = vld [vmem:[%s13609_s20 + $0x708] sm:$0x88] }
 0x24a   : > { %v6736_v29 = vrot.slane %v6662_v10, 6  ;;  %v9756_v26 = vpack.c.bf16 %v9722_v36, %v9716_v31  ;;  %v6737_v5 = vrot.slane %v6664_v28, 6  ;;  %v9643_v43 = vunpack.c.l.bf16 %v12024_v0 }
 0x24b   : > { %v9645_v33 = vunpack.c.l.bf16 %v12025_v37  ;;  %v6732_v49 = vsel %vm3905_vm3, %v6730_v30, %v6731_v17  ;;  %v9711_v57 = vrot.slane %v9639_v39, 4  ;;  %v9712_v51 = vrot.slane %v9641_v42, 4 }
 0x24c   : > { %v6667_v3 = vunpack.c.h.bf16 %v11532_v20  ;;  %v6738_v63 = vsel %vm3905_vm3, %v6736_v29, %v6737_v5  ;;  %v9717_v4 = vrot.slane %v9643_v43, 4  ;;  %v6669_v7 = vunpack.c.h.bf16 %v11533_v15 }
 0x24d   : > { %v9718_v2 = vrot.slane %v9645_v33, 4  ;;  %v6774_v22 = vpack.c.bf16 %v6738_v63, %v6732_v49  ;;  %v9713_v44 = vsel %vm922_vm2, %v9711_v57, %v9712_v51  ;;  %v6671_v13 = vunpack.c.h.bf16 %v11534_v1 }
 0x24e   : > { %v6673_v16 = vunpack.c.h.bf16 %v11535_v48  ;;  %v6745_v0 = vrot.slane %v6667_v3, 6  ;;  %v6746_v9 = vrot.slane %v6669_v7, 6  ;;  %v9648_v25 = vunpack.c.h.bf16 %v12026_v61 }
 0x24f   : > { %9935 = vmatmul.mubr.bf16.gmra.mrb[20].mxu1 %v9753_v24  ;;  %v9719_v45 = vsel %vm922_vm2, %v9717_v4, %v9718_v2  ;;  %v6751_v6 = vrot.slane %v6671_v13, 6  ;;  %v9650_v32 = vunpack.c.h.bf16 %v12027_v38  ;;  %v9652_v8 = vunpack.c.h.bf16 %v12028_v12 }
 0x250   : > { %6954 = vmatmul.mubr.bf16.gmra.mrb[36].mxu0 %v6772_v27  ;;  %12072 = vmatprep.mubr.msk.bf16.mxu1 %vm642_vm1, %v9756_v26  ;;  %v9755_v34 = vpack.c.bf16 %v9719_v45, %v9713_v44  ;;  %v6752_v37 = vrot.slane %v6673_v16, 6  ;;  %v6747_v62 = vsel %vm3905_vm3, %v6745_v0, %v6746_v9  ;;  %v9654_v21 = vunpack.c.h.bf16 %v12029_v55 }
 0x251   : > { %11578 = vmatprep.mubr.msk.bf16.mxu0 %vm642_vm1, %v6775_v60  ;;  %v9726_v50 = vrot.slane %v9648_v25, 4  ;;  %v9727_v35 = vrot.slane %v9650_v32, 4  ;;  %v6666_v18 = vunpack.c.l.bf16 %v11532_v20  ;;  %v6668_v24 = vunpack.c.l.bf16 %v11533_v15 }
 0x252   : > { %v6753_v53 = vsel %vm3905_vm3, %v6751_v6, %v6752_v37  ;;  %v9732_v46 = vrot.slane %v9652_v8, 4  ;;  %v9733_v27 = vrot.slane %v9654_v21, 4  ;;  %v6670_v23 = vunpack.c.l.bf16 %v11534_v1 }
 0x253   : > { %v6777_v19 = vpack.c.bf16 %v6753_v53, %v6747_v62  ;;  %v9728_v58 = vsel %vm922_vm2, %v9726_v50, %v9727_v35  ;;  %v6672_v47 = vunpack.c.l.bf16 %v11535_v48  ;;  %v6742_v52 = vrot.slane %v6666_v18, 6 }
 0x254   : > { %v6743_v40 = vrot.slane %v6668_v24, 6  ;;  %v9734_v11 = vsel %vm922_vm2, %v9732_v46, %v9733_v27  ;;  %v6748_v56 = vrot.slane %v6670_v23, 6  ;;  %v9647_v60 = vunpack.c.l.bf16 %v12026_v61 }
 0x255   : > { %v9649_v14 = vunpack.c.l.bf16 %v12027_v38  ;;  %v9758_v41 = vpack.c.bf16 %v9734_v11, %v9728_v58  ;;  %v6749_v10 = vrot.slane %v6672_v47, 6  ;;  %v9651_v31 = vunpack.c.l.bf16 %v12028_v12 }
 0x256   : > { %v9653_v28 = vunpack.c.l.bf16 %v12029_v55  ;;  %v9723_v30 = vrot.slane %v9647_v60, 4  ;;  %v6744_v36 = vsel %vm3905_vm3, %v6742_v52, %v6743_v40 }
 0x257   : > { %9945 = vmatmul.mubr.bf16.gmra.mrb[24].mxu1 %v9755_v34  ;;  %v9724_v39 = vrot.slane %v9649_v14, 4  ;;  %v9729_v20 = vrot.slane %v9651_v31, 4  ;;  %v6750_v17 = vsel %vm3905_vm3, %v6748_v56, %v6749_v10 }
 0x258   : > { %6964 = vmatmul.mubr.bf16.gmra.mrb[40].mxu0 %v6774_v22  ;;  %12073 = vmatprep.mubr.msk.bf16.mxu1 %vm642_vm1, %v9758_v41  ;;  %v9730_v42 = vrot.slane %v9653_v28, 4  ;;  %v6776_v26 = vpack.c.bf16 %v6750_v17, %v6744_v36 }
 0x259   : > { %11579 = vmatprep.mubr.msk.bf16.mxu0 %vm642_vm1, %v6777_v19  ;;  %v9725_v29 = vsel %vm922_vm2, %v9723_v30, %v9724_v39 }
 0x25a   : > { %v9731_v15 = vsel %vm922_vm2, %v9729_v20, %v9730_v42 }
 0x25b   : > { %v9757_v5 = vpack.c.bf16 %v9731_v15, %v9725_v29 }
 0x25f   : > { %9955 = vmatmul.mubr.bf16.gmra.mrb[28].mxu1 %v9757_v5 }
 0x260   : > { %6974 = vmatmul.mubr.bf16.gmra.mrb[44].mxu0 %v6776_v26 }
 0x31a   : > { %v9926_v43 = vpop.f32.mrb[16].mxu1 }
 0x31b   : > { %v6945_v33 = vpop.f32.mrb[32].mxu0  ;;  %v9928_v1 = vpop.f32.mrb[17].mxu1  ;;  %v10083_v49 = vmul.f32 %v9926_v43, %v9926_v43 }
 0x31c   : > { %v7102_v48 = vmul.f32 %v6945_v33, %v6945_v33  ;;  %v6947_v57 = vpop.f32.mrb[33].mxu0  ;;  %v12107_v51 = vpack.c.bf16 %v9928_v1, %v9926_v43  ;;  %v9930_v3 = vpop.f32.mrb[18].mxu1  ;;  %v10084_v25 = vmul.f32 %v9928_v1, %v9928_v1 }
 0x31d   : > { %v12099_v61 = vpack.c.bf16 %v6947_v57, %v6945_v33  ;;  %v7103_v63 = vmul.f32 %v6947_v57, %v6947_v57  ;;  %v6949_v4 = vpop.f32.mrb[34].mxu0  ;;  %v10037_v2 = vadd.f32 %v9930_v3, %v9926_v43  ;;  %v10085_v7 = vmul.f32 %v9930_v3, %v9930_v3  ;;  %v9932_v38 = vpop.f32.mrb[19].mxu1 }
 0x31e   : > { %10029 = vst [vmem:[%s16758_s28] sm:$0xff] %v12107_v51  ;;  %v7056_v22 = vadd.f32 %v6949_v4, %v6945_v33  ;;  %v7104_v44 = vmul.f32 %v6949_v4, %v6949_v4  ;;  %v6951_v13 = vpop.f32.mrb[35].mxu0  ;;  %v12108_v16 = vpack.c.bf16 %v9932_v38, %v9930_v3  ;;  %v10050_v12 = vadd.f32 %v9932_v38, %v9928_v1 }
 0x31f   : > { %7048 = vst [vmem:[%s16764_s7] sm:$0xff] %v12099_v61  ;;  %v10099_v55 = vadd.f32 %v10085_v7, %v10083_v49  ;;  %v12100_v45 = vpack.c.bf16 %v6951_v13, %v6949_v4  ;;  %v7069_v0 = vadd.f32 %v6951_v13, %v6947_v57  ;;  %v7105_v9 = vmul.f32 %v6951_v13, %v6951_v13 }
 0x320   : > { %v7118_v34 = vadd.f32 %v7104_v44, %v7102_v48  ;;  %10030 = vst [vmem:[%s16758_s28 + $0x8] sm:$0xff] %v12108_v16  ;;  %v10086_v6 = vmul.f32 %v9932_v38, %v9932_v38 }
 0x321   : > { %7049 = vst [vmem:[%s16764_s7 + $0x8] sm:$0xff] %v12100_v45  ;;  %v7131_v37 = vadd.f32 %v7105_v9, %v7103_v63 }
 0x322   : > { %v10112_v32 = vadd.f32 %v10086_v6, %v10084_v25  ;;  %v9936_v62 = vpop.f32.mrb[20].mxu1 }
 0x323   : > { %v6955_v8 = vpop.f32.mrb[36].mxu0  ;;  %v10038_v21 = vadd.f32 %v10037_v2, %v9936_v62  ;;  %v10087_v50 = vmul.f32 %v9936_v62, %v9936_v62  ;;  %v9938_v53 = vpop.f32.mrb[21].mxu1 }
 0x324   : > { %v7057_v35 = vadd.f32 %v7056_v22, %v6955_v8  ;;  %v7106_v18 = vmul.f32 %v6955_v8, %v6955_v8  ;;  %v6957_v24 = vpop.f32.mrb[37].mxu0  ;;  %v12109_v19 = vpack.c.bf16 %v9938_v53, %v9936_v62  ;;  %v10051_v46 = vadd.f32 %v10050_v12, %v9938_v53  ;;  %v9940_v27 = vpop.f32.mrb[22].mxu1 }
 0x325   : > { %v10100_v23 = vadd.f32 %v10099_v55, %v10087_v50  ;;  %v12101_v58 = vpack.c.bf16 %v6957_v24, %v6955_v8  ;;  %v7070_v47 = vadd.f32 %v7069_v0, %v6957_v24  ;;  %v7107_v52 = vmul.f32 %v6957_v24, %v6957_v24  ;;  %v6959_v40 = vpop.f32.mrb[38].mxu0  ;;  %v9942_v11 = vpop.f32.mrb[23].mxu1 }
 0x326   : > { %v7119_v56 = vadd.f32 %v7118_v34, %v7106_v18  ;;  %10031 = vst [vmem:[%s16758_s28 + $0x10] sm:$0xff] %v12109_v19  ;;  %v10088_v60 = vmul.f32 %v9938_v53, %v9938_v53  ;;  %v7058_v14 = vadd.f32 %v7057_v35, %v6959_v40  ;;  %v7108_v41 = vmul.f32 %v6959_v40, %v6959_v40  ;;  %v6961_v10 = vpop.f32.mrb[39].mxu0 }
 0x327   : > { %7050 = vst [vmem:[%s16764_s7 + $0x10] sm:$0xff] %v12101_v58  ;;  %v7132_v31 = vadd.f32 %v7131_v37, %v7107_v52  ;;  %v10039_v28 = vadd.f32 %v10038_v21, %v9940_v27  ;;  %v10089_v30 = vmul.f32 %v9940_v27, %v9940_v27  ;;  %v12102_v39 = vpack.c.bf16 %v6961_v10, %v6959_v40 }
 0x328   : > { %v10113_v20 = vadd.f32 %v10112_v32, %v10088_v60  ;;  %v7120_v36 = vadd.f32 %v7119_v56, %v7108_v41  ;;  %v7071_v17 = vadd.f32 %v7070_v47, %v6961_v10  ;;  %v7109_v29 = vmul.f32 %v6961_v10, %v6961_v10 }
 0x329   : > { %v10101_v42 = vadd.f32 %v10100_v23, %v10089_v30  ;;  %7051 = vst [vmem:[%s16764_s7 + $0x18] sm:$0xff] %v12102_v39  ;;  %v12110_v15 = vpack.c.bf16 %v9942_v11, %v9940_v27  ;;  %v10052_v26 = vadd.f32 %v10051_v46, %v9942_v11  ;;  %v10090_v5 = vmul.f32 %v9942_v11, %v9942_v11 }
 0x32a   : > { %v7133_v43 = vadd.f32 %v7132_v31, %v7109_v29  ;;  %v9946_v33 = vpop.f32.mrb[24].mxu1 }
 0x32b   : > { %10032 = vst [vmem:[%s16758_s28 + $0x18] sm:$0xff] %v12110_v15  ;;  %v10114_v1 = vadd.f32 %v10113_v20, %v10090_v5  ;;  %v6965_v48 = vpop.f32.mrb[40].mxu0  ;;  %v10040_v49 = vadd.f32 %v10039_v28, %v9946_v33  ;;  %v10091_v57 = vmul.f32 %v9946_v33, %v9946_v33  ;;  %v9948_v51 = vpop.f32.mrb[25].mxu1 }
 0x32c   : > { %v7059_v3 = vadd.f32 %v7058_v14, %v6965_v48  ;;  %v7110_v61 = vmul.f32 %v6965_v48, %v6965_v48  ;;  %v6967_v63 = vpop.f32.mrb[41].mxu0  ;;  %v12111_v4 = vpack.c.bf16 %v9948_v51, %v9946_v33  ;;  %v10053_v2 = vadd.f32 %v10052_v26, %v9948_v51  ;;  %v9950_v7 = vpop.f32.mrb[26].mxu1 }
 0x32d   : > { %v10102_v38 = vadd.f32 %v10101_v42, %v10091_v57  ;;  %v12103_v22 = vpack.c.bf16 %v6967_v63, %v6965_v48  ;;  %v7072_v44 = vadd.f32 %v7071_v17, %v6967_v63  ;;  %v7111_v13 = vmul.f32 %v6967_v63, %v6967_v63  ;;  %v6969_v16 = vpop.f32.mrb[42].mxu0  ;;  %v9952_v12 = vpop.f32.mrb[27].mxu1 }
 0x32e   : > { %v7121_v55 = vadd.f32 %v7120_v36, %v7110_v61  ;;  %10033 = vst [vmem:[%s16758_s28 + $0x20] sm:$0xff] %v12111_v4  ;;  %v10092_v45 = vmul.f32 %v9948_v51, %v9948_v51  ;;  %v7060_v0 = vadd.f32 %v7059_v3, %v6969_v16  ;;  %v7112_v9 = vmul.f32 %v6969_v16, %v6969_v16  ;;  %v6971_v25 = vpop.f32.mrb[43].mxu0 }
 0x32f   : > { %7052 = vst [vmem:[%s16764_s7 + $0x20] sm:$0xff] %v12103_v22  ;;  %v7134_v34 = vadd.f32 %v7133_v43, %v7111_v13  ;;  %v10041_v6 = vadd.f32 %v10040_v49, %v9950_v7  ;;  %v10093_v37 = vmul.f32 %v9950_v7, %v9950_v7  ;;  %v12104_v32 = vpack.c.bf16 %v6971_v25, %v6969_v16 }
 0x330   : > { %v10115_v62 = vadd.f32 %v10114_v1, %v10092_v45  ;;  %v7122_v8 = vadd.f32 %v7121_v55, %v7112_v9  ;;  %v7073_v21 = vadd.f32 %v7072_v44, %v6971_v25  ;;  %v7113_v50 = vmul.f32 %v6971_v25, %v6971_v25 }
 0x331   : > { %v10103_v53 = vadd.f32 %v10102_v38, %v10093_v37  ;;  %7053 = vst [vmem:[%s16764_s7 + $0x28] sm:$0xff] %v12104_v32  ;;  %v12112_v35 = vpack.c.bf16 %v9952_v12, %v9950_v7  ;;  %v10054_v18 = vadd.f32 %v10053_v2, %v9952_v12  ;;  %v10094_v24 = vmul.f32 %v9952_v12, %v9952_v12 }
 0x332   : > { %v7135_v19 = vadd.f32 %v7134_v34, %v7113_v50  ;;  %v9956_v46 = vpop.f32.mrb[28].mxu1 }
 0x333   : > { %10034 = vst [vmem:[%s16758_s28 + $0x28] sm:$0xff] %v12112_v35  ;;  %v10116_v27 = vadd.f32 %v10115_v62, %v10094_v24  ;;  %v6975_v23 = vpop.f32.mrb[44].mxu0  ;;  %v10042_v58 = vadd.f32 %v10041_v6, %v9956_v46  ;;  %v10095_v47 = vmul.f32 %v9956_v46, %v9956_v46  ;;  %v9958_v52 = vpop.f32.mrb[29].mxu1 }
 0x334   : > { %v7061_v40 = vadd.f32 %v7060_v0, %v6975_v23  ;;  %v7114_v11 = vmul.f32 %v6975_v23, %v6975_v23  ;;  %v6977_v56 = vpop.f32.mrb[45].mxu0  ;;  %v12113_v60 = vpack.c.bf16 %v9958_v52, %v9956_v46  ;;  %v10055_v14 = vadd.f32 %v10054_v18, %v9958_v52  ;;  %v9960_v41 = vpop.f32.mrb[30].mxu1 }
 0x335   : > { %v10104_v10 = vadd.f32 %v10103_v53, %v10095_v47  ;;  %v12105_v31 = vpack.c.bf16 %v6977_v56, %v6975_v23  ;;  %v7074_v28 = vadd.f32 %v7073_v21, %v6977_v56  ;;  %v7115_v30 = vmul.f32 %v6977_v56, %v6977_v56  ;;  %v6979_v39 = vpop.f32.mrb[46].mxu0  ;;  %v9962_v20 = vpop.f32.mrb[31].mxu1 }
 0x336   : > { %v7123_v36 = vadd.f32 %v7122_v8, %v7114_v11  ;;  %10035 = vst [vmem:[%s16758_s28 + $0x30] sm:$0xff] %v12113_v60  ;;  %v10096_v17 = vmul.f32 %v9958_v52, %v9958_v52  ;;  %v7062_v29 = vadd.f32 %v7061_v40, %v6979_v39  ;;  %v7116_v42 = vmul.f32 %v6979_v39, %v6979_v39  ;;  %v6981_v15 = vpop.f32.mrb[47].mxu0 }
 0x337   : > { %7054 = vst [vmem:[%s16764_s7 + $0x30] sm:$0xff] %v12105_v31  ;;  %v7136_v26 = vadd.f32 %v7135_v19, %v7115_v30  ;;  %v10043_v5 = vadd.f32 %v10042_v58, %v9960_v41  ;;  %v10097_v43 = vmul.f32 %v9960_v41, %v9960_v41  ;;  %v12106_v33 = vpack.c.bf16 %v6981_v15, %v6979_v39 }
 0x338   : > { %v10117_v1 = vadd.f32 %v10116_v27, %v10096_v17  ;;  %v7063_v48 = vrot.slane %v7062_v29, 4  ;;  %v7124_v49 = vadd.f32 %v7123_v36, %v7116_v42  ;;  %v7075_v57 = vadd.f32 %v7074_v28, %v6981_v15 }
 0x339   : > { %v10044_v51 = vrot.slane %v10043_v5, 4  ;;  %v10105_v3 = vadd.f32 %v10104_v10, %v10097_v43  ;;  %7055 = vst [vmem:[%s16764_s7 + $0x38] sm:$0xff] %v12106_v33  ;;  %v7117_v61 = vmul.f32 %v6981_v15, %v6981_v15  ;;  %v12114_v63 = vpack.c.bf16 %v9962_v20, %v9960_v41 }
 0x33a   : > { %v7064_v4 = vadd.f32 %v7063_v48, %v7062_v29  ;;  %v7125_v2 = vrot.slane %v7124_v49, 4  ;;  %v7076_v7 = vrot.slane %v7075_v57, 4  ;;  %v10056_v38 = vadd.f32 %v10055_v14, %v9962_v20 }
 0x33b   : > { %v10045_v22 = vadd.f32 %v10044_v51, %v10043_v5  ;;  %v10106_v44 = vrot.slane %v10105_v3, 4  ;;  %v7137_v13 = vadd.f32 %v7136_v26, %v7117_v61  ;;  %10036 = vst [vmem:[%s16758_s28 + $0x38] sm:$0xff] %v12114_v63  ;;  %v10098_v16 = vmul.f32 %v9962_v20, %v9962_v20 }
 0x33c   : > { %v7065_v12 = vrot.slane %v7064_v4, 2  ;;  %v7126_v55 = vadd.f32 %v7125_v2, %v7124_v49  ;;  %v7077_v45 = vadd.f32 %v7076_v7, %v7075_v57  ;;  %v10057_v0 = vrot.slane %v10056_v38, 4 }
 0x33d   : > { %v10046_v9 = vrot.slane %v10045_v22, 2  ;;  %v10107_v25 = vadd.f32 %v10106_v44, %v10105_v3  ;;  %v7138_v34 = vrot.slane %v7137_v13, 4  ;;  %v10118_v6 = vadd.f32 %v10117_v1, %v10098_v16 }
 0x33e   : > { %v7066_v37 = vadd.f32 %v7065_v12, %v7064_v4  ;;  %v7127_v32 = vrot.slane %v7126_v55, 2  ;;  %v7078_v62 = vrot.slane %v7077_v45, 2  ;;  %v10058_v8 = vadd.f32 %v10057_v0, %v10056_v38 }
 0x33f   : > { %v10047_v21 = vadd.f32 %v10046_v9, %v10045_v22  ;;  %v10108_v50 = vrot.slane %v10107_v25, 2  ;;  %v7139_v53 = vadd.f32 %v7138_v34, %v7137_v13  ;;  %v10119_v35 = vrot.slane %v10118_v6, 4 }
 0x340   : > { %v7067_v18 = vrot.slane %v7066_v37, 1  ;;  %v7128_v24 = vadd.f32 %v7127_v32, %v7126_v55  ;;  %v7079_v19 = vadd.f32 %v7078_v62, %v7077_v45  ;;  %v10059_v46 = vrot.slane %v10058_v8, 2 }
 0x341   : > { %v10048_v27 = vrot.slane %v10047_v21, 1  ;;  %v10109_v23 = vadd.f32 %v10108_v50, %v10107_v25  ;;  %v7140_v58 = vrot.slane %v7139_v53, 2  ;;  %v10120_v47 = vadd.f32 %v10119_v35, %v10118_v6 }
 0x342   : > { %v7068_v52 = vadd.f32 %v7067_v18, %v7066_v37  ;;  %v7129_v40 = vrot.slane %v7128_v24, 1  ;;  %v7080_v11 = vrot.slane %v7079_v19, 1  ;;  %v10060_v56 = vadd.f32 %v10059_v46, %v10058_v8 }
 0x343   : > { %v10110_v60 = vrot.slane %v10109_v23, 1  ;;  %v7141_v14 = vadd.f32 %v7140_v58, %v7139_v53  ;;  %v10121_v41 = vrot.slane %v10120_v47, 2  ;;  %v10049_v10 = vadd.f32 %v10048_v27, %v10047_v21 }
 0x344   : > { %v7081_v31 = vadd.f32 %v7080_v11, %v7079_v19  ;;  %v10061_v28 = vrot.slane %v10060_v56, 1  ;;  %v7130_v30 = vadd.f32 %v7129_v40, %v7128_v24 }
 0x345   : > { %v7142_v39 = vrot.slane %v7141_v14, 1  ;;  %v10122_v20 = vadd.f32 %v10121_v41, %v10120_v47  ;;  %v10111_v29 = vadd.f32 %v10110_v60, %v10109_v23 }
 0x346   : > { %v7084_v36 = vcombine.low %v7068_v52, %v7081_v31  ;;  %v10062_v17 = vadd.f32 %v10061_v28, %v10060_v56 }
 0x347   : > { %v7143_v42 = vadd.f32 %v7142_v39, %v7141_v14  ;;  %v10123_v15 = vrot.slane %v10122_v20, 1 }
 0x348   : > { %v7091_v26 = vrot.slane %v7084_v36, %v14620_v54  ;;  %v10065_v5 = vcombine.low %v10049_v10, %v10062_v17 }
 0x349   : > { %v7146_v43 = vcombine.low %v7130_v30, %v7143_v42  ;;  %v10124_v33 = vadd.f32 %v10123_v15, %v10122_v20 }
 0x34a   : > { %v7098_v1 = vrot.slane %v7091_v26, %v14620_v54  ;;  %v10072_v48 = vrot.slane %v10065_v5, %v14620_v54 }
 0x34b   : > { %v7153_v49 = vrot.slane %v7146_v43, %v14620_v54  ;;  %v10127_v57 = vcombine.low %v10111_v29, %v10124_v33 }
 0x34c   : > { %11588 = vst.msk [vmem:[%s14914_s19 + $0x2] ss:$4 sm:$0x3] %vm14857_vm4, %v7098_v1  ;;  %v10079_v51 = vrot.slane %v10072_v48, %v14620_v54 }
 0x34d   : > { %v7160_v3 = vrot.slane %v7153_v49, %v14620_v54  ;;  %v10134_v61 = vrot.slane %v10127_v57, %v14620_v54 }
 0x34e   : > { %12082 = vst.msk [vmem:[%s14914_s19 + $0x3] ss:$4 sm:$0x3] %vm14857_vm4, %v10079_v51 }
 0x34f   : > { %11589 = vst.msk [vmem:[%s14940_s12 + $0x2] ss:$4 sm:$0x3] %vm14857_vm4, %v7160_v3  ;;  %v10141_v63 = vrot.slane %v10134_v61, %v14620_v54 }
 0x351   : > { %12083 = vst.msk [vmem:[%s14940_s12 + $0x3] ss:$4 sm:$0x3] %vm14857_vm4, %v10141_v63 }
 0x352 PF: > { %s17_s23 = sadd.s32 1, %s13459_s23   ;;  %s16820_s21 = smov %s13455_s22 }
 0x353   : > { %p14_p5 = scmp.ge.s32.totalorder %s17_s23, 4   ;;  %s16821_s22 = smov %s16823_s24 }
 0x355   :  { %16 = sbr.rel (!%p14_p5) target bundleno = 2 (0x2), region = 146 }

</bundles_post_ra>
